<compile_context>
chip_gen: v7x
topology: tpu7x:2x2x1
jax: 0.10.0
libtpu: 0.0.40
codegen_flags: <defaults>
</compile_context>

<pallas_src>
import math
from functools import partial

import numpy as np
import jax
import jax.numpy as jnp
from jax import lax
from jax.experimental import pallas as pl
from jax.experimental.pallas import tpu as pltpu


# ---------------------------------------------------------------------------
# host-side helpers (pure layout / geometry precompute; no activation math)
# ---------------------------------------------------------------------------
def pixel_unshuffle(x, r):
    """NCHW, matches torch.nn.PixelUnshuffle channel ordering."""
    B, C, H, W = x.shape
    x = x.reshape(B, C, H // r, r, W // r, r)
    x = x.transpose(0, 1, 3, 5, 2, 4)
    return x.reshape(B, C * r * r, H // r, W // r)


def _conv_masks(H, W):
    """Masks for the row-padded (H+2, W) lane layout:
       row 0: zero column W-1  (source mask for dx = -1 taps)
       row 1: zero column 0    (source mask for dx = +1 taps)
       row 2: zero the two pad rows (re-applied to every conv output)."""
    Hp = H + 2
    HWp = Hp * W
    r = np.arange(HWp) // W
    c = np.arange(HWp) % W
    m = np.ones((3, HWp), np.float32)
    m[0, c == W - 1] = 0.0
    m[1, c == 0] = 0.0
    m[2, (r == 0) | (r == Hp - 1)] = 0.0
    return jnp.asarray(m)


def _spatial_gate_mats(H, W, w7, b7, gamma, beta, mean, var, eps=1e-5):
    """Bake the 7x7 (Cin=2 -> Cout=1) 'same' conv over the 4x4-maxpooled grid
    (its tap offsets, zero padding and the padded-layout lanes that carry the
    pooled values) plus the folded eval-mode BatchNorm into two
    ((H+2)*W, Ho*Wo) matrices + a bias."""
    Hp = H + 2
    HWp = Hp * W
    Ho, Wo = H // 4, W // 4
    Np = Ho * Wo
    p = np.arange(HWp)
    pr, pc = p // W, p % W
    orow = pr - 1                                     # original row (-1 / H = pad)
    is_pool_lane = (orow >= 0) & (orow < H) & (orow % 4 == 0) & (pc % 4 == 0)
    a = np.clip(orow, 0, H - 1) // 4                  # pooled row of anchor lane
    b = pc // 4                                       # pooled col of anchor lane
    q = np.arange(Np)
    qr, qc = q // Wo, q % Wo
    ky = a[:, None] - qr[None, :] + 3                 # 7x7 kernel tap row
    kx = b[:, None] - qc[None, :] + 3                 # 7x7 kernel tap col
    valid = is_pool_lane[:, None] & (ky >= 0) & (ky < 7) & (kx >= 0) & (kx < 7)
    kyc, kxc = np.clip(ky, 0, 6), np.clip(kx, 0, 6)
    # TODO(synk): BatchNorm2d is folded with eval-mode running stats only;
    # training-mode batch statistics are not implemented.
    s_bn = gamma[0] / jnp.sqrt(var[0] + eps)
    t_bn = beta[0] - mean[0] * s_bn
    m_max = jnp.where(valid, w7[0, 0][kyc, kxc], 0.0) * s_bn      # ChannelPool max
    m_mean = jnp.where(valid, w7[0, 1][kyc, kxc], 0.0) * s_bn     # ChannelPool mean
    bias = (b7[0] * s_bn + t_bn).reshape(1, 1)
    return (m_max.astype(jnp.float32), m_mean.astype(jnp.float32),
            bias.astype(jnp.float32))


def _flatten_conv_w(w):
    """(Cout, Cin, K, K) -> (Cout, K*K*Cin), tap-major / channel-minor."""
    cout, cin, K, _ = w.shape
    return jnp.transpose(w, (0, 2, 3, 1)).reshape(cout, K * K * cin)


def prepare_params(params, n_encoder_res, H, W):
    """Reshape PyTorch-layout params into the kernel layout (conv weights bf16)."""
    wdt = jnp.bfloat16
    col = lambda b: b.reshape(-1, 1).astype(jnp.float32)
    kp = {"cmask": _conv_masks(H, W)}
    kp["e1_w"] = _flatten_conv_w(params["e1_w"]).astype(wdt)
    kp["e1_b"] = col(params["e1_b"])
    kp["rb_w1"] = jnp.stack([_flatten_conv_w(params[f"rb{i}_w1"])
                             for i in range(n_encoder_res)]).astype(wdt)
    kp["rb_b1"] = jnp.stack([col(params[f"rb{i}_b1"]) for i in range(n_encoder_res)])
    kp["rb_w2"] = jnp.stack([_flatten_conv_w(params[f"rb{i}_w2"])
                             for i in range(n_encoder_res)]).astype(wdt)
    kp["rb_b2"] = jnp.stack([col(params[f"rb{i}_b2"]) for i in range(n_encoder_res)])
    for k in ("e3_w1", "e3_w2", "e3_w3"):
        kp[k] = _flatten_conv_w(params[k]).astype(wdt)
    for k in ("e3_b1", "e3_b2", "e3_b3"):
        kp[k] = col(params[k])
    kp["mlp_w1"] = params["mlp_w1"].astype(jnp.float32)
    kp["mlp_b1"] = col(params["mlp_b1"])
    kp["mlp_w2"] = params["mlp_w2"].astype(jnp.float32)
    kp["mlp_b2"] = col(params["mlp_b2"])
    kp["sp_mmax"], kp["sp_mmean"], kp["sp_bias"] = _spatial_gate_mats(
        H, W, params["sp_w"], params["sp_b"], params["sp_bn_gamma"],
        params["sp_bn_beta"], params["sp_bn_mean"], params["sp_bn_var"])
    return kp


# ---------------------------------------------------------------------------
# the fused Pallas kernel
# ---------------------------------------------------------------------------
def _build_kernel(n_encoder_res, H, W):
    Hp = H + 2
    HWp = Hp * W
    inv_hw = 1.0 / float(H * W)
    shifts3 = tuple((dy - 1) * W + (dx - 1) for dy in range(3) for dx in range(3))

    def shift_lanes(x, s):
        # y[:, p] = x[:, (p + s) % HWp]; wrapped lanes land only on positions
        # that are either zero at the source (pad rows / column masks) or are
        # re-zeroed by the pad-row mask afterwards.
        k = s % HWp
        if k == 0:
            return x
        return jnp.concatenate([x[:, k:], x[:, :k]], axis=1)

    def kernel(x_ref, msk_ref,
               e1w_ref, e1b_ref, rbw1_ref, rbb1_ref, rbw2_ref, rbb2_ref,
               w31_ref, b31_ref, w32_ref, b32_ref, w33_ref, b33_ref,
               mw1_ref, mb1_ref, mw2_ref, mb2_ref,
               mmax_ref, mmean_ref, spb_ref,
               cz_ref, sz_ref):
        msk = msk_ref[...]                                  # (3, HWp) f32
        cm_n = msk[0:1, :]     # zero col W-1 : source mask for dx = -1 taps
        cm_p = msk[1:2, :]     # zero col 0   : source mask for dx = +1 taps
        pmask = msk[2:3, :]    # zero the two pad rows

        def conv3(x, w, b, slope):
            # x: (Cin, HWp) f32 with zero pad rows; w: (Cout, 9*Cin) bf16;
            # b: (Cout, 1) f32.  Two column-mask multiplies + three bf16 casts
            # build the three horizontal source variants; the 9 taps are bf16
            # lane shifts concatenated on sublanes -> ONE deep-contraction MXU
            # matmul with f32 accumulation; vertical borders come for free
            # from the zero pad rows.
            srcs = ((x * cm_n).astype(jnp.bfloat16),        # dx = -1 source
                    x.astype(jnp.bfloat16),                 # dx =  0 source
                    (x * cm_p).astype(jnp.bfloat16))        # dx = +1 source
            taps = [shift_lanes(srcs[t % 3], shifts3[t]) for t in range(9)]
            cols = jnp.concatenate(taps, axis=0)            # (9*Cin, HWp) bf16
            y = jnp.dot(w, cols, preferred_element_type=jnp.float32) + b
            if slope is not None:
                y = jnp.where(y > 0, y, slope * y)
            return y * pmask                                # keep pad rows at 0

        x0 = x_ref[0]                                       # (Cin0, HWp) f32

        # ---- E_12: conv3x3 + LeakyReLU(0.1), then the residual blocks -------
        h = conv3(x0, e1w_ref[...], e1b_ref[...], 0.1)
        for i in range(n_encoder_res):
            r = conv3(h, rbw1_ref[i], rbb1_ref[i], 0.1)
            h = conv3(r, rbw2_ref[i], rbb2_ref[i], None) + h
        mid = h                                             # (n_feats, HWp)

        # ---- E3: 3x (conv3x3 + LeakyReLU), then global average pool ---------
        e = conv3(mid, w31_ref[...], b31_ref[...], 0.1)
        e = conv3(e, w32_ref[...], b32_ref[...], 0.1)
        e = conv3(e, w33_ref[...], b33_ref[...], 0.1)       # (4*n_feats, HWp)
        # pad rows are zero, so the sum over HWp lanes / (H*W) is the true mean
        fea1 = jnp.sum(e, axis=1, keepdims=True) * inv_hw   # (4*n_feats, 1)

        # ---- MLP + sigmoid -> c_z (column form: y = W @ x + b) --------------
        t1 = jnp.dot(mw1_ref[...], fea1,
                     preferred_element_type=jnp.float32) + mb1_ref[...]
        t1 = jnp.where(t1 > 0, t1, 0.1 * t1)
        t2 = jnp.dot(mw2_ref[...], t1,
                     preferred_element_type=jnp.float32) + mb2_ref[...]
        cz_ref[0] = pl.reciprocal(1.0 + jnp.exp(-t2), approx=True)

        # ---- SpatialGate -----------------------------------------------------
        # MaxPool2d(4,4) as a lane-shift max tree: the pooled value for cell
        # (ho, wo) lands on padded lane p = (4*ho+1)*W + 4*wo; all other lanes
        # are don't-care and carry zero weight in mmax/mmean.
        p1 = jnp.maximum(mid, shift_lanes(mid, 1))
        p2 = jnp.maximum(p1, shift_lanes(p1, 2))            # max over 4 cols
        p3 = jnp.maximum(p2, shift_lanes(p2, W))
        p4 = jnp.maximum(p3, shift_lanes(p3, 2 * W))        # max over 4x4 win

        cp_max = jnp.max(p4, axis=0, keepdims=True)         # (1, HWp) ChannelPool
        cp_mean = jnp.mean(p4, axis=0, keepdims=True)       # (1, HWp)

        # 7x7 conv (Cin=2, Cout=1) + folded BN + sigmoid as one matmul.
        s = (jnp.dot(cp_max, mmax_ref[...], preferred_element_type=jnp.float32)
             + jnp.dot(cp_mean, mmean_ref[...], preferred_element_type=jnp.float32)
             + spb_ref[...])
        sz_ref[0] = pl.reciprocal(1.0 + jnp.exp(-s), approx=True)

    return kernel


# ---------------------------------------------------------------------------
# forward pass (matches CPEN2.forward)
# ---------------------------------------------------------------------------
def cpen2_forward(params, ms, pan, n_encoder_res, n_feats):
    ms_u = pixel_unshuffle(ms, 4)
    pan_u = pixel_unshuffle(pan, 4)
    x = jnp.concatenate([ms_u, pan_u], axis=1)              # (N, Cin0, H, W)
    N, Cin0, H, W = x.shape
    assert H % 4 == 0 and W % 4 == 0
    Hp = H + 2
    HWp = Hp * W
    Ho, Wo = H // 4, W // 4
    Np = Ho * Wo
    d = 4 * n_feats
    # row-padded lane layout: one zero row above and below the image
    x = jnp.pad(x, ((0, 0), (0, 0), (1, 1), (0, 0))).reshape(N, Cin0, HWp)

    kp = prepare_params(params, n_encoder_res, H, W)
    kernel = _build_kernel(n_encoder_res, H, W)

    weight_args = [kp["cmask"], kp["e1_w"], kp["e1_b"],
                   kp["rb_w1"], kp["rb_b1"], kp["rb_w2"], kp["rb_b2"],
                   kp["e3_w1"], kp["e3_b1"], kp["e3_w2"], kp["e3_b2"],
                   kp["e3_w3"], kp["e3_b3"],
                   kp["mlp_w1"], kp["mlp_b1"], kp["mlp_w2"], kp["mlp_b2"],
                   kp["sp_mmax"], kp["sp_mmean"], kp["sp_bias"]]

    in_specs = [pl.BlockSpec((1, Cin0, HWp), lambda n: (n, 0, 0))]
    in_specs += [pl.BlockSpec(a.shape, lambda n, _nd=a.ndim: (0,) * _nd)
                 for a in weight_args]

    # TODO(synk): for large post-unshuffle resolutions, tile H*W with a 1-pixel
    # halo (and add that axis as a second "parallel" grid dim so both v7x
    # TensorCores stay busy even at batch 1); at the sizes this module is used
    # with, the full spatial extent fits VMEM so one block per batch is fastest.
    c_z3, s_z3 = pl.pallas_call(
        kernel,
        out_shape=(jax.ShapeDtypeStruct((N, d, 1), jnp.float32),
                   jax.ShapeDtypeStruct((N, 1, Np), jnp.float32)),
        grid=(N,),
        in_specs=in_specs,
        out_specs=(pl.BlockSpec((1, d, 1), lambda n: (n, 0, 0)),
                   pl.BlockSpec((1, 1, Np), lambda n: (n, 0, 0))),
        compiler_params=pltpu.CompilerParams(
            dimension_semantics=("parallel",),
            vmem_limit_bytes=64 * 1024 * 1024),
    )(x, *weight_args)

    c_z = c_z3.reshape(N, d)
    s_z = s_z3.reshape(N, 1, Ho, Wo)
    S2_IPR = [c_z, s_z]
    return c_z, s_z, S2_IPR


# ---------------------------------------------------------------------------
# parameters (deterministic synthetic init; PyTorch-style layouts)
# ---------------------------------------------------------------------------
def init_params(key, channels, n_feats, n_encoder_res):
    def conv_p(k, cin, cout, K):
        kw, kb = jax.random.split(k)
        std = 1.0 / math.sqrt(cin * K * K)
        w = std * jax.random.normal(kw, (cout, cin, K, K), jnp.float32)
        b = std * jax.random.normal(kb, (cout,), jnp.float32)
        return w, b

    p = {}
    keys = jax.random.split(key, 8 + 2 * n_encoder_res)
    it = iter(keys)
    cin0 = channels * 16 + 1 * 16
    p["e1_w"], p["e1_b"] = conv_p(next(it), cin0, n_feats, 3)
    for i in range(n_encoder_res):
        p[f"rb{i}_w1"], p[f"rb{i}_b1"] = conv_p(next(it), n_feats, n_feats, 3)
        p[f"rb{i}_w2"], p[f"rb{i}_b2"] = conv_p(next(it), n_feats, n_feats, 3)
    p["e3_w1"], p["e3_b1"] = conv_p(next(it), n_feats, 2 * n_feats, 3)
    p["e3_w2"], p["e3_b2"] = conv_p(next(it), 2 * n_feats, 2 * n_feats, 3)
    p["e3_w3"], p["e3_b3"] = conv_p(next(it), 2 * n_feats, 4 * n_feats, 3)
    d = 4 * n_feats
    std = 1.0 / math.sqrt(d)
    k1, k2, k3, k4 = jax.random.split(next(it), 4)
    p["mlp_w1"] = std * jax.random.normal(k1, (d, d), jnp.float32)
    p["mlp_b1"] = std * jax.random.normal(k2, (d,), jnp.float32)
    p["mlp_w2"] = std * jax.random.normal(k3, (d, d), jnp.float32)
    p["mlp_b2"] = std * jax.random.normal(k4, (d,), jnp.float32)
    p["sp_w"], p["sp_b"] = conv_p(next(it), 2, 1, 7)
    p["sp_bn_gamma"] = jnp.ones((1,), jnp.float32)
    p["sp_bn_beta"] = jnp.zeros((1,), jnp.float32)
    p["sp_bn_mean"] = jnp.zeros((1,), jnp.float32)
    p["sp_bn_var"] = jnp.ones((1,), jnp.float32)
    return p


# ---------------------------------------------------------------------------
# pure JAX/XLA reference (eval mode) for a numerical self-check
# ---------------------------------------------------------------------------
def _reference_forward(params, ms, pan, n_encoder_res):
    def conv(x, w, b, K):
        y = lax.conv_general_dilated(x, w, (1, 1), [(K // 2, K // 2)] * 2,
                                     dimension_numbers=("NCHW", "OIHW", "NCHW"))
        return y + b.reshape(1, -1, 1, 1)

    lrelu = lambda t: jnp.where(t > 0, t, 0.1 * t)
    ms_u = pixel_unshuffle(ms, 4)
    pan_u = pixel_unshuffle(pan, 4)
    x = jnp.concatenate([ms_u, pan_u], axis=1)
    h = lrelu(conv(x, params["e1_w"], params["e1_b"], 3))
    for i in range(n_encoder_res):
        r = lrelu(conv(h, params[f"rb{i}_w1"], params[f"rb{i}_b1"], 3))
        h = conv(r, params[f"rb{i}_w2"], params[f"rb{i}_b2"], 3) + h
    e = lrelu(conv(h, params["e3_w1"], params["e3_b1"], 3))
    e = lrelu(conv(e, params["e3_w2"], params["e3_b2"], 3))
    e = lrelu(conv(e, params["e3_w3"], params["e3_b3"], 3))
    fea1 = e.mean(axis=(2, 3))
    hm = lrelu(fea1 @ params["mlp_w1"].T + params["mlp_b1"])
    c_z = jax.nn.sigmoid(hm @ params["mlp_w2"].T + params["mlp_b2"])
    fea2 = lax.reduce_window(h, -jnp.inf, lax.max, (1, 1, 4, 4), (1, 1, 4, 4), "VALID")
    cp = jnp.concatenate([fea2.max(axis=1, keepdims=True),
                          fea2.mean(axis=1, keepdims=True)], axis=1)
    s = conv(cp, params["sp_w"], params["sp_b"], 7)
    eps = 1e-5
    sc = params["sp_bn_gamma"] / jnp.sqrt(params["sp_bn_var"] + eps)
    tb = params["sp_bn_beta"] - params["sp_bn_mean"] * sc
    s_z = jax.nn.sigmoid(sc.reshape(1, -1, 1, 1) * s + tb.reshape(1, -1, 1, 1))
    return c_z, s_z


if __name__ == "__main__":
    key = jax.random.PRNGKey(0)
    channels, n_feats, n_encoder_res = 4, 16, 2            # small synthetic config
    B, Hin, Win = 2, 64, 64
    k_ms, k_pan, k_par = jax.random.split(key, 3)
    ms = jax.random.normal(k_ms, (B, channels, Hin, Win), jnp.float32)
    pan = jax.random.normal(k_pan, (B, 1, Hin, Win), jnp.float32)
    params = init_params(k_par, channels, n_feats, n_encoder_res)

    fwd = jax.jit(partial(cpen2_forward, n_encoder_res=n_encoder_res, n_feats=n_feats))
    c_z, s_z, S2_IPR = fwd(params, ms, pan)
    jax.block_until_ready((c_z, s_z))

    assert c_z.shape == (B, 4 * n_feats)
    assert s_z.shape == (B, 1, Hin // 16, Win // 16)
    assert len(S2_IPR) == 2

    # numerical self-check vs. a pure-JAX reference (bf16 matmuls -> loose tol)
    ref_cz, ref_sz = _reference_forward(params, ms, pan, n_encoder_res)
    np.testing.assert_allclose(np.asarray(c_z), np.asarray(ref_cz), atol=5e-2, rtol=0)
    np.testing.assert_allclose(np.asarray(s_z), np.asarray(ref_sz), atol=5e-2, rtol=0)

    print("KERNEL_OK")
</pallas_src>

<mosaic_0001>
module attributes {stable_mosaic.version = 11 : i64} {
  func.func @kernel(%arg0: i32, %arg1: memref<1x80x288xf32, #tpu.memory_space<vmem>>, %arg2: memref<3x288xf32, #tpu.memory_space<vmem>>, %arg3: memref<16x720xbf16, #tpu.memory_space<vmem>>, %arg4: memref<16x1xf32, #tpu.memory_space<vmem>>, %arg5: memref<2x16x144xbf16, #tpu.memory_space<vmem>>, %arg6: memref<2x16x1xf32, #tpu.memory_space<vmem>>, %arg7: memref<2x16x144xbf16, #tpu.memory_space<vmem>>, %arg8: memref<2x16x1xf32, #tpu.memory_space<vmem>>, %arg9: memref<32x144xbf16, #tpu.memory_space<vmem>>, %arg10: memref<32x1xf32, #tpu.memory_space<vmem>>, %arg11: memref<32x288xbf16, #tpu.memory_space<vmem>>, %arg12: memref<32x1xf32, #tpu.memory_space<vmem>>, %arg13: memref<64x288xbf16, #tpu.memory_space<vmem>>, %arg14: memref<64x1xf32, #tpu.memory_space<vmem>>, %arg15: memref<64x64xf32, #tpu.memory_space<vmem>>, %arg16: memref<64x1xf32, #tpu.memory_space<vmem>>, %arg17: memref<64x64xf32, #tpu.memory_space<vmem>>, %arg18: memref<64x1xf32, #tpu.memory_space<vmem>>, %arg19: memref<288x16xf32, #tpu.memory_space<vmem>>, %arg20: memref<288x16xf32, #tpu.memory_space<vmem>>, %arg21: memref<1x1xf32, #tpu.memory_space<vmem>>, %arg22: memref<1x64x1xf32, #tpu.memory_space<vmem>>, %arg23: memref<1x1x16xf32, #tpu.memory_space<vmem>>) attributes {dimension_semantics = [#tpu.dimension_semantics<parallel>], iteration_bounds = array<i64: 2>, scalar_prefetch = 0 : i64, scratch_operands = 0 : i64, tpu.core_type = #tpu.core_type<tc>, window_params = [{transform_indices = @transform_0, window_bounds = array<i64: 1, 80, 288>}, {pipeline_mode = #tpu.pipeline_mode<synchronous>, transform_indices = @transform_1, window_bounds = array<i64: 3, 288>}, {pipeline_mode = #tpu.pipeline_mode<synchronous>, transform_indices = @transform_2, window_bounds = array<i64: 16, 720>}, {pipeline_mode = #tpu.pipeline_mode<synchronous>, transform_indices = @transform_3, window_bounds = array<i64: 16, 1>}, {pipeline_mode = #tpu.pipeline_mode<synchronous>, transform_indices = @transform_4, window_bounds = array<i64: 2, 16, 144>}, {pipeline_mode = #tpu.pipeline_mode<synchronous>, transform_indices = @transform_5, window_bounds = array<i64: 2, 16, 1>}, {pipeline_mode = #tpu.pipeline_mode<synchronous>, transform_indices = @transform_6, window_bounds = array<i64: 2, 16, 144>}, {pipeline_mode = #tpu.pipeline_mode<synchronous>, transform_indices = @transform_7, window_bounds = array<i64: 2, 16, 1>}, {pipeline_mode = #tpu.pipeline_mode<synchronous>, transform_indices = @transform_8, window_bounds = array<i64: 32, 144>}, {pipeline_mode = #tpu.pipeline_mode<synchronous>, transform_indices = @transform_9, window_bounds = array<i64: 32, 1>}, {pipeline_mode = #tpu.pipeline_mode<synchronous>, transform_indices = @transform_10, window_bounds = array<i64: 32, 288>}, {pipeline_mode = #tpu.pipeline_mode<synchronous>, transform_indices = @transform_11, window_bounds = array<i64: 32, 1>}, {pipeline_mode = #tpu.pipeline_mode<synchronous>, transform_indices = @transform_12, window_bounds = array<i64: 64, 288>}, {pipeline_mode = #tpu.pipeline_mode<synchronous>, transform_indices = @transform_13, window_bounds = array<i64: 64, 1>}, {pipeline_mode = #tpu.pipeline_mode<synchronous>, transform_indices = @transform_14, window_bounds = array<i64: 64, 64>}, {pipeline_mode = #tpu.pipeline_mode<synchronous>, transform_indices = @transform_15, window_bounds = array<i64: 64, 1>}, {pipeline_mode = #tpu.pipeline_mode<synchronous>, transform_indices = @transform_16, window_bounds = array<i64: 64, 64>}, {pipeline_mode = #tpu.pipeline_mode<synchronous>, transform_indices = @transform_17, window_bounds = array<i64: 64, 1>}, {pipeline_mode = #tpu.pipeline_mode<synchronous>, transform_indices = @transform_18, window_bounds = array<i64: 288, 16>}, {pipeline_mode = #tpu.pipeline_mode<synchronous>, transform_indices = @transform_19, window_bounds = array<i64: 288, 16>}, {pipeline_mode = #tpu.pipeline_mode<synchronous>, transform_indices = @transform_20, window_bounds = array<i64: 1, 1>}, {transform_indices = @transform_21, window_bounds = array<i64: 1, 64, 1>}, {transform_indices = @transform_22, window_bounds = array<i64: 1, 1, 16>}]} {
    %c0 = arith.constant 0 : index
    %c0_0 = arith.constant 0 : index
    %0 = vector.load %arg2[%c0, %c0_0] : memref<3x288xf32, #tpu.memory_space<vmem>>, vector<3x288xf32>
    %1 = vector.extract_strided_slice %0 {offsets = [0, 0], sizes = [1, 288], strides = [1, 1]} : vector<3x288xf32> to vector<1x288xf32>
    %2 = vector.extract_strided_slice %0 {offsets = [1, 0], sizes = [1, 288], strides = [1, 1]} : vector<3x288xf32> to vector<1x288xf32>
    %3 = vector.extract_strided_slice %0 {offsets = [2, 0], sizes = [1, 288], strides = [1, 1]} : vector<3x288xf32> to vector<1x288xf32>
    %c0_1 = arith.constant 0 : index
    %c0_2 = arith.constant 0 : index
    %c0_3 = arith.constant 0 : index
    %4 = vector.load %arg1[%c0_1, %c0_2, %c0_3] : memref<1x80x288xf32, #tpu.memory_space<vmem>>, vector<1x80x288xf32>
    %5 = vector.shape_cast %4 : vector<1x80x288xf32> to vector<80x288xf32>
    %c0_4 = arith.constant 0 : index
    %c0_5 = arith.constant 0 : index
    %6 = vector.load %arg3[%c0_4, %c0_5] : memref<16x720xbf16, #tpu.memory_space<vmem>>, vector<16x720xbf16>
    %c0_6 = arith.constant 0 : index
    %c0_7 = arith.constant 0 : index
    %7 = vector.load %arg4[%c0_6, %c0_7] : memref<16x1xf32, #tpu.memory_space<vmem>>, vector<16x1xf32>
    %8 = vector.broadcast %1 : vector<1x288xf32> to vector<80x288xf32>
    %9 = arith.mulf %5, %8 : vector<80x288xf32>
    %10 = arith.truncf %9 : vector<80x288xf32> to vector<80x288xbf16>
    %11 = arith.truncf %5 : vector<80x288xf32> to vector<80x288xbf16>
    %12 = vector.broadcast %2 : vector<1x288xf32> to vector<80x288xf32>
    %13 = arith.mulf %5, %12 : vector<80x288xf32>
    %14 = arith.truncf %13 : vector<80x288xf32> to vector<80x288xbf16>
    %15 = vector.extract_strided_slice %10 {offsets = [0, 271], sizes = [80, 17], strides = [1, 1]} : vector<80x288xbf16> to vector<80x17xbf16>
    %16 = vector.extract_strided_slice %10 {offsets = [0, 0], sizes = [80, 271], strides = [1, 1]} : vector<80x288xbf16> to vector<80x271xbf16>
    %17 = tpu.concatenate %15, %16 in 1 : vector<80x17xbf16>, vector<80x271xbf16> -> vector<80x288xbf16>
    %18 = vector.extract_strided_slice %11 {offsets = [0, 272], sizes = [80, 16], strides = [1, 1]} : vector<80x288xbf16> to vector<80x16xbf16>
    %19 = vector.extract_strided_slice %11 {offsets = [0, 0], sizes = [80, 272], strides = [1, 1]} : vector<80x288xbf16> to vector<80x272xbf16>
    %20 = tpu.concatenate %18, %19 in 1 : vector<80x16xbf16>, vector<80x272xbf16> -> vector<80x288xbf16>
    %21 = vector.extract_strided_slice %14 {offsets = [0, 273], sizes = [80, 15], strides = [1, 1]} : vector<80x288xbf16> to vector<80x15xbf16>
    %22 = vector.extract_strided_slice %14 {offsets = [0, 0], sizes = [80, 273], strides = [1, 1]} : vector<80x288xbf16> to vector<80x273xbf16>
    %23 = tpu.concatenate %21, %22 in 1 : vector<80x15xbf16>, vector<80x273xbf16> -> vector<80x288xbf16>
    %24 = vector.extract_strided_slice %10 {offsets = [0, 287], sizes = [80, 1], strides = [1, 1]} : vector<80x288xbf16> to vector<80x1xbf16>
    %25 = vector.extract_strided_slice %10 {offsets = [0, 0], sizes = [80, 287], strides = [1, 1]} : vector<80x288xbf16> to vector<80x287xbf16>
    %26 = tpu.concatenate %24, %25 in 1 : vector<80x1xbf16>, vector<80x287xbf16> -> vector<80x288xbf16>
    %27 = vector.extract_strided_slice %14 {offsets = [0, 1], sizes = [80, 287], strides = [1, 1]} : vector<80x288xbf16> to vector<80x287xbf16>
    %28 = vector.extract_strided_slice %14 {offsets = [0, 0], sizes = [80, 1], strides = [1, 1]} : vector<80x288xbf16> to vector<80x1xbf16>
    %29 = tpu.concatenate %27, %28 in 1 : vector<80x287xbf16>, vector<80x1xbf16> -> vector<80x288xbf16>
    %30 = vector.extract_strided_slice %10 {offsets = [0, 15], sizes = [80, 273], strides = [1, 1]} : vector<80x288xbf16> to vector<80x273xbf16>
    %31 = vector.extract_strided_slice %10 {offsets = [0, 0], sizes = [80, 15], strides = [1, 1]} : vector<80x288xbf16> to vector<80x15xbf16>
    %32 = tpu.concatenate %30, %31 in 1 : vector<80x273xbf16>, vector<80x15xbf16> -> vector<80x288xbf16>
    %33 = vector.extract_strided_slice %11 {offsets = [0, 16], sizes = [80, 272], strides = [1, 1]} : vector<80x288xbf16> to vector<80x272xbf16>
    %34 = vector.extract_strided_slice %11 {offsets = [0, 0], sizes = [80, 16], strides = [1, 1]} : vector<80x288xbf16> to vector<80x16xbf16>
    %35 = tpu.concatenate %33, %34 in 1 : vector<80x272xbf16>, vector<80x16xbf16> -> vector<80x288xbf16>
    %36 = vector.extract_strided_slice %14 {offsets = [0, 17], sizes = [80, 271], strides = [1, 1]} : vector<80x288xbf16> to vector<80x271xbf16>
    %37 = vector.extract_strided_slice %14 {offsets = [0, 0], sizes = [80, 17], strides = [1, 1]} : vector<80x288xbf16> to vector<80x17xbf16>
    %38 = tpu.concatenate %36, %37 in 1 : vector<80x271xbf16>, vector<80x17xbf16> -> vector<80x288xbf16>
    %39 = tpu.concatenate %17, %20, %23, %26, %11, %29, %32, %35, %38 in 0 : vector<80x288xbf16>, vector<80x288xbf16>, vector<80x288xbf16>, vector<80x288xbf16>, vector<80x288xbf16>, vector<80x288xbf16>, vector<80x288xbf16>, vector<80x288xbf16>, vector<80x288xbf16> -> vector<720x288xbf16>
    %cst = arith.constant dense<0.000000e+00> : vector<16x288xf32>
    %40 = tpu.matmul %6, %39, %cst {dimension_numbers = #tpu.dot_dimension_numbers<[1], [0], [0], [1], [0, 0, 1, 1], [], []>} : vector<16x720xbf16>, vector<720x288xbf16>, vector<16x288xf32> -> vector<16x288xf32>
    %41 = vector.broadcast %7 : vector<16x1xf32> to vector<16x288xf32>
    %42 = arith.addf %40, %41 : vector<16x288xf32>
    %cst_8 = arith.constant 0.000000e+00 : f32
    %43 = vector.broadcast %cst_8 : f32 to vector<16x288xf32>
    %44 = arith.cmpf ogt, %42, %43 : vector<16x288xf32>
    %cst_9 = arith.constant 1.000000e-01 : f32
    %45 = vector.broadcast %cst_9 : f32 to vector<16x288xf32>
    %46 = arith.mulf %45, %42 : vector<16x288xf32>
    %47 = arith.select %44, %42, %46 : vector<16x288xi1>, vector<16x288xf32>
    %48 = vector.broadcast %3 : vector<1x288xf32> to vector<16x288xf32>
    %49 = arith.mulf %47, %48 : vector<16x288xf32>
    %c0_10 = arith.constant 0 : index
    %c0_11 = arith.constant 0 : index
    %c0_12 = arith.constant 0 : index
    %50 = vector.load %arg5[%c0_10, %c0_11, %c0_12] : memref<2x16x144xbf16, #tpu.memory_space<vmem>>, vector<1x16x144xbf16>
    %51 = vector.shape_cast %50 : vector<1x16x144xbf16> to vector<16x144xbf16>
    %c0_13 = arith.constant 0 : index
    %c0_14 = arith.constant 0 : index
    %c0_15 = arith.constant 0 : index
    %52 = vector.load %arg6[%c0_13, %c0_14, %c0_15] : memref<2x16x1xf32, #tpu.memory_space<vmem>>, vector<1x16x1xf32>
    %53 = vector.shape_cast %52 : vector<1x16x1xf32> to vector<16x1xf32>
    %54 = vector.broadcast %1 : vector<1x288xf32> to vector<16x288xf32>
    %55 = arith.mulf %49, %54 : vector<16x288xf32>
    %56 = arith.truncf %55 : vector<16x288xf32> to vector<16x288xbf16>
    %57 = arith.truncf %49 : vector<16x288xf32> to vector<16x288xbf16>
    %58 = vector.broadcast %2 : vector<1x288xf32> to vector<16x288xf32>
    %59 = arith.mulf %49, %58 : vector<16x288xf32>
    %60 = arith.truncf %59 : vector<16x288xf32> to vector<16x288xbf16>
    %61 = vector.extract_strided_slice %56 {offsets = [0, 271], sizes = [16, 17], strides = [1, 1]} : vector<16x288xbf16> to vector<16x17xbf16>
    %62 = vector.extract_strided_slice %56 {offsets = [0, 0], sizes = [16, 271], strides = [1, 1]} : vector<16x288xbf16> to vector<16x271xbf16>
    %63 = tpu.concatenate %61, %62 in 1 : vector<16x17xbf16>, vector<16x271xbf16> -> vector<16x288xbf16>
    %64 = vector.extract_strided_slice %57 {offsets = [0, 272], sizes = [16, 16], strides = [1, 1]} : vector<16x288xbf16> to vector<16x16xbf16>
    %65 = vector.extract_strided_slice %57 {offsets = [0, 0], sizes = [16, 272], strides = [1, 1]} : vector<16x288xbf16> to vector<16x272xbf16>
    %66 = tpu.concatenate %64, %65 in 1 : vector<16x16xbf16>, vector<16x272xbf16> -> vector<16x288xbf16>
    %67 = vector.extract_strided_slice %60 {offsets = [0, 273], sizes = [16, 15], strides = [1, 1]} : vector<16x288xbf16> to vector<16x15xbf16>
    %68 = vector.extract_strided_slice %60 {offsets = [0, 0], sizes = [16, 273], strides = [1, 1]} : vector<16x288xbf16> to vector<16x273xbf16>
    %69 = tpu.concatenate %67, %68 in 1 : vector<16x15xbf16>, vector<16x273xbf16> -> vector<16x288xbf16>
    %70 = vector.extract_strided_slice %56 {offsets = [0, 287], sizes = [16, 1], strides = [1, 1]} : vector<16x288xbf16> to vector<16x1xbf16>
    %71 = vector.extract_strided_slice %56 {offsets = [0, 0], sizes = [16, 287], strides = [1, 1]} : vector<16x288xbf16> to vector<16x287xbf16>
    %72 = tpu.concatenate %70, %71 in 1 : vector<16x1xbf16>, vector<16x287xbf16> -> vector<16x288xbf16>
    %73 = vector.extract_strided_slice %60 {offsets = [0, 1], sizes = [16, 287], strides = [1, 1]} : vector<16x288xbf16> to vector<16x287xbf16>
    %74 = vector.extract_strided_slice %60 {offsets = [0, 0], sizes = [16, 1], strides = [1, 1]} : vector<16x288xbf16> to vector<16x1xbf16>
    %75 = tpu.concatenate %73, %74 in 1 : vector<16x287xbf16>, vector<16x1xbf16> -> vector<16x288xbf16>
    %76 = vector.extract_strided_slice %56 {offsets = [0, 15], sizes = [16, 273], strides = [1, 1]} : vector<16x288xbf16> to vector<16x273xbf16>
    %77 = vector.extract_strided_slice %56 {offsets = [0, 0], sizes = [16, 15], strides = [1, 1]} : vector<16x288xbf16> to vector<16x15xbf16>
    %78 = tpu.concatenate %76, %77 in 1 : vector<16x273xbf16>, vector<16x15xbf16> -> vector<16x288xbf16>
    %79 = vector.extract_strided_slice %57 {offsets = [0, 16], sizes = [16, 272], strides = [1, 1]} : vector<16x288xbf16> to vector<16x272xbf16>
    %80 = vector.extract_strided_slice %57 {offsets = [0, 0], sizes = [16, 16], strides = [1, 1]} : vector<16x288xbf16> to vector<16x16xbf16>
    %81 = tpu.concatenate %79, %80 in 1 : vector<16x272xbf16>, vector<16x16xbf16> -> vector<16x288xbf16>
    %82 = vector.extract_strided_slice %60 {offsets = [0, 17], sizes = [16, 271], strides = [1, 1]} : vector<16x288xbf16> to vector<16x271xbf16>
    %83 = vector.extract_strided_slice %60 {offsets = [0, 0], sizes = [16, 17], strides = [1, 1]} : vector<16x288xbf16> to vector<16x17xbf16>
    %84 = tpu.concatenate %82, %83 in 1 : vector<16x271xbf16>, vector<16x17xbf16> -> vector<16x288xbf16>
    %85 = tpu.concatenate %63, %66, %69, %72, %57, %75, %78, %81, %84 in 0 : vector<16x288xbf16>, vector<16x288xbf16>, vector<16x288xbf16>, vector<16x288xbf16>, vector<16x288xbf16>, vector<16x288xbf16>, vector<16x288xbf16>, vector<16x288xbf16>, vector<16x288xbf16> -> vector<144x288xbf16>
    %cst_16 = arith.constant dense<0.000000e+00> : vector<16x288xf32>
    %86 = tpu.matmul %51, %85, %cst_16 {dimension_numbers = #tpu.dot_dimension_numbers<[1], [0], [0], [1], [0, 0, 1, 1], [], []>} : vector<16x144xbf16>, vector<144x288xbf16>, vector<16x288xf32> -> vector<16x288xf32>
    %87 = vector.broadcast %53 : vector<16x1xf32> to vector<16x288xf32>
    %88 = arith.addf %86, %87 : vector<16x288xf32>
    %cst_17 = arith.constant 0.000000e+00 : f32
    %89 = vector.broadcast %cst_17 : f32 to vector<16x288xf32>
    %90 = arith.cmpf ogt, %88, %89 : vector<16x288xf32>
    %cst_18 = arith.constant 1.000000e-01 : f32
    %91 = vector.broadcast %cst_18 : f32 to vector<16x288xf32>
    %92 = arith.mulf %91, %88 : vector<16x288xf32>
    %93 = arith.select %90, %88, %92 : vector<16x288xi1>, vector<16x288xf32>
    %94 = vector.broadcast %3 : vector<1x288xf32> to vector<16x288xf32>
    %95 = arith.mulf %93, %94 : vector<16x288xf32>
    %c0_19 = arith.constant 0 : index
    %c0_20 = arith.constant 0 : index
    %c0_21 = arith.constant 0 : index
    %96 = vector.load %arg7[%c0_19, %c0_20, %c0_21] : memref<2x16x144xbf16, #tpu.memory_space<vmem>>, vector<1x16x144xbf16>
    %97 = vector.shape_cast %96 : vector<1x16x144xbf16> to vector<16x144xbf16>
    %c0_22 = arith.constant 0 : index
    %c0_23 = arith.constant 0 : index
    %c0_24 = arith.constant 0 : index
    %98 = vector.load %arg8[%c0_22, %c0_23, %c0_24] : memref<2x16x1xf32, #tpu.memory_space<vmem>>, vector<1x16x1xf32>
    %99 = vector.shape_cast %98 : vector<1x16x1xf32> to vector<16x1xf32>
    %100 = vector.broadcast %1 : vector<1x288xf32> to vector<16x288xf32>
    %101 = arith.mulf %95, %100 : vector<16x288xf32>
    %102 = arith.truncf %101 : vector<16x288xf32> to vector<16x288xbf16>
    %103 = arith.truncf %95 : vector<16x288xf32> to vector<16x288xbf16>
    %104 = vector.broadcast %2 : vector<1x288xf32> to vector<16x288xf32>
    %105 = arith.mulf %95, %104 : vector<16x288xf32>
    %106 = arith.truncf %105 : vector<16x288xf32> to vector<16x288xbf16>
    %107 = vector.extract_strided_slice %102 {offsets = [0, 271], sizes = [16, 17], strides = [1, 1]} : vector<16x288xbf16> to vector<16x17xbf16>
    %108 = vector.extract_strided_slice %102 {offsets = [0, 0], sizes = [16, 271], strides = [1, 1]} : vector<16x288xbf16> to vector<16x271xbf16>
    %109 = tpu.concatenate %107, %108 in 1 : vector<16x17xbf16>, vector<16x271xbf16> -> vector<16x288xbf16>
    %110 = vector.extract_strided_slice %103 {offsets = [0, 272], sizes = [16, 16], strides = [1, 1]} : vector<16x288xbf16> to vector<16x16xbf16>
    %111 = vector.extract_strided_slice %103 {offsets = [0, 0], sizes = [16, 272], strides = [1, 1]} : vector<16x288xbf16> to vector<16x272xbf16>
    %112 = tpu.concatenate %110, %111 in 1 : vector<16x16xbf16>, vector<16x272xbf16> -> vector<16x288xbf16>
    %113 = vector.extract_strided_slice %106 {offsets = [0, 273], sizes = [16, 15], strides = [1, 1]} : vector<16x288xbf16> to vector<16x15xbf16>
    %114 = vector.extract_strided_slice %106 {offsets = [0, 0], sizes = [16, 273], strides = [1, 1]} : vector<16x288xbf16> to vector<16x273xbf16>
    %115 = tpu.concatenate %113, %114 in 1 : vector<16x15xbf16>, vector<16x273xbf16> -> vector<16x288xbf16>
    %116 = vector.extract_strided_slice %102 {offsets = [0, 287], sizes = [16, 1], strides = [1, 1]} : vector<16x288xbf16> to vector<16x1xbf16>
    %117 = vector.extract_strided_slice %102 {offsets = [0, 0], sizes = [16, 287], strides = [1, 1]} : vector<16x288xbf16> to vector<16x287xbf16>
    %118 = tpu.concatenate %116, %117 in 1 : vector<16x1xbf16>, vector<16x287xbf16> -> vector<16x288xbf16>
    %119 = vector.extract_strided_slice %106 {offsets = [0, 1], sizes = [16, 287], strides = [1, 1]} : vector<16x288xbf16> to vector<16x287xbf16>
    %120 = vector.extract_strided_slice %106 {offsets = [0, 0], sizes = [16, 1], strides = [1, 1]} : vector<16x288xbf16> to vector<16x1xbf16>
    %121 = tpu.concatenate %119, %120 in 1 : vector<16x287xbf16>, vector<16x1xbf16> -> vector<16x288xbf16>
    %122 = vector.extract_strided_slice %102 {offsets = [0, 15], sizes = [16, 273], strides = [1, 1]} : vector<16x288xbf16> to vector<16x273xbf16>
    %123 = vector.extract_strided_slice %102 {offsets = [0, 0], sizes = [16, 15], strides = [1, 1]} : vector<16x288xbf16> to vector<16x15xbf16>
    %124 = tpu.concatenate %122, %123 in 1 : vector<16x273xbf16>, vector<16x15xbf16> -> vector<16x288xbf16>
    %125 = vector.extract_strided_slice %103 {offsets = [0, 16], sizes = [16, 272], strides = [1, 1]} : vector<16x288xbf16> to vector<16x272xbf16>
    %126 = vector.extract_strided_slice %103 {offsets = [0, 0], sizes = [16, 16], strides = [1, 1]} : vector<16x288xbf16> to vector<16x16xbf16>
    %127 = tpu.concatenate %125, %126 in 1 : vector<16x272xbf16>, vector<16x16xbf16> -> vector<16x288xbf16>
    %128 = vector.extract_strided_slice %106 {offsets = [0, 17], sizes = [16, 271], strides = [1, 1]} : vector<16x288xbf16> to vector<16x271xbf16>
    %129 = vector.extract_strided_slice %106 {offsets = [0, 0], sizes = [16, 17], strides = [1, 1]} : vector<16x288xbf16> to vector<16x17xbf16>
    %130 = tpu.concatenate %128, %129 in 1 : vector<16x271xbf16>, vector<16x17xbf16> -> vector<16x288xbf16>
    %131 = tpu.concatenate %109, %112, %115, %118, %103, %121, %124, %127, %130 in 0 : vector<16x288xbf16>, vector<16x288xbf16>, vector<16x288xbf16>, vector<16x288xbf16>, vector<16x288xbf16>, vector<16x288xbf16>, vector<16x288xbf16>, vector<16x288xbf16>, vector<16x288xbf16> -> vector<144x288xbf16>
    %cst_25 = arith.constant dense<0.000000e+00> : vector<16x288xf32>
    %132 = tpu.matmul %97, %131, %cst_25 {dimension_numbers = #tpu.dot_dimension_numbers<[1], [0], [0], [1], [0, 0, 1, 1], [], []>} : vector<16x144xbf16>, vector<144x288xbf16>, vector<16x288xf32> -> vector<16x288xf32>
    %133 = vector.broadcast %99 : vector<16x1xf32> to vector<16x288xf32>
    %134 = arith.addf %132, %133 : vector<16x288xf32>
    %135 = vector.broadcast %3 : vector<1x288xf32> to vector<16x288xf32>
    %136 = arith.mulf %134, %135 : vector<16x288xf32>
    %137 = arith.addf %136, %49 : vector<16x288xf32>
    %c1 = arith.constant 1 : index
    %c0_26 = arith.constant 0 : index
    %c0_27 = arith.constant 0 : index
    %138 = vector.load %arg5[%c1, %c0_26, %c0_27] : memref<2x16x144xbf16, #tpu.memory_space<vmem>>, vector<1x16x144xbf16>
    %139 = vector.shape_cast %138 : vector<1x16x144xbf16> to vector<16x144xbf16>
    %c1_28 = arith.constant 1 : index
    %c0_29 = arith.constant 0 : index
    %c0_30 = arith.constant 0 : index
    %140 = vector.load %arg6[%c1_28, %c0_29, %c0_30] : memref<2x16x1xf32, #tpu.memory_space<vmem>>, vector<1x16x1xf32>
    %141 = vector.shape_cast %140 : vector<1x16x1xf32> to vector<16x1xf32>
    %142 = vector.broadcast %1 : vector<1x288xf32> to vector<16x288xf32>
    %143 = arith.mulf %137, %142 : vector<16x288xf32>
    %144 = arith.truncf %143 : vector<16x288xf32> to vector<16x288xbf16>
    %145 = arith.truncf %137 : vector<16x288xf32> to vector<16x288xbf16>
    %146 = vector.broadcast %2 : vector<1x288xf32> to vector<16x288xf32>
    %147 = arith.mulf %137, %146 : vector<16x288xf32>
    %148 = arith.truncf %147 : vector<16x288xf32> to vector<16x288xbf16>
    %149 = vector.extract_strided_slice %144 {offsets = [0, 271], sizes = [16, 17], strides = [1, 1]} : vector<16x288xbf16> to vector<16x17xbf16>
    %150 = vector.extract_strided_slice %144 {offsets = [0, 0], sizes = [16, 271], strides = [1, 1]} : vector<16x288xbf16> to vector<16x271xbf16>
    %151 = tpu.concatenate %149, %150 in 1 : vector<16x17xbf16>, vector<16x271xbf16> -> vector<16x288xbf16>
    %152 = vector.extract_strided_slice %145 {offsets = [0, 272], sizes = [16, 16], strides = [1, 1]} : vector<16x288xbf16> to vector<16x16xbf16>
    %153 = vector.extract_strided_slice %145 {offsets = [0, 0], sizes = [16, 272], strides = [1, 1]} : vector<16x288xbf16> to vector<16x272xbf16>
    %154 = tpu.concatenate %152, %153 in 1 : vector<16x16xbf16>, vector<16x272xbf16> -> vector<16x288xbf16>
    %155 = vector.extract_strided_slice %148 {offsets = [0, 273], sizes = [16, 15], strides = [1, 1]} : vector<16x288xbf16> to vector<16x15xbf16>
    %156 = vector.extract_strided_slice %148 {offsets = [0, 0], sizes = [16, 273], strides = [1, 1]} : vector<16x288xbf16> to vector<16x273xbf16>
    %157 = tpu.concatenate %155, %156 in 1 : vector<16x15xbf16>, vector<16x273xbf16> -> vector<16x288xbf16>
    %158 = vector.extract_strided_slice %144 {offsets = [0, 287], sizes = [16, 1], strides = [1, 1]} : vector<16x288xbf16> to vector<16x1xbf16>
    %159 = vector.extract_strided_slice %144 {offsets = [0, 0], sizes = [16, 287], strides = [1, 1]} : vector<16x288xbf16> to vector<16x287xbf16>
    %160 = tpu.concatenate %158, %159 in 1 : vector<16x1xbf16>, vector<16x287xbf16> -> vector<16x288xbf16>
    %161 = vector.extract_strided_slice %148 {offsets = [0, 1], sizes = [16, 287], strides = [1, 1]} : vector<16x288xbf16> to vector<16x287xbf16>
    %162 = vector.extract_strided_slice %148 {offsets = [0, 0], sizes = [16, 1], strides = [1, 1]} : vector<16x288xbf16> to vector<16x1xbf16>
    %163 = tpu.concatenate %161, %162 in 1 : vector<16x287xbf16>, vector<16x1xbf16> -> vector<16x288xbf16>
    %164 = vector.extract_strided_slice %144 {offsets = [0, 15], sizes = [16, 273], strides = [1, 1]} : vector<16x288xbf16> to vector<16x273xbf16>
    %165 = vector.extract_strided_slice %144 {offsets = [0, 0], sizes = [16, 15], strides = [1, 1]} : vector<16x288xbf16> to vector<16x15xbf16>
    %166 = tpu.concatenate %164, %165 in 1 : vector<16x273xbf16>, vector<16x15xbf16> -> vector<16x288xbf16>
    %167 = vector.extract_strided_slice %145 {offsets = [0, 16], sizes = [16, 272], strides = [1, 1]} : vector<16x288xbf16> to vector<16x272xbf16>
    %168 = vector.extract_strided_slice %145 {offsets = [0, 0], sizes = [16, 16], strides = [1, 1]} : vector<16x288xbf16> to vector<16x16xbf16>
    %169 = tpu.concatenate %167, %168 in 1 : vector<16x272xbf16>, vector<16x16xbf16> -> vector<16x288xbf16>
    %170 = vector.extract_strided_slice %148 {offsets = [0, 17], sizes = [16, 271], strides = [1, 1]} : vector<16x288xbf16> to vector<16x271xbf16>
    %171 = vector.extract_strided_slice %148 {offsets = [0, 0], sizes = [16, 17], strides = [1, 1]} : vector<16x288xbf16> to vector<16x17xbf16>
    %172 = tpu.concatenate %170, %171 in 1 : vector<16x271xbf16>, vector<16x17xbf16> -> vector<16x288xbf16>
    %173 = tpu.concatenate %151, %154, %157, %160, %145, %163, %166, %169, %172 in 0 : vector<16x288xbf16>, vector<16x288xbf16>, vector<16x288xbf16>, vector<16x288xbf16>, vector<16x288xbf16>, vector<16x288xbf16>, vector<16x288xbf16>, vector<16x288xbf16>, vector<16x288xbf16> -> vector<144x288xbf16>
    %cst_31 = arith.constant dense<0.000000e+00> : vector<16x288xf32>
    %174 = tpu.matmul %139, %173, %cst_31 {dimension_numbers = #tpu.dot_dimension_numbers<[1], [0], [0], [1], [0, 0, 1, 1], [], []>} : vector<16x144xbf16>, vector<144x288xbf16>, vector<16x288xf32> -> vector<16x288xf32>
    %175 = vector.broadcast %141 : vector<16x1xf32> to vector<16x288xf32>
    %176 = arith.addf %174, %175 : vector<16x288xf32>
    %cst_32 = arith.constant 0.000000e+00 : f32
    %177 = vector.broadcast %cst_32 : f32 to vector<16x288xf32>
    %178 = arith.cmpf ogt, %176, %177 : vector<16x288xf32>
    %cst_33 = arith.constant 1.000000e-01 : f32
    %179 = vector.broadcast %cst_33 : f32 to vector<16x288xf32>
    %180 = arith.mulf %179, %176 : vector<16x288xf32>
    %181 = arith.select %178, %176, %180 : vector<16x288xi1>, vector<16x288xf32>
    %182 = vector.broadcast %3 : vector<1x288xf32> to vector<16x288xf32>
    %183 = arith.mulf %181, %182 : vector<16x288xf32>
    %c1_34 = arith.constant 1 : index
    %c0_35 = arith.constant 0 : index
    %c0_36 = arith.constant 0 : index
    %184 = vector.load %arg7[%c1_34, %c0_35, %c0_36] : memref<2x16x144xbf16, #tpu.memory_space<vmem>>, vector<1x16x144xbf16>
    %185 = vector.shape_cast %184 : vector<1x16x144xbf16> to vector<16x144xbf16>
    %c1_37 = arith.constant 1 : index
    %c0_38 = arith.constant 0 : index
    %c0_39 = arith.constant 0 : index
    %186 = vector.load %arg8[%c1_37, %c0_38, %c0_39] : memref<2x16x1xf32, #tpu.memory_space<vmem>>, vector<1x16x1xf32>
    %187 = vector.shape_cast %186 : vector<1x16x1xf32> to vector<16x1xf32>
    %188 = vector.broadcast %1 : vector<1x288xf32> to vector<16x288xf32>
    %189 = arith.mulf %183, %188 : vector<16x288xf32>
    %190 = arith.truncf %189 : vector<16x288xf32> to vector<16x288xbf16>
    %191 = arith.truncf %183 : vector<16x288xf32> to vector<16x288xbf16>
    %192 = vector.broadcast %2 : vector<1x288xf32> to vector<16x288xf32>
    %193 = arith.mulf %183, %192 : vector<16x288xf32>
    %194 = arith.truncf %193 : vector<16x288xf32> to vector<16x288xbf16>
    %195 = vector.extract_strided_slice %190 {offsets = [0, 271], sizes = [16, 17], strides = [1, 1]} : vector<16x288xbf16> to vector<16x17xbf16>
    %196 = vector.extract_strided_slice %190 {offsets = [0, 0], sizes = [16, 271], strides = [1, 1]} : vector<16x288xbf16> to vector<16x271xbf16>
    %197 = tpu.concatenate %195, %196 in 1 : vector<16x17xbf16>, vector<16x271xbf16> -> vector<16x288xbf16>
    %198 = vector.extract_strided_slice %191 {offsets = [0, 272], sizes = [16, 16], strides = [1, 1]} : vector<16x288xbf16> to vector<16x16xbf16>
    %199 = vector.extract_strided_slice %191 {offsets = [0, 0], sizes = [16, 272], strides = [1, 1]} : vector<16x288xbf16> to vector<16x272xbf16>
    %200 = tpu.concatenate %198, %199 in 1 : vector<16x16xbf16>, vector<16x272xbf16> -> vector<16x288xbf16>
    %201 = vector.extract_strided_slice %194 {offsets = [0, 273], sizes = [16, 15], strides = [1, 1]} : vector<16x288xbf16> to vector<16x15xbf16>
    %202 = vector.extract_strided_slice %194 {offsets = [0, 0], sizes = [16, 273], strides = [1, 1]} : vector<16x288xbf16> to vector<16x273xbf16>
    %203 = tpu.concatenate %201, %202 in 1 : vector<16x15xbf16>, vector<16x273xbf16> -> vector<16x288xbf16>
    %204 = vector.extract_strided_slice %190 {offsets = [0, 287], sizes = [16, 1], strides = [1, 1]} : vector<16x288xbf16> to vector<16x1xbf16>
    %205 = vector.extract_strided_slice %190 {offsets = [0, 0], sizes = [16, 287], strides = [1, 1]} : vector<16x288xbf16> to vector<16x287xbf16>
    %206 = tpu.concatenate %204, %205 in 1 : vector<16x1xbf16>, vector<16x287xbf16> -> vector<16x288xbf16>
    %207 = vector.extract_strided_slice %194 {offsets = [0, 1], sizes = [16, 287], strides = [1, 1]} : vector<16x288xbf16> to vector<16x287xbf16>
    %208 = vector.extract_strided_slice %194 {offsets = [0, 0], sizes = [16, 1], strides = [1, 1]} : vector<16x288xbf16> to vector<16x1xbf16>
    %209 = tpu.concatenate %207, %208 in 1 : vector<16x287xbf16>, vector<16x1xbf16> -> vector<16x288xbf16>
    %210 = vector.extract_strided_slice %190 {offsets = [0, 15], sizes = [16, 273], strides = [1, 1]} : vector<16x288xbf16> to vector<16x273xbf16>
    %211 = vector.extract_strided_slice %190 {offsets = [0, 0], sizes = [16, 15], strides = [1, 1]} : vector<16x288xbf16> to vector<16x15xbf16>
    %212 = tpu.concatenate %210, %211 in 1 : vector<16x273xbf16>, vector<16x15xbf16> -> vector<16x288xbf16>
    %213 = vector.extract_strided_slice %191 {offsets = [0, 16], sizes = [16, 272], strides = [1, 1]} : vector<16x288xbf16> to vector<16x272xbf16>
    %214 = vector.extract_strided_slice %191 {offsets = [0, 0], sizes = [16, 16], strides = [1, 1]} : vector<16x288xbf16> to vector<16x16xbf16>
    %215 = tpu.concatenate %213, %214 in 1 : vector<16x272xbf16>, vector<16x16xbf16> -> vector<16x288xbf16>
    %216 = vector.extract_strided_slice %194 {offsets = [0, 17], sizes = [16, 271], strides = [1, 1]} : vector<16x288xbf16> to vector<16x271xbf16>
    %217 = vector.extract_strided_slice %194 {offsets = [0, 0], sizes = [16, 17], strides = [1, 1]} : vector<16x288xbf16> to vector<16x17xbf16>
    %218 = tpu.concatenate %216, %217 in 1 : vector<16x271xbf16>, vector<16x17xbf16> -> vector<16x288xbf16>
    %219 = tpu.concatenate %197, %200, %203, %206, %191, %209, %212, %215, %218 in 0 : vector<16x288xbf16>, vector<16x288xbf16>, vector<16x288xbf16>, vector<16x288xbf16>, vector<16x288xbf16>, vector<16x288xbf16>, vector<16x288xbf16>, vector<16x288xbf16>, vector<16x288xbf16> -> vector<144x288xbf16>
    %cst_40 = arith.constant dense<0.000000e+00> : vector<16x288xf32>
    %220 = tpu.matmul %185, %219, %cst_40 {dimension_numbers = #tpu.dot_dimension_numbers<[1], [0], [0], [1], [0, 0, 1, 1], [], []>} : vector<16x144xbf16>, vector<144x288xbf16>, vector<16x288xf32> -> vector<16x288xf32>
    %221 = vector.broadcast %187 : vector<16x1xf32> to vector<16x288xf32>
    %222 = arith.addf %220, %221 : vector<16x288xf32>
    %223 = vector.broadcast %3 : vector<1x288xf32> to vector<16x288xf32>
    %224 = arith.mulf %222, %223 : vector<16x288xf32>
    %225 = arith.addf %224, %137 : vector<16x288xf32>
    %c0_41 = arith.constant 0 : index
    %c0_42 = arith.constant 0 : index
    %226 = vector.load %arg9[%c0_41, %c0_42] : memref<32x144xbf16, #tpu.memory_space<vmem>>, vector<32x144xbf16>
    %c0_43 = arith.constant 0 : index
    %c0_44 = arith.constant 0 : index
    %227 = vector.load %arg10[%c0_43, %c0_44] : memref<32x1xf32, #tpu.memory_space<vmem>>, vector<32x1xf32>
    %228 = vector.broadcast %1 : vector<1x288xf32> to vector<16x288xf32>
    %229 = arith.mulf %225, %228 : vector<16x288xf32>
    %230 = arith.truncf %229 : vector<16x288xf32> to vector<16x288xbf16>
    %231 = arith.truncf %225 : vector<16x288xf32> to vector<16x288xbf16>
    %232 = vector.broadcast %2 : vector<1x288xf32> to vector<16x288xf32>
    %233 = arith.mulf %225, %232 : vector<16x288xf32>
    %234 = arith.truncf %233 : vector<16x288xf32> to vector<16x288xbf16>
    %235 = vector.extract_strided_slice %230 {offsets = [0, 271], sizes = [16, 17], strides = [1, 1]} : vector<16x288xbf16> to vector<16x17xbf16>
    %236 = vector.extract_strided_slice %230 {offsets = [0, 0], sizes = [16, 271], strides = [1, 1]} : vector<16x288xbf16> to vector<16x271xbf16>
    %237 = tpu.concatenate %235, %236 in 1 : vector<16x17xbf16>, vector<16x271xbf16> -> vector<16x288xbf16>
    %238 = vector.extract_strided_slice %231 {offsets = [0, 272], sizes = [16, 16], strides = [1, 1]} : vector<16x288xbf16> to vector<16x16xbf16>
    %239 = vector.extract_strided_slice %231 {offsets = [0, 0], sizes = [16, 272], strides = [1, 1]} : vector<16x288xbf16> to vector<16x272xbf16>
    %240 = tpu.concatenate %238, %239 in 1 : vector<16x16xbf16>, vector<16x272xbf16> -> vector<16x288xbf16>
    %241 = vector.extract_strided_slice %234 {offsets = [0, 273], sizes = [16, 15], strides = [1, 1]} : vector<16x288xbf16> to vector<16x15xbf16>
    %242 = vector.extract_strided_slice %234 {offsets = [0, 0], sizes = [16, 273], strides = [1, 1]} : vector<16x288xbf16> to vector<16x273xbf16>
    %243 = tpu.concatenate %241, %242 in 1 : vector<16x15xbf16>, vector<16x273xbf16> -> vector<16x288xbf16>
    %244 = vector.extract_strided_slice %230 {offsets = [0, 287], sizes = [16, 1], strides = [1, 1]} : vector<16x288xbf16> to vector<16x1xbf16>
    %245 = vector.extract_strided_slice %230 {offsets = [0, 0], sizes = [16, 287], strides = [1, 1]} : vector<16x288xbf16> to vector<16x287xbf16>
    %246 = tpu.concatenate %244, %245 in 1 : vector<16x1xbf16>, vector<16x287xbf16> -> vector<16x288xbf16>
    %247 = vector.extract_strided_slice %234 {offsets = [0, 1], sizes = [16, 287], strides = [1, 1]} : vector<16x288xbf16> to vector<16x287xbf16>
    %248 = vector.extract_strided_slice %234 {offsets = [0, 0], sizes = [16, 1], strides = [1, 1]} : vector<16x288xbf16> to vector<16x1xbf16>
    %249 = tpu.concatenate %247, %248 in 1 : vector<16x287xbf16>, vector<16x1xbf16> -> vector<16x288xbf16>
    %250 = vector.extract_strided_slice %230 {offsets = [0, 15], sizes = [16, 273], strides = [1, 1]} : vector<16x288xbf16> to vector<16x273xbf16>
    %251 = vector.extract_strided_slice %230 {offsets = [0, 0], sizes = [16, 15], strides = [1, 1]} : vector<16x288xbf16> to vector<16x15xbf16>
    %252 = tpu.concatenate %250, %251 in 1 : vector<16x273xbf16>, vector<16x15xbf16> -> vector<16x288xbf16>
    %253 = vector.extract_strided_slice %231 {offsets = [0, 16], sizes = [16, 272], strides = [1, 1]} : vector<16x288xbf16> to vector<16x272xbf16>
    %254 = vector.extract_strided_slice %231 {offsets = [0, 0], sizes = [16, 16], strides = [1, 1]} : vector<16x288xbf16> to vector<16x16xbf16>
    %255 = tpu.concatenate %253, %254 in 1 : vector<16x272xbf16>, vector<16x16xbf16> -> vector<16x288xbf16>
    %256 = vector.extract_strided_slice %234 {offsets = [0, 17], sizes = [16, 271], strides = [1, 1]} : vector<16x288xbf16> to vector<16x271xbf16>
    %257 = vector.extract_strided_slice %234 {offsets = [0, 0], sizes = [16, 17], strides = [1, 1]} : vector<16x288xbf16> to vector<16x17xbf16>
    %258 = tpu.concatenate %256, %257 in 1 : vector<16x271xbf16>, vector<16x17xbf16> -> vector<16x288xbf16>
    %259 = tpu.concatenate %237, %240, %243, %246, %231, %249, %252, %255, %258 in 0 : vector<16x288xbf16>, vector<16x288xbf16>, vector<16x288xbf16>, vector<16x288xbf16>, vector<16x288xbf16>, vector<16x288xbf16>, vector<16x288xbf16>, vector<16x288xbf16>, vector<16x288xbf16> -> vector<144x288xbf16>
    %cst_45 = arith.constant dense<0.000000e+00> : vector<32x288xf32>
    %260 = tpu.matmul %226, %259, %cst_45 {dimension_numbers = #tpu.dot_dimension_numbers<[1], [0], [0], [1], [0, 0, 1, 1], [], []>} : vector<32x144xbf16>, vector<144x288xbf16>, vector<32x288xf32> -> vector<32x288xf32>
    %261 = vector.broadcast %227 : vector<32x1xf32> to vector<32x288xf32>
    %262 = arith.addf %260, %261 : vector<32x288xf32>
    %cst_46 = arith.constant 0.000000e+00 : f32
    %263 = vector.broadcast %cst_46 : f32 to vector<32x288xf32>
    %264 = arith.cmpf ogt, %262, %263 : vector<32x288xf32>
    %cst_47 = arith.constant 1.000000e-01 : f32
    %265 = vector.broadcast %cst_47 : f32 to vector<32x288xf32>
    %266 = arith.mulf %265, %262 : vector<32x288xf32>
    %267 = arith.select %264, %262, %266 : vector<32x288xi1>, vector<32x288xf32>
    %268 = vector.broadcast %3 : vector<1x288xf32> to vector<32x288xf32>
    %269 = arith.mulf %267, %268 : vector<32x288xf32>
    %c0_48 = arith.constant 0 : index
    %c0_49 = arith.constant 0 : index
    %270 = vector.load %arg11[%c0_48, %c0_49] : memref<32x288xbf16, #tpu.memory_space<vmem>>, vector<32x288xbf16>
    %c0_50 = arith.constant 0 : index
    %c0_51 = arith.constant 0 : index
    %271 = vector.load %arg12[%c0_50, %c0_51] : memref<32x1xf32, #tpu.memory_space<vmem>>, vector<32x1xf32>
    %272 = vector.broadcast %1 : vector<1x288xf32> to vector<32x288xf32>
    %273 = arith.mulf %269, %272 : vector<32x288xf32>
    %274 = arith.truncf %273 : vector<32x288xf32> to vector<32x288xbf16>
    %275 = arith.truncf %269 : vector<32x288xf32> to vector<32x288xbf16>
    %276 = vector.broadcast %2 : vector<1x288xf32> to vector<32x288xf32>
    %277 = arith.mulf %269, %276 : vector<32x288xf32>
    %278 = arith.truncf %277 : vector<32x288xf32> to vector<32x288xbf16>
    %279 = vector.extract_strided_slice %274 {offsets = [0, 271], sizes = [32, 17], strides = [1, 1]} : vector<32x288xbf16> to vector<32x17xbf16>
    %280 = vector.extract_strided_slice %274 {offsets = [0, 0], sizes = [32, 271], strides = [1, 1]} : vector<32x288xbf16> to vector<32x271xbf16>
    %281 = tpu.concatenate %279, %280 in 1 : vector<32x17xbf16>, vector<32x271xbf16> -> vector<32x288xbf16>
    %282 = vector.extract_strided_slice %275 {offsets = [0, 272], sizes = [32, 16], strides = [1, 1]} : vector<32x288xbf16> to vector<32x16xbf16>
    %283 = vector.extract_strided_slice %275 {offsets = [0, 0], sizes = [32, 272], strides = [1, 1]} : vector<32x288xbf16> to vector<32x272xbf16>
    %284 = tpu.concatenate %282, %283 in 1 : vector<32x16xbf16>, vector<32x272xbf16> -> vector<32x288xbf16>
    %285 = vector.extract_strided_slice %278 {offsets = [0, 273], sizes = [32, 15], strides = [1, 1]} : vector<32x288xbf16> to vector<32x15xbf16>
    %286 = vector.extract_strided_slice %278 {offsets = [0, 0], sizes = [32, 273], strides = [1, 1]} : vector<32x288xbf16> to vector<32x273xbf16>
    %287 = tpu.concatenate %285, %286 in 1 : vector<32x15xbf16>, vector<32x273xbf16> -> vector<32x288xbf16>
    %288 = vector.extract_strided_slice %274 {offsets = [0, 287], sizes = [32, 1], strides = [1, 1]} : vector<32x288xbf16> to vector<32x1xbf16>
    %289 = vector.extract_strided_slice %274 {offsets = [0, 0], sizes = [32, 287], strides = [1, 1]} : vector<32x288xbf16> to vector<32x287xbf16>
    %290 = tpu.concatenate %288, %289 in 1 : vector<32x1xbf16>, vector<32x287xbf16> -> vector<32x288xbf16>
    %291 = vector.extract_strided_slice %278 {offsets = [0, 1], sizes = [32, 287], strides = [1, 1]} : vector<32x288xbf16> to vector<32x287xbf16>
    %292 = vector.extract_strided_slice %278 {offsets = [0, 0], sizes = [32, 1], strides = [1, 1]} : vector<32x288xbf16> to vector<32x1xbf16>
    %293 = tpu.concatenate %291, %292 in 1 : vector<32x287xbf16>, vector<32x1xbf16> -> vector<32x288xbf16>
    %294 = vector.extract_strided_slice %274 {offsets = [0, 15], sizes = [32, 273], strides = [1, 1]} : vector<32x288xbf16> to vector<32x273xbf16>
    %295 = vector.extract_strided_slice %274 {offsets = [0, 0], sizes = [32, 15], strides = [1, 1]} : vector<32x288xbf16> to vector<32x15xbf16>
    %296 = tpu.concatenate %294, %295 in 1 : vector<32x273xbf16>, vector<32x15xbf16> -> vector<32x288xbf16>
    %297 = vector.extract_strided_slice %275 {offsets = [0, 16], sizes = [32, 272], strides = [1, 1]} : vector<32x288xbf16> to vector<32x272xbf16>
    %298 = vector.extract_strided_slice %275 {offsets = [0, 0], sizes = [32, 16], strides = [1, 1]} : vector<32x288xbf16> to vector<32x16xbf16>
    %299 = tpu.concatenate %297, %298 in 1 : vector<32x272xbf16>, vector<32x16xbf16> -> vector<32x288xbf16>
    %300 = vector.extract_strided_slice %278 {offsets = [0, 17], sizes = [32, 271], strides = [1, 1]} : vector<32x288xbf16> to vector<32x271xbf16>
    %301 = vector.extract_strided_slice %278 {offsets = [0, 0], sizes = [32, 17], strides = [1, 1]} : vector<32x288xbf16> to vector<32x17xbf16>
    %302 = tpu.concatenate %300, %301 in 1 : vector<32x271xbf16>, vector<32x17xbf16> -> vector<32x288xbf16>
    %303 = tpu.concatenate %281, %284, %287, %290, %275, %293, %296, %299, %302 in 0 : vector<32x288xbf16>, vector<32x288xbf16>, vector<32x288xbf16>, vector<32x288xbf16>, vector<32x288xbf16>, vector<32x288xbf16>, vector<32x288xbf16>, vector<32x288xbf16>, vector<32x288xbf16> -> vector<288x288xbf16>
    %cst_52 = arith.constant dense<0.000000e+00> : vector<32x288xf32>
    %304 = tpu.matmul %270, %303, %cst_52 {dimension_numbers = #tpu.dot_dimension_numbers<[1], [0], [0], [1], [0, 0, 1, 1], [], []>} : vector<32x288xbf16>, vector<288x288xbf16>, vector<32x288xf32> -> vector<32x288xf32>
    %305 = vector.broadcast %271 : vector<32x1xf32> to vector<32x288xf32>
    %306 = arith.addf %304, %305 : vector<32x288xf32>
    %cst_53 = arith.constant 0.000000e+00 : f32
    %307 = vector.broadcast %cst_53 : f32 to vector<32x288xf32>
    %308 = arith.cmpf ogt, %306, %307 : vector<32x288xf32>
    %cst_54 = arith.constant 1.000000e-01 : f32
    %309 = vector.broadcast %cst_54 : f32 to vector<32x288xf32>
    %310 = arith.mulf %309, %306 : vector<32x288xf32>
    %311 = arith.select %308, %306, %310 : vector<32x288xi1>, vector<32x288xf32>
    %312 = vector.broadcast %3 : vector<1x288xf32> to vector<32x288xf32>
    %313 = arith.mulf %311, %312 : vector<32x288xf32>
    %c0_55 = arith.constant 0 : index
    %c0_56 = arith.constant 0 : index
    %314 = vector.load %arg13[%c0_55, %c0_56] : memref<64x288xbf16, #tpu.memory_space<vmem>>, vector<64x288xbf16>
    %c0_57 = arith.constant 0 : index
    %c0_58 = arith.constant 0 : index
    %315 = vector.load %arg14[%c0_57, %c0_58] : memref<64x1xf32, #tpu.memory_space<vmem>>, vector<64x1xf32>
    %316 = vector.broadcast %1 : vector<1x288xf32> to vector<32x288xf32>
    %317 = arith.mulf %313, %316 : vector<32x288xf32>
    %318 = arith.truncf %317 : vector<32x288xf32> to vector<32x288xbf16>
    %319 = arith.truncf %313 : vector<32x288xf32> to vector<32x288xbf16>
    %320 = vector.broadcast %2 : vector<1x288xf32> to vector<32x288xf32>
    %321 = arith.mulf %313, %320 : vector<32x288xf32>
    %322 = arith.truncf %321 : vector<32x288xf32> to vector<32x288xbf16>
    %323 = vector.extract_strided_slice %318 {offsets = [0, 271], sizes = [32, 17], strides = [1, 1]} : vector<32x288xbf16> to vector<32x17xbf16>
    %324 = vector.extract_strided_slice %318 {offsets = [0, 0], sizes = [32, 271], strides = [1, 1]} : vector<32x288xbf16> to vector<32x271xbf16>
    %325 = tpu.concatenate %323, %324 in 1 : vector<32x17xbf16>, vector<32x271xbf16> -> vector<32x288xbf16>
    %326 = vector.extract_strided_slice %319 {offsets = [0, 272], sizes = [32, 16], strides = [1, 1]} : vector<32x288xbf16> to vector<32x16xbf16>
    %327 = vector.extract_strided_slice %319 {offsets = [0, 0], sizes = [32, 272], strides = [1, 1]} : vector<32x288xbf16> to vector<32x272xbf16>
    %328 = tpu.concatenate %326, %327 in 1 : vector<32x16xbf16>, vector<32x272xbf16> -> vector<32x288xbf16>
    %329 = vector.extract_strided_slice %322 {offsets = [0, 273], sizes = [32, 15], strides = [1, 1]} : vector<32x288xbf16> to vector<32x15xbf16>
    %330 = vector.extract_strided_slice %322 {offsets = [0, 0], sizes = [32, 273], strides = [1, 1]} : vector<32x288xbf16> to vector<32x273xbf16>
    %331 = tpu.concatenate %329, %330 in 1 : vector<32x15xbf16>, vector<32x273xbf16> -> vector<32x288xbf16>
    %332 = vector.extract_strided_slice %318 {offsets = [0, 287], sizes = [32, 1], strides = [1, 1]} : vector<32x288xbf16> to vector<32x1xbf16>
    %333 = vector.extract_strided_slice %318 {offsets = [0, 0], sizes = [32, 287], strides = [1, 1]} : vector<32x288xbf16> to vector<32x287xbf16>
    %334 = tpu.concatenate %332, %333 in 1 : vector<32x1xbf16>, vector<32x287xbf16> -> vector<32x288xbf16>
    %335 = vector.extract_strided_slice %322 {offsets = [0, 1], sizes = [32, 287], strides = [1, 1]} : vector<32x288xbf16> to vector<32x287xbf16>
    %336 = vector.extract_strided_slice %322 {offsets = [0, 0], sizes = [32, 1], strides = [1, 1]} : vector<32x288xbf16> to vector<32x1xbf16>
    %337 = tpu.concatenate %335, %336 in 1 : vector<32x287xbf16>, vector<32x1xbf16> -> vector<32x288xbf16>
    %338 = vector.extract_strided_slice %318 {offsets = [0, 15], sizes = [32, 273], strides = [1, 1]} : vector<32x288xbf16> to vector<32x273xbf16>
    %339 = vector.extract_strided_slice %318 {offsets = [0, 0], sizes = [32, 15], strides = [1, 1]} : vector<32x288xbf16> to vector<32x15xbf16>
    %340 = tpu.concatenate %338, %339 in 1 : vector<32x273xbf16>, vector<32x15xbf16> -> vector<32x288xbf16>
    %341 = vector.extract_strided_slice %319 {offsets = [0, 16], sizes = [32, 272], strides = [1, 1]} : vector<32x288xbf16> to vector<32x272xbf16>
    %342 = vector.extract_strided_slice %319 {offsets = [0, 0], sizes = [32, 16], strides = [1, 1]} : vector<32x288xbf16> to vector<32x16xbf16>
    %343 = tpu.concatenate %341, %342 in 1 : vector<32x272xbf16>, vector<32x16xbf16> -> vector<32x288xbf16>
    %344 = vector.extract_strided_slice %322 {offsets = [0, 17], sizes = [32, 271], strides = [1, 1]} : vector<32x288xbf16> to vector<32x271xbf16>
    %345 = vector.extract_strided_slice %322 {offsets = [0, 0], sizes = [32, 17], strides = [1, 1]} : vector<32x288xbf16> to vector<32x17xbf16>
    %346 = tpu.concatenate %344, %345 in 1 : vector<32x271xbf16>, vector<32x17xbf16> -> vector<32x288xbf16>
    %347 = tpu.concatenate %325, %328, %331, %334, %319, %337, %340, %343, %346 in 0 : vector<32x288xbf16>, vector<32x288xbf16>, vector<32x288xbf16>, vector<32x288xbf16>, vector<32x288xbf16>, vector<32x288xbf16>, vector<32x288xbf16>, vector<32x288xbf16>, vector<32x288xbf16> -> vector<288x288xbf16>
    %cst_59 = arith.constant dense<0.000000e+00> : vector<64x288xf32>
    %348 = tpu.matmul %314, %347, %cst_59 {dimension_numbers = #tpu.dot_dimension_numbers<[1], [0], [0], [1], [0, 0, 1, 1], [], []>} : vector<64x288xbf16>, vector<288x288xbf16>, vector<64x288xf32> -> vector<64x288xf32>
    %349 = vector.broadcast %315 : vector<64x1xf32> to vector<64x288xf32>
    %350 = arith.addf %348, %349 : vector<64x288xf32>
    %cst_60 = arith.constant 0.000000e+00 : f32
    %351 = vector.broadcast %cst_60 : f32 to vector<64x288xf32>
    %352 = arith.cmpf ogt, %350, %351 : vector<64x288xf32>
    %cst_61 = arith.constant 1.000000e-01 : f32
    %353 = vector.broadcast %cst_61 : f32 to vector<64x288xf32>
    %354 = arith.mulf %353, %350 : vector<64x288xf32>
    %355 = arith.select %352, %350, %354 : vector<64x288xi1>, vector<64x288xf32>
    %356 = vector.broadcast %3 : vector<1x288xf32> to vector<64x288xf32>
    %357 = arith.mulf %355, %356 : vector<64x288xf32>
    %cst_62 = arith.constant dense<0.000000e+00> : vector<64xf32>
    %358 = vector.multi_reduction <add>, %357, %cst_62 [1] : vector<64x288xf32> to vector<64xf32>
    %359 = vector.shape_cast %358 : vector<64xf32> to vector<64x1xf32>
    %cst_63 = arith.constant 3.906250e-03 : f32
    %360 = vector.broadcast %cst_63 : f32 to vector<64x1xf32>
    %361 = arith.mulf %359, %360 : vector<64x1xf32>
    %c0_64 = arith.constant 0 : index
    %c0_65 = arith.constant 0 : index
    %362 = vector.load %arg15[%c0_64, %c0_65] : memref<64x64xf32, #tpu.memory_space<vmem>>, vector<64x64xf32>
    %cst_66 = arith.constant dense<0.000000e+00> : vector<64x1xf32>
    %363 = tpu.matmul %362, %361, %cst_66 {dimension_numbers = #tpu.dot_dimension_numbers<[1], [0], [0], [1], [0, 0, 1, 1], [], []>} : vector<64x64xf32>, vector<64x1xf32>, vector<64x1xf32> -> vector<64x1xf32>
    %c0_67 = arith.constant 0 : index
    %c0_68 = arith.constant 0 : index
    %364 = vector.load %arg16[%c0_67, %c0_68] : memref<64x1xf32, #tpu.memory_space<vmem>>, vector<64x1xf32>
    %365 = arith.addf %363, %364 : vector<64x1xf32>
    %cst_69 = arith.constant 0.000000e+00 : f32
    %366 = vector.broadcast %cst_69 : f32 to vector<64x1xf32>
    %367 = arith.cmpf ogt, %365, %366 : vector<64x1xf32>
    %cst_70 = arith.constant 1.000000e-01 : f32
    %368 = vector.broadcast %cst_70 : f32 to vector<64x1xf32>
    %369 = arith.mulf %368, %365 : vector<64x1xf32>
    %370 = arith.select %367, %365, %369 : vector<64x1xi1>, vector<64x1xf32>
    %c0_71 = arith.constant 0 : index
    %c0_72 = arith.constant 0 : index
    %371 = vector.load %arg17[%c0_71, %c0_72] : memref<64x64xf32, #tpu.memory_space<vmem>>, vector<64x64xf32>
    %cst_73 = arith.constant dense<0.000000e+00> : vector<64x1xf32>
    %372 = tpu.matmul %371, %370, %cst_73 {dimension_numbers = #tpu.dot_dimension_numbers<[1], [0], [0], [1], [0, 0, 1, 1], [], []>} : vector<64x64xf32>, vector<64x1xf32>, vector<64x1xf32> -> vector<64x1xf32>
    %c0_74 = arith.constant 0 : index
    %c0_75 = arith.constant 0 : index
    %373 = vector.load %arg18[%c0_74, %c0_75] : memref<64x1xf32, #tpu.memory_space<vmem>>, vector<64x1xf32>
    %374 = arith.addf %372, %373 : vector<64x1xf32>
    %cst_76 = arith.constant 0.000000e+00 : f32
    %375 = vector.broadcast %cst_76 : f32 to vector<64x1xf32>
    %376 = arith.subf %375, %374 : vector<64x1xf32>
    %377 = math.exp %376 : vector<64x1xf32>
    %cst_77 = arith.constant 1.000000e+00 : f32
    %378 = vector.broadcast %cst_77 : f32 to vector<64x1xf32>
    %379 = arith.addf %378, %377 : vector<64x1xf32>
    %380 = tpu.reciprocal %379 {approx = true} : vector<64x1xf32> -> vector<64x1xf32>
    %c0_78 = arith.constant 0 : index
    %c0_79 = arith.constant 0 : index
    %c0_80 = arith.constant 0 : index
    %381 = vector.load %arg22[%c0_78, %c0_79, %c0_80] : memref<1x64x1xf32, #tpu.memory_space<vmem>>, vector<1x64x1xf32>
    %382 = vector.shape_cast %381 : vector<1x64x1xf32> to vector<64x1xf32>
    %383 = vector.shape_cast %380 : vector<64x1xf32> to vector<1x64x1xf32>
    tpu.vector_store %arg22[%c0_78, %c0_79, %c0_80], %383 {strides = array<i32>} : memref<1x64x1xf32, #tpu.memory_space<vmem>>, vector<1x64x1xf32>,
    %384 = vector.extract_strided_slice %225 {offsets = [0, 1], sizes = [16, 287], strides = [1, 1]} : vector<16x288xf32> to vector<16x287xf32>
    %385 = vector.extract_strided_slice %225 {offsets = [0, 0], sizes = [16, 1], strides = [1, 1]} : vector<16x288xf32> to vector<16x1xf32>
    %386 = tpu.concatenate %384, %385 in 1 : vector<16x287xf32>, vector<16x1xf32> -> vector<16x288xf32>
    %387 = arith.maximumf %225, %386 : vector<16x288xf32>
    %388 = vector.extract_strided_slice %387 {offsets = [0, 2], sizes = [16, 286], strides = [1, 1]} : vector<16x288xf32> to vector<16x286xf32>
    %389 = vector.extract_strided_slice %387 {offsets = [0, 0], sizes = [16, 2], strides = [1, 1]} : vector<16x288xf32> to vector<16x2xf32>
    %390 = tpu.concatenate %388, %389 in 1 : vector<16x286xf32>, vector<16x2xf32> -> vector<16x288xf32>
    %391 = arith.maximumf %387, %390 : vector<16x288xf32>
    %392 = vector.extract_strided_slice %391 {offsets = [0, 16], sizes = [16, 272], strides = [1, 1]} : vector<16x288xf32> to vector<16x272xf32>
    %393 = vector.extract_strided_slice %391 {offsets = [0, 0], sizes = [16, 16], strides = [1, 1]} : vector<16x288xf32> to vector<16x16xf32>
    %394 = tpu.concatenate %392, %393 in 1 : vector<16x272xf32>, vector<16x16xf32> -> vector<16x288xf32>
    %395 = arith.maximumf %391, %394 : vector<16x288xf32>
    %396 = vector.extract_strided_slice %395 {offsets = [0, 32], sizes = [16, 256], strides = [1, 1]} : vector<16x288xf32> to vector<16x256xf32>
    %397 = vector.extract_strided_slice %395 {offsets = [0, 0], sizes = [16, 32], strides = [1, 1]} : vector<16x288xf32> to vector<16x32xf32>
    %398 = tpu.concatenate %396, %397 in 1 : vector<16x256xf32>, vector<16x32xf32> -> vector<16x288xf32>
    %399 = arith.maximumf %395, %398 : vector<16x288xf32>
    %cst_81 = arith.constant dense<0xFF800000> : vector<288xf32>
    %400 = vector.multi_reduction <maximumf>, %399, %cst_81 [0] : vector<16x288xf32> to vector<288xf32>
    %401 = vector.shape_cast %400 : vector<288xf32> to vector<1x288xf32>
    %cst_82 = arith.constant dense<0.000000e+00> : vector<288xf32>
    %402 = vector.multi_reduction <add>, %399, %cst_82 [0] : vector<16x288xf32> to vector<288xf32>
    %403 = vector.shape_cast %402 : vector<288xf32> to vector<1x288xf32>
    %cst_83 = arith.constant 1.600000e+01 : f32
    %404 = vector.broadcast %cst_83 : f32 to vector<1x288xf32>
    %405 = arith.divf %403, %404 : vector<1x288xf32>
    %c0_84 = arith.constant 0 : index
    %c0_85 = arith.constant 0 : index
    %406 = vector.load %arg19[%c0_84, %c0_85] : memref<288x16xf32, #tpu.memory_space<vmem>>, vector<288x16xf32>
    %cst_86 = arith.constant dense<0.000000e+00> : vector<1x16xf32>
    %407 = tpu.matmul %401, %406, %cst_86 {dimension_numbers = #tpu.dot_dimension_numbers<[1], [0], [0], [1], [0, 0, 1, 1], [], []>} : vector<1x288xf32>, vector<288x16xf32>, vector<1x16xf32> -> vector<1x16xf32>
    %c0_87 = arith.constant 0 : index
    %c0_88 = arith.constant 0 : index
    %408 = vector.load %arg20[%c0_87, %c0_88] : memref<288x16xf32, #tpu.memory_space<vmem>>, vector<288x16xf32>
    %cst_89 = arith.constant dense<0.000000e+00> : vector<1x16xf32>
    %409 = tpu.matmul %405, %408, %cst_89 {dimension_numbers = #tpu.dot_dimension_numbers<[1], [0], [0], [1], [0, 0, 1, 1], [], []>} : vector<1x288xf32>, vector<288x16xf32>, vector<1x16xf32> -> vector<1x16xf32>
    %410 = arith.addf %407, %409 : vector<1x16xf32>
    %c0_90 = arith.constant 0 : index
    %c0_91 = arith.constant 0 : index
    %411 = vector.load %arg21[%c0_90, %c0_91] : memref<1x1xf32, #tpu.memory_space<vmem>>, vector<1x1xf32>
    %412 = vector.broadcast %411 : vector<1x1xf32> to vector<1x16xf32>
    %413 = arith.addf %410, %412 : vector<1x16xf32>
    %cst_92 = arith.constant 0.000000e+00 : f32
    %414 = vector.broadcast %cst_92 : f32 to vector<1x16xf32>
    %415 = arith.subf %414, %413 : vector<1x16xf32>
    %416 = math.exp %415 : vector<1x16xf32>
    %cst_93 = arith.constant 1.000000e+00 : f32
    %417 = vector.broadcast %cst_93 : f32 to vector<1x16xf32>
    %418 = arith.addf %417, %416 : vector<1x16xf32>
    %419 = tpu.reciprocal %418 {approx = true} : vector<1x16xf32> -> vector<1x16xf32>
    %c0_94 = arith.constant 0 : index
    %c0_95 = arith.constant 0 : index
    %c0_96 = arith.constant 0 : index
    %420 = vector.load %arg23[%c0_94, %c0_95, %c0_96] : memref<1x1x16xf32, #tpu.memory_space<vmem>>, vector<1x1x16xf32>
    %421 = vector.shape_cast %420 : vector<1x1x16xf32> to vector<1x16xf32>
    %422 = vector.shape_cast %419 : vector<1x16xf32> to vector<1x1x16xf32>
    tpu.vector_store %arg23[%c0_94, %c0_95, %c0_96], %422 {strides = array<i32>} : memref<1x1x16xf32, #tpu.memory_space<vmem>>, vector<1x1x16xf32>,
    return
  }
  func.func @transform_0(%arg0: i32) -> (i32, i32, i32) {
    %c0_i32 = arith.constant 0 : i32
    %c0_i32_0 = arith.constant 0 : i32
    %c0_i32_1 = arith.constant 0 : i32
    return %arg0, %c0_i32, %c0_i32_0 : i32, i32, i32
  }
  func.func @transform_1(%arg0: i32) -> (i32, i32) {
    %c0_i32 = arith.constant 0 : i32
    %c0_i32_0 = arith.constant 0 : i32
    %c0_i32_1 = arith.constant 0 : i32
    return %c0_i32, %c0_i32_0 : i32, i32
  }
  func.func @transform_2(%arg0: i32) -> (i32, i32) {
    %c0_i32 = arith.constant 0 : i32
    %c0_i32_0 = arith.constant 0 : i32
    %c0_i32_1 = arith.constant 0 : i32
    return %c0_i32, %c0_i32_0 : i32, i32
  }
  func.func @transform_3(%arg0: i32) -> (i32, i32) {
    %c0_i32 = arith.constant 0 : i32
    %c0_i32_0 = arith.constant 0 : i32
    %c0_i32_1 = arith.constant 0 : i32
    return %c0_i32, %c0_i32_0 : i32, i32
  }
  func.func @transform_4(%arg0: i32) -> (i32, i32, i32) {
    %c0_i32 = arith.constant 0 : i32
    %c0_i32_0 = arith.constant 0 : i32
    %c0_i32_1 = arith.constant 0 : i32
    %c0_i32_2 = arith.constant 0 : i32
    return %c0_i32, %c0_i32_0, %c0_i32_1 : i32, i32, i32
  }
  func.func @transform_5(%arg0: i32) -> (i32, i32, i32) {
    %c0_i32 = arith.constant 0 : i32
    %c0_i32_0 = arith.constant 0 : i32
    %c0_i32_1 = arith.constant 0 : i32
    %c0_i32_2 = arith.constant 0 : i32
    return %c0_i32, %c0_i32_0, %c0_i32_1 : i32, i32, i32
  }
  func.func @transform_6(%arg0: i32) -> (i32, i32, i32) {
    %c0_i32 = arith.constant 0 : i32
    %c0_i32_0 = arith.constant 0 : i32
    %c0_i32_1 = arith.constant 0 : i32
    %c0_i32_2 = arith.constant 0 : i32
    return %c0_i32, %c0_i32_0, %c0_i32_1 : i32, i32, i32
  }
  func.func @transform_7(%arg0: i32) -> (i32, i32, i32) {
    %c0_i32 = arith.constant 0 : i32
    %c0_i32_0 = arith.constant 0 : i32
    %c0_i32_1 = arith.constant 0 : i32
    %c0_i32_2 = arith.constant 0 : i32
    return %c0_i32, %c0_i32_0, %c0_i32_1 : i32, i32, i32
  }
  func.func @transform_8(%arg0: i32) -> (i32, i32) {
    %c0_i32 = arith.constant 0 : i32
    %c0_i32_0 = arith.constant 0 : i32
    %c0_i32_1 = arith.constant 0 : i32
    return %c0_i32, %c0_i32_0 : i32, i32
  }
  func.func @transform_9(%arg0: i32) -> (i32, i32) {
    %c0_i32 = arith.constant 0 : i32
    %c0_i32_0 = arith.constant 0 : i32
    %c0_i32_1 = arith.constant 0 : i32
    return %c0_i32, %c0_i32_0 : i32, i32
  }
  func.func @transform_10(%arg0: i32) -> (i32, i32) {
    %c0_i32 = arith.constant 0 : i32
    %c0_i32_0 = arith.constant 0 : i32
    %c0_i32_1 = arith.constant 0 : i32
    return %c0_i32, %c0_i32_0 : i32, i32
  }
  func.func @transform_11(%arg0: i32) -> (i32, i32) {
    %c0_i32 = arith.constant 0 : i32
    %c0_i32_0 = arith.constant 0 : i32
    %c0_i32_1 = arith.constant 0 : i32
    return %c0_i32, %c0_i32_0 : i32, i32
  }
  func.func @transform_12(%arg0: i32) -> (i32, i32) {
    %c0_i32 = arith.constant 0 : i32
    %c0_i32_0 = arith.constant 0 : i32
    %c0_i32_1 = arith.constant 0 : i32
    return %c0_i32, %c0_i32_0 : i32, i32
  }
  func.func @transform_13(%arg0: i32) -> (i32, i32) {
    %c0_i32 = arith.constant 0 : i32
    %c0_i32_0 = arith.constant 0 : i32
    %c0_i32_1 = arith.constant 0 : i32
    return %c0_i32, %c0_i32_0 : i32, i32
  }
  func.func @transform_14(%arg0: i32) -> (i32, i32) {
    %c0_i32 = arith.constant 0 : i32
    %c0_i32_0 = arith.constant 0 : i32
    %c0_i32_1 = arith.constant 0 : i32
    return %c0_i32, %c0_i32_0 : i32, i32
  }
  func.func @transform_15(%arg0: i32) -> (i32, i32) {
    %c0_i32 = arith.constant 0 : i32
    %c0_i32_0 = arith.constant 0 : i32
    %c0_i32_1 = arith.constant 0 : i32
    return %c0_i32, %c0_i32_0 : i32, i32
  }
  func.func @transform_16(%arg0: i32) -> (i32, i32) {
    %c0_i32 = arith.constant 0 : i32
    %c0_i32_0 = arith.constant 0 : i32
    %c0_i32_1 = arith.constant 0 : i32
    return %c0_i32, %c0_i32_0 : i32, i32
  }
  func.func @transform_17(%arg0: i32) -> (i32, i32) {
    %c0_i32 = arith.constant 0 : i32
    %c0_i32_0 = arith.constant 0 : i32
    %c0_i32_1 = arith.constant 0 : i32
    return %c0_i32, %c0_i32_0 : i32, i32
  }
  func.func @transform_18(%arg0: i32) -> (i32, i32) {
    %c0_i32 = arith.constant 0 : i32
    %c0_i32_0 = arith.constant 0 : i32
    %c0_i32_1 = arith.constant 0 : i32
    return %c0_i32, %c0_i32_0 : i32, i32
  }
  func.func @transform_19(%arg0: i32) -> (i32, i32) {
    %c0_i32 = arith.constant 0 : i32
    %c0_i32_0 = arith.constant 0 : i32
    %c0_i32_1 = arith.constant 0 : i32
    return %c0_i32, %c0_i32_0 : i32, i32
  }
  func.func @transform_20(%arg0: i32) -> (i32, i32) {
    %c0_i32 = arith.constant 0 : i32
    %c0_i32_0 = arith.constant 0 : i32
    %c0_i32_1 = arith.constant 0 : i32
    return %c0_i32, %c0_i32_0 : i32, i32
  }
  func.func @transform_21(%arg0: i32) -> (i32, i32, i32) {
    %c0_i32 = arith.constant 0 : i32
    %c0_i32_0 = arith.constant 0 : i32
    %c0_i32_1 = arith.constant 0 : i32
    return %arg0, %c0_i32, %c0_i32_0 : i32, i32, i32
  }
  func.func @transform_22(%arg0: i32) -> (i32, i32, i32) {
    %c0_i32 = arith.constant 0 : i32
    %c0_i32_0 = arith.constant 0 : i32
    %c0_i32_1 = arith.constant 0 : i32
    return %arg0, %c0_i32, %c0_i32_0 : i32, i32, i32
  }
}

</mosaic_0001>

<bundles_post_ra>
// kernel: cpen2_forward.1
= control target key start
LH: loop header
LB: loop body
LE: loop exit
PB: predicated region body
PF: predicated region fallthrough
CT: control target
= control target key end

     0   :  { %s11102_s0 = inlined_call_operand.hbm [shape: f32[2,80,288], index: 0, kind: input, shape index: {}]   ;;  %s11103_s1 = inlined_call_operand.hbm [shape: f32[3,288], index: 1, kind: input, shape index: {}]   ;;  %s11104_s2 = inlined_call_operand.hbm [shape: bf16[16,720], index: 2, kind: input, shape index: {}]   ;;  %s11105_s3 = inlined_call_operand.hbm [shape: f32[16,1], index: 3, kind: input, shape index: {}]   ;;  %s11106_s4 = inlined_call_operand.hbm [shape: bf16[2,16,144], index: 4, kind: input, shape index: {}]   ;;  %s11107_s5 = inlined_call_operand.hbm [shape: f32[2,16,1], index: 5, kind: input, shape index: {}]   ;;  %s11108_s6 = inlined_call_operand.hbm [shape: bf16[2,16,144], index: 6, kind: input, shape index: {}]   ;;  %s11109_s7 = inlined_call_operand.hbm [shape: f32[2,16,1], index: 7, kind: input, shape index: {}]   ;;  %s11110_s8 = inlined_call_operand.hbm [shape: bf16[32,144], index: 8, kind: input, shape index: {}]   ;;  %s11111_s9 = inlined_call_operand.hbm [shape: f32[32,1], index: 9, kind: input, shape index: {}]   ;;  %s11112_s10 = inlined_call_operand.hbm [shape: bf16[32,288], index: 10, kind: input, shape index: {}]   ;;  %s11113_s11 = inlined_call_operand.hbm [shape: f32[32,1], index: 11, kind: input, shape index: {}]   ;;  %s11114_s12 = inlined_call_operand.hbm [shape: bf16[64,288], index: 12, kind: input, shape index: {}]   ;;  %s11115_s13 = inlined_call_operand.hbm [shape: f32[64,1], index: 13, kind: input, shape index: {}]   ;;  %s11116_s14 = inlined_call_operand.hbm [shape: f32[64,64], index: 14, kind: input, shape index: {}]   ;;  %s11117_s15 = inlined_call_operand.hbm [shape: f32[64,1], index: 15, kind: input, shape index: {}]   ;;  %s11118_s16 = inlined_call_operand.hbm [shape: f32[64,64], index: 16, kind: input, shape index: {}]   ;;  %s11119_s17 = inlined_call_operand.hbm [shape: f32[64,1], index: 17, kind: input, shape index: {}]   ;;  %s11120_s18 = inlined_call_operand.hbm [shape: f32[288,16], index: 18, kind: input, shape index: {}]   ;;  %s11121_s19 = inlined_call_operand.hbm [shape: f32[288,16], index: 19, kind: input, shape index: {}]   ;;  %s11122_s20 = inlined_call_operand.<no memory space> [shape: f32[1,1], index: 20, kind: input, shape index: {}]   ;;  %s11123_s21 = inlined_call_operand.hbm [shape: f32[2,64,1], index: 21, kind: output, shape index: {0}]   ;;  %s11124_s22 = inlined_call_operand.hbm [shape: f32[2,1,16], index: 22, kind: output, shape index: {1}]  }
   0x1   :  { %11197 = sst [smem:[#allocation86_spill]] %s11102_s0  ;;  %v28_v0 = vstv %s11122_s20 }
   0x2   :  { %11198 = sst [smem:[#allocation87_spill]] %s11103_s1  ;;  %29 = vst [vmem:[#allocation2] sm:$0x1] %v28_v0 }
   0x3   :  { %11199 = sst [smem:[#allocation88_spill]] %s11104_s2 }
   0x4   :  { %11200 = sst [smem:[#allocation89_spill]] %s11105_s3 }
   0x5   :  { %11201 = sst [smem:[#allocation90_spill]] %s11106_s4 }
   0x6   :  { %11202 = sst [smem:[#allocation91_spill]] %s11107_s5 }
   0x7   :  { %11203 = sst [smem:[#allocation92_spill]] %s11108_s6 }
   0x8   :  { %11204 = sst [smem:[#allocation93_spill]] %s11109_s7 }
   0x9   :  { %11205 = sst [smem:[#allocation94_spill]] %s11110_s8 }
   0xa   :  { %11206 = sst [smem:[#allocation95_spill]] %s11111_s9 }
   0xb   :  { %11207 = sst [smem:[#allocation96_spill]] %s11123_s21 }
   0xc   :  { %11208 = sst [smem:[#allocation97_spill]] %s11124_s22 }
   0xd   :  { %30 = vsyncpa [#allocation4], 0 }
   0xe   :  { %32 = vsyncpa [#allocation4 + $0x1], 0 }
   0xf   :  { %33 = vsyncpa [#allocation7], 0 }
  0x10   :  { %34 = vsyncpa [#allocation10], 0 }
  0x11   :  { %35 = vsyncpa [#allocation13], 0 }
  0x12   :  { %36 = vsyncpa [#allocation16], 0 }
  0x13   :  { %37 = vsyncpa [#allocation19], 0 }
  0x14   :  { %38 = vsyncpa [#allocation22], 0 }
  0x15   :  { %39 = vsyncpa [#allocation25], 0 }
  0x16   :  { %40 = vsyncpa [#allocation28], 0 }
  0x17   :  { %41 = vsyncpa [#allocation31], 0 }
  0x18   :  { %42 = vsyncpa [#allocation34], 0 }
  0x19   :  { %43 = vsyncpa [#allocation5], 0 }
  0x1a   :  { %45 = vsyncpa [#allocation5 + $0x1], 0 }
  0x1b   :  { %46 = vsyncpa [#allocation37], 0 }
  0x1c   :  { %48 = vsyncpa [#allocation37 + $0x1], 0  ;;  %s8039_s29 = smov 0   ;;  %s8041_s20 = smov 0  }
  0x1d   :  { %s8043_s30 = smov 0   ;;  %s8045_s4 = smov 0  }
  0x1e LB: > { %11209 = sst [smem:[#allocation51_spill]] %s7860_s29  ;;  %s7874_s0 = smov [#allocation6]   ;;  %s7872_s4 = sphi %s8045_s4, %s8518_s4   ;;  %s7868_s30 = sphi %s8043_s30, %s11333_s30   ;;  %s7864_s20 = sphi %s8041_s20, %s11332_s20   ;;  %s7860_s29 = sphi %s8039_s29, %s11331_s29  }
  0x1f   : > { %11210 = sst [smem:[#allocation52_spill]] %s7864_s20  ;;  %s570_s23 = sshll.u32 %s7874_s0, 4  ;;  %s571_s23 = int_to_ptr.vmem [resolvable:$true] %s570_s23 }
  0x20   : > { %11211 = sst [smem:[#allocation53_spill]] %s7868_s30  ;;  %s8060_s1 = sadd.s32 4294967295, %s7872_s4  }
  0x21   : > { %11212 = sst [smem:[#allocation54_spill]] %s7872_s4  ;;  %p6181_p0 = scmp.ge.s32.totalorder %s7872_s4, 1 }
  0x22   : > { %11213 = sst [smem:[#allocation55_spill]] %s8060_s1  ;;  %p11135_p1 = scmp.eq.s32.totalorder %s8060_s1, 0 }
  0x23   : > { %p557_p2 = scmp.lt.s32.totalorder %s7872_s4, 3  ;;  %s7875_s24 = smov [#allocation9]  }
  0x24   : > { %s593_s6 = sshll.u32 %s7875_s24, 4  ;;  %s7876_s26 = smov [#allocation12]   ;;  %s8072_s6 = int_to_ptr.vmem [resolvable:$true] %s593_s6 }
  0x25   : > { %p8065_p3 = pnand %p6181_p0, %p557_p2  ;;  %s619_s2 = sshll.u32 %s7876_s26, 4  ;;  %s8080_s2 = int_to_ptr.vmem [resolvable:$true] %s619_s2 }
  0x26   : > { %s11217_s28 = sld [smem:[#allocation87_spill]] }
  0x27   : > { %s11214_s5 = scalar_select %p8065_p3, 1, 0 }
  0x28   : > { %p6896_p5 = pneg %p8065_p3 }
  0x29   : > { %11215 = sst [smem:[#allocation56_spill]] %s11214_s5 }
  0x2a   : > { %p8076_p6 = pnand %p6896_p5, %p11135_p1 }
  0x2c   : > { %s7172_s0 = scalar_lea.hbm %s11217_s28, 192  ;;  %p8090_p8 = pneg %p8076_p6 }
  0x2d   : > { %p7173_p7 = scmp.ne.s32.totalorder %s11217_s28, %s7172_s0  ;;  %p7179_p11 = scmp.lt.u32.totalorder %s7172_s0, %s11217_s28 }
  0x2f   : > { %p7175_p9 = pnand %p8090_p8, %p7173_p7 }
  0x31   : > { %p7176_p10 = pneg %p7175_p9 }
  0x33   : > { %p7181_p12 = pnand %p7179_p11, %p7176_p10 }
  0x35   : > { %7184 = shalt.err (!%p7181_p12)
}
  0x36   : > { %s7185_s27 = scalar_lea.vmem %s571_s23, 192  ;;  %p7193_p5 = scmp.lt.s32.totalorder %s571_s23, %s571_s23 }
  0x37   : > { %p7186_p13 = scmp.ne.s32.totalorder %s571_s23, %s7185_s27  ;;  %p7194_p4 = scmp.lt.s32.totalorder %s7185_s27, %s7185_s27 }
  0x39   : > { %p7188_p0 = pnand %p7186_p13, %p8090_p8  ;;  %p7195_p1 = por %p7194_p4, %p7193_p5 }
  0x3b   : > { %p7189_p2 = pneg %p7188_p0 }
  0x3d   : > { %p7196_p3 = pnand %p7195_p1, %p7189_p2 }
  0x3f   : > { %7199 = shalt.err (!%p7196_p3)
}
  0x40   : > { %6899 = dma.hbm_to_vmem [thread:$0]  (!%p8076_p6), %s11217_s28, 192, %s571_s23, [#allocation7]  }
  0x41   : > { %s11219_s0 = sld [smem:[#allocation89_spill]] }
  0x47   : > { %s7200_s26 = scalar_lea.hbm %s11219_s0, 256 }
  0x48   : > { %p7201_p7 = scmp.ne.s32.totalorder %s11219_s0, %s7200_s26  ;;  %p7207_p1 = scmp.lt.u32.totalorder %s7200_s26, %s11219_s0 }
  0x4a   : > { %p7203_p9 = pnand %p7201_p7, %p8090_p8 }
  0x4c   : > { %p7204_p4 = pneg %p7203_p9 }
  0x4e   : > { %p7209_p3 = pnand %p7207_p1, %p7204_p4 }
  0x50   : > { %7212 = shalt.err (!%p7209_p3)
}
  0x51   : > { %s7213_s23 = scalar_lea.vmem %s8072_s6, 256  ;;  %p7221_p13 = scmp.lt.s32.totalorder %s8072_s6, %s8072_s6 }
  0x52   : > { %p7214_p10 = scmp.ne.s32.totalorder %s8072_s6, %s7213_s23  ;;  %p7222_p0 = scmp.lt.s32.totalorder %s7213_s23, %s7213_s23 }
  0x54   : > { %p7216_p11 = pnand %p7214_p10, %p8090_p8  ;;  %p7223_p2 = por %p7222_p0, %p7221_p13 }
  0x56   : > { %p7217_p12 = pneg %p7216_p11 }
  0x58   : > { %p7224_p5 = pnand %p7223_p2, %p7217_p12 }
  0x5a   : > { %7227 = shalt.err (!%p7224_p5)
}
  0x5b   : > { %s11146_s29 = smov 128   ;;  %s11148_s20 = smov 8  }
  0x5c   : > { %6905 = dma.hbm_to_vmem [thread:$0]  (!%p8076_p6), %s11219_s0, 256, %s8072_s6, [#allocation10], %s11146_s29, %s11146_s29, %s11148_s20  }
  0x5d   : > { %s11220_s3 = sld [smem:[#allocation91_spill]] }
  0x63   : > { %s7228_s26 = scalar_lea.hbm %s11220_s3, 512 }
  0x64   : > { %p7229_p7 = scmp.ne.s32.totalorder %s11220_s3, %s7228_s26  ;;  %p7235_p1 = scmp.lt.u32.totalorder %s7228_s26, %s11220_s3 }
  0x66   : > { %p7231_p9 = pnand %p7229_p7, %p8090_p8 }
  0x68   : > { %p7232_p4 = pneg %p7231_p9 }
  0x6a   : > { %p7237_p3 = pnand %p7235_p1, %p7232_p4 }
  0x6c   : > { %7240 = shalt.err (!%p7237_p3)
}
  0x6d   : > { %s7241_s6 = scalar_lea.vmem %s8080_s2, 512  ;;  %p7249_p13 = scmp.lt.s32.totalorder %s8080_s2, %s8080_s2 }
  0x6e   : > { %p7242_p10 = scmp.ne.s32.totalorder %s8080_s2, %s7241_s6  ;;  %p7250_p0 = scmp.lt.s32.totalorder %s7241_s6, %s7241_s6 }
  0x70   : > { %p7244_p11 = pnand %p7242_p10, %p8090_p8  ;;  %p7251_p2 = por %p7250_p0, %p7249_p13 }
  0x72   : > { %p7245_p12 = pneg %p7244_p11 }
  0x74   : > { %p7252_p5 = pnand %p7251_p2, %p7245_p12 }
  0x76   : > { %7255 = shalt.err (!%p7252_p5)
}
  0x77   : > { %6911 = dma.hbm_to_vmem [thread:$0]  (!%p8076_p6), %s11220_s3, 512, %s8080_s2, [#allocation13], %s11146_s29, %s11146_s29, %s11148_s20  }
  0x78   : > { %s7879_s1 = smov [#allocation15]   ;;  %s7880_s22 = smov [#allocation18]  }
  0x79   : > { %s645_s21 = sshll.u32 %s7879_s1, 4  ;;  %s671_s5 = sshll.u32 %s7880_s22, 4  ;;  %s646_s21 = int_to_ptr.vmem [resolvable:$true] %s645_s21  ;;  %s672_s5 = int_to_ptr.vmem [resolvable:$true] %s671_s5 }
  0x7a   : > { %s11221_s7 = sld [smem:[#allocation93_spill]] }
  0x80   : > { %s7256_s23 = scalar_lea.hbm %s11221_s7, 512 }
  0x81   : > { %p7257_p7 = scmp.ne.s32.totalorder %s11221_s7, %s7256_s23  ;;  %p7263_p1 = scmp.lt.u32.totalorder %s7256_s23, %s11221_s7 }
  0x83   : > { %p7259_p9 = pnand %p7257_p7, %p8090_p8 }
  0x85   : > { %p7260_p4 = pneg %p7259_p9 }
  0x87   : > { %p7265_p3 = pnand %p7263_p1, %p7260_p4 }
  0x89   : > { %7268 = shalt.err (!%p7265_p3)
}
  0x8a   : > { %s7269_s2 = scalar_lea.vmem %s646_s21, 512  ;;  %p7277_p13 = scmp.lt.s32.totalorder %s646_s21, %s646_s21 }
  0x8b   : > { %p7270_p10 = scmp.ne.s32.totalorder %s646_s21, %s7269_s2  ;;  %p7278_p0 = scmp.lt.s32.totalorder %s7269_s2, %s7269_s2 }
  0x8d   : > { %p7272_p11 = pnand %p7270_p10, %p8090_p8  ;;  %p7279_p2 = por %p7278_p0, %p7277_p13 }
  0x8f   : > { %p7273_p12 = pneg %p7272_p11 }
  0x91   : > { %p7280_p5 = pnand %p7279_p2, %p7273_p12 }
  0x93   : > { %7283 = shalt.err (!%p7280_p5)
}
  0x94   : > { %6917 = dma.hbm_to_vmem [thread:$0]  (!%p8076_p6), %s11221_s7, 512, %s646_s21, [#allocation16], %s11146_s29, %s11146_s29, %s11148_s20  }
  0x95   : > { %s11222_s9 = sld [smem:[#allocation95_spill]] }
  0x9b   : > { %s7284_s22 = scalar_lea.hbm %s11222_s9, 512 }
  0x9c   : > { %p7285_p7 = scmp.ne.s32.totalorder %s11222_s9, %s7284_s22  ;;  %p7291_p1 = scmp.lt.u32.totalorder %s7284_s22, %s11222_s9 }
  0x9e   : > { %p7287_p9 = pnand %p7285_p7, %p8090_p8 }
  0xa0   : > { %p7288_p4 = pneg %p7287_p9 }
  0xa2   : > { %p7293_p3 = pnand %p7291_p1, %p7288_p4 }
  0xa4   : > { %7296 = shalt.err (!%p7293_p3)
}
  0xa5   : > { %s7297_s30 = scalar_lea.vmem %s672_s5, 512  ;;  %p7305_p13 = scmp.lt.s32.totalorder %s672_s5, %s672_s5 }
  0xa6   : > { %p7298_p10 = scmp.ne.s32.totalorder %s672_s5, %s7297_s30  ;;  %p7306_p0 = scmp.lt.s32.totalorder %s7297_s30, %s7297_s30 }
  0xa8   : > { %p7300_p11 = pnand %p7298_p10, %p8090_p8  ;;  %p7307_p2 = por %p7306_p0, %p7305_p13 }
  0xaa   : > { %p7301_p12 = pneg %p7300_p11 }
  0xac   : > { %p7308_p5 = pnand %p7307_p2, %p7301_p12 }
  0xae   : > { %7311 = shalt.err (!%p7308_p5)
}
  0xaf   : > { %6923 = dma.hbm_to_vmem [thread:$0]  (!%p8076_p6), %s11222_s9, 512, %s672_s5, [#allocation19], %s11146_s29, %s11146_s29, %s11148_s20  }
  0xb0   : > { %s7881_s4 = smov [#allocation21]   ;;  %s7882_s28 = smov [#allocation24]  }
  0xb1   : > { %s697_s0 = sshll.u32 %s7881_s4, 4  ;;  %s723_s1 = sshll.u32 %s7882_s28, 4  ;;  %s698_s0 = int_to_ptr.vmem [resolvable:$true] %s697_s0  ;;  %s724_s1 = int_to_ptr.vmem [resolvable:$true] %s723_s1 }
  0xb2   : > { %s7312_s27 = scalar_lea.hbm %s11113_s11, 512 }
  0xb3   : > { %p7313_p7 = scmp.ne.s32.totalorder %s11113_s11, %s7312_s27  ;;  %p7319_p1 = scmp.lt.u32.totalorder %s7312_s27, %s11113_s11 }
  0xb5   : > { %p7315_p9 = pnand %p7313_p7, %p8090_p8 }
  0xb7   : > { %p7316_p4 = pneg %p7315_p9 }
  0xb9   : > { %p7321_p3 = pnand %p7319_p1, %p7316_p4 }
  0xbb   : > { %7324 = shalt.err (!%p7321_p3)
}
  0xbc   : > { %s7325_s5 = scalar_lea.vmem %s698_s0, 512  ;;  %p7333_p13 = scmp.lt.s32.totalorder %s698_s0, %s698_s0 }
  0xbd   : > { %p7326_p10 = scmp.ne.s32.totalorder %s698_s0, %s7325_s5  ;;  %p7334_p0 = scmp.lt.s32.totalorder %s7325_s5, %s7325_s5 }
  0xbf   : > { %p7328_p11 = pnand %p7326_p10, %p8090_p8  ;;  %p7335_p2 = por %p7334_p0, %p7333_p13 }
  0xc1   : > { %p7329_p12 = pneg %p7328_p11 }
  0xc3   : > { %p7336_p5 = pnand %p7335_p2, %p7329_p12 }
  0xc5   : > { %7339 = shalt.err (!%p7336_p5)
}
  0xc6   : > { %6929 = dma.hbm_to_vmem [thread:$0]  (!%p8076_p6), %s11113_s11, 512, %s698_s0, [#allocation22], %s11146_s29, %s11146_s29, %s11148_s20  }
  0xc7   : > { %s7340_s26 = scalar_lea.hbm %s11115_s13, 1024 }
  0xc8   : > { %p7341_p7 = scmp.ne.s32.totalorder %s11115_s13, %s7340_s26  ;;  %p7347_p1 = scmp.lt.u32.totalorder %s7340_s26, %s11115_s13 }
  0xca   : > { %p7343_p9 = pnand %p7341_p7, %p8090_p8 }
  0xcc   : > { %p7344_p4 = pneg %p7343_p9 }
  0xce   : > { %p7349_p3 = pnand %p7347_p1, %p7344_p4 }
  0xd0   : > { %7352 = shalt.err (!%p7349_p3)
}
  0xd1   : > { %s7353_s21 = scalar_lea.vmem %s724_s1, 1024  ;;  %p7361_p13 = scmp.lt.s32.totalorder %s724_s1, %s724_s1 }
  0xd2   : > { %p7354_p10 = scmp.ne.s32.totalorder %s724_s1, %s7353_s21  ;;  %p7362_p0 = scmp.lt.s32.totalorder %s7353_s21, %s7353_s21 }
  0xd4   : > { %p7356_p11 = pnand %p7354_p10, %p8090_p8  ;;  %p7363_p2 = por %p7362_p0, %p7361_p13 }
  0xd6   : > { %p7357_p12 = pneg %p7356_p11 }
  0xd8   : > { %p7364_p5 = pnand %p7363_p2, %p7357_p12 }
  0xda   : > { %7367 = shalt.err (!%p7364_p5)
}
  0xdb   : > { %6935 = dma.hbm_to_vmem [thread:$0]  (!%p8076_p6), %s11115_s13, 1024, %s724_s1, [#allocation25], %s11146_s29, %s11146_s29, %s11148_s20  }
  0xdc   : > { %s7883_s2 = smov [#allocation27]   ;;  %s7884_s28 = smov [#allocation30]  }
  0xdd   : > { %s749_s4 = sshll.u32 %s7883_s2, 4  ;;  %s775_s22 = sshll.u32 %s7884_s28, 4  ;;  %s750_s4 = int_to_ptr.vmem [resolvable:$true] %s749_s4  ;;  %s776_s22 = int_to_ptr.vmem [resolvable:$true] %s775_s22 }
  0xde   : > { %s7368_s23 = scalar_lea.hbm %s11117_s15, 1024 }
  0xdf   : > { %p7369_p7 = scmp.ne.s32.totalorder %s11117_s15, %s7368_s23  ;;  %p7375_p1 = scmp.lt.u32.totalorder %s7368_s23, %s11117_s15 }
  0xe1   : > { %p7371_p9 = pnand %p7369_p7, %p8090_p8 }
  0xe3   : > { %p7372_p4 = pneg %p7371_p9 }
  0xe5   : > { %p7377_p3 = pnand %p7375_p1, %p7372_p4 }
  0xe7   : > { %7380 = shalt.err (!%p7377_p3)
}
  0xe8   : > { %s7381_s1 = scalar_lea.vmem %s750_s4, 1024  ;;  %p7389_p13 = scmp.lt.s32.totalorder %s750_s4, %s750_s4 }
  0xe9   : > { %p7382_p10 = scmp.ne.s32.totalorder %s750_s4, %s7381_s1  ;;  %p7390_p0 = scmp.lt.s32.totalorder %s7381_s1, %s7381_s1 }
  0xeb   : > { %p7384_p11 = pnand %p7382_p10, %p8090_p8  ;;  %p7391_p2 = por %p7390_p0, %p7389_p13 }
  0xed   : > { %p7385_p12 = pneg %p7384_p11 }
  0xef   : > { %p7392_p5 = pnand %p7391_p2, %p7385_p12 }
  0xf1   : > { %7395 = shalt.err (!%p7392_p5)
}
  0xf2   : > { %6941 = dma.hbm_to_vmem [thread:$0]  (!%p8076_p6), %s11117_s15, 1024, %s750_s4, [#allocation28], %s11146_s29, %s11146_s29, %s11148_s20  }
  0xf3   : > { %s7396_s27 = scalar_lea.hbm %s11119_s17, 1024 }
  0xf4   : > { %p7397_p7 = scmp.ne.s32.totalorder %s11119_s17, %s7396_s27  ;;  %p7403_p1 = scmp.lt.u32.totalorder %s7396_s27, %s11119_s17 }
  0xf6   : > { %p7399_p9 = pnand %p7397_p7, %p8090_p8 }
  0xf8   : > { %p7400_p4 = pneg %p7399_p9 }
  0xfa   : > { %p7405_p3 = pnand %p7403_p1, %p7400_p4 }
  0xfc   : > { %7408 = shalt.err (!%p7405_p3)
}
  0xfd   : > { %s7409_s0 = scalar_lea.vmem %s776_s22, 1024  ;;  %p7417_p13 = scmp.lt.s32.totalorder %s776_s22, %s776_s22 }
  0xfe   : > { %p7410_p10 = scmp.ne.s32.totalorder %s776_s22, %s7409_s0  ;;  %p7418_p0 = scmp.lt.s32.totalorder %s7409_s0, %s7409_s0 }
 0x100   : > { %p7412_p11 = pnand %p7410_p10, %p8090_p8  ;;  %p7419_p2 = por %p7418_p0, %p7417_p13 }
 0x102   : > { %p7413_p12 = pneg %p7412_p11 }
 0x104   : > { %p7420_p5 = pnand %p7419_p2, %p7413_p12 }
 0x106   : > { %7423 = shalt.err (!%p7420_p5)
}
 0x107   : > { %6947 = dma.hbm_to_vmem [thread:$0]  (!%p8076_p6), %s11119_s17, 1024, %s776_s22, [#allocation31], %s11146_s29, %s11146_s29, %s11148_s20  }
 0x108   : > { %s7885_s5 = smov [#allocation8]   ;;  %s11223_s27 = sld [smem:[#allocation88_spill]] }
 0x109   : > { %s580_s2 = sshll.u32 %s7885_s5, 4  ;;  %s581_s2 = int_to_ptr.vmem [resolvable:$true] %s580_s2 }
 0x10e   : > { %s7424_s23 = scalar_lea.hbm %s11223_s27, 768 }
 0x10f   : > { %p7425_p7 = scmp.ne.s32.totalorder %s11223_s27, %s7424_s23  ;;  %p7431_p1 = scmp.lt.u32.totalorder %s7424_s23, %s11223_s27 }
 0x111   : > { %p7427_p9 = pnand %p7425_p7, %p8090_p8 }
 0x113   : > { %p7428_p4 = pneg %p7427_p9 }
 0x115   : > { %p7433_p3 = pnand %p7431_p1, %p7428_p4 }
 0x117   : > { %7436 = shalt.err (!%p7433_p3)
}
 0x118   : > { %s7437_s22 = scalar_lea.vmem %s581_s2, 768  ;;  %p7445_p13 = scmp.lt.s32.totalorder %s581_s2, %s581_s2 }
 0x119   : > { %p7438_p10 = scmp.ne.s32.totalorder %s581_s2, %s7437_s22  ;;  %p7446_p0 = scmp.lt.s32.totalorder %s7437_s22, %s7437_s22 }
 0x11b   : > { %p7440_p11 = pnand %p7438_p10, %p8090_p8  ;;  %p7447_p2 = por %p7446_p0, %p7445_p13 }
 0x11d   : > { %p7441_p12 = pneg %p7440_p11 }
 0x11f   : > { %p7448_p5 = pnand %p7447_p2, %p7441_p12 }
 0x121   : > { %7451 = shalt.err (!%p7448_p5)
}
 0x122   : > { %s11151_s4 = smov 384   ;;  %s11152_s1 = smov 24  }
 0x123   : > { %6902 = dma.hbm_to_vmem [thread:$0]  (!%p8076_p6), %s11223_s27, 768, %s581_s2, [#allocation7], %s11151_s4, %s11151_s4, %s11152_s1  }
 0x124   : > { %s7888_s26 = smov [#allocation11]   ;;  %s7889_s6 = smov [#allocation14]  }
 0x125   : > { %s606_s23 = sshll.u32 %s7888_s26, 4  ;;  %s632_s30 = sshll.u32 %s7889_s6, 4  ;;  %s607_s23 = int_to_ptr.vmem [resolvable:$true] %s606_s23  ;;  %s8305_s30 = int_to_ptr.vmem [resolvable:$true] %s632_s30 }
 0x126   : > { %s11224_s22 = sld [smem:[#allocation90_spill]] }
 0x12c   : > { %s7452_s29 = scalar_lea.hbm %s11224_s22, 512 }
 0x12d   : > { %p7453_p7 = scmp.ne.s32.totalorder %s11224_s22, %s7452_s29  ;;  %p7459_p1 = scmp.lt.u32.totalorder %s7452_s29, %s11224_s22 }
 0x12f   : > { %p7455_p9 = pnand %p7453_p7, %p8090_p8 }
 0x131   : > { %p7456_p4 = pneg %p7455_p9 }
 0x133   : > { %p7461_p3 = pnand %p7459_p1, %p7456_p4 }
 0x135   : > { %7464 = shalt.err (!%p7461_p3)
}
 0x136   : > { %s7465_s28 = scalar_lea.vmem %s607_s23, 512  ;;  %p7473_p13 = scmp.lt.s32.totalorder %s607_s23, %s607_s23 }
 0x137   : > { %p7466_p10 = scmp.ne.s32.totalorder %s607_s23, %s7465_s28  ;;  %p7474_p0 = scmp.lt.s32.totalorder %s7465_s28, %s7465_s28 }
 0x139   : > { %p7468_p11 = pnand %p7466_p10, %p8090_p8  ;;  %p7475_p2 = por %p7474_p0, %p7473_p13 }
 0x13b   : > { %p7469_p12 = pneg %p7468_p11 }
 0x13d   : > { %p7476_p5 = pnand %p7475_p2, %p7469_p12 }
 0x13f   : > { %7479 = shalt.err (!%p7476_p5)
}
 0x140   : > { %s11225_s20 = smov 8   ;;  %s11226_s3 = smov 128  }
 0x141   : > { %6908 = dma.hbm_to_vmem [thread:$0]  (!%p8076_p6), %s11224_s22, 512, %s607_s23, [#allocation10], %s11226_s3, %s11226_s3, %s11225_s20  }
 0x142   : > { %s11227_s0 = sld [smem:[#allocation92_spill]] }
 0x148   : > { %s7480_s5 = scalar_lea.hbm %s11227_s0, 512 }
 0x149   : > { %p7481_p7 = scmp.ne.s32.totalorder %s11227_s0, %s7480_s5  ;;  %p7487_p1 = scmp.lt.u32.totalorder %s7480_s5, %s11227_s0 }
 0x14b   : > { %p7483_p9 = pnand %p7481_p7, %p8090_p8 }
 0x14d   : > { %p7484_p4 = pneg %p7483_p9 }
 0x14f   : > { %p7489_p3 = pnand %p7487_p1, %p7484_p4 }
 0x151   : > { %7492 = shalt.err (!%p7489_p3)
}
 0x152   : > { %s7493_s23 = scalar_lea.vmem %s8305_s30, 512  ;;  %p7501_p13 = scmp.lt.s32.totalorder %s8305_s30, %s8305_s30 }
 0x153   : > { %p7494_p10 = scmp.ne.s32.totalorder %s8305_s30, %s7493_s23  ;;  %p7502_p0 = scmp.lt.s32.totalorder %s7493_s23, %s7493_s23 }
 0x155   : > { %p7496_p11 = pnand %p7494_p10, %p8090_p8  ;;  %p7503_p2 = por %p7502_p0, %p7501_p13 }
 0x157   : > { %p7497_p12 = pneg %p7496_p11 }
 0x159   : > { %p7504_p5 = pnand %p7503_p2, %p7497_p12 }
 0x15b   : > { %7507 = shalt.err (!%p7504_p5)
}
 0x15c   : > { %6914 = dma.hbm_to_vmem [thread:$0]  (!%p8076_p6), %s11227_s0, 512, %s8305_s30, [#allocation13], %s11226_s3, %s11226_s3, %s11225_s20  }
 0x15d   : > { %s7890_s26 = smov [#allocation17]   ;;  %s7891_s6 = smov [#allocation20]  }
 0x15e   : > { %s658_s29 = sshll.u32 %s7890_s26, 4  ;;  %s684_s21 = sshll.u32 %s7891_s6, 4  ;;  %s659_s29 = int_to_ptr.vmem [resolvable:$true] %s658_s29  ;;  %s8354_s21 = int_to_ptr.vmem [resolvable:$true] %s684_s21 }
 0x15f   : > { %s11228_s8 = sld [smem:[#allocation94_spill]] }
 0x165   : > { %s7508_s28 = scalar_lea.hbm %s11228_s8, 512 }
 0x166   : > { %p7509_p7 = scmp.ne.s32.totalorder %s11228_s8, %s7508_s28  ;;  %p7515_p1 = scmp.lt.u32.totalorder %s7508_s28, %s11228_s8 }
 0x168   : > { %p7511_p9 = pnand %p7509_p7, %p8090_p8 }
 0x16a   : > { %p7512_p4 = pneg %p7511_p9 }
 0x16c   : > { %p7517_p3 = pnand %p7515_p1, %p7512_p4 }
 0x16e   : > { %7520 = shalt.err (!%p7517_p3)
}
 0x16f   : > { %s7521_s1 = scalar_lea.vmem %s659_s29, 512  ;;  %p7529_p13 = scmp.lt.s32.totalorder %s659_s29, %s659_s29 }
 0x170   : > { %p7522_p10 = scmp.ne.s32.totalorder %s659_s29, %s7521_s1  ;;  %p7530_p0 = scmp.lt.s32.totalorder %s7521_s1, %s7521_s1 }
 0x172   : > { %p7524_p11 = pnand %p7522_p10, %p8090_p8  ;;  %p7531_p2 = por %p7530_p0, %p7529_p13 }
 0x174   : > { %p7525_p12 = pneg %p7524_p11 }
 0x176   : > { %p7532_p5 = pnand %p7531_p2, %p7525_p12 }
 0x178   : > { %7535 = shalt.err (!%p7532_p5)
}
 0x179   : > { %6920 = dma.hbm_to_vmem [thread:$0]  (!%p8076_p6), %s11228_s8, 512, %s659_s29, [#allocation16], %s11226_s3, %s11226_s3, %s11225_s20  }
 0x17a   : > { %s7536_s2 = scalar_lea.hbm %s11112_s10, 768 }
 0x17b   : > { %p7537_p7 = scmp.ne.s32.totalorder %s11112_s10, %s7536_s2  ;;  %p7543_p1 = scmp.lt.u32.totalorder %s7536_s2, %s11112_s10 }
 0x17d   : > { %p7539_p9 = pnand %p7537_p7, %p8090_p8 }
 0x17f   : > { %p7540_p4 = pneg %p7539_p9 }
 0x181   : > { %p7545_p3 = pnand %p7543_p1, %p7540_p4 }
 0x183   : > { %7548 = shalt.err (!%p7545_p3)
}
 0x184   : > { %s7549_s29 = scalar_lea.vmem %s8354_s21, 768  ;;  %p7557_p13 = scmp.lt.s32.totalorder %s8354_s21, %s8354_s21 }
 0x185   : > { %p7550_p10 = scmp.ne.s32.totalorder %s8354_s21, %s7549_s29  ;;  %p7558_p0 = scmp.lt.s32.totalorder %s7549_s29, %s7549_s29 }
 0x187   : > { %p7552_p11 = pnand %p7550_p10, %p8090_p8  ;;  %p7559_p2 = por %p7558_p0, %p7557_p13 }
 0x189   : > { %p7553_p12 = pneg %p7552_p11 }
 0x18b   : > { %p7560_p5 = pnand %p7559_p2, %p7553_p12 }
 0x18d   : > { %7563 = shalt.err (!%p7560_p5)
}
 0x18e   : > { %s7892_s1 = smov 192   ;;  %s7893_s7 = smov 12  }
 0x18f   : > { %6926 = dma.hbm_to_vmem [thread:$0]  (!%p8076_p6), %s11112_s10, 768, %s8354_s21, [#allocation19], %s7892_s1, %s7892_s1, %s7893_s7  }
 0x190   : > { %s7894_s5 = smov [#allocation23]   ;;  %s7895_s28 = smov [#allocation26]  }
 0x191   : > { %s710_s2 = sshll.u32 %s7894_s5, 4  ;;  %s736_s23 = sshll.u32 %s7895_s28, 4  ;;  %s711_s2 = int_to_ptr.vmem [resolvable:$true] %s710_s2  ;;  %s8400_s23 = int_to_ptr.vmem [resolvable:$true] %s736_s23 }
 0x192   : > { %s7564_s29 = scalar_lea.hbm %s11114_s12, 1536 }
 0x193   : > { %p7565_p7 = scmp.ne.s32.totalorder %s11114_s12, %s7564_s29  ;;  %p7571_p1 = scmp.lt.u32.totalorder %s7564_s29, %s11114_s12 }
 0x195   : > { %p7567_p9 = pnand %p7565_p7, %p8090_p8 }
 0x197   : > { %p7568_p4 = pneg %p7567_p9 }
 0x199   : > { %p7573_p3 = pnand %p7571_p1, %p7568_p4 }
 0x19b   : > { %7576 = shalt.err (!%p7573_p3)
}
 0x19c   : > { %s7577_s6 = scalar_lea.vmem %s711_s2, 1536  ;;  %p7585_p13 = scmp.lt.s32.totalorder %s711_s2, %s711_s2 }
 0x19d   : > { %p7578_p10 = scmp.ne.s32.totalorder %s711_s2, %s7577_s6  ;;  %p7586_p0 = scmp.lt.s32.totalorder %s7577_s6, %s7577_s6 }
 0x19f   : > { %p7580_p11 = pnand %p7578_p10, %p8090_p8  ;;  %p7587_p2 = por %p7586_p0, %p7585_p13 }
 0x1a1   : > { %p7581_p12 = pneg %p7580_p11 }
 0x1a3   : > { %p7588_p5 = pnand %p7587_p2, %p7581_p12 }
 0x1a5   : > { %7591 = shalt.err (!%p7588_p5)
}
 0x1a6   : > { %6932 = dma.hbm_to_vmem [thread:$0]  (!%p8076_p6), %s11114_s12, 1536, %s711_s2, [#allocation22], %s7892_s1, %s7892_s1, %s7893_s7  }
 0x1a7   : > { %s7592_s4 = scalar_lea.hbm %s11116_s14, 1024 }
 0x1a8   : > { %p7593_p7 = scmp.ne.s32.totalorder %s11116_s14, %s7592_s4  ;;  %p7599_p1 = scmp.lt.u32.totalorder %s7592_s4, %s11116_s14 }
 0x1aa   : > { %p7595_p9 = pnand %p7593_p7, %p8090_p8 }
 0x1ac   : > { %p7596_p4 = pneg %p7595_p9 }
 0x1ae   : > { %p7601_p3 = pnand %p7599_p1, %p7596_p4 }
 0x1b0   : > { %7604 = shalt.err (!%p7601_p3)
}
 0x1b1   : > { %s7605_s1 = scalar_lea.vmem %s8400_s23, 1024  ;;  %p7613_p13 = scmp.lt.s32.totalorder %s8400_s23, %s8400_s23 }
 0x1b2   : > { %p7606_p10 = scmp.ne.s32.totalorder %s8400_s23, %s7605_s1  ;;  %p7614_p0 = scmp.lt.s32.totalorder %s7605_s1, %s7605_s1 }
 0x1b4   : > { %p7608_p11 = pnand %p7606_p10, %p8090_p8  ;;  %p7615_p2 = por %p7614_p0, %p7613_p13 }
 0x1b6   : > { %p7609_p12 = pneg %p7608_p11 }
 0x1b8   : > { %p7616_p5 = pnand %p7615_p2, %p7609_p12 }
 0x1ba   : > { %7619 = shalt.err (!%p7616_p5)
}
 0x1bb   : > { %6938 = dma.hbm_to_vmem [thread:$0]  (!%p8076_p6), %s11116_s14, 1024, %s8400_s23, [#allocation25], %s11226_s3, %s11226_s3, %s11225_s20  }
 0x1bc   : > { %s7896_s6 = smov [#allocation29]   ;;  %s7897_s0 = smov [#allocation32]  }
 0x1bd   : > { %s762_s8 = sshll.u32 %s7896_s6, 4  ;;  %s788_s5 = sshll.u32 %s7897_s0, 4  ;;  %s763_s8 = int_to_ptr.vmem [resolvable:$true] %s762_s8  ;;  %s8446_s5 = int_to_ptr.vmem [resolvable:$true] %s788_s5 }
 0x1be   : > { %s7620_s30 = scalar_lea.hbm %s11118_s16, 1024 }
 0x1bf   : > { %p7621_p7 = scmp.ne.s32.totalorder %s11118_s16, %s7620_s30  ;;  %p7627_p1 = scmp.lt.u32.totalorder %s7620_s30, %s11118_s16 }
 0x1c1   : > { %p7623_p9 = pnand %p7621_p7, %p8090_p8 }
 0x1c3   : > { %p7624_p4 = pneg %p7623_p9 }
 0x1c5   : > { %p7629_p3 = pnand %p7627_p1, %p7624_p4 }
 0x1c7   : > { %7632 = shalt.err (!%p7629_p3)
}
 0x1c8   : > { %s7633_s1 = scalar_lea.vmem %s763_s8, 1024  ;;  %p7641_p13 = scmp.lt.s32.totalorder %s763_s8, %s763_s8 }
 0x1c9   : > { %p7634_p10 = scmp.ne.s32.totalorder %s763_s8, %s7633_s1  ;;  %p7642_p0 = scmp.lt.s32.totalorder %s7633_s1, %s7633_s1 }
 0x1cb   : > { %p7636_p11 = pnand %p7634_p10, %p8090_p8  ;;  %p7643_p2 = por %p7642_p0, %p7641_p13 }
 0x1cd   : > { %p7637_p12 = pneg %p7636_p11 }
 0x1cf   : > { %p7644_p5 = pnand %p7643_p2, %p7637_p12 }
 0x1d1   : > { %7647 = shalt.err (!%p7644_p5)
}
 0x1d2   : > { %6944 = dma.hbm_to_vmem [thread:$0]  (!%p8076_p6), %s11118_s16, 1024, %s763_s8, [#allocation28], %s11226_s3, %s11226_s3, %s11225_s20  }
 0x1d3   : > { %s7648_s28 = scalar_lea.hbm %s11120_s18, 4608 }
 0x1d4   : > { %p7649_p7 = scmp.ne.s32.totalorder %s11120_s18, %s7648_s28  ;;  %p7655_p1 = scmp.lt.u32.totalorder %s7648_s28, %s11120_s18 }
 0x1d6   : > { %p7651_p9 = pnand %p7649_p7, %p8090_p8 }
 0x1d8   : > { %p7652_p4 = pneg %p7651_p9 }
 0x1da   : > { %p7657_p3 = pnand %p7655_p1, %p7652_p4 }
 0x1dc   : > { %7660 = shalt.err (!%p7657_p3)
}
 0x1dd   : > { %s7661_s8 = scalar_lea.vmem %s8446_s5, 4608  ;;  %p7669_p13 = scmp.lt.s32.totalorder %s8446_s5, %s8446_s5 }
 0x1de   : > { %p7662_p10 = scmp.ne.s32.totalorder %s8446_s5, %s7661_s8  ;;  %p7670_p0 = scmp.lt.s32.totalorder %s7661_s8, %s7661_s8 }
 0x1e0   : > { %p7664_p11 = pnand %p7662_p10, %p8090_p8  ;;  %p7671_p2 = por %p7670_p0, %p7669_p13 }
 0x1e2   : > { %p7665_p12 = pneg %p7664_p11 }
 0x1e4   : > { %p7672_p5 = pnand %p7671_p2, %p7665_p12 }
 0x1e6   : > { %7675 = shalt.err (!%p7672_p5)
}
 0x1e7   : > { %6950 = dma.hbm_to_vmem [thread:$0]  (!%p8076_p6), %s11120_s18, 4608, %s8446_s5, [#allocation31], %s11226_s3, %s11226_s3, %s11225_s20  }
 0x1e8   : > { %s7898_s1 = smov [#allocation33]   ;;  %s7676_s0 = scalar_lea.hbm %s11121_s19, 4608 }
 0x1e9   : > { %s801_s7 = sshll.u32 %s7898_s1, 4  ;;  %p7677_p7 = scmp.ne.s32.totalorder %s11121_s19, %s7676_s0  ;;  %s802_s7 = int_to_ptr.vmem [resolvable:$true] %s801_s7 }
 0x1ea   : > { %p7683_p1 = scmp.lt.u32.totalorder %s7676_s0, %s11121_s19 }
 0x1eb   : > { %p7679_p9 = pnand %p7677_p7, %p8090_p8 }
 0x1ed   : > { %p7680_p4 = pneg %p7679_p9 }
 0x1ef   : > { %p7685_p3 = pnand %p7683_p1, %p7680_p4 }
 0x1f1   : > { %7688 = shalt.err (!%p7685_p3)
}
 0x1f2   : > { %s7689_s5 = scalar_lea.vmem %s802_s7, 4608  ;;  %p7697_p13 = scmp.lt.s32.totalorder %s802_s7, %s802_s7 }
 0x1f3   : > { %p7690_p10 = scmp.ne.s32.totalorder %s802_s7, %s7689_s5  ;;  %p7698_p0 = scmp.lt.s32.totalorder %s7689_s5, %s7689_s5 }
 0x1f5   : > { %p7692_p11 = pnand %p7690_p10, %p8090_p8  ;;  %p7699_p2 = por %p7698_p0, %p7697_p13 }
 0x1f7   : > { %p7693_p12 = pneg %p7692_p11 }
 0x1f9   : > { %p7700_p5 = pnand %p7699_p2, %p7693_p12 }
 0x1fb   : > { %7703 = shalt.err (!%p7700_p5)
}
 0x1fc   : > { %s11229_s21 = sld [smem:[#allocation54_spill]]  ;;  %s11230_s23 = sld [smem:[#allocation53_spill]] }
 0x1fd   : > { %s11231_s24 = sld [smem:[#allocation52_spill]]  ;;  %s11232_s1 = sld [smem:[#allocation51_spill]] }
 0x1fe   : > { %s11233_s2 = sld [smem:[#allocation55_spill]] }
 0x1ff   : > { %6953 = dma.hbm_to_vmem [thread:$0]  (!%p8076_p6), %s11121_s19, 4608, %s802_s7, [#allocation34], %s11226_s3, %s11226_s3, %s11225_s20  }
 0x202   : > { %s6180_s25 = sadd.s32 4294967294, %s11229_s21   ;;  %s8518_s4 = sadd.s32 1, %s11229_s21  }
 0x203   : > { %s61_s6 = sadd.s32 1, %s11230_s23  ;;  %s58_s0 = ssub.s32 %s11229_s21, %s8518_s4 }
 0x204   : > { %p68_p8 = scmp.ne.s32.totalorder %s11230_s23, %s11231_s24  ;;  %p59_p7 = scmp.eq.s32.totalorder %s58_s0, 0 }
 0x205   : > { %p69_p9 = scmp.eq.s32.totalorder %s11229_s21, 0  ;;  %p74_p4 = scmp.ne.s32.totalorder %s11231_s24, %s11232_s1 }
 0x206   : > { %p518_p1 = scmp.eq.s32.totalorder %s11233_s2, 1  ;;  %p11234_p10 = scmp.eq.s32.totalorder %s11233_s2, 0 }
 0x207   : > { %s8530_s28 = scalar_select %p59_p7, %s11230_s23, %s61_s6  }
 0x208   : > { %p70_p3 = por %p69_p9, %p68_p8  ;;  %p8534_p11 = por %p11234_p10, %p74_p4 }
 0x209   : > { %p8538_p6 = por %p518_p1, %p68_p8  ;;  %p524_p12 = scmp.eq.s32.totalorder %s6180_s25, 1 }
 0x20a   : > { %p6984_p13 = scmp.lt.s32.totalorder %s11229_s21, 2  ;;  %s818_s3 = sand.u32 1, %s11230_s23  }
 0x20b   : > { %s11236_s20 = scalar_select %p8538_p6, 1, 0 }
 0x20c   : > { %p8544_p0 = por %p524_p12, %p74_p4  ;;  %s6811_s29 = smul.u32 240, %s818_s3 }
 0x20d   : > { %p8548_p2 = pnand %p6984_p13, %p70_p3  ;;  %s6812_s26 = smul.u32 3840, %s11229_s21 }
 0x20e   : > { %s11237_s7 = scalar_select %p8544_p0, 1, 0 }
 0x20f   : > { %s11239_s1 = sld [smem:[#allocation86_spill]]  ;;  %s822_s23 = scalar_lea.vmem [#allocation3], %s6811_s29 }
 0x210   : > { %s829_s25 = sshll.u32 %s822_s23, 4  ;;  %s8560_s6 = scalar_lea.sflag [#allocation4], %s818_s3  ;;  %s8558_s25 = int_to_ptr.vmem [resolvable:$true] %s829_s25 }
 0x211   : > { %p7706_p8 = pneg %p8548_p2 }
 0x215   : > { %s8556_s2 = scalar_lea.hbm %s11239_s1, %s6812_s26  ;;  %s7709_s8 = scalar_lea.hbm %s11239_s1, 7680 }
 0x216   : > { %s7704_s0 = scalar_lea.hbm %s8556_s2, 3840  ;;  %p7710_p4 = scmp.lt.u32.totalorder %s8556_s2, %s11239_s1 }
 0x217   : > { %p7705_p5 = scmp.ne.s32.totalorder %s8556_s2, %s7704_s0  ;;  %p7711_p1 = scmp.lt.u32.totalorder %s7709_s8, %s7704_s0 }
 0x218   : > { %p7713_p10 = scmp.lt.u32.totalorder %s7704_s0, %s8556_s2 }
 0x219   : > { %p7707_p7 = pnand %p7706_p8, %p7705_p5  ;;  %p7712_p3 = por %p7711_p1, %p7710_p4 }
 0x21b   : > { %p7708_p9 = pneg %p7707_p7  ;;  %p7714_p12 = por %p7713_p10, %p7712_p3 }
 0x21d   : > { %p7715_p13 = pnand %p7714_p12, %p7708_p9 }
 0x21f   : > { %7718 = shalt.err (!%p7715_p13)
}
 0x220   : > { %s7719_s3 = scalar_lea.vmem %s8558_s25, 3840  ;;  %s7899_s29 = smov [#allocation3]  }
 0x221   : > { %p7720_p5 = scmp.ne.s32.totalorder %s8558_s25, %s7719_s3  ;;  %s7724_s23 = sshll.u32 %s7899_s29, 4  ;;  %s7725_s23 = int_to_ptr.vmem [resolvable:$false] %s7724_s23 }
 0x222   : > { %s7726_s9 = scalar_lea.vmem %s7725_s23, 7680  ;;  %p7727_p6 = scmp.lt.s32.totalorder %s8558_s25, %s7725_s23 }
 0x223   : > { %p7722_p7 = pnand %p7720_p5, %p7706_p8  ;;  %p7728_p4 = scmp.lt.s32.totalorder %s7726_s9, %s7719_s3 }
 0x225   : > { %p7723_p0 = pneg %p7722_p7  ;;  %p7729_p1 = por %p7728_p4, %p7727_p6 }
 0x227   : > { %p7730_p3 = pnand %p7729_p1, %p7723_p0 }
 0x229   : > { %7733 = shalt.err (!%p7730_p3)
}
 0x22a   : > { %s11240_s0 = smov 24   ;;  %s11241_s21 = smov 384  }
 0x22b   : > { %6957 = dma.hbm_to_vmem [thread:$0]  (!%p8548_p2), %s8556_s2, 3840, %s8558_s25, %s8560_s6, %s11241_s21, %s11241_s21, %s11240_s0  }
 0x22c   : > { %s11242_s26 = sld [smem:[#allocation56_spill]] }
 0x232   : > { %p11243_p8 = scmp.ne.s32.totalorder %s11242_s26, 0 }
 0x234   : > { %841 = sbr.rel (%p11243_p8) target bundleno = 5051 (0x13bb), region = 104 }
 0x23b   : > { %s11244_s8 = sld [smem:[#allocation52_spill]] }
 0x241   : > { %s8594_s24 = sand.u32 1, %s11244_s8  }
 0x242   : > { %s6813_s3 = smul.u32 240, %s8594_s24  ;;  %s844_s29 = scalar_lea.sflag [#allocation4], %s8594_s24 }
 0x244   : > { %s8598_s23 = scalar_lea.vmem [#allocation3], %s6813_s3 }
 0x245   : > { %7807 = dma.done.wait (%p8534_p11), %s844_s29, 3840  }
 0x246   : > { %7809 = vsyncadd (%p8534_p11), %s844_s29, 4294963456  ;;  %s11245_s5 = sld [smem:[#allocation55_spill]] }
 0x24c   : > { %p11246_p6 = scmp.eq.s32.totalorder %s11245_s5, 0 }
 0x24e   : > { %7811 = dma.done.wait (%p11246_p6), [#allocation7], 960   ;;  %p11247_p0 = pmov %p11246_p6 }
 0x250   : > { %7813 = vsyncadd (%p11247_p0), [#allocation7], 4294966336  ;;  %p11248_p2 = pmov %p11247_p0 }
 0x251   : > { %p11249_p9 = pmov %p11247_p0 }
 0x252   : > { %7815 = dma.done.wait (%p11248_p2), [#allocation10], 768  }
 0x253   : > { %7817 = vsyncadd (%p11249_p9), [#allocation10], 4294966528  ;;  %p11250_p10 = pmov %p11247_p0 }
 0x254   : > { %p11251_p12 = pmov %p11247_p0 }
 0x255   : > { %7819 = dma.done.wait (%p11250_p10), [#allocation13], 1024  }
 0x256   : > { %7821 = vsyncadd (%p11251_p12), [#allocation13], 4294966272  ;;  %p11252_p11 = pmov %p11247_p0 }
 0x257   : > { %p11253_p13 = pmov %p11247_p0 }
 0x258   : > { %7823 = dma.done.wait (%p11252_p11), [#allocation16], 1024  }
 0x259   : > { %7825 = vsyncadd (%p11253_p13), [#allocation16], 4294966272  ;;  %p11254_p5 = pmov %p11247_p0 }
 0x25a   : > { %p11255_p7 = pmov %p11247_p0 }
 0x25b   : > { %7827 = dma.done.wait (%p11254_p5), [#allocation19], 1280  }
 0x25c   : > { %7829 = vsyncadd (%p11255_p7), [#allocation19], 4294966016  ;;  %p11256_p4 = pmov %p11247_p0 }
 0x25d   : > { %p11257_p1 = pmov %p11247_p0 }
 0x25e   : > { %7831 = dma.done.wait (%p11256_p4), [#allocation22], 2048  }
 0x25f   : > { %7833 = vsyncadd (%p11257_p1), [#allocation22], 4294965248  ;;  %p11258_p3 = pmov %p11247_p0 }
 0x260   : > { %p11259_p8 = pmov %p11247_p0 }
 0x261   : > { %7835 = dma.done.wait (%p11258_p3), [#allocation25], 2048  }
 0x262   : > { %7837 = vsyncadd (%p11259_p8), [#allocation25], 4294965248  ;;  %p11260_p6 = pmov %p11247_p0 }
 0x264   : > { %7839 = dma.done.wait (%p11260_p6), [#allocation28], 2048  }
 0x265   : > { %7841 = vsyncadd (%p11247_p0), [#allocation28], 4294965248  ;;  %p11261_p2 = pmov %p11247_p0 }
 0x266   : > { %p11262_p9 = pmov %p11247_p0 }
 0x267   : > { %7843 = dma.done.wait (%p11261_p2), [#allocation31], 5632  }
 0x268   : > { %7845 = vsyncadd (%p11262_p9), [#allocation31], 4294961664  ;;  %p11263_p10 = pmov %p11247_p0 }
 0x269   : > { %p11264_p12 = pmov %p11247_p0 }
 0x26a   : > { %7847 = dma.done.wait (%p11263_p10), [#allocation34], 4608  }
 0x26b   : > { %7849 = vsyncadd (%p11264_p12), [#allocation34], 4294962688  ;;  %v1031_v1 = vlaneseq  ;;  %v990_v5 = vld [vmem:[#allocation6 + $0x8] sm:$0x7]  ;;  %v8651_v7 = vld [vmem:[#allocation6] sm:$0x77] }
 0x26c   : > { %v8654_v8 = vld [vmem:[%s8598_s23 + $0x10] sm:$0xff]  ;;  %v8657_v9 = vld [vmem:[%s8598_s23 + $0x28] sm:$0xff]  ;;  %v8660_v10 = vld [vmem:[%s8598_s23] sm:$0xff]  ;;  %s7900_s30 = smov 113   ;;  %s7901_s2 = smov 17   ;;  %vm1245_vm0 = vcmask 138240  }
 0x26d   : > { %v8644_v2 = vshrl.u32 %v1031_v1, 7  ;;  %v8669_v14 = vld [vmem:[%s8598_s23 + $0x18] sm:$0xff]  ;;  %v8672_v15 = vld [vmem:[%s8598_s23 + $0x30] sm:$0xff]  ;;  %v8675_v16 = vld [vmem:[%s8598_s23 + $0x48] sm:$0xff]  ;;  %s7902_s25 = smov 16   ;;  %s7903_s6 = smov 112  }
 0x26e   : > { %v8681_v18 = vld [vmem:[%s8598_s23 + $0x8] sm:$0xff]  ;;  %v8684_v19 = vld [vmem:[%s8598_s23 + $0x20] sm:$0xff]  ;;  %v8705_v28 = vld [vmem:[%s8598_s23 + $0x58] sm:$0xff]  ;;  %s7904_s9 = smov 15   ;;  %s7905_s0 = smov 111   ;;  %vm1342_vm1 = vcmask 130048  }
 0x26f   : > { %11265 = vst [vmem:[#allocation57_spill] sm:$0xff] %v8644_v2  ;;  %v8647_v3 = vsub.s32 0, %v8644_v2  ;;  %v1037_v4 = vsub.s32 4, %v8644_v2  ;;  %v8702_v27 = vld [vmem:[%s8598_s23 + $0x40] sm:$0xff]  ;;  %v8714_v32 = vld [vmem:[%s8598_s23 + $0x38] sm:$0xff]  ;;  %v8717_v33 = vld [vmem:[%s8598_s23 + $0x50] sm:$0xff] }
 0x270   : > { %v8730_v38 = vld [vmem:[%s8598_s23 + $0x68] sm:$0xff]  ;;  %v8733_v39 = vld [vmem:[%s8598_s23 + $0x80] sm:$0xff]  ;;  %v8736_v40 = vsub.s32 1, %v8644_v2  ;;  %v8750_v45 = vld [vmem:[%s8598_s23 + $0x78] sm:$0xff]  ;;  %s7906_s21 = smov 1   ;;  %s7907_s26 = smov 97  }
 0x271   : > { %11266 = vst [vmem:[#allocation58_spill] sm:$0xff] %v8647_v3  ;;  %v1042_v6 = vrot.slane %v990_v5, %v8647_v3  ;;  %v1034_v11 = vrot.slane %v8651_v7, %v8647_v3  ;;  %v1038_v12 = vrot.slane %v8651_v7, %v1037_v4  ;;  %v8747_v44 = vld [vmem:[%s8598_s23 + $0x60] sm:$0xff]  ;;  %v8754_v47 = vld [vmem:[%s8598_s23 + $0x90] sm:$0xff]  ;;  %v8757_v48 = vld [vmem:[%s8598_s23 + $0xa8] sm:$0xff]  ;;  %s7908_s8 = smov 127   ;;  %s7909_s3 = smov 31  }
 0x272   : > { %v1129_v46 = vrot.slane %v990_v5, %v8736_v40  ;;  %v8768_v52 = vld [vmem:[%s8598_s23 + $0x70] sm:$0xff]  ;;  %v8771_v53 = vld [vmem:[%s8598_s23 + $0x88] sm:$0xff]  ;;  %v8785_v58 = vld [vmem:[%s8598_s23 + $0xa0] sm:$0xff]  ;;  %vm1439_vm2 = vcmask 121856   ;;  %vm1521_vm3 = vcmask 7168   ;;  %vm1593_vm4 = vcmask 1039360  }
 0x273   : > { %v8666_v13 = vrot.slane %v1042_v6, %v8647_v3  ;;  %v8678_v17 = vrot.slane %v1034_v11, %v8647_v3  ;;  %v8687_v20 = vrot.slane %v1038_v12, %v8647_v3  ;;  %v8788_v59 = vld [vmem:[%s8598_s23 + $0xb8] sm:$0xff]  ;;  %v8802_v0 = vld [vmem:[%s8598_s23 + $0xb0] sm:$0xff]  ;;  %v8817_v12 = vld [vmem:[%s8598_s23 + $0xc8] sm:$0xff]  ;;  %v8950_v3 = vpack.c.bf16 %v8757_v48, %v8754_v47  ;;  %s7911_s29 = smov 126   ;;  %p11324_p13 = scmp.ne.s32.totalorder %s11236_s20, 0 }
 0x274   : > { %v8782_v57 = vrot.slane %v1129_v46, %v8736_v40  ;;  %v8799_v63 = vld [vmem:[%s8598_s23 + $0x98] sm:$0xff]  ;;  %vm1624_vm5 = vcmask 252928   ;;  %vm1665_vm6 = vcmask 924672   ;;  %vm1807_vm7 = vcmask 654336  }
 0x275   : > { %11267 = vst [vmem:[#allocation59_spill] sm:$0xff] %v8666_v13  ;;  %11268 = vst [vmem:[#allocation60_spill] sm:$0xff] %v8678_v17  ;;  %v1060_v21 = vmul.f32 %v8666_v13, %v8654_v8  ;;  %v1063_v22 = vmul.f32 %v8666_v13, %v8657_v9  ;;  %v1058_v23 = vmul.f32 %v8678_v17, %v8660_v10  ;;  %vm1706_vm8 = vcmask 916480  }
 0x276   : > { %11269 = vst [vmem:[#allocation61_spill] sm:$0xff] %v8687_v20  ;;  %v1061_v24 = vmul.f32 %v8678_v17, %v8669_v14  ;;  %v1064_v25 = vmul.f32 %v8678_v17, %v8672_v15  ;;  %v1067_v26 = vmul.f32 %v8678_v17, %v8675_v16  ;;  %v1059_v30 = vmul.f32 %v8687_v20, %v8681_v18 }
 0x277   : > { %v8707_v29 = vpack.c.bf16 %v1063_v22, %v1060_v21  ;;  %v1062_v31 = vmul.f32 %v8687_v20, %v8684_v19  ;;  %v1066_v36 = vmul.f32 %v8666_v13, %v8702_v27  ;;  %v1069_v37 = vmul.f32 %v8666_v13, %v8705_v28  ;;  %11270 = vst [vmem:[#allocation62_spill] sm:$0xff] %v8782_v57  ;;  %v8820_v21 = vld [vmem:[%s8598_s23 + $0xe0] sm:$0xff] }
 0x278   : > { %v8719_v34 = vpack.c.bf16 %v1061_v24, %v1058_v23  ;;  %v8723_v35 = vpack.c.bf16 %v1067_v26, %v1064_v25  ;;  %v1065_v42 = vmul.f32 %v8687_v20, %v8714_v32  ;;  %v1068_v43 = vmul.f32 %v8687_v20, %v8717_v33  ;;  %v8831_v25 = vld [vmem:[%s8598_s23 + $0xc0] sm:$0xff]  ;;  %v8834_v26 = vld [vmem:[%s8598_s23 + $0xd8] sm:$0xff]  ;;  %11273 = vst [vmem:[#allocation65_spill] sm:$0xff] %v8950_v3 }
 0x279   : > { %1195 = vrot.lane.b32.xlu1 %v8707_v29, %s7900_s30  ;;  %v8740_v41 = vpack.c.bf16 %v1062_v31, %v1059_v30  ;;  %v8761_v49 = vpack.c.bf16 %v1069_v37, %v1066_v36  ;;  %v1071_v50 = vmul.f32 %v8687_v20, %v8730_v38  ;;  %v1074_v51 = vmul.f32 %v8687_v20, %v8733_v39 }
 0x27a   : > { %1215 = vrot.lane.b32.xlu0 %v8719_v34, %s7901_s2  ;;  %v8775_v54 = vpack.c.bf16 %v1068_v43, %v1065_v42  ;;  %v1070_v55 = vmul.f32 %v8678_v17, %v8747_v44  ;;  %v1073_v56 = vmul.f32 %v8678_v17, %v8750_v45  ;;  %v1076_v61 = vmul.f32 %v8678_v17, %v8754_v47 }
 0x27b   : > { %v8792_v60 = vpack.c.bf16 %v1074_v51, %v1071_v50  ;;  %v1079_v62 = vmul.f32 %v8678_v17, %v8757_v48  ;;  %v1072_v4 = vmul.f32 %v8666_v13, %v8768_v52  ;;  %v1075_v5 = vmul.f32 %v8666_v13, %v8771_v53 }
 0x27c   : > { %v8806_v1 = vpack.c.bf16 %v1073_v56, %v1070_v55  ;;  %v1147_v6 = vmul.f32 %v8782_v57, %v8654_v8  ;;  %v1150_v11 = vmul.f32 %v8782_v57, %v8657_v9  ;;  %v1078_v23 = vmul.f32 %v8666_v13, %v8785_v58  ;;  %v8863_v56 = vld [vmem:[%s8598_s23 + $0xd0] sm:$0xff] }
 0x27d   : > { %1221 = vrot.lane.b32.xlu1 %v8723_v35, %s7901_s2  ;;  %v8824_v22 = vpack.c.bf16 %v1079_v62, %v1076_v61  ;;  %v1081_v24 = vmul.f32 %v8666_v13, %v8788_v59  ;;  %v8838_v30 = vpack.c.bf16 %v1075_v5, %v1072_v4  ;;  %v1077_v31 = vmul.f32 %v8687_v20, %v8799_v63  ;;  %v8866_v61 = vld [vmem:[%s8598_s23 + $0xe8] sm:$0xff]  ;;  %s7912_s23 = smov 30  }
 0x27e   : > { %1217 = vrot.lane.b32.xlu0 %v8740_v41, %s7901_s2  ;;  %v1080_v36 = vmul.f32 %v8687_v20, %v8802_v0  ;;  %v8844_v37 = vpack.c.bf16 %v1150_v11, %v1147_v6  ;;  %v1083_v43 = vmul.f32 %v8687_v20, %v8817_v12  ;;  %v1086_v46 = vmul.f32 %v8687_v20, %v8820_v21 }
 0x27f   : > { %v8848_v42 = vpack.c.bf16 %v1081_v24, %v1078_v23  ;;  %v1082_v51 = vmul.f32 %v8678_v17, %v8831_v25  ;;  %v1085_v55 = vmul.f32 %v8678_v17, %v8834_v26  ;;  %v1084_v5 = vmul.f32 %v8666_v13, %v8863_v56 }
 0x280   : > { %v8856_v50 = vpack.c.bf16 %v1080_v36, %v1077_v31  ;;  %v8870_v62 = vpack.c.bf16 %v1086_v46, %v1083_v43  ;;  %v1087_v6 = vmul.f32 %v8666_v13, %v8866_v61  ;;  %v8884_v11 = vpack.c.bf16 %v8669_v14, %v8660_v10 }
 0x281   : > { %1197 = vrot.lane.b32.xlu1 %v8761_v49, %s7900_s30  ;;  %v8874_v4 = vpack.c.bf16 %v1085_v55, %v1082_v51  ;;  %v8894_v24 = vpack.c.bf16 %v8657_v9, %v8654_v8  ;;  %v8900_v31 = vpack.c.bf16 %v8684_v19, %v8681_v18  ;;  %v8906_v36 = vpack.c.bf16 %v8717_v33, %v8714_v32 }
 0x282   : > { %1223 = vrot.lane.b32.xlu0 %v8775_v54, %s7901_s2  ;;  %v8888_v23 = vpack.c.bf16 %v1087_v6, %v1084_v5  ;;  %v8912_v8 = vpack.c.bf16 %v8675_v16, %v8672_v15  ;;  %v8918_v9 = vpack.c.bf16 %v8750_v45, %v8747_v44  ;;  %v8924_v43 = vpack.c.bf16 %v8705_v28, %v8702_v27 }
 0x283   : > { %v8930_v46 = vpack.c.bf16 %v8771_v53, %v8768_v52  ;;  %v1124_v51 = vsub.s32 5, %v8644_v2  ;;  %v8937_v55 = vpack.c.bf16 %v8733_v39, %v8730_v38  ;;  %v8943_v5 = vpack.c.bf16 %v8802_v0, %v8799_v63 }
 0x284   : > { %v1121_v17 = vrot.slane %v8651_v7, %v8736_v40  ;;  %v8958_v20 = vpack.c.bf16 %v8834_v26, %v8831_v25  ;;  %vm1747_vm9 = vcmask 908288  }
 0x285   : > { %1229 = vrot.lane.b32.xlu1 %v8792_v60, %s7901_s2  ;;  %11271 = vst [vmem:[#allocation63_spill] sm:$0xff] %v8937_v55  ;;  %11272 = vst [vmem:[#allocation64_spill] sm:$0xff] %v8943_v5  ;;  %v1125_v6 = vrot.slane %v8651_v7, %v1124_v51  ;;  %v8967_v51 = vpack.c.bf16 %v8788_v59, %v8785_v58  ;;  %v8976_v7 = vpack.c.bf16 %v8866_v61, %v8863_v56 }
 0x286   : > { %1227 = vrot.lane.b32.xlu0 %v8806_v1, %s7901_s2  ;;  %11274 = vst [vmem:[#allocation66_spill] sm:$0xff] %v8958_v20  ;;  %v8970_v2 = vrot.slane %v1121_v17, %v8736_v40  ;;  %v8986_v17 = vpack.c.bf16 %v8820_v21, %v8817_v12 }
 0x287   : > { %v8961_v13 = vrot.slane %v1125_v6, %v8736_v40 }
 0x288   : > { %11276 = vst [vmem:[#allocation68_spill] sm:$0xff] %v8970_v2  ;;  %v1145_v40 = vmul.f32 %v8970_v2, %v8660_v10 }
 0x289   : > { %1233 = vrot.lane.b32.xlu1 %v8824_v22, %s7901_s2  ;;  %11275 = vst [vmem:[#allocation67_spill] sm:$0xff] %v8961_v13  ;;  %v1146_v6 = vmul.f32 %v8961_v13, %v8681_v18 }
 0x28a   : > { %1199 = vrot.lane.b32.xlu0 %v8838_v30, %s7900_s30 }
 0x28d   : > { %1201 = vrot.lane.b32.xlu1 %v8848_v42, %s7900_s30 }
 0x28e   : > { %1235 = vrot.lane.b32.xlu0 %v8856_v50, %s7901_s2 }
 0x291   : > { %1241 = vrot.lane.b32.xlu1 %v8870_v62, %s7901_s2 }
 0x292   : > { %1239 = vrot.lane.b32.xlu0 %v8874_v4, %s7901_s2 }
 0x295   : > { %1312 = vrot.lane.b32.xlu1 %v8884_v11, %s7902_s25 }
 0x296   : > { %1203 = vrot.lane.b32.xlu0 %v8888_v23, %s7900_s30 }
 0x299   : > { %1292 = vrot.lane.b32.xlu1 %v8894_v24, %s7903_s6 }
 0x29a   : > { %1314 = vrot.lane.b32.xlu0 %v8900_v31, %s7902_s25 }
 0x29d   : > { %1320 = vrot.lane.b32.xlu1 %v8906_v36, %s7902_s25 }
 0x29e   : > { %1318 = vrot.lane.b32.xlu0 %v8912_v8, %s7902_s25 }
 0x2a1   : > { %1324 = vrot.lane.b32.xlu1 %v8918_v9, %s7902_s25 }
 0x2a2   : > { %1294 = vrot.lane.b32.xlu0 %v8924_v43, %s7903_s6 }
 0x2a5   : > { %1296 = vrot.lane.b32.xlu1 %v8930_v46, %s7903_s6 }
 0x2a6   : > { %1326 = vrot.lane.b32.xlu0 %v8937_v55, %s7902_s25 }
 0x2a9   : > { %1332 = vrot.lane.b32.xlu1 %v8943_v5, %s7902_s25  ;;  %v1149_v5 = vmul.f32 %v8961_v13, %v8684_v19  ;;  %v1151_v19 = vmul.f32 %v8970_v2, %v8672_v15  ;;  %v1156_v15 = vmul.f32 %v8782_v57, %v8705_v28  ;;  %v1161_v28 = vmul.f32 %v8961_v13, %v8733_v39 }
 0x2aa   : > { %1330 = vrot.lane.b32.xlu0 %v8950_v3, %s7902_s25  ;;  %v1154_v3 = vmul.f32 %v8970_v2, %v8675_v16  ;;  %v1152_v16 = vmul.f32 %v8961_v13, %v8714_v32  ;;  %v1157_v32 = vmul.f32 %v8970_v2, %v8747_v44  ;;  %v1166_v39 = vmul.f32 %v8970_v2, %v8757_v48 }
 0x2ab   : > { %v8994_v18 = vpack.c.bf16 %v1149_v5, %v1146_v6  ;;  %v1159_v44 = vmul.f32 %v8782_v57, %v8768_v52  ;;  %v1168_v48 = vmul.f32 %v8782_v57, %v8788_v59  ;;  %v1164_v52 = vmul.f32 %v8961_v13, %v8799_v63 }
 0x2ac   : > { %v9006_v10 = vpack.c.bf16 %v1154_v3, %v1151_v19  ;;  %v1173_v59 = vmul.f32 %v8961_v13, %v8820_v21  ;;  %v1169_v63 = vmul.f32 %v8970_v2, %v8831_v25  ;;  %v1171_v21 = vmul.f32 %v8782_v57, %v8863_v56 }
 0x2ad   : > { %1336 = vrot.lane.b32.xlu1 %v8958_v20, %s7902_s25  ;;  %v1148_v20 = vmul.f32 %v8970_v2, %v8669_v14  ;;  %v1153_v14 = vmul.f32 %v8782_v57, %v8702_v27  ;;  %v1158_v27 = vmul.f32 %v8961_v13, %v8730_v38  ;;  %v1163_v38 = vmul.f32 %v8970_v2, %v8754_v47 }
 0x2ae   : > { %1298 = vrot.lane.b32.xlu0 %v8967_v51, %s7903_s6  ;;  %v1165_v47 = vmul.f32 %v8782_v57, %v8785_v58  ;;  %v1170_v58 = vmul.f32 %v8961_v13, %v8817_v12 }
 0x2af   : > { %v9002_v55 = vpack.c.bf16 %v1148_v20, %v1145_v40  ;;  %v1155_v20 = vmul.f32 %v8961_v13, %v8717_v33  ;;  %v9020_v3 = vpack.c.bf16 %v1156_v15, %v1153_v14  ;;  %v1160_v33 = vmul.f32 %v8970_v2, %v8750_v45 }
 0x2b0   : > { %v9036_v6 = vpack.c.bf16 %v1161_v28, %v1158_v27  ;;  %v1162_v45 = vmul.f32 %v8782_v57, %v8771_v53  ;;  %v9052_v19 = vpack.c.bf16 %v1166_v39, %v1163_v38  ;;  %v1167_v53 = vmul.f32 %v8961_v13, %v8802_v0 }
 0x2b1   : > { %1300 = vrot.lane.b32.xlu1 %v8976_v7, %s7903_s6  ;;  %v9028_v5 = vpack.c.bf16 %v1155_v20, %v1152_v16  ;;  %v9044_v40 = vpack.c.bf16 %v1160_v33, %v1157_v32  ;;  %v9068_v15 = vpack.c.bf16 %v1168_v48, %v1165_v47  ;;  %v1172_v0 = vmul.f32 %v8970_v2, %v8834_v26  ;;  %v7085_v26 = vld [vmem:[#allocation8 + $0x4] ss:$24 sps:$4 sm:$0xff]  }
 0x2b2   : > { %1338 = vrot.lane.b32.xlu0 %v8986_v17, %s7902_s25  ;;  %v9060_v14 = vpack.c.bf16 %v1162_v45, %v1159_v44  ;;  %v9076_v16 = vpack.c.bf16 %v1167_v53, %v1164_v52  ;;  %v9084_v20 = vpack.c.bf16 %v1173_v59, %v1170_v58  ;;  %v1174_v27 = vmul.f32 %v8782_v57, %v8866_v61 }
 0x2b3   : > { %v9088_v12 = vpack.c.bf16 %v1172_v0, %v1169_v63  ;;  %1843 = vmatprep.mubr.bf16.mxu0 %v7085_v26  ;;  %1972 = vmatprep.mubr.bf16.mxu1 %v7085_v26 }
 0x2b4   : > { %v9098_v25 = vpack.c.bf16 %v1174_v27, %v1171_v21 }
 0x2b5   : > { %1411 = vrot.lane.b32.xlu1 %v8994_v18, %s7904_s9 }
 0x2b6   : > { %1409 = vrot.lane.b32.xlu0 %v9002_v55, %s7904_s9 }
 0x2b9   : > { %1415 = vrot.lane.b32.xlu1 %v9006_v10, %s7904_s9 }
 0x2ba   : > { %1389 = vrot.lane.b32.xlu0 %v8844_v37, %s7905_s0 }
 0x2bd   : > { %1391 = vrot.lane.b32.xlu1 %v9020_v3, %s7905_s0 }
 0x2be   : > { %1417 = vrot.lane.b32.xlu0 %v9028_v5, %s7904_s9 }
 0x2c1   : > { %1423 = vrot.lane.b32.xlu1 %v9036_v6, %s7904_s9 }
 0x2c2   : > { %1421 = vrot.lane.b32.xlu0 %v9044_v40, %s7904_s9 }
 0x2c5   : > { %1427 = vrot.lane.b32.xlu1 %v9052_v19, %s7904_s9 }
 0x2c6   : > { %1393 = vrot.lane.b32.xlu0 %v9060_v14, %s7905_s0 }
 0x2c9   : > { %1395 = vrot.lane.b32.xlu1 %v9068_v15, %s7905_s0 }
 0x2ca   : > { %1429 = vrot.lane.b32.xlu0 %v9076_v16, %s7904_s9 }
 0x2cd   : > { %1435 = vrot.lane.b32.xlu1 %v9084_v20, %s7904_s9 }
 0x2ce   : > { %1433 = vrot.lane.b32.xlu0 %v9088_v12, %s7904_s9 }
 0x2d1   : > { %1491 = vrot.lane.b32.xlu1 %v8719_v34, %s7906_s21 }
 0x2d2   : > { %1397 = vrot.lane.b32.xlu0 %v9098_v25, %s7905_s0 }
 0x2d5   : > { %1481 = vrot.lane.b32.xlu1 %v8707_v29, %s7907_s26 }
 0x2d6   : > { %1493 = vrot.lane.b32.xlu0 %v8740_v41, %s7906_s21 }
 0x2d9   : > { %1499 = vrot.lane.b32.xlu1 %v8775_v54, %s7906_s21 }
 0x2da   : > { %1497 = vrot.lane.b32.xlu0 %v8723_v35, %s7906_s21 }
 0x2dd   : > { %1334 = vrot.lane.b32.xlu1 %v8967_v51, %s7902_s25 }
 0x2de   : > { %1483 = vrot.lane.b32.xlu0 %v8761_v49, %s7907_s26 }
 0x2e1   : > { %1503 = vrot.lane.b32.xlu1 %v8806_v1, %s7906_s21 }
 0x2e2   : > { %1219 = vrot.lane.b32.xlu0 %v8707_v29, %s7901_s2 }
 0x2e5   : > { %1485 = vrot.lane.b32.xlu1 %v8838_v30, %s7907_s26 }
 0x2e6   : > { %1505 = vrot.lane.b32.xlu0 %v8792_v60, %s7906_s21 }
 0x2e9   : > { %1225 = vrot.lane.b32.xlu1 %v8761_v49, %s7901_s2 }
 0x2ea   : > { %1340 = vrot.lane.b32.xlu0 %v8976_v7, %s7902_s25 }
 0x2eb   : > { %v9128_v56 = vpop.permute.xlu1 %1195 }
 0x2ec   : > { %v1216_v61 = vpop.permute.xlu0 %1215 }
 0x2ed   : > { %1511 = vrot.lane.b32.xlu1 %v8856_v50, %s7906_s21  ;;  %v9144_v38 = vsel %vm1245_vm0, %v9128_v56, %v1216_v61 }
 0x2ee   : > { %1509 = vrot.lane.b32.xlu0 %v8824_v22, %s7906_s21 }
 0x2ef   : > { %v1222_v28 = vpop.permute.xlu1 %1221 }
 0x2f0   : > { %v9134_v32 = vpop.permute.xlu0 %1217 }
 0x2f1   : > { %1413 = vrot.lane.b32.xlu1 %v8844_v37, %s7904_s9  ;;  %v1246_v33 = vsel %vm1245_vm0, %v1216_v61, %v9134_v32 }
 0x2f2   : > { %1487 = vrot.lane.b32.xlu0 %v8848_v42, %s7907_s26  ;;  %1811 = vmatprep.subr.bf16.mxu0 %v1246_v33 }
 0x2f3   : > { %1812 = vmatpush1.bf16.msra.mxu0 %v9144_v38  ;;  %v9147_v39 = vpop.permute.xlu1 %1197 }
 0x2f4   : > { %v9149_v44 = vpop.permute.xlu0 %1223  ;;  %v9153_v45 = vsel %vm1245_vm0, %v9147_v39, %v1222_v28 }
 0x2f5   : > { %1515 = vrot.lane.b32.xlu1 %v8874_v4, %s7906_s21  ;;  %v1248_v47 = vsel %vm1245_vm0, %v1222_v28, %v9149_v44 }
 0x2f6   : > { %1231 = vrot.lane.b32.xlu0 %v8838_v30, %s7901_s2  ;;  %1813 = vmatprep.subr.bf16.mxu0 %v1248_v47 }
 0x2f7   : > { %1814 = vmatpush1.bf16.msra.mxu0 %v9153_v45  ;;  %v9162_v48 = vpop.permute.xlu1 %1229 }
 0x2f8   : > { %v1228_v52 = vpop.permute.xlu0 %1227 }
 0x2f9   : > { %1489 = vrot.lane.b32.xlu1 %v8888_v23, %s7907_s26  ;;  %v1250_v53 = vsel %vm1245_vm0, %v1228_v52, %v9162_v48 }
 0x2fa   : > { %1517 = vrot.lane.b32.xlu0 %v8870_v62, %s7906_s21  ;;  %1815 = vmatprep.subr.bf16.mxu0 %v1250_v53 }
 0x2fb   : > { %v1234_v58 = vpop.permute.xlu1 %1233 }
 0x2fc   : > { %v9170_v59 = vpop.permute.xlu0 %1199 }
 0x2fd   : > { %1237 = vrot.lane.b32.xlu1 %v8848_v42, %s7901_s2  ;;  %v9176_v63 = vsel %vm1245_vm0, %v9170_v59, %v1228_v52 }
 0x2fe   : > { %1419 = vrot.lane.b32.xlu0 %v9020_v3, %s7904_s9  ;;  %1816 = vmatpush1.bf16.msra.mxu0 %v9176_v63 }
 0x2ff   : > { %v9181_v0 = vpop.permute.xlu1 %1201 }
 0x300   : > { %v9183_v21 = vpop.permute.xlu0 %1235  ;;  %v9187_v27 = vsel %vm1245_vm0, %v9181_v0, %v1234_v58 }
 0x301   : > { %1243 = vrot.lane.b32.xlu1 %v8888_v23, %s7901_s2  ;;  %v1252_v26 = vsel %vm1245_vm0, %v1234_v58, %v9183_v21 }
 0x302   : > { %1425 = vrot.lane.b32.xlu0 %v9060_v14, %s7904_s9  ;;  %1817 = vmatprep.subr.bf16.mxu0 %v1252_v26 }
 0x303   : > { %1818 = vmatpush1.bf16.msra.mxu0 %v9187_v27  ;;  %v9196_v61 = vpop.permute.xlu1 %1241 }
 0x304   : > { %v1240_v28 = vpop.permute.xlu0 %1239 }
 0x305   : > { %1316 = vrot.lane.b32.xlu1 %v8894_v24, %s7902_s25  ;;  %v1254_v33 = vsel %vm1245_vm0, %v1240_v28, %v9196_v61 }
 0x306   : > { %1431 = vrot.lane.b32.xlu0 %v9068_v15, %s7904_s9  ;;  %1819 = vmatprep.subr.bf16.mxu0 %v1254_v33 }
 0x307   : > { %v1313_v47 = vpop.permute.xlu1 %1312 }
 0x308   : > { %v9204_v52 = vpop.permute.xlu0 %1203 }
 0x309   : > { %1322 = vrot.lane.b32.xlu1 %v8924_v43, %s7902_s25  ;;  %v9210_v53 = vsel %vm1245_vm0, %v9204_v52, %v1240_v28 }
 0x30a   : > { %1437 = vrot.lane.b32.xlu0 %v9098_v25, %s7904_s9  ;;  %1820 = vmatpush1.bf16.msra.mxu0 %v9210_v53 }
 0x30b   : > { %v9215_v58 = vpop.permute.xlu1 %1292 }
 0x30c   : > { %11277 = vst [vmem:[#allocation69_spill] sm:$0xff] %v9215_v58  ;;  %v9217_v26 = vpop.permute.xlu0 %1314  ;;  %v9221_v33 = vsel %vm1342_vm1, %v9215_v58, %v1313_v47 }
 0x30d   : > { %11278 = vst [vmem:[#allocation70_spill] sm:$0xff] %v9221_v33  ;;  %1328 = vrot.lane.b32.xlu1 %v8930_v46, %s7902_s25  ;;  %v1343_v28 = vsel %vm1342_vm1, %v1313_v47, %v9217_v26 }
 0x30e   : > { %1495 = vrot.lane.b32.xlu0 %v8707_v29, %s7906_s21  ;;  %1821 = vmatprep.subr.bf16.mxu0 %v1343_v28 }
 0x30f   : > { %1822 = vmatpush1.bf16.msra.mxu0 %v9221_v33  ;;  %v9230_v57 = vpop.permute.xlu1 %1320 }
 0x310   : > { %v1319_v2 = vpop.permute.xlu0 %1318 }
 0x311   : > { %1565 = vrot.lane.b32.xlu1 %v8994_v18, %s7908_s8  ;;  %v1345_v13 = vsel %vm1342_vm1, %v1319_v2, %v9230_v57 }
 0x312   : > { %1501 = vrot.lane.b32.xlu0 %v8761_v49, %s7906_s21  ;;  %1823 = vmatprep.subr.bf16.mxu0 %v1345_v13 }
 0x313   : > { %v1325_v47 = vpop.permute.xlu1 %1324 }
 0x314   : > { %v9238_v58 = vpop.permute.xlu0 %1294 }
 0x315   : > { %1563 = vrot.lane.b32.xlu1 %v9002_v55, %s7908_s8  ;;  %v9244_v29 = vsel %vm1342_vm1, %v9238_v58, %v1319_v2 }
 0x316   : > { %11279 = vst [vmem:[#allocation71_spill] sm:$0xff] %v9244_v29  ;;  %1567 = vrot.lane.b32.xlu0 %v8844_v37, %s7908_s8  ;;  %1824 = vmatpush1.bf16.msra.mxu0 %v9244_v29 }
 0x317   : > { %v9249_v28 = vpop.permute.xlu1 %1296 }
 0x318   : > { %11280 = vst [vmem:[#allocation72_spill] sm:$0xff] %v9249_v28  ;;  %v9251_v33 = vpop.permute.xlu0 %1326  ;;  %v9255_v13 = vsel %vm1342_vm1, %v9249_v28, %v1325_v47 }
 0x319   : > { %11281 = vst [vmem:[#allocation73_spill] sm:$0xff] %v9255_v13  ;;  %1507 = vrot.lane.b32.xlu1 %v8838_v30, %s7906_s21  ;;  %v1347_v2 = vsel %vm1342_vm1, %v1325_v47, %v9251_v33 }
 0x31a   : > { %1614 = vrot.lane.b32.xlu0 %v9002_v55, %s7909_s3  ;;  %1825 = vmatprep.subr.bf16.mxu0 %v1347_v2 }
 0x31b   : > { %1826 = vmatpush1.bf16.msra.mxu0 %v9255_v13  ;;  %v9264_v49 = vpop.permute.xlu1 %1332 }
 0x31c   : > { %v1331_v37 = vpop.permute.xlu0 %1330 }
 0x31d   : > { %1573 = vrot.lane.b32.xlu1 %v9020_v3, %s7908_s8  ;;  %v1349_v28 = vsel %vm1342_vm1, %v1331_v37, %v9264_v49 }
 0x31e   : > { %1571 = vrot.lane.b32.xlu0 %v9028_v5, %s7908_s8  ;;  %1827 = vmatprep.subr.bf16.mxu0 %v1349_v28 }
 0x31f   : > { %v1337_v30 = vpop.permute.xlu1 %1336 }
 0x320   : > { %v9272_v47 = vpop.permute.xlu0 %1298 }
 0x321   : > { %11282 = vst [vmem:[#allocation74_spill] sm:$0xff] %v9272_v47  ;;  %1616 = vrot.lane.b32.xlu1 %v9006_v10, %s7909_s3  ;;  %v9278_v2 = vsel %vm1342_vm1, %v9272_v47, %v1331_v37 }
 0x322   : > { %11283 = vst [vmem:[#allocation75_spill] sm:$0xff] %v9278_v2  ;;  %1569 = vrot.lane.b32.xlu0 %v9006_v10, %s7908_s8  ;;  %1828 = vmatpush1.bf16.msra.mxu0 %v9278_v2 }
 0x323   : > { %v9283_v3 = vpop.permute.xlu1 %1300 }
 0x324   : > { %11284 = vst [vmem:[#allocation76_spill] sm:$0xff] %v9283_v3  ;;  %v9285_v13 = vpop.permute.xlu0 %1338  ;;  %v9289_v28 = vsel %vm1342_vm1, %v9283_v3, %v1337_v30 }
 0x325   : > { %11285 = vst [vmem:[#allocation77_spill] sm:$0xff] %v9289_v28  ;;  %1577 = vrot.lane.b32.xlu1 %v9036_v6, %s7908_s8  ;;  %v1351_v37 = vsel %vm1342_vm1, %v1337_v30, %v9285_v13 }
 0x326   : > { %1513 = vrot.lane.b32.xlu0 %v8848_v42, %s7906_s21  ;;  %1829 = vmatprep.subr.bf16.mxu0 %v1351_v37 }
 0x327   : > { %1830 = vmatpush1.bf16.msra.mxu0 %v9289_v28  ;;  %v9298_v2 = vpop.permute.xlu1 %1411 }
 0x328   : > { %v1410_v47 = vpop.permute.xlu0 %1409 }
 0x329   : > { %1575 = vrot.lane.b32.xlu1 %v9044_v40, %s7908_s8  ;;  %v1440_v3 = vsel %vm1439_vm2, %v1410_v47, %v9298_v2 }
 0x32a   : > { %1579 = vrot.lane.b32.xlu0 %v9060_v14, %s7908_s8  ;;  %1831 = vmatprep.subr.bf16.mxu0 %v1440_v3 }
 0x32b   : > { %v1416_v30 = vpop.permute.xlu1 %1415 }
 0x32c   : > { %v9306_v29 = vpop.permute.xlu0 %1389 }
 0x32d   : > { %1519 = vrot.lane.b32.xlu1 %v8888_v23, %s7906_s21  ;;  %v9312_v42 = vsel %vm1439_vm2, %v9306_v29, %v1410_v47 }
 0x32e   : > { %11286 = vst [vmem:[#allocation78_spill] sm:$0xff] %v9312_v42  ;;  %1618 = vrot.lane.b32.xlu0 %v9044_v40, %s7909_s3  ;;  %1832 = vmatpush1.bf16.msra.mxu0 %v9312_v42 }
 0x32f   : > { %v9317_v37 = vpop.permute.xlu1 %1391 }
 0x330   : > { %11287 = vst [vmem:[#allocation79_spill] sm:$0xff] %v9317_v37  ;;  %v9319_v28 = vpop.permute.xlu0 %1417  ;;  %v9323_v14 = vsel %vm1439_vm2, %v9317_v37, %v1416_v30 }
 0x331   : > { %11288 = vst [vmem:[#allocation80_spill] sm:$0xff] %v9323_v14  ;;  %1585 = vrot.lane.b32.xlu1 %v9068_v15, %s7908_s8  ;;  %v1442_v23 = vsel %vm1439_vm2, %v1416_v30, %v9319_v28 }
 0x332   : > { %1583 = vrot.lane.b32.xlu0 %v9076_v16, %s7908_s8  ;;  %1833 = vmatprep.subr.bf16.mxu0 %v1442_v23 }
 0x333   : > { %1834 = vmatpush1.bf16.msra.mxu0 %v9323_v14  ;;  %v9332_v47 = vpop.permute.xlu1 %1423 }
 0x334   : > { %v1422_v3 = vpop.permute.xlu0 %1421 }
 0x335   : > { %1620 = vrot.lane.b32.xlu1 %v9052_v19, %s7909_s3  ;;  %v1444_v37 = vsel %vm1439_vm2, %v1422_v3, %v9332_v47 }
 0x336   : > { %1581 = vrot.lane.b32.xlu0 %v9052_v19, %s7908_s8  ;;  %1835 = vmatprep.subr.bf16.mxu0 %v1444_v37 }
 0x337   : > { %v1428_v15 = vpop.permute.xlu1 %1427 }
 0x338   : > { %v9340_v30 = vpop.permute.xlu0 %1393 }
 0x339   : > { %11289 = vst [vmem:[#allocation81_spill] sm:$0xff] %v9340_v30  ;;  %1591 = vrot.lane.b32.xlu1 %v9098_v25, %s7908_s8  ;;  %v9346_v23 = vsel %vm1439_vm2, %v9340_v30, %v1422_v3 }
 0x33a   : > { %11290 = vst [vmem:[#allocation82_spill] sm:$0xff] %v9346_v23  ;;  %1589 = vrot.lane.b32.xlu0 %v9084_v20, %s7908_s8  ;;  %1836 = vmatpush1.bf16.msra.mxu0 %v9346_v23  ;;  %v11194_v23 = vmov 0  }
 0x33b   : > { %v9351_v14 = vpop.permute.xlu1 %1395  ;;  %7082 = vset.pattern.permute.xlu1 %v11194_v23  ;;  %7081 = vset.pattern.permute.xlu0 %v11194_v23 }
 0x33c   : > { %11291 = vst [vmem:[#allocation83_spill] sm:$0xff] %v9351_v14  ;;  %v9353_v42 = vpop.permute.xlu0 %1429  ;;  %v9357_v37 = vsel %vm1439_vm2, %v9351_v14, %v1428_v15 }
 0x33d   : > { %11292 = vst [vmem:[#allocation84_spill] sm:$0xff] %v9357_v37  ;;  %1622 = vrot.lane.b32.xlu1 %v9088_v12, %s7909_s3  ;;  %v1446_v25 = vsel %vm1439_vm2, %v1428_v15, %v9353_v42 }
 0x33e   : > { %1587 = vrot.lane.b32.xlu0 %v9088_v12, %s7908_s8  ;;  %1837 = vmatprep.subr.bf16.mxu0 %v1446_v25 }
 0x33f   : > { %1838 = vmatpush1.bf16.msra.mxu0 %v9357_v37  ;;  %v9366_v3 = vpop.permute.xlu1 %1435 }
 0x340   : > { %v1434_v30 = vpop.permute.xlu0 %1433 }
 0x341   : > { %v1448_v14 = vsel %vm1439_vm2, %v1434_v30, %v9366_v3  ;;  %1645 = vrot.lane.b32.xlu1 %v8719_v34, %s7900_s30 }
 0x342   : > { %1647 = vrot.lane.b32.xlu0 %v8740_v41, %s7900_s30  ;;  %1839 = vmatprep.subr.bf16.mxu0 %v1448_v14 }
 0x343   : > { %v1492_v15 = vpop.permute.xlu1 %1491 }
 0x344   : > { %v9376_v25 = vpop.permute.xlu0 %1397 }
 0x345   : > { %v9380_v37 = vsel %vm1439_vm2, %v9376_v25, %v1434_v30  ;;  %1649 = vrot.lane.b32.xlu1 %v8723_v35, %s7900_s30 }
 0x346   : > { %11293 = vst [vmem:[#allocation85_spill] sm:$0xff] %v9380_v37  ;;  %1651 = vrot.lane.b32.xlu0 %v8775_v54, %s7900_s30  ;;  %1840 = vmatpush1.bf16.msra.mxu0 %v9380_v37  ;;  %v9398_v54 = vld [vmem:[#allocation8] ss:$24 sps:$4 sm:$0xff]   ;;  %v9400_v37 = vld [vmem:[#allocation8 + $0xc] ss:$24 sps:$4 sm:$0xff]  }
 0x347   : > { %v1482_v34 = vpop.permute.xlu1 %1481 }
 0x348   : > { %v9387_v23 = vpop.permute.xlu0 %1493  ;;  %v1545_v41 = vsel %vm1521_vm3, %v1482_v34, %v1492_v15 }
 0x349   : > { %v1522_v14 = vsel %vm1521_vm3, %v1492_v15, %v9387_v23  ;;  %1653 = vrot.lane.b32.xlu1 %v8806_v1, %s7900_s30 }
 0x34a   : > { %1655 = vrot.lane.b32.xlu0 %v8792_v60, %s7900_s30  ;;  %1841 = vmatprep.subr.bf16.mxu0 %v1522_v14 }
 0x34b   : > { %1842 = vmatpush1.bf16.msra.mxu0 %v1545_v41  ;;  %v9396_v35 = vpop.permute.xlu1 %1499 }
 0x34c   : > { %v1498_v30 = vpop.permute.xlu0 %1497 }
 0x34d   : > { %v1524_v34 = vsel %vm1521_vm3, %v1498_v30, %v9396_v35  ;;  %1657 = vrot.lane.b32.xlu1 %v8824_v22, %s7900_s30 }
 0x34e   : > { %1659 = vrot.lane.b32.xlu0 %v8856_v50, %s7900_s30  ;;  %1854 = vmatprep.subr.bf16.mxu0 %v1524_v34 }
 0x34f   : > { %v1335_v60 = vpop.permute.xlu1 %1334  ;;  %1844 = vmatmul.mubr.bf16.vlgmr.msra.gmra.mrb[0].mxu0 %v9398_v54 }
 0x350   : > { %v1484_v1 = vpop.permute.xlu0 %1483  ;;  %v1350_v15 = vsel %vm1342_vm1, %v9264_v49, %v1335_v60  ;;  %1886 = vmatprep.mubr.bf16.mxu0 %v9400_v37 }
 0x351   : > { %v1549_v41 = vsel %vm1521_vm3, %v1484_v1, %v1498_v30  ;;  %6311 = vmatprep.subr.bf16.mxu1 %v1350_v15  ;;  %1661 = vrot.lane.b32.xlu1 %v8874_v4, %s7900_s30  ;;  %v11294_v15 = vld [vmem:[#allocation63_spill] sm:$0xff] }
 0x352   : > { %1663 = vrot.lane.b32.xlu0 %v8870_v62, %s7900_s30  ;;  %1855 = vmatpush1.bf16.msra.mxu0 %v1549_v41 }
 0x353   : > { %v1504_v22 = vpop.permute.xlu1 %1503 }
 0x354   : > { %v1220_v50 = vpop.permute.xlu0 %1219 }
 0x355   : > { %v1247_v14 = vsel %vm1245_vm0, %v9134_v32, %v1220_v50  ;;  %1686 = vrot.lane.b32.xlu1 %v8884_v11, %s7903_s6 }
 0x356   : > { %1688 = vrot.lane.b32.xlu0 %v8900_v31, %s7903_s6  ;;  %6312 = vmatpush3.bf16.msra.mxu1 %v1247_v14  ;;  %v11295_v14 = vld [vmem:[#allocation65_spill] sm:$0xff] }
 0x357   : > { %v1486_v49 = vpop.permute.xlu1 %1485 }
 0x358   : > { %v1553_v30 = vsel %vm1521_vm3, %v1486_v49, %v1504_v22  ;;  %v9424_v4 = vpop.permute.xlu0 %1505 }
 0x359   : > { %v1526_v62 = vsel %vm1521_vm3, %v1504_v22, %v9424_v4  ;;  %1690 = vrot.lane.b32.xlu1 %v8912_v8, %s7903_s6 }
 0x35a   : > { %1692 = vrot.lane.b32.xlu0 %v8906_v36, %s7903_s6  ;;  %1856 = vmatprep.subr.bf16.mxu0 %v1526_v62 }
 0x35b   : > { %1857 = vmatpush1.bf16.msra.mxu0 %v1553_v30  ;;  %v1226_v32 = vpop.permute.xlu1 %1225 }
 0x35c   : > { %v1341_v34 = vpop.permute.xlu0 %1340  ;;  %v1249_v60 = vsel %vm1245_vm0, %v9149_v44, %v1226_v32  ;;  %v11296_v44 = vld [vmem:[#allocation64_spill] sm:$0xff]  ;;  %v11297_v32 = vld [vmem:[#allocation66_spill] sm:$0xff] }
 0x35d   : > { %v1352_v1 = vsel %vm1342_vm1, %v9285_v13, %v1341_v34  ;;  %1694 = vrot.lane.b32.xlu1 %v8918_v9, %s7903_s6 }
 0x35e   : > { %1696 = vrot.lane.b32.xlu0 %v11294_v15, %s7903_s6  ;;  %6313 = vmatprep.subr.bf16.mxu1 %v1352_v1 }
 0x35f   : > { %6314 = vmatpush3.bf16.msra.mxu1 %v1249_v60  ;;  %v9440_v41 = vpop.permute.xlu1 %1511 }
 0x360   : > { %v1510_v22 = vpop.permute.xlu0 %1509 }
 0x361   : > { %v1528_v50 = vsel %vm1521_vm3, %v1510_v22, %v9440_v41  ;;  %1698 = vrot.lane.b32.xlu1 %v11295_v14, %s7903_s6 }
 0x362   : > { %1700 = vrot.lane.b32.xlu0 %v11296_v44, %s7903_s6  ;;  %1858 = vmatprep.subr.bf16.mxu0 %v1528_v50 }
 0x363   : > { %v1414_v13 = vpop.permute.xlu1 %1413 }
 0x364   : > { %v1488_v49 = vpop.permute.xlu0 %1487  ;;  %v1441_v30 = vsel %vm1439_vm2, %v9298_v2, %v1414_v13 }
 0x365   : > { %v1557_v62 = vsel %vm1521_vm3, %v1488_v49, %v1510_v22  ;;  %6315 = vmatprep.subr.bf16.mxu1 %v1441_v30  ;;  %1702 = vrot.lane.b32.xlu1 %v11297_v32, %s7903_s6 }
 0x366   : > { %1704 = vrot.lane.b32.xlu0 %v8986_v17, %s7903_s6  ;;  %1859 = vmatpush1.bf16.msra.mxu0 %v1557_v62 }
 0x367   : > { %v1516_v34 = vpop.permute.xlu1 %1515 }
 0x368   : > { %v1232_v60 = vpop.permute.xlu0 %1231 }
 0x369   : > { %v1251_v1 = vsel %vm1245_vm0, %v9162_v48, %v1232_v60  ;;  %1727 = vrot.lane.b32.xlu1 %v9002_v55, %s7905_s0 }
 0x36a   : > { %1729 = vrot.lane.b32.xlu0 %v8994_v18, %s7905_s0  ;;  %6316 = vmatpush3.bf16.msra.mxu1 %v1251_v1 }
 0x36b   : > { %v1490_v2 = vpop.permute.xlu1 %1489 }
 0x36c   : > { %v1561_v22 = vsel %vm1521_vm3, %v1490_v2, %v1516_v34  ;;  %v9462_v50 = vpop.permute.xlu0 %1517 }
 0x36d   : > { %v1530_v13 = vsel %vm1521_vm3, %v1516_v34, %v9462_v50  ;;  %1731 = vrot.lane.b32.xlu1 %v9006_v10, %s7905_s0 }
 0x36e   : > { %1733 = vrot.lane.b32.xlu0 %v9028_v5, %s7905_s0  ;;  %1860 = vmatprep.subr.bf16.mxu0 %v1530_v13 }
 0x36f   : > { %1861 = vmatpush1.bf16.msra.mxu0 %v1561_v22  ;;  %v1238_v55 = vpop.permute.xlu1 %1237 }
 0x370   : > { %v1420_v48 = vpop.permute.xlu0 %1419  ;;  %v1253_v18 = vsel %vm1245_vm0, %v9183_v21, %v1238_v55  ;;  %1862 = vmatprep.subr.bf16.mxu0 %v8900_v31 }
 0x371   : > { %v1443_v49 = vsel %vm1439_vm2, %v9319_v28, %v1420_v48  ;;  %1735 = vrot.lane.b32.xlu1 %v9044_v40, %s7905_s0 }
 0x372   : > { %1737 = vrot.lane.b32.xlu0 %v9036_v6, %s7905_s0  ;;  %6317 = vmatprep.subr.bf16.mxu1 %v1443_v49 }
 0x373   : > { %6318 = vmatpush3.bf16.msra.mxu1 %v1253_v18  ;;  %v1244_v10 = vpop.permute.xlu1 %1243  ;;  %1863 = vmatpush1.bf16.msra.mxu0 %v8884_v11 }
 0x374   : > { %v1426_v5 = vpop.permute.xlu0 %1425  ;;  %v1255_v21 = vsel %vm1245_vm0, %v9196_v61, %v1244_v10  ;;  %1864 = vmatprep.subr.bf16.mxu0 %v8906_v36 }
 0x375   : > { %v1445_v31 = vsel %vm1439_vm2, %v9332_v47, %v1426_v5  ;;  %1739 = vrot.lane.b32.xlu1 %v9052_v19, %s7905_s0  ;;  %v1028_v19 = vld [vmem:[#allocation9 + $0x8] sm:$0xff] }
 0x376   : > { %1741 = vrot.lane.b32.xlu0 %v9076_v16, %s7905_s0  ;;  %6319 = vmatprep.subr.bf16.mxu1 %v1445_v31 }
 0x377   : > { %6320 = vmatpush3.bf16.msra.mxu1 %v1255_v21  ;;  %v1317_v6 = vpop.permute.xlu1 %1316  ;;  %1865 = vmatpush1.bf16.msra.mxu0 %v8912_v8  ;;  %v1027_v8 = vld [vmem:[#allocation9] sm:$0xff] }
 0x378   : > { %v1432_v11 = vpop.permute.xlu0 %1431  ;;  %v1344_v40 = vsel %vm1342_vm1, %v9217_v26, %v1317_v6  ;;  %1866 = vmatprep.subr.bf16.mxu0 %v11294_v15 }
 0x379   : > { %v1447_v36 = vsel %vm1439_vm2, %v9353_v42, %v1432_v11  ;;  %1743 = vrot.lane.b32.xlu1 %v9088_v12, %s7905_s0 }
 0x37a   : > { %1745 = vrot.lane.b32.xlu0 %v9084_v20, %s7905_s0  ;;  %6321 = vmatprep.subr.bf16.mxu1 %v1447_v36 }
 0x37b   : > { %6322 = vmatpush3.bf16.msra.mxu1 %v1344_v40  ;;  %v1323_v16 = vpop.permute.xlu1 %1322  ;;  %1867 = vmatpush1.bf16.msra.mxu0 %v8918_v9 }
 0x37c   : > { %v1438_v61 = vpop.permute.xlu0 %1437  ;;  %v1346_v26 = vsel %vm1342_vm1, %v9230_v57, %v1323_v16  ;;  %1868 = vmatprep.subr.bf16.mxu0 %v11296_v44 }
 0x37d   : > { %v1449_v28 = vsel %vm1439_vm2, %v9366_v3, %v1438_v61  ;;  %1775 = vperm.xlu1 %7082, %v1028_v19  }
 0x37e   : > { %6323 = vmatprep.subr.bf16.mxu1 %v1449_v28  ;;  %1770 = vperm.xlu0 %7081, %v1027_v8  }
 0x37f   : > { %6324 = vmatpush3.bf16.msra.mxu1 %v1346_v26  ;;  %v1329_v20 = vpop.permute.xlu1 %1328  ;;  %1869 = vmatpush1.bf16.msra.mxu0 %v11295_v14 }
 0x380   : > { %v1496_v12 = vpop.permute.xlu0 %1495  ;;  %v1348_v9 = vsel %vm1342_vm1, %v9251_v33, %v1329_v20  ;;  %1870 = vmatprep.subr.bf16.mxu0 %v8986_v17 }
 0x381   : > { %v1523_v57 = vsel %vm1521_vm3, %v9387_v23, %v1496_v12 }
 0x382   : > { %6325 = vmatprep.subr.bf16.mxu1 %v1523_v57 }
 0x383   : > { %6326 = vmatpush3.bf16.msra.mxu1 %v1348_v9  ;;  %v1566_v42 = vpop.permute.xlu1 %1565  ;;  %1871 = vmatpush1.bf16.msra.mxu0 %v11297_v32 }
 0x384   : > { %v1502_v47 = vpop.permute.xlu0 %1501  ;;  %6333 = vmatprep.subr.bf16.mxu1 %v8976_v7 }
 0x385   : > { %v1525_v3 = vsel %vm1521_vm3, %v9396_v35, %v1502_v47  ;;  %v7086_v47 = vld [vmem:[#allocation8 + $0x8] ss:$24 sps:$4 sm:$0xff]  }
 0x386   : > { %1973 = vmatmul.mubr.bf16.vlgmr.msra.gmra.mrb[0].mxu1 %v9398_v54 }
 0x387   : > { %6334 = vmatpush3.bf16.msra.mxu1 %v1525_v3  ;;  %v1564_v33 = vpop.permute.xlu1 %1563  ;;  %2013 = vmatprep.mubr.bf16.mxu1 %v9400_v37 }
 0x388   : > { %v1594_v17 = vsel %vm1593_vm4, %v1564_v33, %v1566_v42  ;;  %v1568_v23 = vpop.permute.xlu0 %1567 }
 0x389   : > { %v1595_v15 = vsel %vm1593_vm4, %v1566_v42, %v1568_v23 }
 0x38a   : > { %1872 = vmatprep.subr.bf16.mxu0 %v1595_v15 }
 0x38b   : > { %1873 = vmatpush1.bf16.msra.mxu0 %v1594_v17  ;;  %v1508_v14 = vpop.permute.xlu1 %1507 }
 0x38c   : > { %v1527_v7 = vsel %vm1521_vm3, %v9424_v4, %v1508_v14  ;;  %v1615_v35 = vpop.permute.xlu0 %1614 }
 0x38d   : > { %v1627_v44 = vsel %vm1624_vm5, %v1568_v23, %v1615_v35 }
 0x38e   : > { %6335 = vmatprep.subr.bf16.mxu1 %v1627_v44  ;;  %v11299_v44 = vld [vmem:[#allocation69_spill] sm:$0xff] }
 0x38f   : > { %6336 = vmatpush3.bf16.msra.mxu1 %v1527_v7  ;;  %v1574_v54 = vpop.permute.xlu1 %1573 }
 0x390   : > { %v1572_v30 = vpop.permute.xlu0 %1571 }
 0x391   : > { %v1597_v37 = vsel %vm1593_vm4, %v1572_v30, %v1574_v54 }
 0x392   : > { %1874 = vmatprep.subr.bf16.mxu0 %v1597_v37 }
 0x393   : > { %v1617_v62 = vpop.permute.xlu1 %1616 }
 0x394   : > { %v1570_v32 = vpop.permute.xlu0 %1569  ;;  %v1631_v34 = vsel %vm1624_vm5, %v1574_v54, %v1617_v62 }
 0x395   : > { %v1596_v60 = vsel %vm1593_vm4, %v1570_v32, %v1572_v30  ;;  %6337 = vmatprep.subr.bf16.mxu1 %v1631_v34  ;;  %v11300_v30 = vld [vmem:[#allocation70_spill] sm:$0xff]  ;;  %v11301_v32 = vld [vmem:[#allocation71_spill] sm:$0xff] }
 0x396   : > { %1875 = vmatpush1.bf16.msra.mxu0 %v1596_v60 }
 0x397   : > { %v1578_v1 = vpop.permute.xlu1 %1577 }
 0x398   : > { %v1514_v4 = vpop.permute.xlu0 %1513 }
 0x399   : > { %v1529_v2 = vsel %vm1521_vm3, %v9440_v41, %v1514_v4  ;;  %v11302_v4 = vld [vmem:[#allocation72_spill] sm:$0xff] }
 0x39a   : > { %6338 = vmatpush3.bf16.msra.mxu1 %v1529_v2 }
 0x39b   : > { %v1576_v22 = vpop.permute.xlu1 %1575 }
 0x39c   : > { %v1598_v13 = vsel %vm1593_vm4, %v1576_v22, %v1578_v1  ;;  %v1580_v55 = vpop.permute.xlu0 %1579  ;;  %v11303_v22 = vld [vmem:[#allocation73_spill] sm:$0xff] }
 0x39d   : > { %v1599_v48 = vsel %vm1593_vm4, %v1578_v1, %v1580_v55 }
 0x39e   : > { %1876 = vmatprep.subr.bf16.mxu0 %v1599_v48  ;;  %v11304_v48 = vld [vmem:[#allocation74_spill] sm:$0xff] }
 0x39f   : > { %1877 = vmatpush1.bf16.msra.mxu0 %v1598_v13  ;;  %v1520_v18 = vpop.permute.xlu1 %1519 }
 0x3a0   : > { %v1531_v49 = vsel %vm1521_vm3, %v9462_v50, %v1520_v18  ;;  %v1619_v10 = vpop.permute.xlu0 %1618 }
 0x3a1   : > { %v1635_v5 = vsel %vm1624_vm5, %v1580_v55, %v1619_v10 }
 0x3a2   : > { %6339 = vmatprep.subr.bf16.mxu1 %v1635_v5 }
 0x3a3   : > { %6340 = vmatpush3.bf16.msra.mxu1 %v1531_v49  ;;  %v1586_v21 = vpop.permute.xlu1 %1585  ;;  %v11305_v49 = vld [vmem:[#allocation75_spill] sm:$0xff] }
 0x3a4   : > { %v1584_v41 = vpop.permute.xlu0 %1583 }
 0x3a5   : > { %v1601_v31 = vsel %vm1593_vm4, %v1584_v41, %v1586_v21 }
 0x3a6   : > { %1878 = vmatprep.subr.bf16.mxu0 %v1601_v31 }
 0x3a7   : > { %v1621_v6 = vpop.permute.xlu1 %1620 }
 0x3a8   : > { %v1582_v11 = vpop.permute.xlu0 %1581  ;;  %v1639_v40 = vsel %vm1624_vm5, %v1586_v21, %v1621_v6  ;;  %v11307_v6 = vld [vmem:[#allocation77_spill] sm:$0xff] }
 0x3a9   : > { %v1600_v36 = vsel %vm1593_vm4, %v1582_v11, %v1584_v41  ;;  %6341 = vmatprep.subr.bf16.mxu1 %v1639_v40  ;;  %v11306_v41 = vld [vmem:[#allocation76_spill] sm:$0xff] }
 0x3aa   : > { %1879 = vmatpush1.bf16.msra.mxu0 %v1600_v36  ;;  %6342 = vmatpush3.bf16.msra.mxu1 %v8894_v24 }
 0x3ab   : > { %v1592_v50 = vpop.permute.xlu1 %1591 }
 0x3ac   : > { %v1590_v19 = vpop.permute.xlu0 %1589 }
 0x3ad   : > { %v1603_v16 = vsel %vm1593_vm4, %v1590_v19, %v1592_v50 }
 0x3ae   : > { %1880 = vmatprep.subr.bf16.mxu0 %v1603_v16 }
 0x3af   : > { %v1623_v8 = vpop.permute.xlu1 %1622 }
 0x3b0   : > { %v1588_v61 = vpop.permute.xlu0 %1587  ;;  %v1643_v26 = vsel %vm1624_vm5, %v1592_v50, %v1623_v8 }
 0x3b1   : > { %v1602_v28 = vsel %vm1593_vm4, %v1588_v61, %v1590_v19  ;;  %6343 = vmatprep.subr.bf16.mxu1 %v1643_v26  ;;  %v11308_v19 = vld [vmem:[#allocation78_spill] sm:$0xff]  ;;  %v11309_v26 = vld [vmem:[#allocation79_spill] sm:$0xff] }
 0x3b2   : > { %1881 = vmatpush1.bf16.msra.mxu0 %v1602_v28  ;;  %6344 = vmatpush3.bf16.msra.mxu1 %v8924_v43 }
 0x3b3   : > { %6345 = vmatprep.subr.bf16.mxu1 %v9144_v38  ;;  %v1646_v20 = vpop.permute.xlu1 %1645 }
 0x3b4   : > { %v1648_v24 = vpop.permute.xlu0 %1647 }
 0x3b5   : > { %v1666_v12 = vsel %vm1665_vm6, %v1646_v20, %v1648_v24  ;;  %v1667_v9 = vsel %vm1665_vm6, %v1648_v24, %v9128_v56  ;;  %v11298_v56 = vmov 0   ;;  %v11310_v20 = vld [vmem:[#allocation80_spill] sm:$0xff] }
 0x3b6   : > { %1882 = vmatprep.subr.bf16.mxu0 %v1667_v9  ;;  %6346 = vmatpush3.bf16.msra.mxu1 %v8930_v46  ;;  %v7089_v46 = vld [vmem:[#allocation8 + $0x14] ss:$24 sps:$4 sm:$0xff]  }
 0x3b7   : > { %1883 = vmatpush1.bf16.msra.mxu0 %v1666_v12  ;;  %6347 = vmatprep.subr.bf16.mxu1 %v9153_v45  ;;  %v1650_v57 = vpop.permute.xlu1 %1649  ;;  %v11311_v9 = vld [vmem:[#allocation81_spill] sm:$0xff] }
 0x3b8   : > { %v1652_v42 = vpop.permute.xlu0 %1651 }
 0x3b9   : > { %v1668_v43 = vsel %vm1665_vm6, %v1650_v57, %v1652_v42  ;;  %v1669_v38 = vsel %vm1665_vm6, %v1652_v42, %v9147_v39  ;;  %v11312_v42 = vld [vmem:[#allocation82_spill] sm:$0xff] }
 0x3ba   : > { %1884 = vmatprep.subr.bf16.mxu0 %v1669_v38  ;;  %6348 = vmatpush3.bf16.msra.mxu1 %v8967_v51 }
 0x3bb   : > { %1885 = vmatpush1.bf16.msra.mxu0 %v1668_v43  ;;  %v1654_v3 = vpop.permute.xlu1 %1653  ;;  %2022 = vmatprep.subr.bf16.mxu1 %v11298_v56 }
 0x3bc   : > { %v1656_v33 = vpop.permute.xlu0 %1655 }
 0x3bd   : > { %v1670_v17 = vsel %vm1665_vm6, %v1654_v3, %v1656_v33  ;;  %v1671_v45 = vsel %vm1665_vm6, %v1656_v33, %v9170_v59  ;;  %2014 = vmatmul.mubr.bf16.vlgmr.msra.gmra.mrb[4].mxu1 %v7086_v47  ;;  %v11313_v3 = vld [vmem:[#allocation83_spill] sm:$0xff] }
 0x3be   : > { %1897 = vmatprep.subr.bf16.mxu0 %v1671_v45  ;;  %1887 = vmatmul.mubr.bf16.vlgmr.msra.gmra.mrb[0].mxu0 %v7086_v47 }
 0x3bf   : > { %1898 = vmatpush1.bf16.msra.mxu0 %v1670_v17  ;;  %2023 = vmatpush1.bf16.msra.mxu1 %v9176_v63  ;;  %v1658_v39 = vpop.permute.xlu1 %1657 }
 0x3c0   : > { %v1660_v51 = vpop.permute.xlu0 %1659  ;;  %2024 = vmatprep.subr.bf16.mxu1 %v11298_v56  ;;  %6230 = vmatprep.mubr.msk.bf16.mxu0 %vm1807_vm7, %v7089_v46 }
 0x3c1   : > { %v1672_v23 = vsel %vm1665_vm6, %v1658_v39, %v1660_v51  ;;  %v1673_v15 = vsel %vm1665_vm6, %v1660_v51, %v9181_v0  ;;  %6231 = vmatprep.mubr.msk.bf16.mxu1 %vm1807_vm7, %v7089_v46  ;;  %v11314_v46 = vld [vmem:[#allocation84_spill] sm:$0xff] }
 0x3c2   : > { %1899 = vmatprep.subr.bf16.mxu0 %v1673_v15  ;;  %v11315_v15 = vld [vmem:[#allocation85_spill] sm:$0xff] }
 0x3c3   : > { %1900 = vmatpush1.bf16.msra.mxu0 %v1672_v23  ;;  %2025 = vmatpush1.bf16.msra.mxu1 %v9187_v27  ;;  %v1662_v59 = vpop.permute.xlu1 %1661  ;;  %v7091_v23 = vld [vmem:[#allocation8 + $0x10] ss:$24 sps:$4 sm:$0xff]  }
 0x3c4   : > { %v1664_v14 = vpop.permute.xlu0 %1663  ;;  %2026 = vmatprep.subr.bf16.mxu1 %v11298_v56 }
 0x3c5   : > { %v1674_v63 = vsel %vm1665_vm6, %v1662_v59, %v1664_v14  ;;  %v1675_v7 = vsel %vm1665_vm6, %v1664_v14, %v9204_v52 }
 0x3c6   : > { %1901 = vmatprep.subr.bf16.mxu0 %v1675_v7 }
 0x3c7   : > { %1902 = vmatpush1.bf16.msra.mxu0 %v1674_v63  ;;  %2027 = vmatpush1.bf16.msra.mxu1 %v9210_v53  ;;  %v1687_v0 = vpop.permute.xlu1 %1686 }
 0x3c8   : > { %v1689_v35 = vpop.permute.xlu0 %1688  ;;  %2028 = vmatprep.subr.bf16.mxu1 %v11298_v56 }
 0x3c9   : > { %v1707_v27 = vsel %vm1706_vm8, %v1687_v0, %v1689_v35  ;;  %v1708_v54 = vsel %vm1706_vm8, %v1689_v35, %v11299_v44 }
 0x3ca   : > { %1903 = vmatprep.subr.bf16.mxu0 %v1708_v54 }
 0x3cb   : > { %1904 = vmatpush1.bf16.msra.mxu0 %v1707_v27  ;;  %2029 = vmatpush1.bf16.msra.mxu1 %v11300_v30  ;;  %v1691_v37 = vpop.permute.xlu1 %1690 }
 0x3cc   : > { %v1693_v52 = vpop.permute.xlu0 %1692  ;;  %2030 = vmatprep.subr.bf16.mxu1 %v11298_v56 }
 0x3cd   : > { %v1709_v62 = vsel %vm1706_vm8, %v1691_v37, %v1693_v52  ;;  %v1710_v53 = vsel %vm1706_vm8, %v1693_v52, %v9238_v58 }
 0x3ce   : > { %1905 = vmatprep.subr.bf16.mxu0 %v1710_v53 }
 0x3cf   : > { %1906 = vmatpush1.bf16.msra.mxu0 %v1709_v62  ;;  %2031 = vmatpush1.bf16.msra.mxu1 %v11301_v32  ;;  %v1695_v34 = vpop.permute.xlu1 %1694 }
 0x3d0   : > { %v1697_v60 = vpop.permute.xlu0 %1696  ;;  %2032 = vmatprep.subr.bf16.mxu1 %v11298_v56 }
 0x3d1   : > { %v1711_v1 = vsel %vm1706_vm8, %v1695_v34, %v1697_v60  ;;  %v1712_v2 = vsel %vm1706_vm8, %v1697_v60, %v11302_v4 }
 0x3d2   : > { %1907 = vmatprep.subr.bf16.mxu0 %v1712_v2 }
 0x3d3   : > { %1908 = vmatpush1.bf16.msra.mxu0 %v1711_v1  ;;  %2033 = vmatpush1.bf16.msra.mxu1 %v11303_v22  ;;  %v1699_v13 = vpop.permute.xlu1 %1698  ;;  %v11316_v1 = vld [vmem:[#allocation57_spill] sm:$0xff]  ;;  %v7170_v22 = vld [vmem:[#allocation6 + $0x8] sm:$0x7] }
 0x3d4   : > { %v1701_v55 = vpop.permute.xlu0 %1700  ;;  %2034 = vmatprep.subr.bf16.mxu1 %v11298_v56  ;;  %v2083_v4 = vsub.s32 2, %v11316_v1  ;;  %v2087_v2 = vsub.s32 6, %v11316_v1 }
 0x3d5   : > { %v1713_v58 = vsel %vm1706_vm8, %v1699_v13, %v1701_v55  ;;  %v1714_v18 = vsel %vm1706_vm8, %v1701_v55, %v11304_v48 }
 0x3d6   : > { %1909 = vmatprep.subr.bf16.mxu0 %v1714_v18  ;;  %v2092_v13 = vrot.slane %v7170_v22, %v2083_v4  ;;  %v11322_v22 = vld [vmem:[#allocation62_spill] sm:$0xff] }
 0x3d7   : > { %1910 = vmatpush1.bf16.msra.mxu0 %v1713_v58  ;;  %2035 = vmatpush1.bf16.msra.mxu1 %v11305_v49  ;;  %v1703_v10 = vpop.permute.xlu1 %1702 }
 0x3d8   : > { %v1705_v5 = vpop.permute.xlu0 %1704  ;;  %2036 = vmatprep.subr.bf16.mxu1 %v11298_v56 }
 0x3d9   : > { %v1715_v21 = vsel %vm1706_vm8, %v1703_v10, %v1705_v5  ;;  %v1716_v31 = vsel %vm1706_vm8, %v1705_v5, %v11306_v41  ;;  %v7171_v10 = vld [vmem:[#allocation6] sm:$0x77] }
 0x3da   : > { %1911 = vmatprep.subr.bf16.mxu0 %v1716_v31  ;;  %v2088_v5 = vrot.slane %v7171_v10, %v2087_v2  ;;  %v2084_v41 = vrot.slane %v7171_v10, %v2083_v4  ;;  %v9617_v31 = vrot.slane %v2092_v13, %v2083_v4 }
 0x3db   : > { %1912 = vmatpush1.bf16.msra.mxu0 %v1715_v21  ;;  %2037 = vmatpush1.bf16.msra.mxu1 %v11307_v6  ;;  %v1728_v11 = vpop.permute.xlu1 %1727 }
 0x3dc   : > { %v1730_v40 = vpop.permute.xlu0 %1729  ;;  %2038 = vmatprep.subr.bf16.mxu1 %v11298_v56 }
 0x3dd   : > { %v1748_v36 = vsel %vm1747_vm9, %v1728_v11, %v1730_v40  ;;  %v1749_v50 = vsel %vm1747_vm9, %v1730_v40, %v9306_v29 }
 0x3de   : > { %1913 = vmatprep.subr.bf16.mxu0 %v1749_v50 }
 0x3df   : > { %1914 = vmatpush1.bf16.msra.mxu0 %v1748_v36  ;;  %2039 = vmatpush1.bf16.msra.mxu1 %v11308_v19  ;;  %v1732_v16 = vpop.permute.xlu1 %1731 }
 0x3e0   : > { %v1734_v8 = vpop.permute.xlu0 %1733  ;;  %2040 = vmatprep.subr.bf16.mxu1 %v11298_v56 }
 0x3e1   : > { %v1750_v61 = vsel %vm1747_vm9, %v1732_v16, %v1734_v8  ;;  %v1751_v28 = vsel %vm1747_vm9, %v1734_v8, %v11309_v26 }
 0x3e2   : > { %1915 = vmatprep.subr.bf16.mxu0 %v1751_v28 }
 0x3e3   : > { %1916 = vmatpush1.bf16.msra.mxu0 %v1750_v61  ;;  %2041 = vmatpush1.bf16.msra.mxu1 %v11310_v20  ;;  %v1736_v24 = vpop.permute.xlu1 %1735  ;;  %v9619_v20 = vrot.slane %v2088_v5, %v2083_v4 }
 0x3e4   : > { %v1738_v12 = vpop.permute.xlu0 %1737  ;;  %2042 = vmatprep.subr.bf16.mxu1 %v11298_v56 }
 0x3e5   : > { %v1752_v29 = vsel %vm1747_vm9, %v1736_v24, %v1738_v12  ;;  %v1753_v57 = vsel %vm1747_vm9, %v1738_v12, %v11311_v9  ;;  %v9621_v12 = vrot.slane %v2084_v41, %v2083_v4 }
 0x3e6   : > { %1917 = vmatprep.subr.bf16.mxu0 %v1753_v57 }
 0x3e7   : > { %1918 = vmatpush1.bf16.msra.mxu0 %v1752_v29  ;;  %2043 = vmatpush1.bf16.msra.mxu1 %v11312_v42  ;;  %v1740_v43 = vpop.permute.xlu1 %1739 }
 0x3e8   : > { %v1742_v38 = vpop.permute.xlu0 %1741  ;;  %2044 = vmatprep.subr.bf16.mxu1 %v11298_v56 }
 0x3e9   : > { %v1754_v47 = vsel %vm1747_vm9, %v1740_v43, %v1742_v38  ;;  %v1755_v33 = vsel %vm1747_vm9, %v1742_v38, %v11313_v3 }
 0x3ea   : > { %1919 = vmatprep.subr.bf16.mxu0 %v1755_v33 }
 0x3eb   : > { %1920 = vmatpush1.bf16.msra.mxu0 %v1754_v47  ;;  %2045 = vmatpush1.bf16.msra.mxu1 %v11314_v46  ;;  %v1744_v17 = vpop.permute.xlu1 %1743 }
 0x3ec   : > { %v1746_v45 = vpop.permute.xlu0 %1745  ;;  %2046 = vmatprep.subr.bf16.mxu1 %v11298_v56 }
 0x3ed   : > { %v1756_v39 = vsel %vm1747_vm9, %v1744_v17, %v1746_v45  ;;  %v1757_v51 = vsel %vm1747_vm9, %v1746_v45, %v9376_v25 }
 0x3ee   : > { %1921 = vmatprep.subr.bf16.mxu0 %v1757_v51 }
 0x3ef   : > { %1922 = vmatpush1.bf16.msra.mxu0 %v1756_v39  ;;  %2047 = vmatpush1.bf16.msra.mxu1 %v11315_v15  ;;  %v11317_v15 = vld [vmem:[#allocation59_spill] sm:$0xff] }
 0x3f2   : > { %1930 = vmatmul.mubr.bf16.vlgmr.msra.gmra.mrb[0].mxu0 %v7091_v23  ;;  %2055 = vmatmul.mubr.bf16.vlgmr.msra.gmra.mrb[8].mxu1 %v7091_v23 }
 0x3fc   : > { %v1776_v54 = vpop.permute.xlu1 %1775 }
 0x3fd   : > { %v1771_v27 = vpop.permute.xlu0 %1770 }
 0x459   : > { %v6327_v59 = vpop.f32.mrb[0].mxu1 }
 0x45a   : > { %v6328_v14 = vpop.f32.mrb[1].mxu1 }
 0x45b   : > { %v6329_v63 = vadd.f32 %v6328_v14, %v6327_v59  ;;  %v6330_v7 = vpop.f32.mrb[2].mxu1 }
 0x45c   : > { %v6331_v0 = vpop.f32.mrb[3].mxu1 }
 0x45d   : > { %v6332_v35 = vadd.f32 %v6331_v0, %v6330_v7  ;;  %v1975_v25 = vadd.f32 %v6329_v63, %v1771_v27  ;;  %v11318_v63 = vld [vmem:[#allocation61_spill] sm:$0xff] }
 0x45f   : > { %v1978_v34 = vadd.f32 %v6332_v35, %v1776_v54 }
 0x490   : > { %v6349_v44 = vpop.f32.mrb[4].mxu1 }
 0x491   : > { %v6350_v30 = vpop.f32.mrb[5].mxu1 }
 0x492   : > { %v6351_v37 = vadd.f32 %v6350_v30, %v6349_v44  ;;  %v6352_v52 = vpop.f32.mrb[6].mxu1 }
 0x493   : > { %v6353_v62 = vpop.f32.mrb[7].mxu1 }
 0x494   : > { %v6354_v53 = vadd.f32 %v6353_v62, %v6352_v52  ;;  %v2016_v32 = vadd.f32 %v6351_v37, %v1975_v25  ;;  %v11320_v25 = vld [vmem:[#allocation67_spill] sm:$0xff] }
 0x496   : > { %v2019_v60 = vadd.f32 %v6354_v53, %v1978_v34  ;;  %v11321_v34 = vld [vmem:[#allocation68_spill] sm:$0xff] }
 0x4c5   : > { %v1931_v55 = vpop.f32.mrb[0].mxu0  ;;  %v2056_v58 = vpop.f32.mrb[8].mxu1 }
 0x4c6   : > { %v6751_v48 = vadd.f32 %v1931_v55, %v1771_v27  ;;  %v2057_v18 = vadd.f32 %v2056_v58, %v2016_v32  ;;  %v1933_v49 = vpop.f32.mrb[1].mxu0  ;;  %v2058_v21 = vpop.f32.mrb[9].mxu1 }
 0x4c7   : > { %v6752_v6 = vadd.f32 %v1933_v49, %v1771_v27  ;;  %v1935_v11 = vpop.f32.mrb[2].mxu0  ;;  %v2059_v40 = vpop.f32.mrb[10].mxu1  ;;  %v2116_v49 = vld [vmem:[#allocation12] sm:$0xff] }
 0x4c8   : > { %vm2063_vm10 = vcmp.gt.f32.partialorder %v6751_v48, 0.0  ;;  %v2069_v36 = vmul.f32 0.1, %v6751_v48  ;;  %vm2065_vm11 = vcmp.gt.f32.partialorder %v2057_v18, 0.0  ;;  %v2071_v50 = vmul.f32 0.1, %v2057_v18 }
 0x4c9   : > { %vm2064_vm12 = vcmp.gt.f32.partialorder %v6752_v6, 0.0  ;;  %v2070_v19 = vmul.f32 0.1, %v6752_v6  ;;  %v6753_v16 = vadd.f32 %v1935_v11, %v1776_v54  ;;  %v2060_v8 = vadd.f32 %v2059_v40, %v2019_v60  ;;  %v1937_v61 = vpop.f32.mrb[3].mxu0  ;;  %v2061_v26 = vpop.f32.mrb[11].mxu1 }
 0x4ca   : > { %v2077_v28 = vsel %vm2065_vm11, %v2057_v18, %v2071_v50  ;;  %v6754_v24 = vadd.f32 %v1937_v61, %v1776_v54  ;;  %v2075_v9 = vsel %vm2063_vm10, %v6751_v48, %v2069_v36  ;;  %v11319_v54 = vld [vmem:[#allocation60_spill] sm:$0xff] }
 0x4cb   : > { %v2076_v29 = vsel %vm2064_vm12, %v6752_v6, %v2070_v19  ;;  %vm2066_vm13 = vcmp.gt.f32.partialorder %v6753_v16, 0.0  ;;  %v2072_v57 = vmul.f32 0.1, %v6753_v16  ;;  %vm2068_vm14 = vcmp.gt.f32.partialorder %v2060_v8, 0.0  ;;  %v9699_v48 = vld [vmem:[#allocation11 + $0x4] ss:$8 sps:$4 sm:$0xff]  }
 0x4cc   : > { %v2074_v42 = vmul.f32 0.1, %v2060_v8  ;;  %v9625_v43 = vmul.f32 %v9617_v31, %v2077_v28  ;;  %vm2067_vm15 = vcmp.gt.f32.partialorder %v6754_v24, 0.0  ;;  %v2073_v38 = vmul.f32 0.1, %v6754_v24  ;;  %6234 = vmatprep.mubr.msk.bf16.mxu1 %vm1342_vm1, %v9699_v48  ;;  %v2117_v18 = vld [vmem:[#allocation12 + $0x8] sm:$0xff] }
 0x4cd   : > { %v9628_v47 = vmul.f32 %v9619_v20, %v2076_v29  ;;  %v2078_v3 = vsel %vm2066_vm13, %v6753_v16, %v2072_v57  ;;  %v9631_v46 = vmul.f32 %v9621_v12, %v2075_v9 }
 0x4ce   : > { %v2080_v33 = vsel %vm2068_vm14, %v2060_v8, %v2074_v42  ;;  %v9634_v17 = vmul.f32 %v9621_v12, %v2078_v3  ;;  %v2079_v39 = vsel %vm2067_vm15, %v6754_v24, %v2073_v38  ;;  %v2120_v59 = vmul.f32 %v9625_v43, %v11317_v15 }
 0x4cf   : > { %v9637_v45 = vmul.f32 %v9617_v31, %v2080_v33  ;;  %v9640_v51 = vmul.f32 %v9619_v20, %v2079_v39  ;;  %v2119_v7 = vmul.f32 %v9628_v47, %v11318_v63  ;;  %v2118_v52 = vmul.f32 %v9631_v46, %v11319_v54 }
 0x4d0   : > { %v9644_v23 = vpack.c.bf16 %v9634_v17, %v9631_v46  ;;  %v2121_v30 = vmul.f32 %v9634_v17, %v11319_v54  ;;  %v2131_v32 = vmul.f32 %v9628_v47, %v11320_v25  ;;  %v2133_v60 = vmul.f32 %v9634_v17, %v11321_v34 }
 0x4d1   : > { %v2123_v14 = vmul.f32 %v9637_v45, %v11317_v15  ;;  %v2122_v0 = vmul.f32 %v9640_v51, %v11318_v63  ;;  %v9660_v44 = vpack.c.bf16 %v9640_v51, %v9628_v47  ;;  %v9668_v37 = vpack.c.bf16 %v9637_v45, %v9625_v43 }
 0x4d2   : > { %2163 = vrot.lane.b32.xlu0 %v9644_v23, %s7902_s25  ;;  %v2134_v62 = vmul.f32 %v9640_v51, %v11320_v25  ;;  %v2124_v53 = vpack.c.bf16 %v2121_v30, %v2118_v52  ;;  %v2130_v4 = vmul.f32 %v9631_v46, %v11321_v34  ;;  %v2135_v13 = vmul.f32 %v9637_v45, %v11322_v22 }
 0x4d3   : > { %v2126_v35 = vpack.c.bf16 %v2123_v14, %v2120_v59  ;;  %v2125_v27 = vpack.c.bf16 %v2122_v0, %v2119_v7  ;;  %v2132_v55 = vmul.f32 %v9625_v43, %v11322_v22 }
 0x4d4   : > { %v2137_v1 = vpack.c.bf16 %v2134_v62, %v2131_v32  ;;  %v2136_v2 = vpack.c.bf16 %v2133_v60, %v2130_v4  ;;  %v7094_v60 = vld [vmem:[#allocation11] ss:$8 sps:$4 sm:$0xff]  }
 0x4d5   : > { %2140 = vrot.lane.b32.xlu1 %v2126_v35, %s7900_s30  ;;  %v2138_v58 = vpack.c.bf16 %v2135_v13, %v2132_v55 }
 0x4d6   : > { %2146 = vrot.lane.b32.xlu0 %v2125_v27, %s7901_s2 }
 0x4d9   : > { %2165 = vrot.lane.b32.xlu1 %v9660_v44, %s7902_s25 }
 0x4da   : > { %2159 = vrot.lane.b32.xlu0 %v9668_v37, %s7903_s6 }
 0x4dd   : > { %2144 = vrot.lane.b32.xlu1 %v2124_v53, %s7901_s2 }
 0x4de   : > { %2184 = vrot.lane.b32.xlu0 %v2137_v1, %s7904_s9 }
 0x4e1   : > { %2182 = vrot.lane.b32.xlu1 %v2136_v2, %s7904_s9 }
 0x4e2   : > { %2198 = vrot.lane.b32.xlu0 %v2124_v53, %s7906_s21 }
 0x4e5   : > { %2178 = vrot.lane.b32.xlu1 %v2138_v58, %s7905_s0 }
 0x4e6   : > { %2196 = vrot.lane.b32.xlu0 %v2126_v35, %s7907_s26 }
 0x4e9   : > { %2200 = vrot.lane.b32.xlu1 %v2125_v27, %s7906_s21 }
 0x4ea   : > { %2216 = vrot.lane.b32.xlu0 %v2138_v58, %s7908_s8 }
 0x4ed   : > { %2214 = vrot.lane.b32.xlu1 %v2137_v1, %s7908_s8 }
 0x4ee   : > { %2230 = vrot.lane.b32.xlu0 %v2125_v27, %s7900_s30 }
 0x4f1   : > { %2212 = vrot.lane.b32.xlu1 %v2136_v2, %s7908_s8 }
 0x4f2   : > { %2238 = vrot.lane.b32.xlu0 %v9660_v44, %s7903_s6 }
 0x4f5   : > { %2228 = vrot.lane.b32.xlu1 %v2124_v53, %s7900_s30 }
 0x4f6   : > { %2246 = vrot.lane.b32.xlu0 %v2137_v1, %s7905_s0 }
 0x4f9   : > { %2236 = vrot.lane.b32.xlu1 %v9644_v23, %s7903_s6 }
 0x4fa   : > { %2148 = vrot.lane.b32.xlu0 %v2126_v35, %s7901_s2 }
 0x4fd   : > { %2244 = vrot.lane.b32.xlu1 %v2136_v2, %s7905_s0 }
 0x4fe   : > { %2186 = vrot.lane.b32.xlu0 %v2138_v58, %s7904_s9 }
 0x501   : > { %2167 = vrot.lane.b32.xlu1 %v9668_v37, %s7902_s25 }
 0x502   : > { %2222 = vrot.lane.b32.xlu0 %v2136_v2, %s7909_s3 }
 0x505   : > { %2202 = vrot.lane.b32.xlu1 %v2126_v35, %s7906_s21 }
 0x506   : > { %2259 = vperm.xlu0 %7081, %v2117_v18  }
 0x509   : > { %2254 = vperm.xlu1 %7082, %v2116_v49  }
 0x544   : > { %v2164_v10 = vpop.permute.xlu0 %2163 }
 0x547   : > { %v2141_v5 = vpop.permute.xlu1 %2140 }
 0x548   : > { %v2147_v21 = vpop.permute.xlu0 %2146 }
 0x54b   : > { %v2166_v41 = vpop.permute.xlu1 %2165 }
 0x54c   : > { %v2160_v6 = vpop.permute.xlu0 %2159  ;;  %v2169_v19 = vsel %vm1342_vm1, %v2164_v10, %v2166_v41 }
 0x54d   : > { %v9721_v61 = vsel %vm1342_vm1, %v2160_v6, %v2164_v10 }
 0x54f   : > { %v2145_v11 = vpop.permute.xlu1 %2144 }
 0x550   : > { %v2150_v40 = vsel %vm1245_vm0, %v2145_v11, %v2147_v21  ;;  %v9716_v36 = vsel %vm1245_vm0, %v2141_v5, %v2145_v11  ;;  %v2185_v50 = vpop.permute.xlu0 %2184 }
 0x551   : > { %2274 = vmatprep.subr.bf16.mxu1 %v2150_v40 }
 0x552   : > { %2275 = vmatpush1.bf16.msra.mxu1 %v9716_v36 }
 0x553   : > { %2276 = vmatprep.subr.bf16.mxu1 %v2169_v19  ;;  %v2183_v16 = vpop.permute.xlu1 %2182 }
 0x554   : > { %v2199_v8 = vpop.permute.xlu0 %2198  ;;  %v2188_v26 = vsel %vm1439_vm2, %v2183_v16, %v2185_v50 }
 0x556   : > { %2277 = vmatpush1.bf16.msra.mxu1 %v9721_v61 }
 0x557   : > { %2278 = vmatprep.subr.bf16.mxu1 %v2188_v26  ;;  %v2179_v28 = vpop.permute.xlu1 %2178 }
 0x558   : > { %v9726_v24 = vsel %vm1439_vm2, %v2179_v28, %v2183_v16  ;;  %v2197_v29 = vpop.permute.xlu0 %2196 }
 0x559   : > { %v2210_v42 = vsel %vm1521_vm3, %v2197_v29, %v2199_v8 }
 0x55a   : > { %2279 = vmatpush1.bf16.msra.mxu1 %v9726_v24 }
 0x55b   : > { %v2201_v9 = vpop.permute.xlu1 %2200 }
 0x55c   : > { %v2204_v57 = vsel %vm1521_vm3, %v2199_v8, %v2201_v9  ;;  %v2217_v38 = vpop.permute.xlu0 %2216 }
 0x55d   : > { %2280 = vmatprep.subr.bf16.mxu1 %v2204_v57 }
 0x55e   : > { %2281 = vmatpush1.bf16.msra.mxu1 %v2210_v42 }
 0x55f   : > { %2282 = vmatprep.subr.bf16.mxu1 %v9660_v44  ;;  %v2215_v3 = vpop.permute.xlu1 %2214 }
 0x560   : > { %v2231_v33 = vpop.permute.xlu0 %2230  ;;  %v2219_v39 = vsel %vm1593_vm4, %v2215_v3, %v2217_v38 }
 0x561   : > { %v2233_v0 = vsel %vm1665_vm6, %v2231_v33, %v2141_v5 }
 0x562   : > { %2283 = vmatpush1.bf16.msra.mxu1 %v9644_v23 }
 0x563   : > { %2284 = vmatprep.subr.bf16.mxu1 %v2219_v39  ;;  %v2213_v59 = vpop.permute.xlu1 %2212 }
 0x564   : > { %v2218_v14 = vsel %vm1593_vm4, %v2213_v59, %v2215_v3  ;;  %v2239_v7 = vpop.permute.xlu0 %2238 }
 0x565   : > { %v2241_v44 = vsel %vm1706_vm8, %v2239_v7, %v2160_v6 }
 0x566   : > { %2285 = vmatpush1.bf16.msra.mxu1 %v2218_v14 }
 0x567   : > { %2286 = vmatprep.subr.bf16.mxu1 %v2233_v0  ;;  %v2229_v35 = vpop.permute.xlu1 %2228 }
 0x568   : > { %v2232_v27 = vsel %vm1665_vm6, %v2229_v35, %v2231_v33  ;;  %v2247_v30 = vpop.permute.xlu0 %2246 }
 0x569   : > { %v2249_v62 = vsel %vm1747_vm9, %v2247_v30, %v2179_v28 }
 0x56a   : > { %2287 = vmatpush1.bf16.msra.mxu1 %v2232_v27 }
 0x56b   : > { %2288 = vmatprep.subr.bf16.mxu1 %v2241_v44  ;;  %v2237_v23 = vpop.permute.xlu1 %2236 }
 0x56c   : > { %v2240_v52 = vsel %vm1706_vm8, %v2237_v23, %v2239_v7  ;;  %v2149_v1 = vpop.permute.xlu0 %2148 }
 0x56d   : > { %v2151_v4 = vsel %vm1245_vm0, %v2147_v21, %v2149_v1 }
 0x56e   : > { %2289 = vmatpush1.bf16.msra.mxu1 %v2240_v52 }
 0x56f   : > { %2290 = vmatprep.subr.bf16.mxu1 %v2249_v62  ;;  %v2245_v53 = vpop.permute.xlu1 %2244 }
 0x570   : > { %v2248_v32 = vsel %vm1747_vm9, %v2245_v53, %v2247_v30  ;;  %v2187_v55 = vpop.permute.xlu0 %2186 }
 0x571   : > { %v2189_v58 = vsel %vm1439_vm2, %v2185_v50, %v2187_v55 }
 0x572   : > { %2291 = vmatpush1.bf16.msra.mxu1 %v2248_v32 }
 0x573   : > { %2317 = vmatprep.subr.bf16.mxu1 %v11298_v56  ;;  %v2168_v2 = vpop.permute.xlu1 %2167 }
 0x574   : > { %v2170_v13 = vsel %vm1342_vm1, %v2166_v41, %v2168_v2 }
 0x575   : > { %2307 = vmatmul.mubr.bf16.vlgmr.msra.gmra.mrb[12].mxu1 %v7094_v60 }
 0x576   : > { %2318 = vmatpush1.bf16.msra.mxu1 %v2151_v4  ;;  %6235 = vmatprep.mubr.msk.bf16.mxu1 %vm1342_vm1, %v9699_v48  ;;  %v2223_v48 = vpop.permute.xlu0 %2222 }
 0x577   : > { %2319 = vmatprep.subr.bf16.mxu1 %v11298_v56  ;;  %v2203_v18 = vpop.permute.xlu1 %2202  ;;  %v2226_v10 = vsel %vm1624_vm5, %v2217_v38, %v2223_v48 }
 0x578   : > { %v2205_v49 = vsel %vm1521_vm3, %v2201_v9, %v2203_v18 }
 0x57a   : > { %2320 = vmatpush1.bf16.msra.mxu1 %v2170_v13 }
 0x57b   : > { %2321 = vmatprep.subr.bf16.mxu1 %v11298_v56 }
 0x57e   : > { %2322 = vmatpush1.bf16.msra.mxu1 %v2189_v58 }
 0x57f   : > { %2323 = vmatprep.subr.bf16.mxu1 %v11298_v56 }
 0x582   : > { %2324 = vmatpush1.bf16.msra.mxu1 %v2205_v49 }
 0x583   : > { %2325 = vmatprep.subr.bf16.mxu1 %v11298_v56 }
 0x585   : > { %v2260_v6 = vpop.permute.xlu0 %2259 }
 0x586   : > { %2326 = vmatpush1.bf16.msra.mxu1 %v9668_v37 }
 0x587   : > { %2327 = vmatprep.subr.bf16.mxu1 %v11298_v56 }
 0x588   : > { %v2255_v37 = vpop.permute.xlu1 %2254 }
 0x58a   : > { %2328 = vmatpush1.bf16.msra.mxu1 %v2226_v10 }
 0x58b   : > { %2329 = vmatprep.subr.bf16.mxu1 %v11298_v56 }
 0x58e   : > { %2330 = vmatpush1.bf16.msra.mxu1 %v9716_v36 }
 0x58f   : > { %2331 = vmatprep.subr.bf16.mxu1 %v11298_v56 }
 0x592   : > { %2332 = vmatpush1.bf16.msra.mxu1 %v9721_v61 }
 0x593   : > { %2333 = vmatprep.subr.bf16.mxu1 %v11298_v56 }
 0x596   : > { %2334 = vmatpush1.bf16.msra.mxu1 %v9726_v24 }
 0x597   : > { %2585 = vmatprep.subr.bf16.mxu1 %v11298_v56 }
 0x599   : > { %2350 = vmatmul.mubr.bf16.vlgmr.msra.gmra.mrb[16].mxu1 %v7094_v60 }
 0x648   : > { %v2308_v5 = vpop.f32.mrb[12].mxu1 }
 0x649   : > { %v2309_v21 = vadd.f32 %v2308_v5, %v2255_v37  ;;  %v2310_v41 = vpop.f32.mrb[13].mxu1 }
 0x64a   : > { %v2311_v11 = vadd.f32 %v2310_v41, %v2255_v37  ;;  %v2312_v40 = vpop.f32.mrb[14].mxu1 }
 0x64b   : > { %vm2358_vm7 = vcmp.gt.f32.partialorder %v2309_v21, 0.0  ;;  %v2364_v36 = vmul.f32 0.1, %v2309_v21  ;;  %v2313_v50 = vadd.f32 %v2312_v40, %v2260_v6  ;;  %v2314_v19 = vpop.f32.mrb[15].mxu1 }
 0x64c   : > { %vm2359_vm10 = vcmp.gt.f32.partialorder %v2311_v11, 0.0  ;;  %v2365_v16 = vmul.f32 0.1, %v2311_v11  ;;  %v2315_v8 = vadd.f32 %v2314_v19, %v2260_v6  ;;  %v2384_v19 = vld [vmem:[#allocation15] sm:$0xff] }
 0x64d   : > { %v2370_v61 = vsel %vm2358_vm7, %v2309_v21, %v2364_v36  ;;  %vm2361_vm11 = vcmp.gt.f32.partialorder %v2313_v50, 0.0  ;;  %v2367_v26 = vmul.f32 0.1, %v2313_v50  ;;  %v7095_v36 = vld [vmem:[#allocation14 + $0x4] ss:$8 sps:$4 sm:$0xff]  }
 0x64e   : > { %v2376_v28 = vmul.f32 %v2370_v61, %v9621_v12  ;;  %v2371_v24 = vsel %vm2359_vm10, %v2311_v11, %v2365_v16  ;;  %vm2362_vm12 = vcmp.gt.f32.partialorder %v2315_v8, 0.0  ;;  %v2368_v29 = vmul.f32 0.1, %v2315_v8  ;;  %6239 = vmatprep.mubr.msk.bf16.mxu1 %vm1342_vm1, %v7095_v36  ;;  %6238 = vmatprep.mubr.msk.bf16.mxu0 %vm1342_vm1, %v7095_v36 }
 0x64f   : > { %v2377_v9 = vmul.f32 %v2371_v24, %v9619_v20  ;;  %v2373_v57 = vsel %vm2361_vm11, %v2313_v50, %v2367_v26  ;;  %v2385_v50 = vld [vmem:[#allocation15 + $0x8] sm:$0xff] }
 0x650   : > { %v2379_v42 = vmul.f32 %v2373_v57, %v9621_v12  ;;  %v2374_v38 = vsel %vm2362_vm12, %v2315_v8, %v2368_v29  ;;  %v2386_v33 = vmul.f32 %v2376_v28, %v11319_v54  ;;  %v2398_v39 = vmul.f32 %v2376_v28, %v11321_v34 }
 0x651   : > { %v2380_v3 = vmul.f32 %v2374_v38, %v9619_v20  ;;  %v2387_v7 = vmul.f32 %v2377_v9, %v11318_v63  ;;  %v2399_v44 = vmul.f32 %v2377_v9, %v11320_v25 }
 0x652   : > { %v9768_v59 = vpack.c.bf16 %v2379_v42, %v2376_v28  ;;  %v2389_v14 = vmul.f32 %v2379_v42, %v11319_v54  ;;  %v2401_v0 = vmul.f32 %v2379_v42, %v11321_v34 }
 0x653   : > { %v9773_v35 = vpack.c.bf16 %v2380_v3, %v2377_v9  ;;  %v2390_v27 = vmul.f32 %v2380_v3, %v11318_v63  ;;  %v2402_v30 = vmul.f32 %v2380_v3, %v11320_v25 }
 0x654   : > { %2431 = vrot.lane.b32.xlu1 %v9768_v59, %s7902_s25  ;;  %v2392_v23 = vpack.c.bf16 %v2389_v14, %v2386_v33  ;;  %v2404_v52 = vpack.c.bf16 %v2401_v0, %v2398_v39 }
 0x655   : > { %2433 = vrot.lane.b32.xlu0 %v9773_v35, %s7902_s25  ;;  %v2393_v62 = vpack.c.bf16 %v2390_v27, %v2387_v7  ;;  %v2405_v53 = vpack.c.bf16 %v2402_v30, %v2399_v44 }
 0x658   : > { %2412 = vrot.lane.b32.xlu1 %v2392_v23, %s7901_s2 }
 0x659   : > { %2414 = vrot.lane.b32.xlu0 %v2393_v62, %s7901_s2 }
 0x65c   : > { %2450 = vrot.lane.b32.xlu1 %v2404_v52, %s7904_s9 }
 0x65d   : > { %2452 = vrot.lane.b32.xlu0 %v2405_v53, %s7904_s9 }
 0x66c   : > { %v2351_v32 = vpop.f32.mrb[16].mxu1 }
 0x66d   : > { %v2352_v60 = vadd.f32 %v2351_v32, %v2255_v37  ;;  %v2353_v1 = vpop.f32.mrb[17].mxu1 }
 0x66e   : > { %v2354_v4 = vpop.f32.mrb[18].mxu1 }
 0x66f   : > { %vm2360_vm13 = vcmp.gt.f32.partialorder %v2352_v60, 0.0  ;;  %v2366_v2 = vmul.f32 0.1, %v2352_v60  ;;  %v2355_v13 = vadd.f32 %v2354_v4, %v2260_v6  ;;  %v2356_v55 = vpop.f32.mrb[19].mxu1 }
 0x671   : > { %v2372_v58 = vsel %vm2360_vm13, %v2352_v60, %v2366_v2  ;;  %vm2363_vm14 = vcmp.gt.f32.partialorder %v2355_v13, 0.0  ;;  %v2369_v18 = vmul.f32 0.1, %v2355_v13 }
 0x672   : > { %v2378_v49 = vmul.f32 %v2372_v58, %v9617_v31 }
 0x673   : > { %v2375_v48 = vsel %vm2363_vm14, %v2355_v13, %v2369_v18 }
 0x674   : > { %v2381_v10 = vmul.f32 %v2375_v48, %v9617_v31  ;;  %v2388_v5 = vmul.f32 %v2378_v49, %v11317_v15  ;;  %v2400_v41 = vmul.f32 %v2378_v49, %v11322_v22 }
 0x676   : > { %v9789_v21 = vpack.c.bf16 %v2381_v10, %v2378_v49  ;;  %v2391_v37 = vmul.f32 %v2381_v10, %v11317_v15  ;;  %v2403_v11 = vmul.f32 %v2381_v10, %v11322_v22 }
 0x678   : > { %2435 = vrot.lane.b32.xlu0 %v9789_v21, %s7902_s25  ;;  %2427 = vrot.lane.b32.xlu1 %v9789_v21, %s7903_s6  ;;  %v2394_v6 = vpack.c.bf16 %v2391_v37, %v2388_v5  ;;  %v2406_v40 = vpack.c.bf16 %v2403_v11, %v2400_v41 }
 0x67c   : > { %2416 = vrot.lane.b32.xlu0 %v2394_v6, %s7901_s2  ;;  %2408 = vrot.lane.b32.xlu1 %v2394_v6, %s7900_s30 }
 0x680   : > { %2468 = vrot.lane.b32.xlu0 %v2393_v62, %s7906_s21  ;;  %2466 = vrot.lane.b32.xlu1 %v2392_v23, %s7906_s21 }
 0x684   : > { %2454 = vrot.lane.b32.xlu0 %v2406_v40, %s7904_s9  ;;  %2446 = vrot.lane.b32.xlu1 %v2406_v40, %s7905_s0 }
 0x688   : > { %2470 = vrot.lane.b32.xlu0 %v2394_v6, %s7906_s21  ;;  %2464 = vrot.lane.b32.xlu1 %v2394_v6, %s7907_s26 }
 0x68c   : > { %2484 = vrot.lane.b32.xlu0 %v2406_v40, %s7908_s8  ;;  %2482 = vrot.lane.b32.xlu1 %v2405_v53, %s7908_s8 }
 0x690   : > { %2490 = vrot.lane.b32.xlu0 %v2404_v52, %s7909_s3  ;;  %2480 = vrot.lane.b32.xlu1 %v2404_v52, %s7908_s8 }
 0x694   : > { %2496 = vrot.lane.b32.xlu0 %v2392_v23, %s7900_s30  ;;  %2498 = vrot.lane.b32.xlu1 %v2393_v62, %s7900_s30 }
 0x698   : > { %2504 = vrot.lane.b32.xlu0 %v9768_v59, %s7903_s6  ;;  %2506 = vrot.lane.b32.xlu1 %v9773_v35, %s7903_s6 }
 0x69c   : > { %2512 = vrot.lane.b32.xlu0 %v2404_v52, %s7905_s0  ;;  %2514 = vrot.lane.b32.xlu1 %v2405_v53, %s7905_s0 }
 0x6a0   : > { %2527 = vperm.xlu0 %7081, %v2385_v50   ;;  %2522 = vperm.xlu1 %7082, %v2384_v19   ;;  %v7097_v19 = vld [vmem:[#allocation14] ss:$8 sps:$4 sm:$0xff]  }
 0x6c6   : > { %v2432_v16 = vpop.permute.xlu1 %2431 }
 0x6c7   : > { %v2434_v8 = vpop.permute.xlu0 %2433 }
 0x6c8   : > { %v2437_v39 = vsel %vm1342_vm1, %v2432_v16, %v2434_v8 }
 0x6ca   : > { %v2413_v61 = vpop.permute.xlu1 %2412 }
 0x6cb   : > { %v2415_v26 = vpop.permute.xlu0 %2414 }
 0x6cc   : > { %v2418_v28 = vsel %vm1245_vm0, %v2413_v61, %v2415_v26 }
 0x6cd   : > { %2542 = vmatprep.subr.bf16.mxu0 %v2418_v28 }
 0x6ce   : > { %v2451_v24 = vpop.permute.xlu1 %2450 }
 0x6cf   : > { %v2453_v29 = vpop.permute.xlu0 %2452 }
 0x6d0   : > { %v2456_v44 = vsel %vm1439_vm2, %v2451_v24, %v2453_v29 }
 0x6ea   : > { %v2436_v9 = vpop.permute.xlu0 %2435  ;;  %v2428_v57 = vpop.permute.xlu1 %2427 }
 0x6eb   : > { %v2438_v0 = vsel %vm1342_vm1, %v2434_v8, %v2436_v9  ;;  %v2443_v27 = vsel %vm1342_vm1, %v2428_v57, %v2432_v16 }
 0x6ee   : > { %v2417_v42 = vpop.permute.xlu0 %2416  ;;  %v2409_v38 = vpop.permute.xlu1 %2408 }
 0x6ef   : > { %v2419_v3 = vsel %vm1245_vm0, %v2415_v26, %v2417_v42  ;;  %v2424_v33 = vsel %vm1245_vm0, %v2409_v38, %v2413_v61 }
 0x6f0   : > { %2543 = vmatpush1.bf16.msra.mxu0 %v2424_v33  ;;  %2586 = vmatpush1.bf16.msra.mxu1 %v2419_v3 }
 0x6f1   : > { %2544 = vmatprep.subr.bf16.mxu0 %v2437_v39  ;;  %2587 = vmatprep.subr.bf16.mxu1 %v11298_v56 }
 0x6f2   : > { %v2469_v14 = vpop.permute.xlu0 %2468  ;;  %v2467_v7 = vpop.permute.xlu1 %2466 }
 0x6f3   : > { %v2472_v53 = vsel %vm1521_vm3, %v2467_v7, %v2469_v14 }
 0x6f4   : > { %2545 = vmatpush1.bf16.msra.mxu0 %v2443_v27  ;;  %2588 = vmatpush1.bf16.msra.mxu1 %v2438_v0 }
 0x6f5   : > { %2546 = vmatprep.subr.bf16.mxu0 %v2456_v44  ;;  %2589 = vmatprep.subr.bf16.mxu1 %v11298_v56 }
 0x6f6   : > { %v2455_v30 = vpop.permute.xlu0 %2454  ;;  %v2447_v23 = vpop.permute.xlu1 %2446 }
 0x6f7   : > { %v2457_v52 = vsel %vm1439_vm2, %v2453_v29, %v2455_v30  ;;  %v2462_v62 = vsel %vm1439_vm2, %v2447_v23, %v2451_v24 }
 0x6f8   : > { %2547 = vmatpush1.bf16.msra.mxu0 %v2462_v62  ;;  %2590 = vmatpush1.bf16.msra.mxu1 %v2457_v52 }
 0x6f9   : > { %2548 = vmatprep.subr.bf16.mxu0 %v2472_v53  ;;  %2591 = vmatprep.subr.bf16.mxu1 %v11298_v56 }
 0x6fa   : > { %v2471_v32 = vpop.permute.xlu0 %2470  ;;  %v2465_v60 = vpop.permute.xlu1 %2464 }
 0x6fb   : > { %v2473_v1 = vsel %vm1521_vm3, %v2469_v14, %v2471_v32  ;;  %v2478_v4 = vsel %vm1521_vm3, %v2465_v60, %v2467_v7 }
 0x6fc   : > { %2549 = vmatpush1.bf16.msra.mxu0 %v2478_v4  ;;  %2592 = vmatpush1.bf16.msra.mxu1 %v2473_v1 }
 0x6fd   : > { %2550 = vmatprep.subr.bf16.mxu0 %v9773_v35  ;;  %2593 = vmatprep.subr.bf16.mxu1 %v11298_v56 }
 0x6fe   : > { %v2485_v2 = vpop.permute.xlu0 %2484  ;;  %v2483_v13 = vpop.permute.xlu1 %2482 }
 0x6ff   : > { %v2487_v55 = vsel %vm1593_vm4, %v2483_v13, %v2485_v2 }
 0x700   : > { %2551 = vmatpush1.bf16.msra.mxu0 %v9768_v59  ;;  %2594 = vmatpush1.bf16.msra.mxu1 %v9789_v21 }
 0x701   : > { %2552 = vmatprep.subr.bf16.mxu0 %v2487_v55  ;;  %2595 = vmatprep.subr.bf16.mxu1 %v11298_v56 }
 0x702   : > { %v2491_v58 = vpop.permute.xlu0 %2490  ;;  %v2481_v18 = vpop.permute.xlu1 %2480 }
 0x703   : > { %v2494_v49 = vsel %vm1624_vm5, %v2485_v2, %v2491_v58  ;;  %v2486_v48 = vsel %vm1593_vm4, %v2481_v18, %v2483_v13 }
 0x704   : > { %2553 = vmatpush1.bf16.msra.mxu0 %v2486_v48  ;;  %2596 = vmatpush1.bf16.msra.mxu1 %v2494_v49 }
 0x705   : > { %2597 = vmatprep.subr.bf16.mxu1 %v11298_v56 }
 0x706   : > { %v2497_v35 = vpop.permute.xlu0 %2496  ;;  %v2499_v10 = vpop.permute.xlu1 %2498 }
 0x707   : > { %v2501_v5 = vsel %vm1665_vm6, %v2499_v10, %v2409_v38  ;;  %v2500_v59 = vsel %vm1665_vm6, %v2497_v35, %v2499_v10 }
 0x708   : > { %2554 = vmatprep.subr.bf16.mxu0 %v2501_v5  ;;  %2598 = vmatpush1.bf16.msra.mxu1 %v2424_v33 }
 0x709   : > { %2555 = vmatpush1.bf16.msra.mxu0 %v2500_v59  ;;  %2599 = vmatprep.subr.bf16.mxu1 %v11298_v56 }
 0x70a   : > { %v2505_v21 = vpop.permute.xlu0 %2504  ;;  %v2507_v37 = vpop.permute.xlu1 %2506 }
 0x70b   : > { %v2509_v41 = vsel %vm1706_vm8, %v2507_v37, %v2428_v57  ;;  %v2508_v11 = vsel %vm1706_vm8, %v2505_v21, %v2507_v37 }
 0x70c   : > { %2556 = vmatprep.subr.bf16.mxu0 %v2509_v41  ;;  %2600 = vmatpush1.bf16.msra.mxu1 %v2443_v27 }
 0x70d   : > { %2557 = vmatpush1.bf16.msra.mxu0 %v2508_v11  ;;  %2601 = vmatprep.subr.bf16.mxu1 %v11298_v56 }
 0x70e   : > { %v2513_v6 = vpop.permute.xlu0 %2512  ;;  %v2515_v40 = vpop.permute.xlu1 %2514 }
 0x70f   : > { %v2517_v36 = vsel %vm1747_vm9, %v2515_v40, %v2447_v23  ;;  %v2516_v50 = vsel %vm1747_vm9, %v2513_v6, %v2515_v40  ;;  %v7098_v6 = vld [vmem:[#allocation11 + $0x14] ss:$8 sps:$4 sm:$0xff]  }
 0x710   : > { %2558 = vmatprep.subr.bf16.mxu0 %v2517_v36  ;;  %2602 = vmatpush1.bf16.msra.mxu1 %v2462_v62  ;;  %v2643_v40 = vld [vmem:[#allocation12 + $0x18] sm:$0xff]  ;;  %v2642_v36 = vld [vmem:[#allocation12 + $0x10] sm:$0xff] }
 0x711   : > { %2559 = vmatpush1.bf16.msra.mxu0 %v2516_v50  ;;  %2843 = vmatprep.subr.bf16.mxu1 %v11298_v56 }
 0x713   : > { %2618 = vmatmul.mubr.bf16.vlgmr.msra.gmra.mrb[20].mxu1 %v7097_v19 }
 0x714   : > { %2575 = vmatmul.mubr.bf16.vlgmr.msra.gmra.mrb[4].mxu0 %v7097_v19  ;;  %6243 = vmatprep.mubr.msk.bf16.mxu1 %vm1342_vm1, %v7098_v6 }
 0x715   : > { %6242 = vmatprep.mubr.msk.bf16.mxu0 %vm1342_vm1, %v7098_v6  ;;  %v7100_v6 = vld [vmem:[#allocation11 + $0x10] ss:$8 sps:$4 sm:$0xff]  }
 0x71f   : > { %v2528_v16 = vpop.permute.xlu0 %2527  ;;  %v2523_v8 = vpop.permute.xlu1 %2522 }
 0x7e6   : > { %v2619_v61 = vpop.f32.mrb[20].mxu1 }
 0x7e7   : > { %v2620_v26 = vadd.f32 %v2619_v61, %v2523_v8  ;;  %v2576_v28 = vpop.f32.mrb[4].mxu0  ;;  %v2621_v24 = vpop.f32.mrb[21].mxu1 }
 0x7e8   : > { %v2577_v29 = vadd.f32 %v2576_v28, %v2523_v8  ;;  %v2578_v9 = vpop.f32.mrb[5].mxu0  ;;  %v2622_v57 = vpop.f32.mrb[22].mxu1 }
 0x7e9   : > { %v2628_v42 = vmul.f32 %v2620_v26, %v9617_v31  ;;  %v2579_v38 = vadd.f32 %v2578_v9, %v2523_v8  ;;  %v2623_v3 = vadd.f32 %v2622_v57, %v2528_v16  ;;  %v2580_v33 = vpop.f32.mrb[6].mxu0  ;;  %v2624_v39 = vpop.f32.mrb[23].mxu1 }
 0x7ea   : > { %v2626_v14 = vmul.f32 %v2577_v29, %v9621_v12  ;;  %v2581_v7 = vadd.f32 %v2580_v33, %v2528_v16  ;;  %v2582_v0 = vpop.f32.mrb[7].mxu0 }
 0x7eb   : > { %v2631_v27 = vmul.f32 %v2623_v3, %v9617_v31  ;;  %v2583_v44 = vadd.f32 %v2582_v0, %v2528_v16  ;;  %v9858_v23 = vadd.f32 %v2628_v42, %v9625_v43  ;;  %v2627_v52 = vmul.f32 %v2579_v38, %v9619_v20 }
 0x7ec   : > { %v2629_v30 = vmul.f32 %v2581_v7, %v9621_v12  ;;  %v9866_v32 = vadd.f32 %v2626_v14, %v9631_v46 }
 0x7ed   : > { %v9862_v62 = vadd.f32 %v2631_v27, %v9637_v45  ;;  %v2630_v53 = vmul.f32 %v2583_v44, %v9619_v20  ;;  %v9883_v45 = vadd.f32 %v2627_v52, %v9628_v47  ;;  %v2646_v47 = vmul.f32 %v9858_v23, %v11317_v15 }
 0x7ee   : > { %v9869_v60 = vadd.f32 %v2629_v30, %v9634_v17  ;;  %v2644_v2 = vmul.f32 %v9866_v32, %v11319_v54  ;;  %v2658_v10 = vmul.f32 %v9858_v23, %v11322_v22  ;;  %v2656_v5 = vmul.f32 %v9866_v32, %v11321_v34 }
 0x7ef   : > { %v9872_v1 = vadd.f32 %v2630_v53, %v9640_v51  ;;  %v9876_v43 = vpack.c.bf16 %v9862_v62, %v9858_v23  ;;  %v2649_v17 = vmul.f32 %v9862_v62, %v11317_v15  ;;  %v2645_v18 = vmul.f32 %v9883_v45, %v11318_v63 }
 0x7f0   : > { %v9880_v4 = vpack.c.bf16 %v9869_v60, %v9866_v32  ;;  %v2647_v51 = vmul.f32 %v9869_v60, %v11319_v54  ;;  %v2661_v48 = vmul.f32 %v9862_v62, %v11322_v22  ;;  %v2659_v35 = vmul.f32 %v9869_v60, %v11321_v34 }
 0x7f1   : > { %2693 = vrot.lane.b32.xlu0 %v9876_v43, %s7902_s25  ;;  %v9891_v46 = vpack.c.bf16 %v9872_v1, %v9883_v45  ;;  %v2652_v13 = vpack.c.bf16 %v2649_v17, %v2646_v47  ;;  %v2648_v55 = vmul.f32 %v9872_v1, %v11318_v63  ;;  %v2660_v21 = vmul.f32 %v9872_v1, %v11320_v25 }
 0x7f2   : > { %2689 = vrot.lane.b32.xlu1 %v9880_v4, %s7902_s25  ;;  %v2650_v58 = vpack.c.bf16 %v2647_v51, %v2644_v2  ;;  %v2664_v59 = vpack.c.bf16 %v2661_v48, %v2658_v10  ;;  %v2662_v37 = vpack.c.bf16 %v2659_v35, %v2656_v5  ;;  %v2657_v41 = vmul.f32 %v9883_v45, %v11320_v25 }
 0x7f3   : > { %v2651_v49 = vpack.c.bf16 %v2648_v55, %v2645_v18 }
 0x7f4   : > { %v2663_v11 = vpack.c.bf16 %v2660_v21, %v2657_v41 }
 0x7f5   : > { %2691 = vrot.lane.b32.xlu0 %v9891_v46, %s7902_s25 }
 0x7f6   : > { %2685 = vrot.lane.b32.xlu1 %v9876_v43, %s7903_s6 }
 0x7f9   : > { %2674 = vrot.lane.b32.xlu0 %v2652_v13, %s7901_s2 }
 0x7fa   : > { %2670 = vrot.lane.b32.xlu1 %v2650_v58, %s7901_s2 }
 0x7fd   : > { %2672 = vrot.lane.b32.xlu0 %v2651_v49, %s7901_s2 }
 0x7fe   : > { %2666 = vrot.lane.b32.xlu1 %v2652_v13, %s7900_s30 }
 0x801   : > { %2712 = vrot.lane.b32.xlu0 %v2664_v59, %s7904_s9 }
 0x802   : > { %2708 = vrot.lane.b32.xlu1 %v2662_v37, %s7904_s9 }
 0x805   : > { %2710 = vrot.lane.b32.xlu0 %v2663_v11, %s7904_s9 }
 0x806   : > { %2704 = vrot.lane.b32.xlu1 %v2664_v59, %s7905_s0 }
 0x809   : > { %2726 = vrot.lane.b32.xlu0 %v2651_v49, %s7906_s21 }
 0x80a   : > { %2724 = vrot.lane.b32.xlu1 %v2650_v58, %s7906_s21 }
 0x80d   : > { %2728 = vrot.lane.b32.xlu0 %v2652_v13, %s7906_s21 }
 0x80e   : > { %2722 = vrot.lane.b32.xlu1 %v2652_v13, %s7907_s26 }
 0x811   : > { %2742 = vrot.lane.b32.xlu0 %v2664_v59, %s7908_s8 }
 0x812   : > { %2738 = vrot.lane.b32.xlu1 %v2662_v37, %s7908_s8 }
 0x815   : > { %2748 = vrot.lane.b32.xlu0 %v2662_v37, %s7909_s3 }
 0x816   : > { %2740 = vrot.lane.b32.xlu1 %v2663_v11, %s7908_s8 }
 0x819   : > { %2754 = vrot.lane.b32.xlu0 %v2650_v58, %s7900_s30 }
 0x81a   : > { %2756 = vrot.lane.b32.xlu1 %v2651_v49, %s7900_s30 }
 0x81d   : > { %2762 = vrot.lane.b32.xlu0 %v9880_v4, %s7903_s6 }
 0x81e   : > { %2764 = vrot.lane.b32.xlu1 %v9891_v46, %s7903_s6 }
 0x821   : > { %2770 = vrot.lane.b32.xlu0 %v2662_v37, %s7905_s0 }
 0x822   : > { %2772 = vrot.lane.b32.xlu1 %v2663_v11, %s7905_s0 }
 0x825   : > { %2785 = vperm.xlu0 %7081, %v2643_v40  }
 0x826   : > { %2780 = vperm.xlu1 %7082, %v2642_v36  }
 0x863   : > { %v2694_v50 = vpop.permute.xlu0 %2693 }
 0x864   : > { %v2690_v19 = vpop.permute.xlu1 %2689 }
 0x867   : > { %v2692_v16 = vpop.permute.xlu0 %2691 }
 0x868   : > { %v9947_v8 = vpop.permute.xlu1 %2685  ;;  %v2695_v42 = vsel %vm1342_vm1, %v2690_v19, %v2692_v16  ;;  %v2696_v33 = vsel %vm1342_vm1, %v2692_v16, %v2694_v50 }
 0x869   : > { %v2701_v39 = vsel %vm1342_vm1, %v9947_v8, %v2690_v19 }
 0x86b   : > { %v2675_v61 = vpop.permute.xlu0 %2674 }
 0x86c   : > { %v2671_v26 = vpop.permute.xlu1 %2670 }
 0x86f   : > { %v2673_v28 = vpop.permute.xlu0 %2672 }
 0x870   : > { %v2667_v24 = vpop.permute.xlu1 %2666  ;;  %v2676_v29 = vsel %vm1245_vm0, %v2671_v26, %v2673_v28  ;;  %v2677_v9 = vsel %vm1245_vm0, %v2673_v28, %v2675_v61 }
 0x871   : > { %2800 = vmatprep.subr.bf16.mxu0 %v2676_v29  ;;  %2844 = vmatpush1.bf16.msra.mxu1 %v2677_v9  ;;  %v2682_v57 = vsel %vm1245_vm0, %v2667_v24, %v2671_v26 }
 0x872   : > { %2801 = vmatpush1.bf16.msra.mxu0 %v2682_v57  ;;  %2845 = vmatprep.subr.bf16.mxu1 %v11298_v56 }
 0x873   : > { %v2713_v38 = vpop.permute.xlu0 %2712  ;;  %2802 = vmatprep.subr.bf16.mxu0 %v2695_v42 }
 0x874   : > { %v2709_v3 = vpop.permute.xlu1 %2708 }
 0x875   : > { %2846 = vmatpush1.bf16.msra.mxu1 %v2696_v33 }
 0x876   : > { %2803 = vmatpush1.bf16.msra.mxu0 %v2701_v39  ;;  %2847 = vmatprep.subr.bf16.mxu1 %v11298_v56 }
 0x877   : > { %v2711_v14 = vpop.permute.xlu0 %2710 }
 0x878   : > { %v2705_v7 = vpop.permute.xlu1 %2704  ;;  %v2714_v0 = vsel %vm1439_vm2, %v2709_v3, %v2711_v14  ;;  %v2715_v27 = vsel %vm1439_vm2, %v2711_v14, %v2713_v38 }
 0x879   : > { %2804 = vmatprep.subr.bf16.mxu0 %v2714_v0  ;;  %2848 = vmatpush1.bf16.msra.mxu1 %v2715_v27  ;;  %v2720_v44 = vsel %vm1439_vm2, %v2705_v7, %v2709_v3 }
 0x87a   : > { %2805 = vmatpush1.bf16.msra.mxu0 %v2720_v44  ;;  %2849 = vmatprep.subr.bf16.mxu1 %v11298_v56 }
 0x87b   : > { %v2727_v30 = vpop.permute.xlu0 %2726 }
 0x87c   : > { %v2725_v52 = vpop.permute.xlu1 %2724 }
 0x87d   : > { %v2730_v53 = vsel %vm1521_vm3, %v2725_v52, %v2727_v30 }
 0x87e   : > { %2806 = vmatprep.subr.bf16.mxu0 %v2730_v53 }
 0x87f   : > { %v2729_v17 = vpop.permute.xlu0 %2728 }
 0x880   : > { %v2731_v51 = vsel %vm1521_vm3, %v2727_v30, %v2729_v17  ;;  %v2723_v47 = vpop.permute.xlu1 %2722 }
 0x881   : > { %v2736_v2 = vsel %vm1521_vm3, %v2723_v47, %v2725_v52  ;;  %2850 = vmatpush1.bf16.msra.mxu1 %v2731_v51 }
 0x882   : > { %2807 = vmatpush1.bf16.msra.mxu0 %v2736_v2  ;;  %2851 = vmatprep.subr.bf16.mxu1 %v11298_v56 }
 0x883   : > { %v2743_v13 = vpop.permute.xlu0 %2742  ;;  %2808 = vmatprep.subr.bf16.mxu0 %v9891_v46 }
 0x884   : > { %v2739_v55 = vpop.permute.xlu1 %2738 }
 0x885   : > { %2852 = vmatpush1.bf16.msra.mxu1 %v9876_v43 }
 0x886   : > { %2809 = vmatpush1.bf16.msra.mxu0 %v9880_v4  ;;  %2853 = vmatprep.subr.bf16.mxu1 %v11298_v56 }
 0x887   : > { %v2749_v58 = vpop.permute.xlu0 %2748 }
 0x888   : > { %v2752_v18 = vsel %vm1624_vm5, %v2743_v13, %v2749_v58  ;;  %v2741_v49 = vpop.permute.xlu1 %2740 }
 0x889   : > { %2854 = vmatpush1.bf16.msra.mxu1 %v2752_v18  ;;  %v2745_v48 = vsel %vm1593_vm4, %v2741_v49, %v2743_v13  ;;  %v2744_v35 = vsel %vm1593_vm4, %v2739_v55, %v2741_v49 }
 0x88a   : > { %2810 = vmatprep.subr.bf16.mxu0 %v2745_v48  ;;  %2855 = vmatprep.subr.bf16.mxu1 %v11298_v56 }
 0x88b   : > { %v2755_v46 = vpop.permute.xlu0 %2754  ;;  %2811 = vmatpush1.bf16.msra.mxu0 %v2744_v35 }
 0x88c   : > { %v2757_v10 = vpop.permute.xlu1 %2756 }
 0x88d   : > { %2856 = vmatpush1.bf16.msra.mxu1 %v2682_v57  ;;  %v2759_v43 = vsel %vm1665_vm6, %v2757_v10, %v2667_v24  ;;  %v2758_v4 = vsel %vm1665_vm6, %v2755_v46, %v2757_v10 }
 0x88e   : > { %2812 = vmatprep.subr.bf16.mxu0 %v2759_v43  ;;  %2857 = vmatprep.subr.bf16.mxu1 %v11298_v56 }
 0x88f   : > { %v2763_v5 = vpop.permute.xlu0 %2762  ;;  %2813 = vmatpush1.bf16.msra.mxu0 %v2758_v4 }
 0x890   : > { %v2765_v59 = vpop.permute.xlu1 %2764 }
 0x891   : > { %2858 = vmatpush1.bf16.msra.mxu1 %v2701_v39  ;;  %v2767_v21 = vsel %vm1706_vm8, %v2765_v59, %v9947_v8  ;;  %v2766_v37 = vsel %vm1706_vm8, %v2763_v5, %v2765_v59 }
 0x892   : > { %2814 = vmatprep.subr.bf16.mxu0 %v2767_v21  ;;  %2859 = vmatprep.subr.bf16.mxu1 %v11298_v56 }
 0x893   : > { %v2771_v41 = vpop.permute.xlu0 %2770  ;;  %2815 = vmatpush1.bf16.msra.mxu0 %v2766_v37 }
 0x894   : > { %v2773_v11 = vpop.permute.xlu1 %2772 }
 0x895   : > { %2860 = vmatpush1.bf16.msra.mxu1 %v2720_v44  ;;  %v2775_v40 = vsel %vm1747_vm9, %v2773_v11, %v2705_v7  ;;  %v2774_v36 = vsel %vm1747_vm9, %v2771_v41, %v2773_v11 }
 0x896   : > { %2816 = vmatprep.subr.bf16.mxu0 %v2775_v40  ;;  %3113 = vmatprep.subr.bf16.mxu1 %v11298_v56 }
 0x897   : > { %2817 = vmatpush1.bf16.msra.mxu0 %v2774_v36 }
 0x898   : > { %2876 = vmatmul.mubr.bf16.vlgmr.msra.gmra.mrb[24].mxu1 %v7100_v6 }
 0x89a   : > { %2833 = vmatmul.mubr.bf16.vlgmr.msra.gmra.mrb[8].mxu0 %v7100_v6 }
 0x8a4   : > { %v2786_v16 = vpop.permute.xlu0 %2785 }
 0x8a5   : > { %v2781_v50 = vpop.permute.xlu1 %2780 }
 0x96b   : > { %v2877_v19 = vpop.f32.mrb[24].mxu1 }
 0x96c   : > { %v2878_v8 = vadd.f32 %v2877_v19, %v2781_v50  ;;  %v2879_v61 = vpop.f32.mrb[25].mxu1 }
 0x96d   : > { %v2834_v26 = vpop.f32.mrb[8].mxu0  ;;  %v2880_v28 = vpop.f32.mrb[26].mxu1 }
 0x96e   : > { %vm2886_vm15 = vcmp.gt.f32.partialorder %v2878_v8, 0.0  ;;  %v2892_v24 = vmul.f32 0.1, %v2878_v8  ;;  %v2835_v29 = vadd.f32 %v2834_v26, %v2781_v50  ;;  %v2881_v9 = vadd.f32 %v2880_v28, %v2786_v16  ;;  %v2836_v57 = vpop.f32.mrb[9].mxu0  ;;  %v2882_v42 = vpop.f32.mrb[27].mxu1 }
 0x96f   : > { %v2837_v38 = vadd.f32 %v2836_v57, %v2781_v50  ;;  %v2838_v3 = vpop.f32.mrb[10].mxu0 }
 0x970   : > { %v2898_v33 = vsel %vm2886_vm15, %v2878_v8, %v2892_v24  ;;  %vm2884_vm7 = vcmp.gt.f32.partialorder %v2835_v29, 0.0  ;;  %v2890_v39 = vmul.f32 0.1, %v2835_v29  ;;  %vm2889_vm10 = vcmp.gt.f32.partialorder %v2881_v9, 0.0  ;;  %v2840_v14 = vpop.f32.mrb[11].mxu0 }
 0x971   : > { %v2904_v7 = vmul.f32 %v2898_v33, %v9617_v31  ;;  %v2895_v0 = vmul.f32 0.1, %v2881_v9  ;;  %vm2885_vm11 = vcmp.gt.f32.partialorder %v2837_v38, 0.0  ;;  %v2891_v27 = vmul.f32 0.1, %v2837_v38 }
 0x972   : > { %v2896_v44 = vsel %vm2884_vm7, %v2835_v29, %v2890_v39  ;;  %v2839_v30 = vadd.f32 %v2838_v3, %v2786_v16  ;;  %v2841_v52 = vadd.f32 %v2840_v14, %v2786_v16  ;;  %v7101_v24 = vld [vmem:[#allocation14 + $0x14] ss:$8 sps:$4 sm:$0xff]  }
 0x973   : > { %v2902_v53 = vmul.f32 %v2896_v44, %v9621_v12  ;;  %v2901_v17 = vsel %vm2889_vm10, %v2881_v9, %v2895_v0  ;;  %v2897_v51 = vsel %vm2885_vm11, %v2837_v38, %v2891_v27  ;;  %v2916_v58 = vmul.f32 %v2904_v7, %v11317_v15  ;;  %6247 = vmatprep.mubr.msk.bf16.mxu1 %vm1342_vm1, %v7101_v24  ;;  %v2913_v29 = vld [vmem:[#allocation15 + $0x18] sm:$0xff]  ;;  %v2912_v9 = vld [vmem:[#allocation15 + $0x10] sm:$0xff] }
 0x974   : > { %v2907_v47 = vmul.f32 %v2901_v17, %v9617_v31  ;;  %v2903_v2 = vmul.f32 %v2897_v51, %v9619_v20  ;;  %vm2887_vm12 = vcmp.gt.f32.partialorder %v2839_v30, 0.0  ;;  %v2893_v13 = vmul.f32 0.1, %v2839_v30  ;;  %6246 = vmatprep.mubr.msk.bf16.mxu0 %vm1342_vm1, %v7101_v24 }
 0x975   : > { %vm2888_vm13 = vcmp.gt.f32.partialorder %v2841_v52, 0.0  ;;  %v2894_v55 = vmul.f32 0.1, %v2841_v52  ;;  %v2928_v18 = vmul.f32 %v2904_v7, %v11322_v22  ;;  %v2914_v46 = vmul.f32 %v2902_v53, %v11319_v54 }
 0x976   : > { %v2899_v49 = vsel %vm2887_vm12, %v2839_v30, %v2893_v13  ;;  %v9990_v48 = vpack.c.bf16 %v2907_v47, %v2904_v7  ;;  %v2919_v35 = vmul.f32 %v2907_v47, %v11317_v15  ;;  %v2915_v4 = vmul.f32 %v2903_v2, %v11318_v63 }
 0x977   : > { %v2905_v10 = vmul.f32 %v2899_v49, %v9621_v12  ;;  %v2900_v43 = vsel %vm2888_vm13, %v2841_v52, %v2894_v55  ;;  %v2931_v5 = vmul.f32 %v2907_v47, %v11322_v22  ;;  %v2926_v37 = vmul.f32 %v2902_v53, %v11321_v34 }
 0x978   : > { %v2906_v59 = vmul.f32 %v2900_v43, %v9619_v20  ;;  %2963 = vrot.lane.b32.xlu0 %v9990_v48, %s7902_s25  ;;  %2955 = vrot.lane.b32.xlu1 %v9990_v48, %s7903_s6  ;;  %v2922_v21 = vpack.c.bf16 %v2919_v35, %v2916_v58  ;;  %v2927_v19 = vmul.f32 %v2903_v2, %v11320_v25 }
 0x979   : > { %v10003_v41 = vpack.c.bf16 %v2905_v10, %v2902_v53  ;;  %v2934_v11 = vpack.c.bf16 %v2931_v5, %v2928_v18  ;;  %v2917_v6 = vmul.f32 %v2905_v10, %v11319_v54  ;;  %v2929_v40 = vmul.f32 %v2905_v10, %v11321_v34 }
 0x97a   : > { %v10007_v36 = vpack.c.bf16 %v2906_v59, %v2903_v2  ;;  %v2918_v50 = vmul.f32 %v2906_v59, %v11318_v63  ;;  %v2930_v16 = vmul.f32 %v2906_v59, %v11320_v25 }
 0x97b   : > { %v2920_v8 = vpack.c.bf16 %v2917_v6, %v2914_v46  ;;  %v2932_v61 = vpack.c.bf16 %v2929_v40, %v2926_v37 }
 0x97c   : > { %2944 = vrot.lane.b32.xlu0 %v2922_v21, %s7901_s2  ;;  %2959 = vrot.lane.b32.xlu1 %v10003_v41, %s7902_s25  ;;  %v2921_v26 = vpack.c.bf16 %v2918_v50, %v2915_v4  ;;  %v2933_v28 = vpack.c.bf16 %v2930_v16, %v2927_v19 }
 0x980   : > { %2961 = vrot.lane.b32.xlu0 %v10007_v36, %s7902_s25  ;;  %2936 = vrot.lane.b32.xlu1 %v2922_v21, %s7900_s30 }
 0x984   : > { %2942 = vrot.lane.b32.xlu0 %v2921_v26, %s7901_s2  ;;  %2974 = vrot.lane.b32.xlu1 %v2934_v11, %s7905_s0 }
 0x988   : > { %2982 = vrot.lane.b32.xlu0 %v2934_v11, %s7904_s9  ;;  %2940 = vrot.lane.b32.xlu1 %v2920_v8, %s7901_s2 }
 0x98c   : > { %2980 = vrot.lane.b32.xlu0 %v2933_v28, %s7904_s9  ;;  %2978 = vrot.lane.b32.xlu1 %v2932_v61, %s7904_s9 }
 0x990   : > { %2996 = vrot.lane.b32.xlu0 %v2921_v26, %s7906_s21  ;;  %2994 = vrot.lane.b32.xlu1 %v2920_v8, %s7906_s21 }
 0x994   : > { %2998 = vrot.lane.b32.xlu0 %v2922_v21, %s7906_s21  ;;  %2992 = vrot.lane.b32.xlu1 %v2922_v21, %s7907_s26 }
 0x998   : > { %3012 = vrot.lane.b32.xlu0 %v2934_v11, %s7908_s8  ;;  %3008 = vrot.lane.b32.xlu1 %v2932_v61, %s7908_s8 }
 0x99c   : > { %3018 = vrot.lane.b32.xlu0 %v2932_v61, %s7909_s3  ;;  %3010 = vrot.lane.b32.xlu1 %v2933_v28, %s7908_s8 }
 0x9a0   : > { %3024 = vrot.lane.b32.xlu0 %v2920_v8, %s7900_s30  ;;  %3026 = vrot.lane.b32.xlu1 %v2921_v26, %s7900_s30 }
 0x9a4   : > { %3032 = vrot.lane.b32.xlu0 %v10003_v41, %s7903_s6  ;;  %3034 = vrot.lane.b32.xlu1 %v10007_v36, %s7903_s6 }
 0x9a8   : > { %3040 = vrot.lane.b32.xlu0 %v2932_v61, %s7905_s0  ;;  %3042 = vrot.lane.b32.xlu1 %v2933_v28, %s7905_s0 }
 0x9ac   : > { %3055 = vperm.xlu0 %7081, %v2913_v29   ;;  %3050 = vperm.xlu1 %7082, %v2912_v9   ;;  %v7103_v9 = vld [vmem:[#allocation14 + $0x10] ss:$8 sps:$4 sm:$0xff]  }
 0x9ea   : > { %v2964_v57 = vpop.permute.xlu0 %2963  ;;  %v10042_v42 = vpop.permute.xlu1 %2955 }
 0x9ee   : > { %v2945_v38 = vpop.permute.xlu0 %2944  ;;  %v2960_v3 = vpop.permute.xlu1 %2959 }
 0x9ef   : > { %v2971_v13 = vsel %vm1342_vm1, %v10042_v42, %v2960_v3 }
 0x9f2   : > { %v2962_v33 = vpop.permute.xlu0 %2961  ;;  %v2937_v39 = vpop.permute.xlu1 %2936 }
 0x9f3   : > { %v2966_v52 = vsel %vm1342_vm1, %v2962_v33, %v2964_v57  ;;  %v2965_v17 = vsel %vm1342_vm1, %v2960_v3, %v2962_v33 }
 0x9f6   : > { %v2943_v14 = vpop.permute.xlu0 %2942  ;;  %v10044_v7 = vpop.permute.xlu1 %2974 }
 0x9f7   : > { %v2947_v0 = vsel %vm1245_vm0, %v2943_v14, %v2945_v38 }
 0x9f8   : > { %3114 = vmatpush1.bf16.msra.mxu1 %v2947_v0 }
 0x9f9   : > { %3115 = vmatprep.subr.bf16.mxu1 %v11298_v56 }
 0x9fa   : > { %v2983_v27 = vpop.permute.xlu0 %2982  ;;  %v2941_v44 = vpop.permute.xlu1 %2940 }
 0x9fb   : > { %v2946_v30 = vsel %vm1245_vm0, %v2941_v44, %v2943_v14  ;;  %v2952_v53 = vsel %vm1245_vm0, %v2937_v39, %v2941_v44 }
 0x9fc   : > { %3070 = vmatprep.subr.bf16.mxu0 %v2946_v30  ;;  %3116 = vmatpush1.bf16.msra.mxu1 %v2966_v52 }
 0x9fd   : > { %3071 = vmatpush1.bf16.msra.mxu0 %v2952_v53  ;;  %3117 = vmatprep.subr.bf16.mxu1 %v11298_v56 }
 0x9fe   : > { %v2981_v51 = vpop.permute.xlu0 %2980  ;;  %3072 = vmatprep.subr.bf16.mxu0 %v2965_v17  ;;  %v2979_v47 = vpop.permute.xlu1 %2978 }
 0x9ff   : > { %v2985_v2 = vsel %vm1439_vm2, %v2981_v51, %v2983_v27  ;;  %v2984_v55 = vsel %vm1439_vm2, %v2979_v47, %v2981_v51  ;;  %v2990_v49 = vsel %vm1439_vm2, %v10044_v7, %v2979_v47 }
 0xa00   : > { %3118 = vmatpush1.bf16.msra.mxu1 %v2985_v2 }
 0xa01   : > { %3073 = vmatpush1.bf16.msra.mxu0 %v2971_v13  ;;  %3119 = vmatprep.subr.bf16.mxu1 %v11298_v56 }
 0xa02   : > { %v2997_v58 = vpop.permute.xlu0 %2996  ;;  %3074 = vmatprep.subr.bf16.mxu0 %v2984_v55  ;;  %v2995_v18 = vpop.permute.xlu1 %2994 }
 0xa03   : > { %v3000_v35 = vsel %vm1521_vm3, %v2995_v18, %v2997_v58 }
 0xa05   : > { %3075 = vmatpush1.bf16.msra.mxu0 %v2990_v49 }
 0xa06   : > { %v2999_v46 = vpop.permute.xlu0 %2998  ;;  %3076 = vmatprep.subr.bf16.mxu0 %v3000_v35  ;;  %v2993_v10 = vpop.permute.xlu1 %2992 }
 0xa07   : > { %v3001_v43 = vsel %vm1521_vm3, %v2997_v58, %v2999_v46  ;;  %v3006_v4 = vsel %vm1521_vm3, %v2993_v10, %v2995_v18 }
 0xa08   : > { %3120 = vmatpush1.bf16.msra.mxu1 %v3001_v43 }
 0xa09   : > { %3077 = vmatpush1.bf16.msra.mxu0 %v3006_v4  ;;  %3121 = vmatprep.subr.bf16.mxu1 %v11298_v56 }
 0xa0a   : > { %v3013_v5 = vpop.permute.xlu0 %3012  ;;  %3078 = vmatprep.subr.bf16.mxu0 %v10007_v36  ;;  %v3009_v59 = vpop.permute.xlu1 %3008 }
 0xa0c   : > { %3122 = vmatpush1.bf16.msra.mxu1 %v9990_v48 }
 0xa0d   : > { %3079 = vmatpush1.bf16.msra.mxu0 %v10003_v41  ;;  %3123 = vmatprep.subr.bf16.mxu1 %v11298_v56 }
 0xa0e   : > { %v3019_v21 = vpop.permute.xlu0 %3018  ;;  %v3011_v37 = vpop.permute.xlu1 %3010 }
 0xa0f   : > { %v3022_v11 = vsel %vm1624_vm5, %v3013_v5, %v3019_v21  ;;  %v3015_v6 = vsel %vm1593_vm4, %v3011_v37, %v3013_v5  ;;  %v3014_v40 = vsel %vm1593_vm4, %v3009_v59, %v3011_v37 }
 0xa10   : > { %3080 = vmatprep.subr.bf16.mxu0 %v3015_v6  ;;  %3124 = vmatpush1.bf16.msra.mxu1 %v3022_v11 }
 0xa11   : > { %3081 = vmatpush1.bf16.msra.mxu0 %v3014_v40  ;;  %3125 = vmatprep.subr.bf16.mxu1 %v11298_v56 }
 0xa12   : > { %v3025_v36 = vpop.permute.xlu0 %3024  ;;  %v3027_v50 = vpop.permute.xlu1 %3026 }
 0xa13   : > { %v3029_v48 = vsel %vm1665_vm6, %v3027_v50, %v2937_v39  ;;  %v3028_v41 = vsel %vm1665_vm6, %v3025_v36, %v3027_v50 }
 0xa14   : > { %3082 = vmatprep.subr.bf16.mxu0 %v3029_v48  ;;  %3126 = vmatpush1.bf16.msra.mxu1 %v2952_v53 }
 0xa15   : > { %3083 = vmatpush1.bf16.msra.mxu0 %v3028_v41  ;;  %3127 = vmatprep.subr.bf16.mxu1 %v11298_v56 }
 0xa16   : > { %v3033_v19 = vpop.permute.xlu0 %3032  ;;  %v3035_v16 = vpop.permute.xlu1 %3034 }
 0xa17   : > { %v3037_v8 = vsel %vm1706_vm8, %v3035_v16, %v10042_v42  ;;  %v3036_v61 = vsel %vm1706_vm8, %v3033_v19, %v3035_v16 }
 0xa18   : > { %3084 = vmatprep.subr.bf16.mxu0 %v3037_v8  ;;  %3128 = vmatpush1.bf16.msra.mxu1 %v2971_v13 }
 0xa19   : > { %3085 = vmatpush1.bf16.msra.mxu0 %v3036_v61  ;;  %3129 = vmatprep.subr.bf16.mxu1 %v11298_v56 }
 0xa1a   : > { %v3041_v26 = vpop.permute.xlu0 %3040  ;;  %v3043_v28 = vpop.permute.xlu1 %3042 }
 0xa1b   : > { %v3045_v24 = vsel %vm1747_vm9, %v3043_v28, %v10044_v7  ;;  %v3044_v29 = vsel %vm1747_vm9, %v3041_v26, %v3043_v28  ;;  %v7104_v26 = vld [vmem:[#allocation17 + $0x4] ss:$8 sps:$4 sm:$0xff]  }
 0xa1c   : > { %3086 = vmatprep.subr.bf16.mxu0 %v3045_v24  ;;  %3130 = vmatpush1.bf16.msra.mxu1 %v2990_v49  ;;  %v3171_v28 = vld [vmem:[#allocation18 + $0x8] sm:$0xff]  ;;  %v3170_v24 = vld [vmem:[#allocation18] sm:$0xff] }
 0xa1d   : > { %3087 = vmatpush1.bf16.msra.mxu0 %v3044_v29  ;;  %3405 = vmatprep.subr.bf16.mxu1 %v11298_v56  ;;  %v3173_v29 = vld [vmem:[#allocation18 + $0x18] sm:$0xff] }
 0xa1f   : > { %3146 = vmatmul.mubr.bf16.vlgmr.msra.gmra.mrb[28].mxu1 %v7103_v9 }
 0xa20   : > { %3103 = vmatmul.mubr.bf16.vlgmr.msra.gmra.mrb[12].mxu0 %v7103_v9  ;;  %6254 = vmatprep.mubr.msk.bf16.mxu1 %vm1342_vm1, %v7104_v26  ;;  %v3172_v9 = vld [vmem:[#allocation18 + $0x10] sm:$0xff] }
 0xa21   : > { %6252 = vmatprep.mubr.msk.bf16.mxu0 %vm1342_vm1, %v7104_v26 }
 0xa2b   : > { %v3056_v57 = vpop.permute.xlu0 %3055  ;;  %v3051_v42 = vpop.permute.xlu1 %3050 }
 0xaf2   : > { %v3147_v38 = vpop.f32.mrb[28].mxu1 }
 0xaf3   : > { %v3148_v3 = vadd.f32 %v3147_v38, %v3051_v42  ;;  %v3104_v33 = vpop.f32.mrb[12].mxu0  ;;  %v3149_v39 = vpop.f32.mrb[29].mxu1 }
 0xaf4   : > { %v3106_v14 = vpop.f32.mrb[13].mxu0  ;;  %v3150_v0 = vpop.f32.mrb[30].mxu1  ;;  %v3105_v27 = vadd.f32 %v3104_v33, %v3051_v42 }
 0xaf5   : > { %v3156_v7 = vmul.f32 %v3148_v3, %v9617_v31  ;;  %v3151_v44 = vadd.f32 %v3150_v0, %v3056_v57  ;;  %v3108_v30 = vpop.f32.mrb[14].mxu0  ;;  %v3152_v52 = vpop.f32.mrb[31].mxu1  ;;  %v3107_v58 = vadd.f32 %v3106_v14, %v3051_v42 }
 0xaf6   : > { %v3109_v53 = vadd.f32 %v3108_v30, %v3056_v57  ;;  %v3110_v17 = vpop.f32.mrb[15].mxu0  ;;  %v3154_v55 = vmul.f32 %v3105_v27, %v9621_v12 }
 0xaf7   : > { %v3159_v51 = vmul.f32 %v3151_v44, %v9617_v31  ;;  %v3111_v47 = vadd.f32 %v3110_v17, %v3056_v57  ;;  %v10087_v13 = vadd.f32 %v3156_v7, %v9858_v23  ;;  %v3155_v43 = vmul.f32 %v3107_v58, %v9619_v20 }
 0xaf8   : > { %v3157_v2 = vmul.f32 %v3109_v53, %v9621_v12  ;;  %v10104_v23 = vadd.f32 %v3154_v55, %v9866_v32 }
 0xaf9   : > { %v10091_v18 = vadd.f32 %v3159_v51, %v9862_v62  ;;  %v3158_v35 = vmul.f32 %v3111_v47, %v9619_v20  ;;  %v3176_v62 = vmul.f32 %v10087_v13, %v11317_v15  ;;  %v10121_v32 = vadd.f32 %v3155_v43, %v9883_v45 }
 0xafa   : > { %v10094_v49 = vadd.f32 %v3157_v2, %v9869_v60  ;;  %v3188_v37 = vmul.f32 %v10087_v13, %v11322_v22  ;;  %v3174_v36 = vmul.f32 %v10104_v23, %v11319_v54  ;;  %v3186_v16 = vmul.f32 %v10104_v23, %v11321_v34 }
 0xafb   : > { %v10099_v46 = vpack.c.bf16 %v10091_v18, %v10087_v13  ;;  %v3179_v10 = vmul.f32 %v10091_v18, %v11317_v15  ;;  %v10114_v60 = vadd.f32 %v3158_v35, %v9872_v1  ;;  %v3191_v21 = vmul.f32 %v10091_v18, %v11322_v22 }
 0xafc   : > { %v10118_v5 = vpack.c.bf16 %v10094_v49, %v10104_v23  ;;  %v3175_v45 = vmul.f32 %v10121_v32, %v11318_v63  ;;  %v3177_v40 = vmul.f32 %v10094_v49, %v11319_v54  ;;  %v3189_v41 = vmul.f32 %v10094_v49, %v11321_v34 }
 0xafd   : > { %3223 = vrot.lane.b32.xlu0 %v10099_v46, %s7902_s25  ;;  %3215 = vrot.lane.b32.xlu1 %v10099_v46, %s7903_s6  ;;  %v3182_v4 = vpack.c.bf16 %v3179_v10, %v3176_v62  ;;  %v10128_v59 = vpack.c.bf16 %v10114_v60, %v10121_v32  ;;  %v3178_v1 = vmul.f32 %v10114_v60, %v11318_v63 }
 0xafe   : > { %v3194_v6 = vpack.c.bf16 %v3191_v21, %v3188_v37  ;;  %v3180_v50 = vpack.c.bf16 %v3177_v40, %v3174_v36  ;;  %v3190_v48 = vmul.f32 %v10114_v60, %v11320_v25  ;;  %v3187_v19 = vmul.f32 %v10121_v32, %v11320_v25 }
 0xaff   : > { %v3181_v11 = vpack.c.bf16 %v3178_v1, %v3175_v45  ;;  %v3192_v61 = vpack.c.bf16 %v3189_v41, %v3186_v16 }
 0xb00   : > { %v3193_v8 = vpack.c.bf16 %v3190_v48, %v3187_v19 }
 0xb01   : > { %3204 = vrot.lane.b32.xlu0 %v3182_v4, %s7901_s2  ;;  %3219 = vrot.lane.b32.xlu1 %v10118_v5, %s7902_s25 }
 0xb05   : > { %3221 = vrot.lane.b32.xlu0 %v10128_v59, %s7902_s25  ;;  %3196 = vrot.lane.b32.xlu1 %v3182_v4, %s7900_s30 }
 0xb09   : > { %3202 = vrot.lane.b32.xlu0 %v3181_v11, %s7901_s2  ;;  %3234 = vrot.lane.b32.xlu1 %v3194_v6, %s7905_s0 }
 0xb0d   : > { %3242 = vrot.lane.b32.xlu0 %v3194_v6, %s7904_s9  ;;  %3200 = vrot.lane.b32.xlu1 %v3180_v50, %s7901_s2 }
 0xb11   : > { %3240 = vrot.lane.b32.xlu0 %v3193_v8, %s7904_s9  ;;  %3238 = vrot.lane.b32.xlu1 %v3192_v61, %s7904_s9 }
 0xb15   : > { %3256 = vrot.lane.b32.xlu0 %v3181_v11, %s7906_s21  ;;  %3254 = vrot.lane.b32.xlu1 %v3180_v50, %s7906_s21 }
 0xb19   : > { %3258 = vrot.lane.b32.xlu0 %v3182_v4, %s7906_s21  ;;  %3252 = vrot.lane.b32.xlu1 %v3182_v4, %s7907_s26 }
 0xb1d   : > { %3272 = vrot.lane.b32.xlu0 %v3194_v6, %s7908_s8  ;;  %3268 = vrot.lane.b32.xlu1 %v3192_v61, %s7908_s8 }
 0xb21   : > { %3278 = vrot.lane.b32.xlu0 %v3192_v61, %s7909_s3  ;;  %3270 = vrot.lane.b32.xlu1 %v3193_v8, %s7908_s8 }
 0xb25   : > { %3284 = vrot.lane.b32.xlu0 %v3180_v50, %s7900_s30  ;;  %3286 = vrot.lane.b32.xlu1 %v3181_v11, %s7900_s30 }
 0xb29   : > { %3292 = vrot.lane.b32.xlu0 %v10118_v5, %s7903_s6  ;;  %3294 = vrot.lane.b32.xlu1 %v10128_v59, %s7903_s6 }
 0xb2d   : > { %3300 = vrot.lane.b32.xlu0 %v3192_v61, %s7905_s0  ;;  %3302 = vrot.lane.b32.xlu1 %v3193_v8, %s7905_s0 }
 0xb31   : > { %3315 = vperm.xlu0 %7081, %v3171_v28   ;;  %3310 = vperm.xlu1 %7082, %v3170_v24  }
 0xb35   : > { %3325 = vperm.xlu0 %7081, %v3173_v29   ;;  %3320 = vperm.xlu1 %7082, %v3172_v9   ;;  %v7106_v9 = vld [vmem:[#allocation17] ss:$8 sps:$4 sm:$0xff]  }
 0xb6f   : > { %v3224_v57 = vpop.permute.xlu0 %3223  ;;  %v10177_v42 = vpop.permute.xlu1 %3215 }
 0xb73   : > { %v3205_v38 = vpop.permute.xlu0 %3204  ;;  %v3220_v3 = vpop.permute.xlu1 %3219 }
 0xb74   : > { %v3231_v55 = vsel %vm1342_vm1, %v10177_v42, %v3220_v3 }
 0xb77   : > { %v3222_v33 = vpop.permute.xlu0 %3221  ;;  %v3197_v39 = vpop.permute.xlu1 %3196 }
 0xb78   : > { %v3226_v52 = vsel %vm1342_vm1, %v3222_v33, %v3224_v57  ;;  %v3225_v17 = vsel %vm1342_vm1, %v3220_v3, %v3222_v33  ;;  %v7107_v57 = vld [vmem:[#allocation17 + $0x14] ss:$8 sps:$4 sm:$0xff]  }
 0xb7b   : > { %v3203_v14 = vpop.permute.xlu0 %3202  ;;  %v10179_v0 = vpop.permute.xlu1 %3234 }
 0xb7c   : > { %v3207_v7 = vsel %vm1245_vm0, %v3203_v14, %v3205_v38 }
 0xb7d   : > { %3406 = vmatpush1.bf16.msra.mxu1 %v3207_v7 }
 0xb7e   : > { %3407 = vmatprep.subr.bf16.mxu1 %v11298_v56 }
 0xb7f   : > { %v3243_v27 = vpop.permute.xlu0 %3242  ;;  %v3201_v44 = vpop.permute.xlu1 %3200 }
 0xb80   : > { %v3206_v30 = vsel %vm1245_vm0, %v3201_v44, %v3203_v14  ;;  %v3212_v53 = vsel %vm1245_vm0, %v3197_v39, %v3201_v44 }
 0xb81   : > { %3352 = vmatprep.subr.bf16.mxu0 %v3206_v30  ;;  %3408 = vmatpush1.bf16.msra.mxu1 %v3226_v52 }
 0xb82   : > { %3353 = vmatpush1.bf16.msra.mxu0 %v3212_v53  ;;  %3409 = vmatprep.subr.bf16.mxu1 %v11298_v56 }
 0xb83   : > { %v3241_v51 = vpop.permute.xlu0 %3240  ;;  %3354 = vmatprep.subr.bf16.mxu0 %v3225_v17  ;;  %v3239_v47 = vpop.permute.xlu1 %3238 }
 0xb84   : > { %v3245_v2 = vsel %vm1439_vm2, %v3241_v51, %v3243_v27  ;;  %v3244_v58 = vsel %vm1439_vm2, %v3239_v47, %v3241_v51  ;;  %v3250_v43 = vsel %vm1439_vm2, %v10179_v0, %v3239_v47 }
 0xb85   : > { %3410 = vmatpush1.bf16.msra.mxu1 %v3245_v2 }
 0xb86   : > { %3355 = vmatpush1.bf16.msra.mxu0 %v3231_v55  ;;  %3411 = vmatprep.subr.bf16.mxu1 %v11298_v56 }
 0xb87   : > { %v3257_v35 = vpop.permute.xlu0 %3256  ;;  %3356 = vmatprep.subr.bf16.mxu0 %v3244_v58  ;;  %v3255_v10 = vpop.permute.xlu1 %3254 }
 0xb88   : > { %v3260_v62 = vsel %vm1521_vm3, %v3255_v10, %v3257_v35 }
 0xb8a   : > { %3357 = vmatpush1.bf16.msra.mxu0 %v3250_v43 }
 0xb8b   : > { %v3259_v4 = vpop.permute.xlu0 %3258  ;;  %3358 = vmatprep.subr.bf16.mxu0 %v3260_v62  ;;  %v3253_v1 = vpop.permute.xlu1 %3252 }
 0xb8c   : > { %v3261_v21 = vsel %vm1521_vm3, %v3257_v35, %v3259_v4  ;;  %v3266_v45 = vsel %vm1521_vm3, %v3253_v1, %v3255_v10 }
 0xb8d   : > { %3412 = vmatpush1.bf16.msra.mxu1 %v3261_v21 }
 0xb8e   : > { %3359 = vmatpush1.bf16.msra.mxu0 %v3266_v45  ;;  %3413 = vmatprep.subr.bf16.mxu1 %v11298_v56 }
 0xb8f   : > { %v3273_v37 = vpop.permute.xlu0 %3272  ;;  %3360 = vmatprep.subr.bf16.mxu0 %v10128_v59  ;;  %v3269_v11 = vpop.permute.xlu1 %3268 }
 0xb91   : > { %3414 = vmatpush1.bf16.msra.mxu1 %v10099_v46 }
 0xb92   : > { %3361 = vmatpush1.bf16.msra.mxu0 %v10118_v5  ;;  %3415 = vmatprep.subr.bf16.mxu1 %v11298_v56 }
 0xb93   : > { %v3279_v6 = vpop.permute.xlu0 %3278  ;;  %v3271_v40 = vpop.permute.xlu1 %3270 }
 0xb94   : > { %v3282_v36 = vsel %vm1624_vm5, %v3273_v37, %v3279_v6  ;;  %v3275_v50 = vsel %vm1593_vm4, %v3271_v40, %v3273_v37  ;;  %v3274_v48 = vsel %vm1593_vm4, %v3269_v11, %v3271_v40 }
 0xb95   : > { %3362 = vmatprep.subr.bf16.mxu0 %v3275_v50  ;;  %3416 = vmatpush1.bf16.msra.mxu1 %v3282_v36 }
 0xb96   : > { %3363 = vmatpush1.bf16.msra.mxu0 %v3274_v48  ;;  %3417 = vmatprep.subr.bf16.mxu1 %v11298_v56 }
 0xb97   : > { %v3285_v59 = vpop.permute.xlu0 %3284  ;;  %v3287_v41 = vpop.permute.xlu1 %3286 }
 0xb98   : > { %v3289_v46 = vsel %vm1665_vm6, %v3287_v41, %v3197_v39  ;;  %v3288_v5 = vsel %vm1665_vm6, %v3285_v59, %v3287_v41 }
 0xb99   : > { %3364 = vmatprep.subr.bf16.mxu0 %v3289_v46  ;;  %3418 = vmatpush1.bf16.msra.mxu1 %v3212_v53 }
 0xb9a   : > { %3365 = vmatpush1.bf16.msra.mxu0 %v3288_v5  ;;  %3419 = vmatprep.subr.bf16.mxu1 %v11298_v56 }
 0xb9b   : > { %v3293_v19 = vpop.permute.xlu0 %3292  ;;  %v3295_v16 = vpop.permute.xlu1 %3294 }
 0xb9c   : > { %v3297_v8 = vsel %vm1706_vm8, %v3295_v16, %v10177_v42  ;;  %v3296_v61 = vsel %vm1706_vm8, %v3293_v19, %v3295_v16  ;;  %v7109_v42 = vld [vmem:[#allocation17 + $0x10] ss:$8 sps:$4 sm:$0xff]  }
 0xb9d   : > { %3366 = vmatprep.subr.bf16.mxu0 %v3297_v8  ;;  %3420 = vmatpush1.bf16.msra.mxu1 %v3231_v55 }
 0xb9e   : > { %3367 = vmatpush1.bf16.msra.mxu0 %v3296_v61  ;;  %3421 = vmatprep.subr.bf16.mxu1 %v11298_v56 }
 0xb9f   : > { %v3301_v26 = vpop.permute.xlu0 %3300  ;;  %v3303_v28 = vpop.permute.xlu1 %3302 }
 0xba0   : > { %v3305_v24 = vsel %vm1747_vm9, %v3303_v28, %v10179_v0  ;;  %v3304_v29 = vsel %vm1747_vm9, %v3301_v26, %v3303_v28 }
 0xba1   : > { %3368 = vmatprep.subr.bf16.mxu0 %v3305_v24  ;;  %3422 = vmatpush1.bf16.msra.mxu1 %v3250_v43 }
 0xba2   : > { %3369 = vmatpush1.bf16.msra.mxu0 %v3304_v29 }
 0xba4   : > { %3438 = vmatmul.mubr.bf16.vlgmr.msra.gmra.mrb[32].mxu1 %v7106_v9 }
 0xba5   : > { %3385 = vmatmul.mubr.bf16.vlgmr.msra.gmra.mrb[16].mxu0 %v7106_v9  ;;  %6255 = vmatprep.mubr.msk.bf16.mxu1 %vm1342_vm1, %v7107_v57 }
 0xba6   : > { %6253 = vmatprep.mubr.msk.bf16.mxu0 %vm1342_vm1, %v7107_v57 }
 0xbac   : > { %3446 = vmatmul.mubr.bf16.gmra.mrb[36].mxu1 %v7109_v42 }
 0xbad   : > { %3395 = vmatmul.mubr.bf16.gmra.mrb[20].mxu0 %v7109_v42 }
 0xbb0   : > { %v3316_v38 = vpop.permute.xlu0 %3315  ;;  %v3311_v3 = vpop.permute.xlu1 %3310 }
 0xbb4   : > { %v3326_v4 = vpop.permute.xlu0 %3325  ;;  %v3321_v11 = vpop.permute.xlu1 %3320 }
 0xc77   : > { %v3439_v33 = vpop.f32.mrb[32].mxu1 }
 0xc78   : > { %v3440_v39 = vadd.f32 %v3439_v33, %v3311_v3  ;;  %v3386_v14 = vpop.f32.mrb[16].mxu0  ;;  %v3441_v0 = vpop.f32.mrb[33].mxu1 }
 0xc79   : > { %v3387_v7 = vadd.f32 %v3386_v14, %v3311_v3  ;;  %v3388_v27 = vpop.f32.mrb[17].mxu0  ;;  %v3442_v44 = vpop.f32.mrb[34].mxu1 }
 0xc7a   : > { %vm3456_vm14 = vcmp.gt.f32.partialorder %v3440_v39, 0.0  ;;  %v3468_v30 = vmul.f32 0.1, %v3440_v39  ;;  %v3389_v52 = vadd.f32 %v3388_v27, %v3311_v3  ;;  %v3443_v53 = vadd.f32 %v3442_v44, %v3316_v38  ;;  %v3390_v17 = vpop.f32.mrb[18].mxu0  ;;  %v3444_v51 = vpop.f32.mrb[35].mxu1 }
 0xc7b   : > { %vm3454_vm15 = vcmp.gt.f32.partialorder %v3387_v7, 0.0  ;;  %v3466_v47 = vmul.f32 0.1, %v3387_v7  ;;  %v3391_v2 = vadd.f32 %v3390_v17, %v3316_v38  ;;  %v3392_v55 = vpop.f32.mrb[19].mxu0 }
 0xc7c   : > { %v3480_v58 = vsel %vm3456_vm14, %v3440_v39, %v3468_v30  ;;  %vm3455_vm7 = vcmp.gt.f32.partialorder %v3389_v52, 0.0  ;;  %v3467_v35 = vmul.f32 0.1, %v3389_v52  ;;  %vm3459_vm10 = vcmp.gt.f32.partialorder %v3443_v53, 0.0 }
 0xc7d   : > { %v3492_v10 = vmul.f32 %v3480_v58, %v9617_v31  ;;  %v3478_v43 = vsel %vm3454_vm15, %v3387_v7, %v3466_v47  ;;  %v3471_v62 = vmul.f32 0.1, %v3443_v53  ;;  %vm3457_vm11 = vcmp.gt.f32.partialorder %v3391_v2, 0.0 }
 0xc7e   : > { %v10221_v1 = vmul.f32 %v3478_v43, %v9621_v12  ;;  %v3479_v21 = vsel %vm3455_vm7, %v3389_v52, %v3467_v35  ;;  %v3469_v45 = vmul.f32 0.1, %v3391_v2  ;;  %v3393_v37 = vadd.f32 %v3392_v55, %v3316_v38 }
 0xc7f   : > { %v3491_v6 = vmul.f32 %v3479_v21, %v9619_v20  ;;  %v3483_v40 = vsel %vm3459_vm10, %v3443_v53, %v3471_v62  ;;  %v3447_v36 = vpop.f32.mrb[36].mxu1  ;;  %v3516_v50 = vmul.f32 %v3492_v10, %v11317_v15  ;;  %v3540_v48 = vmul.f32 %v3492_v10, %v11322_v22 }
 0xc80   : > { %v3495_v59 = vmul.f32 %v3483_v40, %v9617_v31  ;;  %v3481_v41 = vsel %vm3457_vm11, %v3391_v2, %v3469_v45  ;;  %vm3458_vm12 = vcmp.gt.f32.partialorder %v3393_v37, 0.0  ;;  %v3470_v46 = vmul.f32 0.1, %v3393_v37  ;;  %v3396_v5 = vpop.f32.mrb[20].mxu0  ;;  %v3449_v19 = vpop.f32.mrb[37].mxu1 }
 0xc81   : > { %v3493_v16 = vmul.f32 %v3481_v41, %v9621_v12  ;;  %v3448_v8 = vadd.f32 %v3447_v36, %v3321_v11  ;;  %v3397_v61 = vadd.f32 %v3396_v5, %v3321_v11  ;;  %v3398_v26 = vpop.f32.mrb[21].mxu0  ;;  %v3450_v28 = vpop.f32.mrb[38].mxu1  ;;  %v3515_v24 = vmul.f32 %v3491_v6, %v11318_v63 }
 0xc82   : > { %v3482_v29 = vsel %vm3458_vm12, %v3393_v37, %v3470_v46  ;;  %v3399_v9 = vadd.f32 %v3398_v26, %v3321_v11  ;;  %v3451_v57 = vadd.f32 %v3450_v28, %v3326_v4  ;;  %v3400_v42 = vpop.f32.mrb[22].mxu0  ;;  %v10229_v38 = vpack.c.bf16 %v3495_v59, %v3492_v10  ;;  %v3452_v3 = vpop.f32.mrb[39].mxu1 }
 0xc83   : > { %v3494_v33 = vmul.f32 %v3482_v29, %v9619_v20  ;;  %vm3462_vm13 = vcmp.gt.f32.partialorder %v3448_v8, 0.0  ;;  %v3474_v39 = vmul.f32 0.1, %v3448_v8  ;;  %vm3460_vm14 = vcmp.gt.f32.partialorder %v3397_v61, 0.0  ;;  %v3402_v14 = vpop.f32.mrb[23].mxu0 }
 0xc84   : > { %v3472_v0 = vmul.f32 0.1, %v3397_v61  ;;  %vm3461_vm15 = vcmp.gt.f32.partialorder %v3399_v9, 0.0  ;;  %v3473_v7 = vmul.f32 0.1, %v3399_v9  ;;  %vm3465_vm7 = vcmp.gt.f32.partialorder %v3451_v57, 0.0  ;;  %3596 = vrot.lane.b32.xlu1 %v10229_v38, %s7903_s6  ;;  %6355 = vmatprep.subr.bf16.mxu1 %v10229_v38 }
 0xc85   : > { %v3486_v27 = vsel %vm3462_vm13, %v3448_v8, %v3474_v39  ;;  %v3477_v44 = vmul.f32 0.1, %v3451_v57  ;;  %v3401_v30 = vadd.f32 %v3400_v42, %v3326_v4  ;;  %v3403_v52 = vadd.f32 %v3402_v14, %v3326_v4 }
 0xc86   : > { %v3498_v53 = vmul.f32 %v3486_v27, %v9617_v31  ;;  %v3484_v17 = vsel %vm3460_vm14, %v3397_v61, %v3472_v0  ;;  %v3485_v51 = vsel %vm3461_vm15, %v3399_v9, %v3473_v7  ;;  %v10236_v47 = vpack.c.bf16 %v3494_v33, %v3491_v6 }
 0xc87   : > { %v3496_v2 = vmul.f32 %v3484_v17, %v9621_v12  ;;  %v3497_v55 = vmul.f32 %v3485_v51, %v9619_v20  ;;  %v3489_v58 = vsel %vm3465_vm7, %v3451_v57, %v3477_v44  ;;  %vm3463_vm10 = vcmp.gt.f32.partialorder %v3401_v30, 0.0 }
 0xc88   : > { %v3501_v35 = vmul.f32 %v3489_v58, %v9617_v31  ;;  %v3475_v10 = vmul.f32 0.1, %v3401_v30  ;;  %vm3464_vm11 = vcmp.gt.f32.partialorder %v3403_v52, 0.0  ;;  %v3476_v43 = vmul.f32 0.1, %v3403_v52  ;;  %3606 = vrot.lane.b32.xlu0 %v10236_v47, %s7902_s25 }
 0xc89   : > { %v10244_v62 = vpack.c.bf16 %v3493_v16, %v10221_v1  ;;  %v3518_v4 = vmul.f32 %v3494_v33, %v11318_v63  ;;  %v3519_v21 = vmul.f32 %v3495_v59, %v11317_v15  ;;  %v3539_v45 = vmul.f32 %v3491_v6, %v11320_v25 }
 0xc8a   : > { %v3487_v37 = vsel %vm3463_vm10, %v3401_v30, %v3475_v10  ;;  %v3488_v11 = vsel %vm3464_vm11, %v3403_v52, %v3476_v43  ;;  %v3542_v40 = vmul.f32 %v3494_v33, %v11320_v25  ;;  %v3543_v36 = vmul.f32 %v3495_v59, %v11322_v22  ;;  %v3513_v10 = vld [vmem:[#allocation21 + $0x18] sm:$0xff] }
 0xc8b   : > { %v3499_v41 = vmul.f32 %v3487_v37, %v9621_v12  ;;  %v3500_v46 = vmul.f32 %v3488_v11, %v9619_v20  ;;  %3604 = vrot.lane.b32.xlu1 %v10244_v62, %s7902_s25  ;;  %v3527_v5 = vpack.c.bf16 %v3518_v4, %v3515_v24  ;;  %v10255_v19 = vpack.c.bf16 %v3519_v21, %v3516_v50 }
 0xc8c   : > { %v10257_v8 = vpack.c.bf16 %v3542_v40, %v3539_v45  ;;  %v3552_v61 = vpack.c.bf16 %v3543_v36, %v3540_v48  ;;  %v10259_v6 = vpack.c.bf16 %v3501_v35, %v3498_v53  ;;  %v3514_v26 = vmul.f32 %v10221_v1, %v11319_v54 }
 0xc8d   : > { %3568 = vrot.lane.b32.xlu0 %v3527_v5, %s7901_s2  ;;  %v3517_v59 = vmul.f32 %v3493_v16, %v11319_v54  ;;  %v10265_v28 = vpack.c.bf16 %v3499_v41, %v3496_v2  ;;  %v3538_v29 = vmul.f32 %v10221_v1, %v11321_v34  ;;  %v3541_v50 = vmul.f32 %v3493_v16, %v11321_v34 }
 0xc8e   : > { %v3522_v24 = vmul.f32 %v3498_v53, %v11317_v15  ;;  %v3525_v48 = vmul.f32 %v3501_v35, %v11317_v15  ;;  %v3546_v9 = vmul.f32 %v3498_v53, %v11322_v22  ;;  %v3549_v57 = vmul.f32 %v3501_v35, %v11322_v22  ;;  %v3512_v35 = vld [vmem:[#allocation21 + $0x10] sm:$0xff] }
 0xc8f   : > { %3558 = vrot.lane.b32.xlu1 %v10255_v19, %s7900_s30  ;;  %v3526_v42 = vpack.c.bf16 %v3517_v59, %v3514_v26  ;;  %v3550_v3 = vpack.c.bf16 %v3541_v50, %v3538_v29  ;;  %v10276_v33 = vpack.c.bf16 %v3500_v46, %v3497_v55  ;;  %v3520_v1 = vmul.f32 %v3496_v2, %v11319_v54 }
 0xc90   : > { %v3531_v39 = vpack.c.bf16 %v3525_v48, %v3522_v24  ;;  %v3555_v14 = vpack.c.bf16 %v3549_v57, %v3546_v9  ;;  %v3523_v16 = vmul.f32 %v3499_v41, %v11319_v54  ;;  %v3521_v0 = vmul.f32 %v3497_v55, %v11318_v63 }
 0xc91   : > { %3644 = vrot.lane.b32.xlu0 %v10257_v8, %s7904_s9  ;;  %v3524_v7 = vmul.f32 %v3500_v46, %v11318_v63  ;;  %v3544_v27 = vmul.f32 %v3496_v2, %v11321_v34  ;;  %v3547_v44 = vmul.f32 %v3499_v41, %v11321_v34  ;;  %v3545_v52 = vmul.f32 %v3497_v55, %v11320_v25  ;;  %v7112_v2 = vld [vmem:[#allocation20 + $0x4] ss:$12 sps:$4 sm:$0xff]   ;;  %v3511_v55 = vld [vmem:[#allocation21 + $0x8] sm:$0xff] }
 0xc92   : > { %v3529_v30 = vpack.c.bf16 %v3523_v16, %v3520_v1  ;;  %v3548_v53 = vmul.f32 %v3500_v46, %v11320_v25  ;;  %3871 = vmatprep.mubr.bf16.mxu0 %v7112_v2  ;;  %3977 = vmatprep.mubr.bf16.mxu1 %v7112_v2  ;;  %vm3832_vm12 = vcmask 261120  }
 0xc93   : > { %3634 = vrot.lane.b32.xlu1 %v3552_v61, %s7905_s0  ;;  %v3530_v17 = vpack.c.bf16 %v3524_v7, %v3521_v0  ;;  %v3553_v51 = vpack.c.bf16 %v3547_v44, %v3544_v27 }
 0xc94   : > { %v3554_v58 = vpack.c.bf16 %v3548_v53, %v3545_v52 }
 0xc95   : > { %3598 = vrot.lane.b32.xlu0 %v10259_v6, %s7903_s6 }
 0xc97   : > { %3566 = vrot.lane.b32.xlu1 %v3526_v42, %s7901_s2 }
 0xc99   : > { %3610 = vrot.lane.b32.xlu0 %v10265_v28, %s7902_s25 }
 0xc9b   : > { %3642 = vrot.lane.b32.xlu1 %v3550_v3, %s7904_s9 }
 0xc9d   : > { %3560 = vrot.lane.b32.xlu0 %v3531_v39, %s7900_s30 }
 0xc9f   : > { %3674 = vrot.lane.b32.xlu1 %v3526_v42, %s7906_s21 }
 0xca1   : > { %3636 = vrot.lane.b32.xlu0 %v3555_v14, %s7905_s0 }
 0xca3   : > { %3612 = vrot.lane.b32.xlu1 %v10276_v33, %s7902_s25 }
 0xca5   : > { %3572 = vrot.lane.b32.xlu0 %v3529_v30, %s7901_s2 }
 0xca7   : > { %3574 = vrot.lane.b32.xlu1 %v3530_v17, %s7901_s2 }
 0xca9   : > { %3676 = vrot.lane.b32.xlu0 %v3527_v5, %s7906_s21 }
 0xcab   : > { %3670 = vrot.lane.b32.xlu1 %v10255_v19, %s7907_s26 }
 0xcad   : > { %3648 = vrot.lane.b32.xlu0 %v3553_v51, %s7904_s9 }
 0xcaf   : > { %3570 = vrot.lane.b32.xlu1 %v10255_v19, %s7901_s2 }
 0xcb1   : > { %3680 = vrot.lane.b32.xlu0 %v3529_v30, %s7906_s21 }
 0xcb3   : > { %3706 = vrot.lane.b32.xlu1 %v3552_v61, %s7908_s8 }
 0xcb5   : > { %3672 = vrot.lane.b32.xlu0 %v3531_v39, %s7907_s26 }
 0xcb7   : > { %3650 = vrot.lane.b32.xlu1 %v3554_v58, %s7904_s9 }
 0xcb9   : > { %3704 = vrot.lane.b32.xlu0 %v10257_v8, %s7908_s8 }
 0xcbb   : > { %3576 = vrot.lane.b32.xlu1 %v3531_v39, %s7901_s2 }
 0xcbd   : > { %3702 = vrot.lane.b32.xlu0 %v3550_v3, %s7908_s8 }
 0xcbf   : > { %3682 = vrot.lane.b32.xlu1 %v3530_v17, %s7906_s21 }
 0xcc1   : > { %3708 = vrot.lane.b32.xlu0 %v3553_v51, %s7908_s8 }
 0xcc3   : > { %3712 = vrot.lane.b32.xlu1 %v3555_v14, %s7908_s8 }
 0xcc5   : > { %3608 = vrot.lane.b32.xlu0 %v10229_v38, %s7902_s25  ;;  %v3510_v38 = vld [vmem:[#allocation21] sm:$0xff] }
 0xcc7   : > { %3722 = vrot.lane.b32.xlu1 %v3550_v3, %s7909_s3 }
 0xcc9   : > { %3724 = vrot.lane.b32.xlu0 %v3553_v51, %s7909_s3 }
 0xccb   : > { %3736 = vrot.lane.b32.xlu1 %v3527_v5, %s7900_s30 }
 0xccd   : > { %3710 = vrot.lane.b32.xlu0 %v3554_v58, %s7908_s8 }
 0xccf   : > { %3734 = vrot.lane.b32.xlu1 %v3526_v42, %s7900_s30 }
 0xcd1   : > { %3614 = vrot.lane.b32.xlu0 %v10259_v6, %s7902_s25 }
 0xcd3   : > { %3646 = vrot.lane.b32.xlu1 %v3552_v61, %s7904_s9 }
 0xcd5   : > { %3738 = vrot.lane.b32.xlu0 %v3529_v30, %s7900_s30 }
 0xcd7   : > { %3740 = vrot.lane.b32.xlu1 %v3530_v17, %s7900_s30 }
 0xcd9   : > { %3752 = vrot.lane.b32.xlu0 %v10236_v47, %s7903_s6 }
 0xcdb   : > { %3750 = vrot.lane.b32.xlu1 %v10244_v62, %s7903_s6 }
 0xcdd   : > { %3652 = vrot.lane.b32.xlu0 %v3555_v14, %s7904_s9 }
 0xcdf   : > { %3756 = vrot.lane.b32.xlu1 %v10276_v33, %s7903_s6 }
 0xce1   : > { %3754 = vrot.lane.b32.xlu0 %v10265_v28, %s7903_s6 }
 0xce3   : > { %3678 = vrot.lane.b32.xlu1 %v10255_v19, %s7906_s21 }
 0xce5   : > { %3684 = vrot.lane.b32.xlu0 %v3531_v39, %s7906_s21 }
 0xce7   : > { %3768 = vrot.lane.b32.xlu1 %v10257_v8, %s7905_s0 }
 0xce9   : > { %3766 = vrot.lane.b32.xlu0 %v3550_v3, %s7905_s0 }
 0xceb   : > { %3772 = vrot.lane.b32.xlu1 %v3554_v58, %s7905_s0 }
 0xced   : > { %3770 = vrot.lane.b32.xlu0 %v3553_v51, %s7905_s0 }
 0xcef   : > { %3784 = vperm.xlu1 %7082, %v3510_v38  }
 0xcf1   : > { %3789 = vperm.xlu0 %7081, %v3511_v55  }
 0xcf3   : > { %3794 = vperm.xlu1 %7082, %v3512_v35  }
 0xcf5   : > { %3799 = vperm.xlu0 %7081, %v3513_v10  }
 0xcf6   : > { %v10348_v43 = vpop.permute.xlu1 %3596 }
 0xcfa   : > { %v10350_v4 = vpop.permute.xlu0 %3606 }
 0xcfd   : > { %v3605_v21 = vpop.permute.xlu1 %3604 }
 0xcfe   : > { %v3616_v42 = vsel %vm1342_vm1, %v3605_v21, %v10350_v4  ;;  %v10384_v14 = vsel %vm1342_vm1, %v10348_v43, %v3605_v21 }
 0xcff   : > { %v3569_v45 = vpop.permute.xlu0 %3568 }
 0xd01   : > { %v10352_v37 = vpop.permute.xlu1 %3558 }
 0xd03   : > { %v10354_v11 = vpop.permute.xlu0 %3644 }
 0xd05   : > { %v10356_v40 = vpop.permute.xlu1 %3634 }
 0xd07   : > { %v10358_v36 = vpop.permute.xlu0 %3598 }
 0xd09   : > { %v3567_v41 = vpop.permute.xlu1 %3566 }
 0xd0a   : > { %v3578_v46 = vsel %vm1245_vm0, %v3567_v41, %v3569_v45  ;;  %v10363_v5 = vsel %vm1245_vm0, %v10352_v37, %v3567_v41 }
 0xd0b   : > { %v3611_v19 = vpop.permute.xlu0 %3610  ;;  %3839 = vmatprep.subr.bf16.mxu0 %v3578_v46 }
 0xd0c   : > { %3840 = vmatpush1.bf16.msra.mxu0 %v10363_v5  ;;  %v10392_v27 = vsel %vm1342_vm1, %v10358_v36, %v3611_v19 }
 0xd0d   : > { %v3643_v8 = vpop.permute.xlu1 %3642 }
 0xd0e   : > { %v3654_v44 = vsel %vm1439_vm2, %v3643_v8, %v10354_v11  ;;  %v10400_v53 = vsel %vm1439_vm2, %v10356_v40, %v3643_v8 }
 0xd0f   : > { %v10366_v61 = vpop.permute.xlu0 %3560 }
 0xd11   : > { %v3675_v26 = vpop.permute.xlu1 %3674 }
 0xd13   : > { %v10368_v59 = vpop.permute.xlu0 %3636 }
 0xd15   : > { %v10370_v29 = vpop.permute.xlu1 %3612 }
 0xd16   : > { %v3618_v1 = vsel %vm1342_vm1, %v3611_v19, %v10370_v29 }
 0xd17   : > { %v3573_v50 = vpop.permute.xlu0 %3572 }
 0xd18   : > { %v10377_v57 = vsel %vm1245_vm0, %v10366_v61, %v3573_v50 }
 0xd19   : > { %v3575_v24 = vpop.permute.xlu1 %3574 }
 0xd1a   : > { %v3580_v48 = vsel %vm1245_vm0, %v3573_v50, %v3575_v24 }
 0xd1b   : > { %v10373_v9 = vpop.permute.xlu0 %3676  ;;  %3841 = vmatprep.subr.bf16.mxu0 %v3580_v48 }
 0xd1c   : > { %3842 = vmatpush1.bf16.msra.mxu0 %v10377_v57  ;;  %v3686_v2 = vsel %vm1521_vm3, %v3675_v26, %v10373_v9 }
 0xd1d   : > { %3843 = vmatprep.subr.bf16.mxu0 %v3616_v42  ;;  %v3671_v3 = vpop.permute.xlu1 %3670 }
 0xd1e   : > { %v3696_v35 = vsel %vm1521_vm3, %v3671_v3, %v3675_v26 }
 0xd1f   : > { %v3649_v39 = vpop.permute.xlu0 %3648 }
 0xd20   : > { %3844 = vmatpush1.bf16.msra.mxu0 %v10384_v14 }
 0xd21   : > { %3845 = vmatprep.subr.bf16.mxu0 %v3618_v1  ;;  %v3571_v16 = vpop.permute.xlu1 %3570 }
 0xd22   : > { %v3579_v0 = vsel %vm1245_vm0, %v3569_v45, %v3571_v16 }
 0xd23   : > { %v3681_v7 = vpop.permute.xlu0 %3680  ;;  %6356 = vmatpush3.bf16.msra.mxu1 %v3579_v0 }
 0xd24   : > { %3846 = vmatpush1.bf16.msra.mxu0 %v10392_v27  ;;  %6357 = vmatprep.subr.bf16.mxu1 %v10259_v6  ;;  %v10409_v6 = vsel %vm1439_vm2, %v10368_v59, %v3649_v39 }
 0xd25   : > { %3847 = vmatprep.subr.bf16.mxu0 %v3654_v44  ;;  %v3707_v30 = vpop.permute.xlu1 %3706 }
 0xd27   : > { %v3673_v52 = vpop.permute.xlu0 %3672 }
 0xd28   : > { %3848 = vmatpush1.bf16.msra.mxu0 %v10400_v53  ;;  %v3700_v41 = vsel %vm1521_vm3, %v3673_v52, %v3681_v7 }
 0xd29   : > { %v10403_v17 = vpop.permute.xlu1 %3650 }
 0xd2a   : > { %v3656_v51 = vsel %vm1439_vm2, %v3649_v39, %v10403_v17 }
 0xd2b   : > { %v3705_v58 = vpop.permute.xlu0 %3704  ;;  %3849 = vmatprep.subr.bf16.mxu0 %v3656_v51 }
 0xd2c   : > { %3850 = vmatpush1.bf16.msra.mxu0 %v10409_v6  ;;  %v3715_v42 = vsel %vm1593_vm4, %v3705_v58, %v3707_v30 }
 0xd2d   : > { %3851 = vmatprep.subr.bf16.mxu0 %v3686_v2  ;;  %v3577_v38 = vpop.permute.xlu1 %3576 }
 0xd2e   : > { %v3581_v55 = vsel %vm1245_vm0, %v3575_v24, %v3577_v38 }
 0xd2f   : > { %v3703_v10 = vpop.permute.xlu0 %3702  ;;  %6358 = vmatpush3.bf16.msra.mxu1 %v3581_v55 }
 0xd30   : > { %3852 = vmatpush1.bf16.msra.mxu0 %v3696_v35 }
 0xd31   : > { %v10416_v21 = vpop.permute.xlu1 %3682 }
 0xd32   : > { %v3688_v45 = vsel %vm1521_vm3, %v3681_v7, %v10416_v21 }
 0xd33   : > { %v3709_v46 = vpop.permute.xlu0 %3708  ;;  %3853 = vmatprep.subr.bf16.mxu0 %v3688_v45 }
 0xd34   : > { %3854 = vmatpush1.bf16.msra.mxu0 %v3700_v41  ;;  %v7113_v41 = vld [vmem:[#allocation20 + $0x1c] ss:$12 sps:$4 sm:$0xff]  }
 0xd35   : > { %3855 = vmatprep.subr.bf16.mxu0 %v10236_v47  ;;  %v3713_v19 = vpop.permute.xlu1 %3712 }
 0xd37   : > { %v3609_v8 = vpop.permute.xlu0 %3608 }
 0xd38   : > { %3856 = vmatpush1.bf16.msra.mxu0 %v10244_v62  ;;  %v3617_v24 = vsel %vm1342_vm1, %v10350_v4, %v3609_v8 }
 0xd39   : > { %3857 = vmatprep.subr.bf16.mxu0 %v10276_v33  ;;  %v3723_v26 = vpop.permute.xlu1 %3722  ;;  %v3714_v33 = vsel %vm1593_vm4, %v3703_v10, %v3705_v58  ;;  %v7110_v10 = vld [vmem:[#allocation20] ss:$12 sps:$4 sm:$0xff]  }
 0xd3a   : > { %v3728_v50 = vsel %vm1624_vm5, %v3707_v30, %v3723_v26 }
 0xd3b   : > { %v3725_v48 = vpop.permute.xlu0 %3724  ;;  %6359 = vmatprep.subr.bf16.mxu1 %v3728_v50 }
 0xd3c   : > { %3858 = vmatpush1.bf16.msra.mxu0 %v10265_v28  ;;  %6360 = vmatpush3.bf16.msra.mxu1 %v3617_v24  ;;  %v3732_v47 = vsel %vm1624_vm5, %v3713_v19, %v3725_v48 }
 0xd3d   : > { %3859 = vmatprep.subr.bf16.mxu0 %v3715_v42  ;;  %6361 = vmatprep.subr.bf16.mxu1 %v3732_v47  ;;  %v3737_v62 = vpop.permute.xlu1 %3736 }
 0xd3e   : > { %v3743_v0 = vsel %vm1665_vm6, %v3737_v62, %v10352_v37 }
 0xd3f   : > { %v3711_v3 = vpop.permute.xlu0 %3710 }
 0xd40   : > { %3860 = vmatpush1.bf16.msra.mxu0 %v3714_v33  ;;  %v3717_v39 = vsel %vm1593_vm4, %v3711_v3, %v3713_v19  ;;  %v3716_v16 = vsel %vm1593_vm4, %v3709_v46, %v3711_v3 }
 0xd41   : > { %3861 = vmatprep.subr.bf16.mxu0 %v3717_v39  ;;  %v3735_v4 = vpop.permute.xlu1 %3734 }
 0xd42   : > { %v3742_v44 = vsel %vm1665_vm6, %v3735_v4, %v3737_v62 }
 0xd43   : > { %v3615_v1 = vpop.permute.xlu0 %3614 }
 0xd44   : > { %v3619_v28 = vsel %vm1342_vm1, %v10370_v29, %v3615_v1  ;;  %3862 = vmatpush1.bf16.msra.mxu0 %v3716_v16 }
 0xd45   : > { %3863 = vmatprep.subr.bf16.mxu0 %v3743_v0  ;;  %6362 = vmatpush3.bf16.msra.mxu1 %v3619_v28  ;;  %v3647_v7 = vpop.permute.xlu1 %3646 }
 0xd46   : > { %6363 = vmatprep.subr.bf16.mxu1 %v10363_v5  ;;  %v3655_v52 = vsel %vm1439_vm2, %v10354_v11, %v3647_v7 }
 0xd47   : > { %v3739_v30 = vpop.permute.xlu0 %3738 }
 0xd48   : > { %3864 = vmatpush1.bf16.msra.mxu0 %v3742_v44 }
 0xd49   : > { %6364 = vmatpush3.bf16.msra.mxu1 %v3655_v52  ;;  %v3741_v51 = vpop.permute.xlu1 %3740 }
 0xd4a   : > { %6365 = vmatprep.subr.bf16.mxu1 %v10377_v57  ;;  %v3745_v29 = vsel %vm1665_vm6, %v3741_v51, %v10366_v61  ;;  %v3744_v37 = vsel %vm1665_vm6, %v3739_v30, %v3741_v51 }
 0xd4b   : > { %v3753_v58 = vpop.permute.xlu0 %3752  ;;  %3865 = vmatprep.subr.bf16.mxu0 %v3745_v29 }
 0xd4c   : > { %3866 = vmatpush1.bf16.msra.mxu0 %v3744_v37  ;;  %v3759_v5 = vsel %vm1706_vm8, %v3753_v58, %v10348_v43 }
 0xd4d   : > { %3867 = vmatprep.subr.bf16.mxu0 %v3759_v5  ;;  %v3751_v2 = vpop.permute.xlu1 %3750 }
 0xd4e   : > { %v3758_v11 = vsel %vm1706_vm8, %v3751_v2, %v3753_v58 }
 0xd4f   : > { %v3653_v38 = vpop.permute.xlu0 %3652 }
 0xd50   : > { %v3657_v55 = vsel %vm1439_vm2, %v10403_v17, %v3653_v38  ;;  %3868 = vmatpush1.bf16.msra.mxu0 %v3758_v11 }
 0xd51   : > { %6366 = vmatpush3.bf16.msra.mxu1 %v3657_v55  ;;  %v3757_v57 = vpop.permute.xlu1 %3756 }
 0xd52   : > { %6367 = vmatprep.subr.bf16.mxu1 %v10384_v14  ;;  %v3761_v61 = vsel %vm1706_vm8, %v3757_v57, %v10358_v36 }
 0xd53   : > { %v3755_v35 = vpop.permute.xlu0 %3754  ;;  %3869 = vmatprep.subr.bf16.mxu0 %v3761_v61 }
 0xd54   : > { %v3760_v43 = vsel %vm1706_vm8, %v3755_v35, %v3757_v57 }
 0xd55   : > { %3870 = vmatpush1.bf16.msra.mxu0 %v3760_v43  ;;  %v3679_v45 = vpop.permute.xlu1 %3678 }
 0xd56   : > { %v3687_v46 = vsel %vm1521_vm3, %v10373_v9, %v3679_v45  ;;  %v7115_v9 = vld [vmem:[#allocation20 + $0x18] ss:$12 sps:$4 sm:$0xff]  }
 0xd57   : > { %v3685_v17 = vpop.permute.xlu0 %3684  ;;  %6368 = vmatpush3.bf16.msra.mxu1 %v3687_v46 }
 0xd58   : > { %3872 = vmatmul.mubr.bf16.vlgmr.msra.gmra.mrb[24].mxu0 %v7110_v10  ;;  %6369 = vmatprep.subr.bf16.mxu1 %v10392_v27  ;;  %v3689_v36 = vsel %vm1521_vm3, %v10416_v21, %v3685_v17  ;;  %v7116_v21 = vld [vmem:[#allocation20 + $0x8] ss:$12 sps:$4 sm:$0xff]  }
 0xd59   : > { %v3769_v14 = vpop.permute.xlu1 %3768  ;;  %3881 = vmatprep.mubr.bf16.mxu0 %v7113_v41 }
 0xd5a   : > { %v3775_v19 = vsel %vm1747_vm9, %v3769_v14, %v10356_v40 }
 0xd5b   : > { %v3767_v8 = vpop.permute.xlu0 %3766  ;;  %3892 = vmatprep.subr.bf16.mxu0 %v3775_v19  ;;  %6370 = vmatpush3.bf16.msra.mxu1 %v3689_v36 }
 0xd5c   : > { %v3774_v26 = vsel %vm1747_vm9, %v3767_v8, %v3769_v14  ;;  %6545 = vmatprep.subr.bf16.mxu1 %v10400_v53 }
 0xd5d   : > { %3893 = vmatpush1.bf16.msra.mxu0 %v3774_v26  ;;  %v3773_v50 = vpop.permute.xlu1 %3772 }
 0xd5e   : > { %3978 = vmatmul.mubr.bf16.vlgmr.msra.gmra.mrb[40].mxu1 %v7110_v10  ;;  %v3777_v27 = vsel %vm1747_vm9, %v3773_v50, %v10368_v59  ;;  %v7117_v59 = vld [vmem:[#allocation20 + $0x20] ss:$12 sps:$4 sm:$0xff]  }
 0xd5f   : > { %v3771_v24 = vpop.permute.xlu0 %3770  ;;  %3894 = vmatprep.subr.bf16.mxu0 %v3777_v27  ;;  %6546 = vmatpush3.bf16.msra.mxu1 %v10400_v53 }
 0xd60   : > { %v3776_v40 = vsel %vm1747_vm9, %v3771_v24, %v3773_v50  ;;  %3882 = vmatmul.mubr.bf16.gmra.mrb[28].mxu0 %v7115_v9  ;;  %6547 = vmatprep.subr.bf16.mxu1 %v10409_v6 }
 0xd61   : > { %3895 = vmatpush1.bf16.msra.mxu0 %v3776_v40  ;;  %3985 = vmatprep.mubr.bf16.mxu1 %v7113_v41 }
 0xd62   : > { %3924 = vmatprep.mubr.bf16.mxu0 %v11298_v56 }
 0xd63   : > { %6548 = vmatpush3.bf16.msra.mxu1 %v10409_v6 }
 0xd66   : > { %3986 = vmatmul.mubr.bf16.gmra.mrb[44].mxu1 %v7115_v9 }
 0xd67   : > { %6549 = vmatprep.mubr.msk.bf16.mxu1 %vm3832_vm12, %v7116_v21 }
 0xd68   : > { %6262 = vmatmul.mubr.msk.bf16.vlgmr.msra.gmra.mrb[24].mxu0 %vm3832_vm12, %v7116_v21 }
 0xd69   : > { %3934 = vmatprep.mubr.bf16.mxu0 %v11298_v56 }
 0xd6e   : > { %6550 = vmatmul.mubr.msk.bf16.vlgmr.msra.gmra.mrb[48].mxu1 %vm3832_vm12, %v7117_v59  ;;  %v3785_v33 = vpop.permute.xlu1 %3784 }
 0xd70   : > { %6263 = vmatmul.mubr.msk.bf16.gmra.mrb[28].mxu0 %vm3832_vm12, %v7117_v59  ;;  %v3790_v39 = vpop.permute.xlu0 %3789 }
 0xd72   : > { %v3795_v2 = vpop.permute.xlu1 %3794 }
 0xd74   : > { %v3800_v43 = vpop.permute.xlu0 %3799 }
 0xe31   : > { %v6371_v53 = vpop.f32.mrb[40].mxu1 }
 0xe32   : > { %v6372_v48 = vpop.f32.mrb[41].mxu1 }
 0xe33   : > { %v6373_v42 = vadd.f32 %v6372_v48, %v6371_v53  ;;  %v6374_v47 = vpop.f32.mrb[42].mxu1 }
 0xe34   : > { %v6375_v62 = vpop.f32.mrb[43].mxu1 }
 0xe35   : > { %v6376_v6 = vadd.f32 %v6375_v62, %v6374_v47  ;;  %v3980_v5 = vadd.f32 %v6373_v42, %v3785_v33 }
 0xe37   : > { %v3983_v55 = vadd.f32 %v6376_v6, %v3790_v39 }
 0xe39   : > { %v6377_v3 = vpop.f32.mrb[44].mxu1 }
 0xe3a   : > { %v6378_v4 = vpop.f32.mrb[45].mxu1 }
 0xe3b   : > { %v6379_v1 = vadd.f32 %v6378_v4, %v6377_v3  ;;  %v3926_v16 = vpop.f32.mrb[24].mxu0  ;;  %v6380_v28 = vpop.f32.mrb[46].mxu1 }
 0xe3c   : > { %v6755_v0 = vadd.f32 %v3926_v16, %v3785_v33  ;;  %v3928_v7 = vpop.f32.mrb[25].mxu0  ;;  %v6381_v44 = vpop.f32.mrb[47].mxu1 }
 0xe3d   : > { %v6756_v30 = vadd.f32 %v3928_v7, %v3785_v33  ;;  %v6382_v52 = vadd.f32 %v6381_v44, %v6380_v28  ;;  %v3930_v51 = vpop.f32.mrb[26].mxu0  ;;  %v3988_v35 = vadd.f32 %v6379_v1, %v3795_v2 }
 0xe3e   : > { %vm4043_vm13 = vcmp.gt.f32.partialorder %v6755_v0, 0.0  ;;  %v4055_v29 = vmul.f32 0.1, %v6755_v0  ;;  %v6757_v37 = vadd.f32 %v3930_v51, %v3790_v39  ;;  %v3932_v58 = vpop.f32.mrb[27].mxu0 }
 0xe3f   : > { %vm4044_vm14 = vcmp.gt.f32.partialorder %v6756_v30, 0.0  ;;  %v4056_v11 = vmul.f32 0.1, %v6756_v30  ;;  %v6758_v38 = vadd.f32 %v3932_v58, %v3790_v39  ;;  %v3991_v8 = vadd.f32 %v6382_v52, %v3800_v43 }
 0xe40   : > { %v4067_v57 = vsel %vm4043_vm13, %v6755_v0, %v4055_v29  ;;  %vm4046_vm15 = vcmp.gt.f32.partialorder %v6757_v37, 0.0  ;;  %v4058_v61 = vmul.f32 0.1, %v6757_v37 }
 0xe41   : > { %v10476_v10 = vmul.f32 %v4067_v57, %v9621_v12  ;;  %v4068_v45 = vsel %vm4044_vm14, %v6756_v30, %v4056_v11  ;;  %vm4047_vm7 = vcmp.gt.f32.partialorder %v6758_v38, 0.0  ;;  %v4059_v41 = vmul.f32 0.1, %v6758_v38  ;;  %v6551_v46 = vpop.f32.mrb[48].mxu1 }
 0xe42   : > { %v10479_v17 = vmul.f32 %v4068_v45, %v9619_v20  ;;  %v4070_v14 = vsel %vm4046_vm15, %v6757_v37, %v4058_v61  ;;  %v4037_v36 = vadd.f32 %v6551_v46, %v3988_v35  ;;  %v4028_v19 = vpop.f32.mrb[49].mxu1 }
 0xe43   : > { %v10482_v26 = vmul.f32 %v4070_v14, %v9621_v12  ;;  %v4071_v9 = vsel %vm4047_vm7, %v6758_v38, %v4059_v41  ;;  %v4029_v50 = vadd.f32 %v4028_v19, %v3980_v5  ;;  %v3936_v27 = vpop.f32.mrb[28].mxu0  ;;  %v6552_v24 = vpop.f32.mrb[50].mxu1  ;;  %v10486_v40 = vmul.f32 %v10476_v10, %v11319_v54 }
 0xe44   : > { %v4083_v21 = vmul.f32 %v4071_v9, %v9619_v20  ;;  %vm4051_vm10 = vcmp.gt.f32.partialorder %v4037_v36, 0.0  ;;  %v4063_v59 = vmul.f32 0.1, %v4037_v36  ;;  %v6759_v53 = vadd.f32 %v3936_v27, %v3795_v2  ;;  %v3938_v48 = vpop.f32.mrb[29].mxu0  ;;  %v4031_v42 = vpop.f32.mrb[51].mxu1 }
 0xe45   : > { %vm4045_vm11 = vcmp.gt.f32.partialorder %v4029_v50, 0.0  ;;  %v4057_v47 = vmul.f32 0.1, %v4029_v50  ;;  %v4040_v62 = vadd.f32 %v6552_v24, %v3991_v8  ;;  %v6760_v6 = vadd.f32 %v3938_v48, %v3795_v2  ;;  %v3940_v33 = vpop.f32.mrb[30].mxu0 }
 0xe46   : > { %v4075_v3 = vsel %vm4051_vm10, %v4037_v36, %v4063_v59  ;;  %vm4049_vm13 = vcmp.gt.f32.partialorder %v6759_v53, 0.0  ;;  %v4061_v39 = vmul.f32 0.1, %v6759_v53  ;;  %v4032_v4 = vadd.f32 %v4031_v42, %v3983_v55  ;;  %v3942_v1 = vpop.f32.mrb[31].mxu0 }
 0xe47   : > { %v4087_v16 = vmul.f32 %v4075_v3, %v9617_v31  ;;  %v4069_v28 = vsel %vm4045_vm11, %v4029_v50, %v4057_v47  ;;  %vm4054_vm14 = vcmp.gt.f32.partialorder %v4040_v62, 0.0  ;;  %v4066_v0 = vmul.f32 0.1, %v4040_v62 }
 0xe48   : > { %v4081_v7 = vmul.f32 %v4069_v28, %v9617_v31  ;;  %v4073_v44 = vsel %vm4049_vm13, %v6759_v53, %v4061_v39  ;;  %vm4050_vm15 = vcmp.gt.f32.partialorder %v6760_v6, 0.0  ;;  %v4062_v30 = vmul.f32 0.1, %v6760_v6 }
 0xe49   : > { %v4085_v52 = vmul.f32 %v4073_v44, %v9621_v12  ;;  %v4078_v51 = vsel %vm4054_vm14, %v4040_v62, %v4066_v0  ;;  %vm4048_vm7 = vcmp.gt.f32.partialorder %v4032_v4, 0.0  ;;  %v4060_v29 = vmul.f32 0.1, %v4032_v4 }
 0xe4a   : > { %v4090_v37 = vmul.f32 %v4078_v51, %v9617_v31  ;;  %v4074_v58 = vsel %vm4050_vm15, %v6760_v6, %v4062_v30  ;;  %v6761_v5 = vadd.f32 %v3940_v33, %v3800_v43  ;;  %v6762_v2 = vadd.f32 %v3942_v1, %v3800_v43 }
 0xe4b   : > { %v4086_v11 = vmul.f32 %v4074_v58, %v9619_v20  ;;  %v4072_v38 = vsel %vm4048_vm7, %v4032_v4, %v4060_v29  ;;  %v4123_v55 = vmul.f32 %v4087_v16, %v11317_v15  ;;  %v4117_v57 = vmul.f32 %v4081_v7, %v11317_v15 }
 0xe4c   : > { %v4084_v61 = vmul.f32 %v4072_v38, %v9617_v31  ;;  %vm4052_vm10 = vcmp.gt.f32.partialorder %v6761_v5, 0.0  ;;  %v4064_v35 = vmul.f32 0.1, %v6761_v5  ;;  %vm4053_vm11 = vcmp.gt.f32.partialorder %v6762_v2, 0.0  ;;  %v4112_v38 = vld [vmem:[#allocation24 + $0x28] sm:$0xff] }
 0xe4d   : > { %v4065_v45 = vmul.f32 0.1, %v6762_v2  ;;  %v10497_v41 = vpack.c.bf16 %v4090_v37, %v4087_v16  ;;  %v4126_v46 = vmul.f32 %v4090_v37, %v11317_v15  ;;  %v10501_v14 = vpack.c.bf16 %v4083_v21, %v10479_v17 }
 0xe4e   : > { %v4076_v43 = vsel %vm4052_vm10, %v6761_v5, %v4064_v35  ;;  %v10503_v36 = vpack.c.bf16 %v4084_v61, %v4081_v7  ;;  %v4120_v19 = vmul.f32 %v4084_v61, %v11317_v15  ;;  %v4141_v8 = vmul.f32 %v4081_v7, %v11322_v22  ;;  %v4113_v35 = vld [vmem:[#allocation24 + $0x30] sm:$0xff] }
 0xe4f   : > { %v4088_v9 = vmul.f32 %v4076_v43, %v9621_v12  ;;  %v4077_v50 = vsel %vm4053_vm11, %v6762_v2, %v4065_v45  ;;  %4199 = vrot.lane.b32.xlu0 %v10497_v41, %s7903_s6  ;;  %v10510_v27 = vpack.c.bf16 %v4126_v46, %v4123_v55  ;;  %v4144_v24 = vmul.f32 %v4084_v61, %v11322_v22  ;;  %v4111_v55 = vld [vmem:[#allocation24 + $0x20] sm:$0xff] }
 0xe50   : > { %v4089_v59 = vmul.f32 %v4077_v50, %v9619_v20  ;;  %4197 = vrot.lane.b32.xlu1 %v10503_v36, %s7903_s6  ;;  %6387 = vmatprep.subr.bf16.mxu0 %v10503_v36  ;;  %v10517_v15 = vpack.c.bf16 %v4120_v19, %v4117_v57  ;;  %v4116_v53 = vmul.f32 %v10479_v17, %v11318_v63  ;;  %v4114_v57 = vld [vmem:[#allocation24 + $0x38] sm:$0xff] }
 0xe51   : > { %v10521_v48 = vpack.c.bf16 %v4144_v24, %v4141_v8  ;;  %v4119_v42 = vmul.f32 %v4083_v21, %v11318_v63  ;;  %v10526_v47 = vpack.c.bf16 %v10482_v26, %v10476_v10  ;;  %v4140_v62 = vmul.f32 %v10479_v17, %v11320_v25 }
 0xe52   : > { %v4143_v6 = vmul.f32 %v4083_v21, %v11320_v25  ;;  %v4118_v33 = vmul.f32 %v10482_v26, %v11319_v54  ;;  %v10533_v3 = vpack.c.bf16 %v4088_v9, %v4085_v52  ;;  %v4139_v39 = vmul.f32 %v10476_v10, %v11321_v34 }
 0xe53   : > { %4161 = vrot.lane.b32.xlu0 %v10510_v27, %s7900_s30  ;;  %v4128_v4 = vpack.c.bf16 %v4119_v42, %v4116_v53  ;;  %v4142_v1 = vmul.f32 %v10482_v26, %v11321_v34  ;;  %v4121_v28 = vmul.f32 %v4085_v52, %v11319_v54  ;;  %v4124_v17 = vmul.f32 %v4088_v9, %v11319_v54 }
 0xe54   : > { %4159 = vrot.lane.b32.xlu1 %v10517_v15, %s7900_s30  ;;  %v10545_v21 = vpack.c.bf16 %v4143_v6, %v4140_v62  ;;  %v4127_v0 = vpack.c.bf16 %v4118_v33, %v10486_v40  ;;  %v10548_v7 = vpack.c.bf16 %v4089_v59, %v4086_v11  ;;  %v4147_v30 = vmul.f32 %v4087_v16, %v11322_v22 }
 0xe55   : > { %v4151_v10 = vpack.c.bf16 %v4142_v1, %v4139_v39  ;;  %v4130_v44 = vpack.c.bf16 %v4124_v17, %v4121_v28  ;;  %v4150_v51 = vmul.f32 %v4090_v37, %v11322_v22  ;;  %v4122_v26 = vmul.f32 %v4086_v11, %v11318_v63 }
 0xe56   : > { %v4125_v29 = vmul.f32 %v4089_v59, %v11318_v63  ;;  %v4145_v54 = vmul.f32 %v4085_v52, %v11321_v34  ;;  %v4148_v58 = vmul.f32 %v4088_v9, %v11321_v34  ;;  %v4146_v5 = vmul.f32 %v4086_v11, %v11320_v25  ;;  %v7120_v63 = vld [vmem:[#allocation23 + $0x4] ss:$12 sps:$4 sm:$0xff]   ;;  %v4110_v52 = vld [vmem:[#allocation24 + $0x18] sm:$0xff] }
 0xe57   : > { %4207 = vrot.lane.b32.xlu0 %v10501_v14, %s7902_s25  ;;  %v4156_v40 = vpack.c.bf16 %v4150_v51, %v4147_v30  ;;  %v4149_v2 = vmul.f32 %v4089_v59, %v11320_v25  ;;  %4527 = vmatprep.mubr.bf16.mxu1 %v7120_v63  ;;  %v4108_v25 = vld [vmem:[#allocation24 + $0x8] sm:$0xff]  ;;  %v4107_v34 = vld [vmem:[#allocation24] sm:$0xff]  ;;  %v4109_v11 = vld [vmem:[#allocation24 + $0x10] sm:$0xff] }
 0xe58   : > { %4235 = vrot.lane.b32.xlu1 %v10521_v48, %s7905_s0  ;;  %v4131_v22 = vpack.c.bf16 %v4125_v29, %v4122_v26  ;;  %v4154_v16 = vpack.c.bf16 %v4148_v58, %v4145_v54  ;;  %4673 = vmatprep.mubr.bf16.mxu0 %v7120_v63 }
 0xe59   : > { %v4155_v37 = vpack.c.bf16 %v4149_v2, %v4146_v5 }
 0xe5b   : > { %4169 = vrot.lane.b32.xlu0 %v4128_v4, %s7901_s2 }
 0xe5c   : > { %4205 = vrot.lane.b32.xlu1 %v10526_v47, %s7902_s25 }
 0xe5f   : > { %4245 = vrot.lane.b32.xlu0 %v10545_v21, %s7904_s9 }
 0xe60   : > { %4167 = vrot.lane.b32.xlu1 %v4127_v0, %s7901_s2 }
 0xe63   : > { %4211 = vrot.lane.b32.xlu0 %v10533_v3, %s7902_s25 }
 0xe64   : > { %4243 = vrot.lane.b32.xlu1 %v4151_v10, %s7904_s9 }
 0xe67   : > { %4173 = vrot.lane.b32.xlu0 %v4130_v44, %s7901_s2 }
 0xe68   : > { %4213 = vrot.lane.b32.xlu1 %v10548_v7, %s7902_s25 }
 0xe6b   : > { %4237 = vrot.lane.b32.xlu0 %v4156_v40, %s7905_s0 }
 0xe6c   : > { %4175 = vrot.lane.b32.xlu1 %v4131_v22, %s7901_s2 }
 0xe6f   : > { %4249 = vrot.lane.b32.xlu0 %v4154_v16, %s7904_s9 }
 0xe70   : > { %4275 = vrot.lane.b32.xlu1 %v4127_v0, %s7906_s21 }
 0xe73   : > { %4277 = vrot.lane.b32.xlu0 %v4128_v4, %s7906_s21 }
 0xe74   : > { %4271 = vrot.lane.b32.xlu1 %v10517_v15, %s7907_s26 }
 0xe77   : > { %4281 = vrot.lane.b32.xlu0 %v4130_v44, %s7906_s21 }
 0xe78   : > { %4305 = vrot.lane.b32.xlu1 %v10545_v21, %s7908_s8 }
 0xe7b   : > { %4273 = vrot.lane.b32.xlu0 %v10510_v27, %s7907_s26 }
 0xe7c   : > { %4251 = vrot.lane.b32.xlu1 %v4155_v37, %s7904_s9 }
 0xe7f   : > { %4307 = vrot.lane.b32.xlu0 %v10521_v48, %s7908_s8 }
 0xe80   : > { %4303 = vrot.lane.b32.xlu1 %v4151_v10, %s7908_s8 }
 0xe83   : > { %4309 = vrot.lane.b32.xlu0 %v4154_v16, %s7908_s8 }
 0xe84   : > { %4283 = vrot.lane.b32.xlu1 %v4131_v22, %s7906_s21 }
 0xe87   : > { %4337 = vrot.lane.b32.xlu0 %v4128_v4, %s7900_s30 }
 0xe88   : > { %4313 = vrot.lane.b32.xlu1 %v4156_v40, %s7908_s8 }
 0xe8b   : > { %4177 = vrot.lane.b32.xlu0 %v10510_v27, %s7901_s2 }
 0xe8c   : > { %4171 = vrot.lane.b32.xlu1 %v10517_v15, %s7901_s2  ;;  %s6223_s2 = sshll.u32 %s8594_s24, 6 }
 0xe8f   : > { %4311 = vrot.lane.b32.xlu0 %v4155_v37, %s7908_s8 }
 0xe90   : > { %4335 = vrot.lane.b32.xlu1 %v4127_v0, %s7900_s30 }
 0xe93   : > { %4323 = vrot.lane.b32.xlu0 %v4151_v10, %s7909_s3 }
 0xe94   : > { %4339 = vrot.lane.b32.xlu1 %v4130_v44, %s7900_s30 }
 0xe97   : > { %4209 = vrot.lane.b32.xlu0 %v10503_v36, %s7902_s25 }
 0xe98   : > { %4353 = vrot.lane.b32.xlu1 %v10501_v14, %s7903_s6 }
 0xe9b   : > { %4325 = vrot.lane.b32.xlu0 %v4154_v16, %s7909_s3 }
 0xe9c   : > { %4341 = vrot.lane.b32.xlu1 %v4131_v22, %s7900_s30  ;;  %s7916_s30 = smov 96  }
 0xe9f   : > { %4215 = vrot.lane.b32.xlu0 %v10497_v41, %s7902_s25 }
 0xea0   : > { %4351 = vrot.lane.b32.xlu1 %v10526_v47, %s7903_s6 }
 0xea3   : > { %4355 = vrot.lane.b32.xlu0 %v10533_v3, %s7903_s6 }
 0xea4   : > { %4357 = vrot.lane.b32.xlu1 %v10548_v7, %s7903_s6 }
 0xea7   : > { %4253 = vrot.lane.b32.xlu0 %v4156_v40, %s7904_s9 }
 0xea8   : > { %4247 = vrot.lane.b32.xlu1 %v10521_v48, %s7904_s9 }
 0xeab   : > { %4285 = vrot.lane.b32.xlu0 %v10510_v27, %s7906_s21 }
 0xeac   : > { %4279 = vrot.lane.b32.xlu1 %v10517_v15, %s7906_s21  ;;  %s11323_s21 = sld [smem:[#allocation96_spill]] }
 0xeaf   : > { %4367 = vrot.lane.b32.xlu0 %v4151_v10, %s7905_s0 }
 0xeb0   : > { %4369 = vrot.lane.b32.xlu1 %v10545_v21, %s7905_s0 }
 0xeb3   : > { %4371 = vrot.lane.b32.xlu0 %v4154_v16, %s7905_s0 }
 0xeb4   : > { %4373 = vrot.lane.b32.xlu1 %v4155_v37, %s7905_s0 }
 0xeb7   : > { %4390 = vperm.xlu0 %7081, %v4108_v25  }
 0xeb8   : > { %4385 = vperm.xlu1 %7082, %v4107_v34  }
 0xebb   : > { %4400 = vperm.xlu0 %7081, %v4110_v52  }
 0xebc   : > { %4395 = vperm.xlu1 %7082, %v4109_v11  }
 0xebf   : > { %4410 = vperm.xlu0 %7081, %v4112_v38  }
 0xec0   : > { %4405 = vperm.xlu1 %7082, %v4111_v55  }
 0xec1   : > { %v10628_v61 = vpop.permute.xlu0 %4199 }
 0xec2   : > { %v10630_v45 = vpop.permute.xlu1 %4197 }
 0xec3   : > { %4420 = vperm.xlu0 %7081, %v4114_v57  }
 0xec4   : > { %4415 = vperm.xlu1 %7082, %v4113_v35  }
 0xec5   : > { %v10632_v46 = vpop.permute.xlu0 %4161 }
 0xec6   : > { %v10634_v43 = vpop.permute.xlu1 %4159 }
 0xec9   : > { %v10636_v36 = vpop.permute.xlu0 %4207 }
 0xeca   : > { %v10638_v19 = vpop.permute.xlu1 %4235 }
 0xecd   : > { %v4170_v8 = vpop.permute.xlu0 %4169 }
 0xece   : > { %v4206_v9 = vpop.permute.xlu1 %4205 }
 0xecf   : > { %v4217_v1 = vsel %vm1342_vm1, %v4206_v9, %v10636_v36  ;;  %v10662_v17 = vsel %vm1342_vm1, %v10630_v45, %v4206_v9 }
 0xed1   : > { %v10640_v50 = vpop.permute.xlu0 %4245 }
 0xed2   : > { %v4168_v27 = vpop.permute.xlu1 %4167 }
 0xed3   : > { %v10644_v24 = vsel %vm1245_vm0, %v10634_v43, %v4168_v27  ;;  %v4179_v59 = vsel %vm1245_vm0, %v4168_v27, %v4170_v8 }
 0xed4   : > { %4495 = vmatprep.subr.bf16.mxu1 %v4179_v59 }
 0xed5   : > { %v4212_v15 = vpop.permute.xlu0 %4211  ;;  %4496 = vmatpush1.bf16.msra.mxu1 %v10644_v24 }
 0xed6   : > { %v4244_v53 = vpop.permute.xlu1 %4243  ;;  %v10671_v44 = vsel %vm1342_vm1, %v10628_v61, %v4212_v15 }
 0xed7   : > { %v4255_v51 = vsel %vm1439_vm2, %v4244_v53, %v10640_v50  ;;  %v10678_v29 = vsel %vm1439_vm2, %v10638_v19, %v4244_v53 }
 0xed9   : > { %v4174_v48 = vpop.permute.xlu0 %4173 }
 0xeda   : > { %v10648_v42 = vpop.permute.xlu1 %4213  ;;  %v10655_v39 = vsel %vm1245_vm0, %v10632_v46, %v4174_v48 }
 0xedb   : > { %v4219_v0 = vsel %vm1342_vm1, %v4212_v15, %v10648_v42 }
 0xedd   : > { %v10650_v62 = vpop.permute.xlu0 %4237 }
 0xede   : > { %v4176_v6 = vpop.permute.xlu1 %4175 }
 0xedf   : > { %v4181_v33 = vsel %vm1245_vm0, %v4174_v48, %v4176_v6 }
 0xee0   : > { %4497 = vmatprep.subr.bf16.mxu1 %v4181_v33 }
 0xee1   : > { %v4250_v4 = vpop.permute.xlu0 %4249  ;;  %4498 = vmatpush1.bf16.msra.mxu1 %v10655_v39 }
 0xee2   : > { %4499 = vmatprep.subr.bf16.mxu1 %v4217_v1  ;;  %v4276_v28 = vpop.permute.xlu1 %4275  ;;  %v10687_v5 = vsel %vm1439_vm2, %v10650_v62, %v4250_v4 }
 0xee5   : > { %v10664_v21 = vpop.permute.xlu0 %4277  ;;  %4500 = vmatpush1.bf16.msra.mxu1 %v10662_v17 }
 0xee6   : > { %4501 = vmatprep.subr.bf16.mxu1 %v4219_v0  ;;  %v4272_v10 = vpop.permute.xlu1 %4271  ;;  %v4287_v22 = vsel %vm1521_vm3, %v4276_v28, %v10664_v21 }
 0xee7   : > { %v4297_v37 = vsel %vm1521_vm3, %v4272_v10, %v4276_v28 }
 0xee9   : > { %v4282_v30 = vpop.permute.xlu0 %4281  ;;  %4502 = vmatpush1.bf16.msra.mxu1 %v10671_v44 }
 0xeea   : > { %4503 = vmatprep.subr.bf16.mxu1 %v4255_v51  ;;  %v4306_v26 = vpop.permute.xlu1 %4305 }
 0xeed   : > { %v4274_v54 = vpop.permute.xlu0 %4273  ;;  %4504 = vmatpush1.bf16.msra.mxu1 %v10678_v29 }
 0xeee   : > { %v10681_v58 = vpop.permute.xlu1 %4251  ;;  %v4301_v52 = vsel %vm1521_vm3, %v4274_v54, %v4282_v30 }
 0xeef   : > { %v4257_v40 = vsel %vm1439_vm2, %v4250_v4, %v10681_v58 }
 0xef0   : > { %4505 = vmatprep.subr.bf16.mxu1 %v4257_v40 }
 0xef1   : > { %v4308_v2 = vpop.permute.xlu0 %4307  ;;  %4506 = vmatpush1.bf16.msra.mxu1 %v10687_v5 }
 0xef2   : > { %4507 = vmatprep.subr.bf16.mxu1 %v4287_v22  ;;  %v4304_v16 = vpop.permute.xlu1 %4303  ;;  %v4316_v27 = vsel %vm1593_vm4, %v4306_v26, %v4308_v2 }
 0xef3   : > { %v4315_v15 = vsel %vm1593_vm4, %v4304_v16, %v4306_v26 }
 0xef5   : > { %v4310_v63 = vpop.permute.xlu0 %4309  ;;  %4508 = vmatpush1.bf16.msra.mxu1 %v4297_v37 }
 0xef6   : > { %v10693_v25 = vpop.permute.xlu1 %4283 }
 0xef7   : > { %v4289_v34 = vsel %vm1521_vm3, %v4282_v30, %v10693_v25 }
 0xef8   : > { %4509 = vmatprep.subr.bf16.mxu1 %v4289_v34 }
 0xef9   : > { %v4338_v11 = vpop.permute.xlu0 %4337  ;;  %4510 = vmatpush1.bf16.msra.mxu1 %v4301_v52 }
 0xefa   : > { %4511 = vmatprep.subr.bf16.mxu1 %v10501_v14  ;;  %v4314_v38 = vpop.permute.xlu1 %4313  ;;  %v4344_v48 = vsel %vm1665_vm6, %v4338_v11, %v10634_v43 }
 0xefd   : > { %v4178_v55 = vpop.permute.xlu0 %4177  ;;  %4512 = vmatpush1.bf16.msra.mxu1 %v10526_v47 }
 0xefe   : > { %4513 = vmatprep.subr.bf16.mxu1 %v10548_v7  ;;  %v4172_v57 = vpop.permute.xlu1 %4171  ;;  %v4182_v14 = vsel %vm1245_vm0, %v4176_v6, %v4178_v55  ;;  %v7124_v55 = vld [vmem:[#allocation23 + $0x34] ss:$12 sps:$4 sm:$0xff]  }
 0xeff   : > { %v4180_v35 = vsel %vm1245_vm0, %v4170_v8, %v4172_v57 }
 0xf00   : > { %6388 = vmatpush3.bf16.msra.mxu0 %v4180_v35 }
 0xf01   : > { %v4312_v9 = vpop.permute.xlu0 %4311  ;;  %4514 = vmatpush1.bf16.msra.mxu1 %v10533_v3  ;;  %6389 = vmatprep.subr.bf16.mxu0 %v10497_v41 }
 0xf02   : > { %4515 = vmatprep.subr.bf16.mxu1 %v4316_v27  ;;  %v4336_v59 = vpop.permute.xlu1 %4335  ;;  %v4318_v7 = vsel %vm1593_vm4, %v4312_v9, %v4314_v38  ;;  %v4317_v41 = vsel %vm1593_vm4, %v4310_v63, %v4312_v9  ;;  %v7126_v27 = vld [vmem:[#allocation23 + $0x30] ss:$12 sps:$4 sm:$0xff]  }
 0xf03   : > { %v4343_v4 = vsel %vm1665_vm6, %v4336_v59, %v4338_v11 }
 0xf04   : > { %6390 = vmatpush3.bf16.msra.mxu0 %v4182_v14 }
 0xf05   : > { %v4324_v47 = vpop.permute.xlu0 %4323  ;;  %4516 = vmatpush1.bf16.msra.mxu1 %v4315_v15 }
 0xf06   : > { %4517 = vmatprep.subr.bf16.mxu1 %v4318_v7  ;;  %v4340_v8 = vpop.permute.xlu1 %4339  ;;  %v4329_v53 = vsel %vm1624_vm5, %v4308_v2, %v4324_v47 }
 0xf07   : > { %6391 = vmatprep.subr.bf16.mxu0 %v4329_v53 }
 0xf09   : > { %v4210_v3 = vpop.permute.xlu0 %4209  ;;  %4518 = vmatpush1.bf16.msra.mxu1 %v4317_v41 }
 0xf0a   : > { %v4218_v6 = vsel %vm1342_vm1, %v10636_v36, %v4210_v3  ;;  %4519 = vmatprep.subr.bf16.mxu1 %v4344_v48  ;;  %v4354_v33 = vpop.permute.xlu1 %4353 }
 0xf0b   : > { %6392 = vmatpush3.bf16.msra.mxu0 %v4218_v6  ;;  %v4360_v36 = vsel %vm1706_vm8, %v4354_v33, %v10630_v45  ;;  %v7118_v45 = vld [vmem:[#allocation23] ss:$12 sps:$4 sm:$0xff]  }
 0xf0d   : > { %v4326_v1 = vpop.permute.xlu0 %4325  ;;  %4520 = vmatpush1.bf16.msra.mxu1 %v4343_v4 }
 0xf0e   : > { %v4342_v28 = vpop.permute.xlu1 %4341  ;;  %v4333_v0 = vsel %vm1624_vm5, %v4314_v38, %v4326_v1 }
 0xf0f   : > { %v4345_v10 = vsel %vm1665_vm6, %v4340_v8, %v4342_v28  ;;  %6393 = vmatprep.subr.bf16.mxu0 %v4333_v0  ;;  %v4346_v30 = vsel %vm1665_vm6, %v4342_v28, %v10632_v46 }
 0xf10   : > { %4521 = vmatprep.subr.bf16.mxu1 %v4346_v30 }
 0xf11   : > { %v4216_v43 = vpop.permute.xlu0 %4215  ;;  %4522 = vmatpush1.bf16.msra.mxu1 %v4345_v10 }
 0xf12   : > { %v4220_v51 = vsel %vm1342_vm1, %v10648_v42, %v4216_v43  ;;  %4523 = vmatprep.subr.bf16.mxu1 %v4360_v36  ;;  %v4352_v26 = vpop.permute.xlu1 %4351  ;;  %v7121_v42 = vld [vmem:[#allocation23 + $0x1c] ss:$12 sps:$4 sm:$0xff]  }
 0xf13   : > { %v4359_v54 = vsel %vm1706_vm8, %v4352_v26, %v4354_v33  ;;  %6394 = vmatpush3.bf16.msra.mxu0 %v4220_v51 }
 0xf14   : > { %6395 = vmatprep.subr.bf16.mxu0 %v10644_v24 }
 0xf15   : > { %v4356_v40 = vpop.permute.xlu0 %4355  ;;  %4524 = vmatpush1.bf16.msra.mxu1 %v4359_v54 }
 0xf16   : > { %v4358_v2 = vpop.permute.xlu1 %4357 }
 0xf17   : > { %v4361_v46 = vsel %vm1706_vm8, %v4356_v40, %v4358_v2  ;;  %v4362_v22 = vsel %vm1706_vm8, %v4358_v2, %v10628_v61  ;;  %v7123_v61 = vld [vmem:[#allocation23 + $0x18] ss:$12 sps:$4 sm:$0xff]  }
 0xf18   : > { %4525 = vmatprep.subr.bf16.mxu1 %v4362_v22 }
 0xf19   : > { %v4254_v16 = vpop.permute.xlu0 %4253  ;;  %4526 = vmatpush1.bf16.msra.mxu1 %v4361_v46 }
 0xf1a   : > { %v4248_v37 = vpop.permute.xlu1 %4247  ;;  %v4258_v52 = vsel %vm1439_vm2, %v10681_v58, %v4254_v16 }
 0xf1b   : > { %v4256_v63 = vsel %vm1439_vm2, %v10640_v50, %v4248_v37 }
 0xf1c   : > { %4528 = vmatmul.mubr.bf16.vlgmr.msra.gmra.mrb[52].mxu1 %v7118_v45  ;;  %6396 = vmatpush3.bf16.msra.mxu0 %v4256_v63 }
 0xf1d   : > { %v4286_v24 = vpop.permute.xlu0 %4285  ;;  %6397 = vmatprep.subr.bf16.mxu0 %v10655_v39  ;;  %4537 = vmatprep.mubr.bf16.mxu1 %v7121_v42 }
 0xf1e   : > { %v4280_v34 = vpop.permute.xlu1 %4279 }
 0xf1f   : > { %v4288_v39 = vsel %vm1521_vm3, %v10664_v21, %v4280_v34  ;;  %v7127_v21 = vld [vmem:[#allocation23 + $0x4c] ss:$12 sps:$4 sm:$0xff]  }
 0xf20   : > { %6398 = vmatpush3.bf16.msra.mxu0 %v4258_v52 }
 0xf21   : > { %v4368_v11 = vpop.permute.xlu0 %4367  ;;  %6399 = vmatprep.subr.bf16.mxu0 %v10662_v17 }
 0xf22   : > { %v4370_v38 = vpop.permute.xlu1 %4369 }
 0xf23   : > { %v4375_v57 = vsel %vm1747_vm9, %v4368_v11, %v4370_v38  ;;  %v4376_v50 = vsel %vm1747_vm9, %v4370_v38, %v10638_v19  ;;  %v4290_v19 = vsel %vm1521_vm3, %v10693_v25, %v4286_v24  ;;  %v7133_v25 = vld [vmem:[#allocation23 + $0x50] ss:$12 sps:$4 sm:$0xff]  }
 0xf24   : > { %4538 = vmatmul.mubr.bf16.gmra.mrb[56].mxu1 %v7123_v61  ;;  %4568 = vmatprep.subr.bf16.mxu1 %v4376_v50 }
 0xf25   : > { %6400 = vmatpush3.bf16.msra.mxu0 %v4288_v39  ;;  %v4372_v35 = vpop.permute.xlu0 %4371  ;;  %4569 = vmatpush1.bf16.msra.mxu1 %v4375_v57 }
 0xf26   : > { %6401 = vmatprep.subr.bf16.mxu0 %v10671_v44  ;;  %v4374_v58 = vpop.permute.xlu1 %4373  ;;  %4547 = vmatprep.mubr.bf16.mxu1 %v7124_v55  ;;  %v7129_v44 = vld [vmem:[#allocation23 + $0x48] ss:$12 sps:$4 sm:$0xff]  }
 0xf27   : > { %v4377_v17 = vsel %vm1747_vm9, %v4372_v35, %v4374_v58  ;;  %v4378_v9 = vsel %vm1747_vm9, %v4374_v58, %v10650_v62  ;;  %v7130_v62 = vld [vmem:[#allocation23 + $0x8] ss:$12 sps:$4 sm:$0xff]  }
 0xf28   : > { %4570 = vmatprep.subr.bf16.mxu1 %v4378_v9 }
 0xf29   : > { %6402 = vmatpush3.bf16.msra.mxu0 %v4290_v19  ;;  %4571 = vmatpush1.bf16.msra.mxu1 %v4377_v17 }
 0xf2a   : > { %6553 = vmatprep.subr.bf16.mxu0 %v10678_v29 }
 0xf2c   : > { %4674 = vmatmul.mubr.bf16.vlgmr.msra.gmra.mrb[32].mxu0 %v7118_v45  ;;  %4548 = vmatmul.mubr.bf16.gmra.mrb[60].mxu1 %v7126_v27 }
 0xf2d   : > { %6554 = vmatpush3.bf16.msra.mxu0 %v10678_v29  ;;  %4681 = vmatprep.mubr.bf16.mxu0 %v7121_v42  ;;  %v7131_v29 = vld [vmem:[#allocation23 + $0x20] ss:$12 sps:$4 sm:$0xff]  }
 0xf2e   : > { %6555 = vmatprep.subr.bf16.mxu0 %v10687_v5  ;;  %4557 = vmatprep.mubr.bf16.mxu1 %v7127_v21 }
 0xf31   : > { %6556 = vmatpush3.bf16.msra.mxu0 %v10687_v5  ;;  %v7132_v5 = vld [vmem:[#allocation23 + $0x38] ss:$12 sps:$4 sm:$0xff]  }
 0xf34   : > { %4682 = vmatmul.mubr.bf16.gmra.mrb[36].mxu0 %v7123_v61  ;;  %4558 = vmatmul.mubr.bf16.gmra.mrb[64].mxu1 %v7129_v44 }
 0xf35   : > { %4689 = vmatprep.mubr.bf16.mxu0 %v7124_v55  ;;  %4600 = vmatprep.mubr.bf16.mxu1 %v11298_v56 }
 0xf36   : > { %v10763_v53 = vpop.permute.xlu0 %4390 }
 0xf37   : > { %v4386_v3 = vpop.permute.xlu1 %4385 }
 0xf3a   : > { %v10769_v1 = vpop.permute.xlu0 %4400 }
 0xf3b   : > { %v10771_v28 = vpop.permute.xlu1 %4395 }
 0xf3c   : > { %4690 = vmatmul.mubr.bf16.gmra.mrb[40].mxu0 %v7126_v27  ;;  %6278 = vmatmul.mubr.msk.bf16.vlgmr.msra.gmra.mrb[52].mxu1 %vm3832_vm12, %v7130_v62 }
 0xf3d   : > { %4697 = vmatprep.mubr.bf16.mxu0 %v7127_v21  ;;  %4610 = vmatprep.mubr.bf16.mxu1 %v11298_v56 }
 0xf3e   : > { %v10778_v11 = vpop.permute.xlu0 %4410 }
 0xf3f   : > { %v4406_v38 = vpop.permute.xlu1 %4405 }
 0xf44   : > { %4698 = vmatmul.mubr.bf16.gmra.mrb[44].mxu0 %v7129_v44  ;;  %6279 = vmatmul.mubr.msk.bf16.gmra.mrb[56].mxu1 %vm3832_vm12, %v7131_v29 }
 0xf45   : > { %6557 = vmatprep.mubr.msk.bf16.mxu0 %vm3832_vm12, %v7130_v62  ;;  %4620 = vmatprep.mubr.bf16.mxu1 %v11298_v56 }
 0xf4c   : > { %6558 = vmatmul.mubr.msk.bf16.vlgmr.msra.gmra.mrb[48].mxu0 %vm3832_vm12, %v7131_v29  ;;  %6280 = vmatmul.mubr.msk.bf16.gmra.mrb[60].mxu1 %vm3832_vm12, %v7132_v5 }
 0xf4d   : > { %6561 = vmatprep.mubr.msk.bf16.mxu0 %vm3832_vm12, %v7132_v5  ;;  %4630 = vmatprep.mubr.bf16.mxu1 %v11298_v56 }
 0xf54   : > { %6562 = vmatmul.mubr.msk.bf16.gmra.mrb[52].mxu0 %vm3832_vm12, %v7133_v25  ;;  %6281 = vmatmul.mubr.msk.bf16.gmra.mrb[64].mxu1 %vm3832_vm12, %v7133_v25 }
 0xfff   : > { %v6403_v59 = vpop.f32.mrb[32].mxu0 }
0x1000   : > { %v6404_v14 = vpop.f32.mrb[33].mxu0 }
0x1001   : > { %v6405_v15 = vadd.f32 %v6404_v14, %v6403_v59  ;;  %v6406_v47 = vpop.f32.mrb[34].mxu0 }
0x1002   : > { %v6407_v7 = vpop.f32.mrb[35].mxu0 }
0x1003   : > { %v10761_v8 = vadd.f32 %v6407_v7, %v6406_v47  ;;  %v4676_v25 = vadd.f32 %v6405_v15, %v4386_v3 }
0x1007   : > { %v6409_v41 = vpop.f32.mrb[36].mxu0 }
0x1008   : > { %v6410_v48 = vpop.f32.mrb[37].mxu0 }
0x1009   : > { %v10765_v6 = vadd.f32 %v6410_v48, %v6409_v41  ;;  %v6412_v56 = vpop.f32.mrb[38].mxu0 }
0x100a   : > { %v6413_v33 = vpop.f32.mrb[39].mxu0 }
0x100b   : > { %v10767_v4 = vadd.f32 %v6413_v33, %v6412_v56 }
0x100f   : > { %v6415_v0 = vpop.f32.mrb[40].mxu0  ;;  %v4602_v10 = vpop.f32.mrb[52].mxu1 }
0x1010   : > { %v6763_v30 = vadd.f32 %v4602_v10, %v4386_v3  ;;  %v6416_v43 = vpop.f32.mrb[41].mxu0  ;;  %v4604_v36 = vpop.f32.mrb[53].mxu1 }
0x1011   : > { %v10773_v51 = vadd.f32 %v6416_v43, %v6415_v0  ;;  %v6764_v26 = vadd.f32 %v4604_v36, %v4386_v3  ;;  %v6418_v54 = vpop.f32.mrb[42].mxu0  ;;  %v4606_v40 = vpop.f32.mrb[54].mxu1 }
0x1012   : > { %vm4771_vm0 = vcmp.gt.f32.partialorder %v6763_v30, 0.0  ;;  %v4795_v2 = vmul.f32 0.1, %v6763_v30  ;;  %v6765_v46 = vadd.f32 %v4606_v40, %v10763_v53  ;;  %v6419_v22 = vpop.f32.mrb[43].mxu0  ;;  %v4608_v45 = vpop.f32.mrb[55].mxu1 }
0x1013   : > { %vm4772_vm2 = vcmp.gt.f32.partialorder %v6764_v26, 0.0  ;;  %v4796_v16 = vmul.f32 0.1, %v6764_v26  ;;  %v6420_v42 = vadd.f32 %v6419_v22, %v6418_v54  ;;  %v6766_v37 = vadd.f32 %v4608_v45, %v10763_v53  ;;  %v10794_v36 = vpop.permute.xlu0 %4420 }
0x1014   : > { %v4819_v63 = vsel %vm4771_vm0, %v6763_v30, %v4795_v2  ;;  %vm4774_vm6 = vcmp.gt.f32.partialorder %v6765_v46, 0.0  ;;  %v4798_v24 = vmul.f32 0.1, %v6765_v46  ;;  %v4679_v30 = vadd.f32 %v10761_v8, %v10763_v53 }
0x1015   : > { %v4843_v34 = vmul.f32 %v4819_v63, %v9621_v12  ;;  %v4820_v52 = vsel %vm4772_vm2, %v6764_v26, %v4796_v16  ;;  %vm4775_vm9 = vcmp.gt.f32.partialorder %v6766_v37, 0.0  ;;  %v4799_v61 = vmul.f32 0.1, %v6766_v37  ;;  %v10796_v26 = vpop.permute.xlu1 %4415 }
0x1016   : > { %v4844_v55 = vmul.f32 %v4820_v52, %v9619_v20  ;;  %v4822_v57 = vsel %vm4774_vm6, %v6765_v46, %v4798_v24  ;;  %v4684_v2 = vadd.f32 %v10765_v6, %v10771_v28  ;;  %v4687_v46 = vadd.f32 %v10767_v4, %v10769_v1 }
0x1017   : > { %v4846_v50 = vmul.f32 %v4822_v57, %v9621_v12  ;;  %v4823_v39 = vsel %vm4775_vm9, %v6766_v37, %v4799_v61  ;;  %v6421_v35 = vpop.f32.mrb[44].mxu0  ;;  %v4612_v58 = vpop.f32.mrb[56].mxu1  ;;  %v10805_v16 = vadd.f32 %v10773_v51, %v4406_v38  ;;  %v10808_v37 = vadd.f32 %v6420_v42, %v10778_v11 }
0x1018   : > { %v4847_v17 = vmul.f32 %v4823_v39, %v9619_v20  ;;  %v6767_v9 = vadd.f32 %v4612_v58, %v10771_v28  ;;  %v6422_v19 = vpop.f32.mrb[45].mxu0  ;;  %v4614_v27 = vpop.f32.mrb[57].mxu1  ;;  %v10784_v21 = vadd.f32 %v4844_v55, %v4843_v34 }
0x1019   : > { %v6423_v44 = vadd.f32 %v6422_v19, %v6421_v35  ;;  %v6768_v62 = vadd.f32 %v4614_v27, %v10771_v28  ;;  %v6424_v29 = vpop.f32.mrb[46].mxu0  ;;  %v4616_v5 = vpop.f32.mrb[58].mxu1 }
0x101a   : > { %vm4777_vm13 = vcmp.gt.f32.partialorder %v6767_v9, 0.0  ;;  %v4801_v59 = vmul.f32 0.1, %v6767_v9  ;;  %v6769_v14 = vadd.f32 %v4616_v5, %v10769_v1  ;;  %v6425_v47 = vpop.f32.mrb[47].mxu0  ;;  %v4618_v7 = vpop.f32.mrb[59].mxu1  ;;  %v10788_v41 = vadd.f32 %v4847_v17, %v4846_v50 }
0x101b   : > { %vm4778_vm14 = vcmp.gt.f32.partialorder %v6768_v62, 0.0  ;;  %v4802_v48 = vmul.f32 0.1, %v6768_v62  ;;  %v6426_v56 = vadd.f32 %v6425_v47, %v6424_v29  ;;  %v6770_v33 = vadd.f32 %v4618_v7, %v10769_v1 }
0x101c   : > { %v4825_v0 = vsel %vm4777_vm13, %v6767_v9, %v4801_v59  ;;  %vm4780_vm15 = vcmp.gt.f32.partialorder %v6769_v14, 0.0  ;;  %v4804_v10 = vmul.f32 0.1, %v6769_v14  ;;  %v4700_v45 = vadd.f32 %v6423_v44, %v10796_v26 }
0x101d   : > { %v4849_v15 = vmul.f32 %v4825_v0, %v9621_v12  ;;  %v4826_v3 = vsel %vm4778_vm14, %v6768_v62, %v4802_v48  ;;  %vm4781_vm7 = vcmp.gt.f32.partialorder %v6770_v33, 0.0  ;;  %v4805_v43 = vmul.f32 0.1, %v6770_v33 }
0x101e   : > { %v4850_v54 = vmul.f32 %v4826_v3, %v9619_v20  ;;  %v4828_v40 = vsel %vm4780_vm15, %v6769_v14, %v4804_v10  ;;  %v10811_v6 = vadd.f32 %v6426_v56, %v10794_v36 }
0x101f   : > { %v4829_v22 = vsel %vm4781_vm7, %v6770_v33, %v4805_v43  ;;  %v6559_v8 = vpop.f32.mrb[48].mxu0  ;;  %v4622_v53 = vpop.f32.mrb[60].mxu1  ;;  %v10816_v4 = vmul.f32 %v4828_v40, %v9621_v12 }
0x1020   : > { %v4749_v63 = vadd.f32 %v6559_v8, %v4684_v2  ;;  %v6771_v24 = vadd.f32 %v4622_v53, %v4406_v38  ;;  %v4740_v34 = vpop.f32.mrb[49].mxu0  ;;  %v4624_v52 = vpop.f32.mrb[61].mxu1  ;;  %v10813_v28 = vadd.f32 %v4850_v54, %v4849_v15  ;;  %v10819_v1 = vmul.f32 %v4829_v22, %v9619_v20 }
0x1021   : > { %v4741_v51 = vadd.f32 %v4740_v34, %v4676_v25  ;;  %v6772_v61 = vadd.f32 %v4624_v52, %v4406_v38  ;;  %v6560_v55 = vpop.f32.mrb[50].mxu0  ;;  %v4626_v42 = vpop.f32.mrb[62].mxu1 }
0x1022   : > { %vm4779_vm10 = vcmp.gt.f32.partialorder %v4749_v63, 0.0  ;;  %v4803_v57 = vmul.f32 0.1, %v4749_v63  ;;  %vm4783_vm11 = vcmp.gt.f32.partialorder %v6771_v24, 0.0  ;;  %v4807_v50 = vmul.f32 0.1, %v6771_v24 }
0x1023   : > { %vm4773_vm0 = vcmp.gt.f32.partialorder %v4741_v51, 0.0  ;;  %v4797_v39 = vmul.f32 0.1, %v4741_v51  ;;  %vm4784_vm2 = vcmp.gt.f32.partialorder %v6772_v61, 0.0  ;;  %v4808_v35 = vmul.f32 0.1, %v6772_v61 }
0x1024   : > { %v4827_v58 = vsel %vm4779_vm10, %v4749_v63, %v4803_v57  ;;  %v4831_v17 = vsel %vm4783_vm11, %v6771_v24, %v4807_v50  ;;  %v4752_v9 = vadd.f32 %v6560_v55, %v4687_v46  ;;  %v6773_v19 = vadd.f32 %v4626_v42, %v10778_v11  ;;  %v4743_v27 = vpop.f32.mrb[51].mxu0  ;;  %v4628_v44 = vpop.f32.mrb[63].mxu1 }
0x1025   : > { %v10823_v62 = vmul.f32 %v4827_v58, %v9617_v31  ;;  %v10826_v38 = vmul.f32 %v4831_v17, %v9621_v12  ;;  %v4821_v29 = vsel %vm4773_vm0, %v4741_v51, %v4797_v39  ;;  %v4832_v5 = vsel %vm4784_vm2, %v6772_v61, %v4808_v35 }
0x1026   : > { %v4845_v25 = vmul.f32 %v4821_v29, %v9617_v31  ;;  %v10830_v59 = vmul.f32 %v4832_v5, %v9619_v20  ;;  %vm4782_vm6 = vcmp.gt.f32.partialorder %v4752_v9, 0.0  ;;  %v4806_v14 = vmul.f32 0.1, %v4752_v9 }
0x1027   : > { %vm4786_vm9 = vcmp.gt.f32.partialorder %v6773_v19, 0.0  ;;  %v4810_v47 = vmul.f32 0.1, %v6773_v19  ;;  %v4744_v7 = vadd.f32 %v4743_v27, %v4679_v30  ;;  %v6774_v48 = vadd.f32 %v4628_v44, %v10778_v11  ;;  %v6563_v56 = vpop.f32.mrb[52].mxu0  ;;  %v4632_v33 = vpop.f32.mrb[64].mxu1 }
0x1028   : > { %v4830_v0 = vsel %vm4782_vm6, %v4752_v9, %v4806_v14  ;;  %v4765_v10 = vadd.f32 %v6563_v56, %v4700_v45  ;;  %v6775_v15 = vadd.f32 %v4632_v33, %v10796_v26  ;;  %v4756_v3 = vpop.f32.mrb[53].mxu0  ;;  %v4634_v43 = vpop.f32.mrb[65].mxu1  ;;  %v4868_v54 = vsel %vm3832_vm12, %v4845_v25, 0.0 }
0x1029   : > { %v4854_v40 = vmul.f32 %v4830_v0, %v9617_v31  ;;  %v4834_v2 = vsel %vm4786_vm9, %v6773_v19, %v4810_v47  ;;  %vm4776_vm13 = vcmp.gt.f32.partialorder %v4744_v7, 0.0  ;;  %v4800_v46 = vmul.f32 0.1, %v4744_v7  ;;  %v6564_v22 = vpop.f32.mrb[54].mxu0  ;;  %v4636_v8 = vpop.f32.mrb[66].mxu1 }
0x102a   : > { %v4858_v30 = vmul.f32 %v4834_v2, %v9621_v12  ;;  %vm4787_vm14 = vcmp.gt.f32.partialorder %v6774_v48, 0.0  ;;  %v4811_v11 = vmul.f32 0.1, %v6774_v48  ;;  %vm4791_vm15 = vcmp.gt.f32.partialorder %v4765_v10, 0.0  ;;  %v4759_v53 = vpop.f32.mrb[55].mxu0  ;;  %v4638_v45 = vpop.f32.mrb[67].mxu1 }
0x102b   : > { %v4824_v63 = vsel %vm4776_vm13, %v4744_v7, %v4800_v46  ;;  %v4815_v24 = vmul.f32 0.1, %v4765_v10  ;;  %vm4789_vm7 = vcmp.gt.f32.partialorder %v6775_v15, 0.0  ;;  %v4813_v34 = vmul.f32 0.1, %v6775_v15 }
0x102c   : > { %v4848_v52 = vmul.f32 %v4824_v63, %v9617_v31  ;;  %v4835_v51 = vsel %vm4787_vm14, %v6774_v48, %v4811_v11  ;;  %v4757_v61 = vadd.f32 %v4756_v3, %v10805_v16  ;;  %v6776_v55 = vadd.f32 %v4634_v43, %v10796_v26 }
0x102d   : > { %v4859_v42 = vmul.f32 %v4835_v51, %v9619_v20  ;;  %v4839_v57 = vsel %vm4791_vm15, %v4765_v10, %v4815_v24  ;;  %v4837_v50 = vsel %vm4789_vm7, %v6775_v15, %v4813_v34  ;;  %v4768_v39 = vadd.f32 %v6564_v22, %v10811_v6 }
0x102e   : > { %v4863_v35 = vmul.f32 %v4839_v57, %v9617_v31  ;;  %v4861_v58 = vmul.f32 %v4837_v50, %v9621_v12  ;;  %vm4785_vm10 = vcmp.gt.f32.partialorder %v4757_v61, 0.0  ;;  %v4809_v17 = vmul.f32 0.1, %v4757_v61 }
0x102f   : > { %vm4790_vm11 = vcmp.gt.f32.partialorder %v6776_v55, 0.0  ;;  %v4814_v9 = vmul.f32 0.1, %v6776_v55  ;;  %vm4794_vm0 = vcmp.gt.f32.partialorder %v4768_v39, 0.0  ;;  %v4818_v19 = vmul.f32 0.1, %v4768_v39 }
0x1030   : > { %v4833_v27 = vsel %vm4785_vm10, %v4757_v61, %v4809_v17  ;;  %v6777_v16 = vadd.f32 %v4636_v8, %v10794_v36  ;;  %v4760_v26 = vadd.f32 %v4759_v53, %v10808_v37  ;;  %v6778_v44 = vadd.f32 %v4638_v45, %v10794_v36 }
0x1031   : > { %v4857_v29 = vmul.f32 %v4833_v27, %v9617_v31  ;;  %v4838_v6 = vsel %vm4790_vm11, %v6776_v55, %v4814_v9  ;;  %v4842_v5 = vsel %vm4794_vm0, %v4768_v39, %v4818_v19  ;;  %v4869_v25 = vadd.f32 %v4868_v54, %v10784_v21 }
0x1032   : > { %v4862_v14 = vmul.f32 %v4838_v6, %v9619_v20  ;;  %v4866_v47 = vmul.f32 %v4842_v5, %v9617_v31  ;;  %vm4792_vm2 = vcmp.gt.f32.partialorder %v6777_v16, 0.0  ;;  %v4816_v7 = vmul.f32 0.1, %v6777_v16 }
0x1033   : > { %vm4788_vm6 = vcmp.gt.f32.partialorder %v4760_v26, 0.0  ;;  %v4812_v48 = vmul.f32 0.1, %v4760_v26  ;;  %vm4793_vm9 = vcmp.gt.f32.partialorder %v6778_v44, 0.0  ;;  %v4817_v56 = vmul.f32 0.1, %v6778_v44  ;;  %4870 = vadd.xlane.f32.xlu1 %v4869_v25 }
0x1034   : > { %v4840_v37 = vsel %vm4792_vm2, %v6777_v16, %v4816_v7  ;;  %v4873_v36 = vsel %vm3832_vm12, %v4848_v52, 0.0  ;;  %v4882_v33 = vadd.f32 %v10819_v1, %v10816_v4  ;;  %v4883_v0 = vsel %vm3832_vm12, %v4854_v40, 0.0  ;;  %v4916_v7 = vld [vmem:[#allocation26 + $0x8] sm:$0xff] }
0x1035   : > { %v4864_v21 = vmul.f32 %v4840_v37, %v9621_v12  ;;  %v4836_v10 = vsel %vm4788_vm6, %v4760_v26, %v4812_v48  ;;  %v4841_v15 = vsel %vm4793_vm9, %v6778_v44, %v4817_v56  ;;  %v4874_v3 = vadd.f32 %v4873_v36, %v10788_v41 }
0x1036   : > { %v4860_v43 = vmul.f32 %v4836_v10, %v9617_v31  ;;  %v4865_v54 = vmul.f32 %v4841_v15, %v9619_v20  ;;  %v4884_v2 = vadd.f32 %v4883_v0, %v4882_v33  ;;  %v4878_v46 = vsel %vm3832_vm12, %v10823_v62, 0.0  ;;  %v4918_v33 = vld [vmem:[#allocation26 + $0x18] sm:$0xff] }
0x1037   : > { %4875 = vadd.xlane.f32.xlu0 %v4874_v3  ;;  %v4879_v22 = vadd.f32 %v4878_v46, %v10813_v28  ;;  %v4892_v4 = vadd.f32 %v4859_v42, %v4858_v30  ;;  %v4887_v1 = vadd.f32 %v10830_v59, %v10826_v38  ;;  %v4888_v12 = vsel %vm3832_vm12, %v4857_v29, 0.0  ;;  %v4915_v28 = vld [vmem:[#allocation26] sm:$0xff]  ;;  %v4922_v46 = vld [vmem:[#allocation26 + $0x38] sm:$0xff] }
0x1038   : > { %4885 = vadd.xlane.f32.xlu1 %v4884_v2  ;;  %v4893_v41 = vsel %vm3832_vm12, %v4860_v43, 0.0  ;;  %v4897_v40 = vadd.f32 %v4862_v14, %v4861_v58  ;;  %v4902_v31 = vadd.f32 %v4865_v54, %v4864_v21  ;;  %v4898_v11 = vsel %vm3832_vm12, %v4863_v35, 0.0  ;;  %v4919_v21 = vld [vmem:[#allocation26 + $0x20] sm:$0xff]  ;;  %v4921_v54 = vld [vmem:[#allocation26 + $0x30] sm:$0xff] }
0x1039   : > { %v4894_v8 = vadd.f32 %v4893_v41, %v4892_v4  ;;  %v4889_v20 = vadd.f32 %v4888_v12, %v4887_v1  ;;  %v4903_v62 = vsel %vm3832_vm12, %v4866_v47, 0.0  ;;  %vm4931_vm13 = vcmask 523264  }
0x103a   : > { %v4899_v53 = vadd.f32 %v4898_v11, %v4897_v40  ;;  %v4904_v45 = vadd.f32 %v4903_v62, %v4902_v31  ;;  %6581 = vmatprep.mubr.msk.f32.mxu0 %vm4931_vm13, %v4915_v28  ;;  %vm7914_vm9 = vmmov 0  }
0x103b   : > { %4880 = vadd.xlane.f32.xlu0 %v4879_v22 }
0x103c   : > { %4895 = vadd.xlane.f32.xlu1 %v4894_v8 }
0x103f   : > { %4890 = vadd.xlane.f32.xlu0 %v4889_v20 }
0x1043   : > { %4900 = vadd.xlane.f32.xlu0 %v4899_v53 }
0x104d   : > { %5286 = vrot.lane.b32.xlu1 %v10121_v32, %s7908_s8 }
0x1059   : > { %5284 = vrot.lane.b32.xlu0 %v10104_v23, %s7908_s8 }
0x105d   : > { %5290 = vrot.lane.b32.xlu0 %v10094_v49, %s7908_s8 }
0x1061   : > { %5294 = vrot.lane.b32.xlu0 %v10091_v18, %s7908_s8 }
0x1065   : > { %5309 = vrot.lane.b32.xlu0 %v10094_v49, %s7909_s3 }
0x1071   : > { %4905 = vadd.xlane.f32.xlu1 %v4904_v45 }
0x1082   : > { %5288 = vrot.lane.b32.xlu1 %v10087_v13, %s7908_s8 }
0x1086   : > { %5292 = vrot.lane.b32.xlu1 %v10114_v60, %s7908_s8 }
0x108a   : > { %5307 = vrot.lane.b32.xlu1 %v10104_v23, %s7909_s3  ;;  %s5868_s3 = scalar_lea.sflag [#allocation5], %s8594_s24 }
0x10c0   : > { %v4871_v38 = vpop.xlane.xlu1 %4870 }
0x10c1   : > { %v4907_v30 = vmul.f32 0.00390625, %v4871_v38 }
0x10c4   : > { %v4876_v59 = vpop.xlane.xlu0 %4875 }
0x10c5   : > { %v4908_v63 = vmul.f32 0.00390625, %v4876_v59  ;;  %v4886_v24 = vpop.xlane.xlu1 %4885 }
0x10c6   : > { %v4910_v51 = vmul.f32 0.00390625, %v4886_v24  ;;  %v5543_v24 = vld [vmem:[#allocation33 + $0x80] sm:$0xff] }
0x10c7   : > { %v6643_v34 = vpack.c.bf16 %v4908_v63, %v4907_v30  ;;  %v5085_v63 = vld [vmem:[#allocation29] sm:$0xff] }
0x10c8   : > { %v4881_v52 = vpop.xlane.xlu0 %4880 }
0x10c9   : > { %v4909_v61 = vmul.f32 0.00390625, %v4881_v52  ;;  %6644 = vmatprep.subr.bf16.mxu0 %v6643_v34  ;;  %v4896_v55 = vpop.xlane.xlu1 %4895  ;;  %v5527_v52 = vld [vmem:[#allocation33] sm:$0xff] }
0x10ca   : > { %6646 = vmatpush3.bf16.msra.mxu0 %v6643_v34  ;;  %v4912_v57 = vmul.f32 0.00390625, %v4896_v55  ;;  %v5544_v34 = vld [vmem:[#allocation33 + $0x88] sm:$0xff] }
0x10cb   : > { %v6647_v42 = vpack.c.bf16 %v4910_v51, %v4909_v61  ;;  %v6675_v51 = vpack.c.bf16 %v5544_v34, %v5543_v24  ;;  %v5528_v61 = vld [vmem:[#allocation33 + $0x8] sm:$0xff]  ;;  %v5088_v24 = vld [vmem:[#allocation29 + $0x18] sm:$0xff] }
0x10cc   : > { %v4891_v50 = vpop.xlane.xlu0 %4890  ;;  %v6677_v55 = vpack.c.bf16 %v5528_v61, %v5527_v52  ;;  %v5089_v52 = vld [vmem:[#allocation29 + $0x20] sm:$0xff]  ;;  %v5545_v61 = vld [vmem:[#allocation33 + $0x90] sm:$0xff] }
0x10cd   : > { %v4911_v39 = vmul.f32 0.00390625, %v4891_v50  ;;  %6648 = vmatprep.subr.bf16.mxu0 %v6647_v42  ;;  %v5287_v17 = vpop.permute.xlu1 %5286  ;;  %6676 = vmatprep.subr.bf16.mxu1 %v6675_v51 }
0x10ce   : > { %6650 = vmatpush3.bf16.msra.mxu0 %v6647_v42  ;;  %6678 = vmatpush3.bf16.msra.mxu1 %v6677_v55  ;;  %v4924_v42 = vld [vmem:[#allocation27 + $0x8] sm:$0xff]  ;;  %v5546_v55 = vld [vmem:[#allocation33 + $0x98] sm:$0xff] }
0x10cf   : > { %v6651_v35 = vpack.c.bf16 %v4912_v57, %v4911_v39  ;;  %v4923_v57 = vld [vmem:[#allocation27] sm:$0xff] }
0x10d0   : > { %v4901_v58 = vpop.xlane.xlu0 %4900 }
0x10d1   : > { %6652 = vmatprep.subr.bf16.mxu0 %v6651_v35  ;;  %v4913_v44 = vmul.f32 0.00390625, %v4901_v58 }
0x10d2   : > { %6654 = vmatpush3.bf16.msra.mxu0 %v6651_v35 }
0x10d4   : > { %v5285_v9 = vpop.permute.xlu0 %5284 }
0x10d5   : > { %v5297_v19 = vsel %vm1593_vm4, %v5285_v9, %v5287_v17 }
0x10d6   : > { %v10887_v27 = vmax.f32 %v10104_v23, %v5297_v19  ;;  %v4917_v23 = vld [vmem:[#allocation26 + $0x10] sm:$0xff] }
0x10d7   : > { %v4925_v19 = vld [vmem:[#allocation27 + $0x10] sm:$0xff] }
0x10d8   : > { %5327 = vrot.lane.b32.xlu1 %v10887_v27, %s7911_s29  ;;  %v5291_v16 = vpop.permute.xlu0 %5290 }
0x10dc   : > { %v5295_v6 = vpop.permute.xlu0 %5294 }
0x10e0   : > { %v5310_v48 = vpop.permute.xlu0 %5309 }
0x10e1   : > { %v5314_v0 = vsel %vm1624_vm5, %v5295_v6, %v5310_v48 }
0x10e2   : > { %v5320_v15 = vmax.f32 %v10091_v18, %v5314_v0  ;;  %v4930_v0 = vld [vmem:[#allocation27 + $0x38] sm:$0xff] }
0x10fe   : > { %v4906_v26 = vpop.xlane.xlu1 %4905 }
0x10ff   : > { %v4914_v29 = vmul.f32 0.00390625, %v4906_v26 }
0x1101   : > { %v6655_v5 = vpack.c.bf16 %v4914_v29, %v4913_v44 }
0x1102   : > { %v5289_v25 = vpop.permute.xlu1 %5288 }
0x1103   : > { %v5298_v14 = vsel %vm1593_vm4, %v5287_v17, %v5289_v25  ;;  %6656 = vmatprep.subr.bf16.mxu0 %v6655_v5  ;;  %v4926_v17 = vld [vmem:[#allocation27 + $0x18] sm:$0xff] }
0x1104   : > { %v5316_v47 = vmax.f32 %v10121_v32, %v5298_v14  ;;  %6658 = vmatpush3.bf16.msra.mxu0 %v6655_v5  ;;  %v4928_v5 = vld [vmem:[#allocation27 + $0x28] sm:$0xff] }
0x1106   : > { %5329 = vrot.lane.b32.xlu0 %v5316_v47, %s7911_s29  ;;  %v5293_v56 = vpop.permute.xlu1 %5292 }
0x1107   : > { %v5299_v37 = vsel %vm1593_vm4, %v5291_v16, %v5293_v56  ;;  %6582 = vmatmul.mubr.msk.f32.vlgmr.msra.gmra.mrb[56].mxu0 %vm4931_vm13, %v4916_v7  ;;  %v5300_v43 = vsel %vm1593_vm4, %v5293_v56, %v5295_v6  ;;  %vm5339_vm4 = vcmask 1031168  }
0x1108   : > { %v5318_v36 = vmax.f32 %v10094_v49, %v5299_v37  ;;  %6584 = vmatprep.mubr.msk.f32.mxu0 %vm4931_vm13, %v4917_v23  ;;  %v4920_v49 = vld [vmem:[#allocation26 + $0x28] sm:$0xff]  ;;  %v5319_v2 = vmax.f32 %v10114_v60, %v5300_v43 }
0x110a   : > { %5333 = vrot.lane.b32.xlu0 %v5318_v36, %s7911_s29  ;;  %v5308_v32 = vpop.permute.xlu1 %5307 }
0x110b   : > { %v5313_v10 = vsel %vm1624_vm5, %v5289_v25, %v5308_v32  ;;  %6585 = vmatmul.mubr.msk.f32.gmra.mrb[58].mxu0 %vm4931_vm13, %v4918_v33  ;;  %vm5356_vm5 = vcmask 244736  }
0x110c   : > { %v5317_v3 = vmax.f32 %v10087_v13, %v5313_v10  ;;  %6587 = vmatprep.mubr.msk.f32.mxu0 %vm4931_vm13, %v4919_v21  ;;  %v4929_v10 = vld [vmem:[#allocation27 + $0x30] sm:$0xff] }
0x110e   : > { %5337 = vrot.lane.b32.xlu0 %v5320_v15, %s7911_s29  ;;  %5331 = vrot.lane.b32.xlu1 %v5317_v3, %s7911_s29 }
0x110f   : > { %6588 = vmatmul.mubr.msk.f32.gmra.mrb[60].mxu0 %vm4931_vm13, %v4920_v49 }
0x1110   : > { %6590 = vmatprep.mubr.msk.f32.mxu0 %vm4931_vm13, %v4921_v54 }
0x1112   : > { %5352 = vrot.lane.b32.xlu0 %v5318_v36, %s7912_s23  ;;  %5335 = vrot.lane.b32.xlu1 %v5319_v2, %s7911_s29 }
0x1113   : > { %6591 = vmatmul.mubr.msk.f32.gmra.mrb[62].mxu0 %vm4931_vm13, %v4922_v46 }
0x1114   : > { %6609 = vmatprep.mubr.msk.f32.mxu0 %vm4931_vm13, %v5085_v63  ;;  %v5562_v63 = vld [vmem:[#allocation33 + $0x118] sm:$0xff] }
0x1116   : > { %5350 = vrot.lane.b32.xlu1 %v10887_v27, %s7912_s23  ;;  %s7917_s23 = smov [#allocation35]  }
0x114a   : > { %v5328_v18 = vpop.permute.xlu1 %5327 }
0x1178   : > { %v5330_v13 = vpop.permute.xlu0 %5329 }
0x1179   : > { %v5340_v8 = vsel %vm5339_vm4, %v5328_v18, %v5330_v13 }
0x117a   : > { %v10926_v53 = vmax.f32 %v10887_v27, %v5340_v8  ;;  %v5560_v8 = vld [vmem:[#allocation33 + $0x108] sm:$0xff] }
0x117c   : > { %v5334_v22 = vpop.permute.xlu0 %5333 }
0x1180   : > { %v5332_v4 = vpop.permute.xlu1 %5331  ;;  %v5338_v12 = vpop.permute.xlu0 %5337 }
0x1181   : > { %v5341_v1 = vsel %vm5339_vm4, %v5330_v13, %v5332_v4 }
0x1182   : > { %v10915_v60 = vmax.f32 %v5316_v47, %v5341_v1  ;;  %v4927_v47 = vld [vmem:[#allocation27 + $0x20] sm:$0xff] }
0x1184   : > { %5373 = vrot.lane.b32.xlu1 %v10915_v60, %s7903_s6  ;;  %v5336_v41 = vpop.permute.xlu1 %5335  ;;  %v5353_v20 = vpop.permute.xlu0 %5352 }
0x1185   : > { %v5343_v40 = vsel %vm5339_vm4, %v5336_v41, %v5338_v12  ;;  %v5358_v28 = vsel %vm5356_vm5, %v5338_v12, %v5353_v20  ;;  %v5342_v59 = vsel %vm5339_vm4, %v5334_v22, %v5336_v41  ;;  %v5086_v20 = vld [vmem:[#allocation29 + $0x8] sm:$0xff] }
0x1186   : > { %v10920_v31 = vmax.f32 %v5319_v2, %v5343_v40  ;;  %v10934_v38 = vmax.f32 %v5320_v15, %v5358_v28  ;;  %v10941_v30 = vmax.f32 %v5318_v36, %v5342_v59  ;;  %v5559_v40 = vld [vmem:[#allocation33 + $0x100] sm:$0xff]  ;;  %v7913_v28 = vmov 0.0|0.0   ;;  %v5561_v59 = vld [vmem:[#allocation33 + $0x110] sm:$0xff] }
0x1187   : > { %v6711_v34 = vpack.c.bf16 %v5562_v63, %v5561_v59 }
0x1188   : > { %5379 = vrot.lane.b32.xlu1 %v10920_v31, %s7903_s6  ;;  %v5351_v11 = vpop.permute.xlu1 %5350 }
0x1189   : > { %v5357_v62 = vsel %vm5356_vm5, %v5332_v4, %v5351_v11  ;;  %v6708_v11 = vpack.c.bf16 %v5560_v8, %v5559_v40  ;;  %v5554_v40 = vld [vmem:[#allocation33 + $0xd8] sm:$0xff] }
0x118a   : > { %v10928_v45 = vmax.f32 %v5317_v3, %v5357_v62  ;;  %v5087_v62 = vld [vmem:[#allocation29 + $0x10] sm:$0xff] }
0x118c   : > { %5394 = vrot.lane.b32.xlu1 %v10926_v53, %s7902_s25  ;;  %5375 = vrot.lane.b32.xlu0 %v10928_v45, %s7903_s6 }
0x1190   : > { %5371 = vrot.lane.b32.xlu1 %v10926_v53, %s7903_s6  ;;  %5381 = vrot.lane.b32.xlu0 %v10934_v38, %s7903_s6 }
0x1194   : > { %5396 = vrot.lane.b32.xlu0 %v10941_v30, %s7902_s25  ;;  %s981_s25 = scalar_lea.vmem [#allocation35], %s6223_s2 }
0x1195   : > { %s5885_s8 = sshll.u32 %s981_s25, 4  ;;  %s11024_s8 = int_to_ptr.vmem [resolvable:$true] %s5885_s8 }
0x1196   : > { %s7734_s29 = scalar_lea.vmem %s11024_s8, 1024 }
0x1197   : > { %p7735_p11 = scmp.ne.s32.totalorder %s11024_s8, %s7734_s29 }
0x1198   : > { %5377 = vrot.lane.b32.xlu0 %v10941_v30, %s7903_s6  ;;  %s6310_s6 = sshll.u32 %s11245_s5, 10 }
0x1199   : > { %s11022_s26 = scalar_lea.hbm %s11323_s21, %s6310_s6  ;;  %p7736_p5 = pnand %p7735_p11, %p11324_p13 }
0x119b   : > { %p7737_p7 = pneg %p7736_p5 }
0x11da   : > { %v6583_v50 = vpop.f32.mrb[56].mxu0 }
0x11db   : > { %v5028_v39 = vadd.f32 %v6583_v50, %v4924_v42  ;;  %v5022_v35 = vpop.f32.mrb[57].mxu0  ;;  %v5529_v42 = vld [vmem:[#allocation33 + $0x10] sm:$0xff]  ;;  %v6679_v50 = vpack.c.bf16 %v5546_v55, %v5545_v61  ;;  %v5556_v61 = vld [vmem:[#allocation33 + $0xe8] sm:$0xff]  ;;  %v5539_v55 = vld [vmem:[#allocation33 + $0x60] sm:$0xff] }
0x11dc   : > { %v5023_v58 = vadd.f32 %v5022_v35, %v4923_v57  ;;  %v5090_v57 = vld [vmem:[#allocation29 + $0x28] sm:$0xff] }
0x11dd   : > { %vm5062_vm14 = vcmp.gt.f32.partialorder %v5028_v39, 0.0  ;;  %v5070_v9 = vmul.f32 0.1, %v5028_v39  ;;  %6680 = vmatprep.subr.bf16.mxu1 %v6679_v50 }
0x11de   : > { %vm5061_vm15 = vcmp.gt.f32.partialorder %v5023_v58, 0.0  ;;  %v5069_v27 = vmul.f32 0.1, %v5023_v58  ;;  %v6586_v16 = vpop.f32.mrb[58].mxu0 }
0x11df   : > { %v5038_v26 = vadd.f32 %v6586_v16, %v4926_v17  ;;  %v5032_v44 = vpop.f32.mrb[59].mxu0  ;;  %v5078_v29 = vsel %vm5062_vm14, %v5028_v39, %v5070_v9  ;;  %v5530_v39 = vld [vmem:[#allocation33 + $0x18] sm:$0xff]  ;;  %v5548_v17 = vld [vmem:[#allocation33 + $0xa8] sm:$0xff]  ;;  %v5531_v9 = vld [vmem:[#allocation33 + $0x20] sm:$0xff] }
0x11e0   : > { %v5033_v6 = vadd.f32 %v5032_v44, %v4925_v19  ;;  %v5077_v25 = vsel %vm5061_vm15, %v5023_v58, %v5069_v27  ;;  %v6681_v35 = vpack.c.bf16 %v5530_v39, %v5529_v42  ;;  %v5547_v58 = vld [vmem:[#allocation33 + $0xa0] sm:$0xff]  ;;  %v5091_v19 = vld [vmem:[#allocation29 + $0x30] sm:$0xff]  ;;  %v5532_v16 = vld [vmem:[#allocation33 + $0x28] sm:$0xff] }
0x11e1   : > { %vm5064_vm7 = vcmp.gt.f32.partialorder %v5038_v26, 0.0  ;;  %v5072_v14 = vmul.f32 0.1, %v5038_v26  ;;  %v6659_v7 = vpack.c.bf16 %v5078_v29, %v5077_v25  ;;  %v6683_v27 = vpack.c.bf16 %v5548_v17, %v5547_v58  ;;  %v5092_v29 = vld [vmem:[#allocation29 + $0x38] sm:$0xff]  ;;  %v5540_v39 = vld [vmem:[#allocation33 + $0x68] sm:$0xff] }
0x11e2   : > { %vm5063_vm10 = vcmp.gt.f32.partialorder %v5033_v6, 0.0  ;;  %v5071_v23 = vmul.f32 0.1, %v5033_v6  ;;  %v6589_v48 = vpop.f32.mrb[60].mxu0  ;;  %6682 = vmatpush3.bf16.msra.mxu1 %v6681_v35  ;;  %v6685_v44 = vpack.c.bf16 %v5532_v16, %v5531_v9  ;;  %v5557_v35 = vld [vmem:[#allocation33 + $0xf0] sm:$0xff]  ;;  %v5558_v58 = vld [vmem:[#allocation33 + $0xf8] sm:$0xff]  ;;  %v6701_v17 = vpack.c.bf16 %v5540_v39, %v5539_v55 }
0x11e3   : > { %v5048_v56 = vadd.f32 %v6589_v48, %v4928_v5  ;;  %v5042_v37 = vpop.f32.mrb[61].mxu0  ;;  %6660 = vmatprep.subr.bf16.mxu0 %v6659_v7  ;;  %v5080_v36 = vsel %vm5064_vm7, %v5038_v26, %v5072_v14  ;;  %6684 = vmatprep.subr.bf16.mxu1 %v6683_v27  ;;  %v6703_v9 = vpack.c.bf16 %v5558_v58, %v5557_v35  ;;  %v5542_v27 = vld [vmem:[#allocation33 + $0x78] sm:$0xff]  ;;  %v5492_v39 = vld [vmem:[#allocation32 + $0x8] sm:$0xff]  ;;  %v5509_v35 = vld [vmem:[#allocation32 + $0x90] sm:$0xff] }
0x11e4   : > { %v5043_v33 = vadd.f32 %v5042_v37, %v4927_v47  ;;  %6662 = vmatpush3.bf16.msra.mxu0 %v6659_v7  ;;  %v5079_v21 = vsel %vm5063_vm10, %v5033_v6, %v5071_v23  ;;  %v7915_v23 = vmov 0.0  }
0x11e5   : > { %vm5066_vm11 = vcmp.gt.f32.partialorder %v5048_v56, 0.0  ;;  %v5074_v32 = vmul.f32 0.1, %v5048_v56  ;;  %v6663_v15 = vpack.c.bf16 %v5080_v36, %v5079_v21  ;;  %v5549_v36 = vld [vmem:[#allocation33 + $0xb0] sm:$0xff] }
0x11e6   : > { %vm5065_vm0 = vcmp.gt.f32.partialorder %v5043_v33, 0.0  ;;  %v5073_v3 = vmul.f32 0.1, %v5043_v33  ;;  %v6592_v49 = vpop.f32.mrb[62].mxu0  ;;  %6686 = vmatpush3.bf16.msra.mxu1 %v6685_v44  ;;  %v5508_v44 = vld [vmem:[#allocation32 + $0x88] sm:$0xff] }
0x11e7   : > { %v5058_v43 = vadd.f32 %v6592_v49, %v4930_v0  ;;  %v5052_v54 = vpop.f32.mrb[63].mxu0  ;;  %6664 = vmatprep.subr.bf16.mxu0 %v6663_v15  ;;  %v5082_v2 = vsel %vm5066_vm11, %v5048_v56, %v5074_v32  ;;  %v5533_v0 = vld [vmem:[#allocation33 + $0x30] sm:$0xff]  ;;  %v5534_v32 = vld [vmem:[#allocation33 + $0x38] sm:$0xff] }
0x11e8   : > { %v5053_v46 = vadd.f32 %v5052_v54, %v4929_v10  ;;  %6666 = vmatpush3.bf16.msra.mxu0 %v6663_v15  ;;  %v5081_v13 = vsel %vm5065_vm0, %v5043_v33, %v5073_v3  ;;  %v5550_v33 = vld [vmem:[#allocation33 + $0xb8] sm:$0xff]  ;;  %v6689_v15 = vpack.c.bf16 %v5534_v32, %v5533_v0  ;;  %v5551_v54 = vld [vmem:[#allocation33 + $0xc0] sm:$0xff]  ;;  %v5525_v0 = vld [vmem:[#allocation32 + $0x110] sm:$0xff] }
0x11e9   : > { %vm5068_vm2 = vcmp.gt.f32.partialorder %v5058_v43, 0.0  ;;  %v5076_v18 = vmul.f32 0.1, %v5058_v43  ;;  %v6667_v22 = vpack.c.bf16 %v5082_v2, %v5081_v13  ;;  %v6687_v21 = vpack.c.bf16 %v5550_v33, %v5549_v36  ;;  %v5552_v2 = vld [vmem:[#allocation33 + $0xc8] sm:$0xff] }
0x11ea   : > { %vm5067_vm6 = vcmp.gt.f32.partialorder %v5053_v46, 0.0  ;;  %v5075_v4 = vmul.f32 0.1, %v5053_v46 }
0x11eb   : > { %6668 = vmatprep.subr.bf16.mxu0 %v6667_v22  ;;  %v5084_v1 = vsel %vm5068_vm2, %v5058_v43, %v5076_v18  ;;  %6688 = vmatprep.subr.bf16.mxu1 %v6687_v21  ;;  %v6691_v18 = vpack.c.bf16 %v5552_v2, %v5551_v54  ;;  %v5526_v21 = vld [vmem:[#allocation32 + $0x118] sm:$0xff] }
0x11ec   : > { %6670 = vmatpush3.bf16.msra.mxu0 %v6667_v22  ;;  %v5083_v12 = vsel %vm5067_vm6, %v5053_v46, %v5075_v4  ;;  %6690 = vmatpush3.bf16.msra.mxu1 %v6689_v15  ;;  %v5535_v22 = vld [vmem:[#allocation33 + $0x40] sm:$0xff]  ;;  %v5536_v4 = vld [vmem:[#allocation33 + $0x48] sm:$0xff] }
0x11ed   : > { %v6671_v41 = vpack.c.bf16 %v5084_v1, %v5083_v12  ;;  %6692 = vmatprep.subr.bf16.mxu1 %v6691_v18 }
0x11ef   : > { %6672 = vmatprep.subr.bf16.mxu0 %v6671_v41 }
0x11f0   : > { %6674 = vmatpush3.bf16.msra.mxu0 %v6671_v41  ;;  %v5553_v41 = vld [vmem:[#allocation33 + $0xd0] sm:$0xff] }
0x11f1   : > { %6707 = vmatprep.subr.bf16.mxu0 %v7913_v28 }
0x11f3   : > { %6610 = vmatmul.mubr.msk.f32.vlgmr.msra.gmra.mrb[64].mxu0 %vm4931_vm13, %v5086_v20  ;;  %v6695_v20 = vpack.c.bf16 %v5554_v40, %v5553_v41 }
0x11f4   : > { %6612 = vmatprep.mubr.msk.f32.mxu0 %vm4931_vm13, %v5087_v62  ;;  %6709 = vmatpush3.bf16.msra.mxu0 %v6708_v11  ;;  %v5537_v11 = vld [vmem:[#allocation33 + $0x50] sm:$0xff]  ;;  %v5538_v62 = vld [vmem:[#allocation33 + $0x58] sm:$0xff] }
0x11f5   : > { %6710 = vmatprep.subr.bf16.mxu0 %v7913_v28 }
0x11f6   : > { %v5374_v51 = vpop.permute.xlu1 %5373 }
0x11f7   : > { %6613 = vmatmul.mubr.msk.f32.gmra.mrb[66].mxu0 %vm4931_vm13, %v5088_v24  ;;  %v6697_v24 = vpack.c.bf16 %v5538_v62, %v5537_v11 }
0x11f8   : > { %6615 = vmatprep.mubr.msk.f32.mxu0 %vm4931_vm13, %v5089_v52  ;;  %6712 = vmatpush3.bf16.msra.mxu0 %v6711_v34 }
0x11f9   : > { %6745 = vmatprep.subr.bf16.mxu0 %v7913_v28 }
0x11fa   : > { %v5380_v26 = vpop.permute.xlu1 %5379 }
0x11fb   : > { %6616 = vmatmul.mubr.msk.f32.gmra.mrb[68].mxu0 %vm4931_vm13, %v5090_v57 }
0x11fc   : > { %6618 = vmatprep.mubr.msk.f32.mxu0 %vm4931_vm13, %v5091_v19  ;;  %v5541_v19 = vld [vmem:[#allocation33 + $0x70] sm:$0xff] }
0x11fe   : > { %v5376_v6 = vpop.permute.xlu0 %5375  ;;  %v5395_v5 = vpop.permute.xlu1 %5394 }
0x11ff   : > { %v5385_v25 = vsel %vm1706_vm8, %v5374_v51, %v5376_v6  ;;  %v5400_v14 = vsel %vm1342_vm1, %v5376_v6, %v5395_v5  ;;  %6619 = vmatmul.mubr.msk.f32.gmra.mrb[70].mxu0 %vm4931_vm13, %v5092_v29  ;;  %v6705_v5 = vpack.c.bf16 %v5542_v27, %v5541_v19  ;;  %v5493_v27 = vld [vmem:[#allocation32 + $0x10] sm:$0xff] }
0x1200   : > { %v10961_v47 = vmax.f32 %v10915_v60, %v5385_v25  ;;  %v5404_v7 = vmax.f32 %v10928_v45, %v5400_v14  ;;  %6629 = vmatprep.mubr.msk.f32.mxu0 %vm7914_vm9, %v7915_v23 }
0x1202   : > { %v5382_v48 = vpop.permute.xlu0 %5381  ;;  %5416 = vrot.lane.b32.xlu1 %v10961_v47, %s7916_s30  ;;  %5418 = vrot.lane.b32.xlu0 %v5404_v7, %s7916_s30  ;;  %v5372_v56 = vpop.permute.xlu1 %5371 }
0x1203   : > { %v5387_v37 = vsel %vm1706_vm8, %v5380_v26, %v5382_v48  ;;  %v5384_v45 = vsel %vm1706_vm8, %v5372_v56, %v5374_v51  ;;  %v5555_v51 = vld [vmem:[#allocation33 + $0xe0] sm:$0xff] }
0x1204   : > { %v10971_v60 = vmax.f32 %v10920_v31, %v5387_v37  ;;  %v10977_v3 = vmax.f32 %v10926_v53, %v5384_v45  ;;  %v5849_v53 = vld [vmem:[#allocation2] sm:$0x1]  ;;  %v6699_v50 = vpack.c.bf16 %v5556_v61, %v5555_v51  ;;  %v5524_v37 = vld [vmem:[#allocation32 + $0x108] sm:$0xff] }
0x1205   : > { %v5523_v56 = vld [vmem:[#allocation32 + $0x100] sm:$0xff] }
0x1206   : > { %v5397_v10 = vpop.permute.xlu0 %5396  ;;  %5422 = vrot.lane.b32.xlu1 %v10971_v60, %s7916_s30  ;;  %v5437_v46 = vmax.f32 %v5404_v7, %v10977_v3  ;;  %v6746_v36 = vpack.c.bf16 %v5524_v37, %v5523_v56 }
0x1207   : > { %v5401_v49 = vsel %vm1342_vm1, %v5382_v48, %v5397_v10  ;;  %v6749_v10 = vpack.c.bf16 %v5526_v21, %v5525_v0  ;;  %vm5426_vm1 = vcmask 785408   ;;  %v5515_v0 = vld [vmem:[#allocation32 + $0xc0] sm:$0xff]  ;;  %v5516_v21 = vld [vmem:[#allocation32 + $0xc8] sm:$0xff] }
0x1208   : > { %v5407_v31 = vmax.f32 %v10934_v38, %v5401_v49  ;;  %v6693_v38 = vpack.c.bf16 %v5536_v4, %v5535_v22  ;;  %v5455_v8 = vsel %vm3832_vm12, %v5437_v46, -inf  ;;  %v5478_v59 = vsel %vm3832_vm12, %v5437_v46, 0.0 }
0x120a   : > { %v5378_v43 = vpop.permute.xlu0 %5377  ;;  %5424 = vrot.lane.b32.xlu0 %v5407_v31, %s7916_s30  ;;  %5414 = vrot.lane.b32.xlu1 %v10977_v3, %s7916_s30 }
0x120b   : > { %v5386_v13 = vsel %vm1706_vm8, %v5378_v43, %v5380_v26  ;;  %6694 = vmatpush3.bf16.msra.mxu1 %v6693_v38  ;;  %v5507_v26 = vld [vmem:[#allocation32 + $0x80] sm:$0xff] }
0x120c   : > { %v10987_v1 = vmax.f32 %v10941_v30, %v5386_v13  ;;  %6696 = vmatprep.subr.bf16.mxu1 %v6695_v20  ;;  %v6713_v25 = vpack.c.bf16 %v5508_v44, %v5507_v26  ;;  %v5511_v44 = vld [vmem:[#allocation32 + $0xa0] sm:$0xff] }
0x120e   : > { %v5440_v12 = vmax.f32 %v5407_v31, %v10987_v1  ;;  %5420 = vrot.lane.b32.xlu0 %v10987_v1, %s7916_s30  ;;  %5852 = vperm.xlu1 %7082, %v5849_v53   ;;  %s7738_s30 = sshll.u32 %s7917_s23, 4  ;;  %s7739_s30 = int_to_ptr.vmem [resolvable:$false] %s7738_s30 }
0x120f   : > { %6698 = vmatpush3.bf16.msra.mxu1 %v6697_v24  ;;  %s7740_s2 = scalar_lea.vmem %s7739_s30, 2048  ;;  %p7741_p4 = scmp.lt.s32.totalorder %s11024_s8, %s7739_s30 }
0x1210   : > { %v5456_v30 = vsel %vm3832_vm12, %v5440_v12, -inf  ;;  %v5479_v63 = vsel %vm3832_vm12, %v5440_v12, 0.0  ;;  %6700 = vmatprep.subr.bf16.mxu1 %v6699_v50  ;;  %v5491_v50 = vld [vmem:[#allocation32] sm:$0xff]  ;;  %p7742_p1 = scmp.lt.s32.totalorder %s7740_s2, %s7734_s29 }
0x1211   : > { %v5457_v34 = vmax.f32 %v5455_v8, %v5456_v30  ;;  %v5480_v52 = vadd.f32 %v5479_v63, %v5478_v59 }
0x1212   : > { %p7743_p3 = por %p7742_p1, %p7741_p4 }
0x1213   : > { %v5458_v42 = vrot.slane %v5457_v34, 4  ;;  %v5481_v57 = vrot.slane %v5480_v52, 4  ;;  %6702 = vmatpush3.bf16.msra.mxu1 %v6701_v17  ;;  %v6715_v17 = vpack.c.bf16 %v5492_v39, %v5491_v50  ;;  %v5094_v50 = vld [vmem:[#allocation30 + $0x8] sm:$0xff]  ;;  %v5093_v39 = vld [vmem:[#allocation30] sm:$0xff] }
0x1214   : > { %6704 = vmatprep.subr.bf16.mxu1 %v6703_v9  ;;  %p7744_p8 = pnand %p7743_p3, %p7737_p7 }
0x1215   : > { %v5482_v16 = vadd.f32 %v5481_v57, %v5480_v52  ;;  %v5459_v29 = vmax.f32 %v5457_v34, %v5458_v42 }
0x1217   : > { %v5483_v6 = vrot.slane %v5482_v16, 2  ;;  %v5460_v7 = vrot.slane %v5459_v29, 2  ;;  %6706 = vmatpush3.bf16.msra.mxu1 %v6705_v5 }
0x1218   : > { %6714 = vmatprep.subr.bf16.mxu1 %v6713_v25  ;;  %v5495_v25 = vld [vmem:[#allocation32 + $0x20] sm:$0xff] }
0x1219   : > { %v5484_v14 = vadd.f32 %v5483_v6, %v5482_v16  ;;  %v5461_v32 = vmax.f32 %v5459_v29, %v5460_v7  ;;  %v5494_v16 = vld [vmem:[#allocation32 + $0x18] sm:$0xff]  ;;  %v5512_v29 = vld [vmem:[#allocation32 + $0xa8] sm:$0xff]  ;;  %v5513_v7 = vld [vmem:[#allocation32 + $0xb0] sm:$0xff] }
0x121a   : > { %v6719_v6 = vpack.c.bf16 %v5494_v16, %v5493_v27  ;;  %v6721_v5 = vpack.c.bf16 %v5512_v29, %v5511_v44  ;;  %v5100_v16 = vld [vmem:[#allocation30 + $0x38] sm:$0xff]  ;;  %v5099_v29 = vld [vmem:[#allocation30 + $0x30] sm:$0xff] }
0x121b   : > { %v5485_v48 = vrot.slane %v5484_v14, 1  ;;  %v5462_v15 = vrot.slane %v5461_v32, 1 }
0x121d   : > { %v5486_v45 = vadd.f32 %v5485_v48, %v5484_v14  ;;  %v5463_v49 = vmax.f32 %v5461_v32, %v5462_v15  ;;  %v5496_v14 = vld [vmem:[#allocation32 + $0x28] sm:$0xff]  ;;  %v5514_v48 = vld [vmem:[#allocation32 + $0xb8] sm:$0xff]  ;;  %v6729_v15 = vpack.c.bf16 %v5516_v21, %v5515_v0 }
0x121e   : > { %v6723_v56 = vpack.c.bf16 %v5496_v14, %v5495_v25 }
0x121f   : > { %v5490_v33 = vmul.f32 0.0625, %v5486_v45  ;;  %v6725_v45 = vpack.c.bf16 %v5514_v48, %v5513_v7 }
0x1221   : > { %6630 = vmatmul.mubr.msk.f32.vlgmr.msra.gmra.mrb[72].mxu0 %vm3832_vm12, %v5490_v33  ;;  %v5498_v33 = vld [vmem:[#allocation32 + $0x38] sm:$0xff] }
0x1222   : > { %6747 = vmatpush3.bf16.msra.mxu0 %v6746_v36  ;;  %6640 = vmatprep.mubr.msk.f32.mxu0 %vm7914_vm9, %v7915_v23  ;;  %v5497_v36 = vld [vmem:[#allocation32 + $0x30] sm:$0xff] }
0x1223   : > { %6748 = vmatprep.subr.bf16.mxu0 %v7913_v28  ;;  %v6727_v32 = vpack.c.bf16 %v5498_v33, %v5497_v36 }
0x1226   : > { %6750 = vmatpush3.bf16.msra.mxu0 %v6749_v10 }
0x1229   : > { %6641 = vmatmul.mubr.msk.f32.vlgmr.msra.gmra.mrb[74].mxu0 %vm3832_vm12, %v5463_v49  ;;  %v5499_v49 = vld [vmem:[#allocation32 + $0x40] sm:$0xff] }
0x1274   : > { %v5417_v31 = vpop.permute.xlu1 %5416  ;;  %v5419_v43 = vpop.permute.xlu0 %5418 }
0x1275   : > { %v5428_v2 = vsel %vm5426_vm1, %v5417_v31, %v5419_v43  ;;  %v5517_v43 = vld [vmem:[#allocation32 + $0xd0] sm:$0xff] }
0x1276   : > { %v5436_v18 = vmax.f32 %v10961_v47, %v5428_v2 }
0x1278   : > { %v5423_v54 = vpop.permute.xlu1 %5422 }
0x127c   : > { %v5425_v46 = vpop.permute.xlu0 %5424  ;;  %v5415_v13 = vpop.permute.xlu1 %5414 }
0x127d   : > { %v5430_v53 = vsel %vm5426_vm1, %v5423_v54, %v5425_v46  ;;  %v5427_v23 = vsel %vm5426_vm1, %v5415_v13, %v5417_v31  ;;  %v5500_v31 = vld [vmem:[#allocation32 + $0x48] sm:$0xff] }
0x127e   : > { %v5439_v22 = vmax.f32 %v10971_v60, %v5430_v53  ;;  %v5435_v8 = vmax.f32 %v10977_v3, %v5427_v23  ;;  %v6731_v2 = vpack.c.bf16 %v5500_v31, %v5499_v49  ;;  %v5501_v53 = vld [vmem:[#allocation32 + $0x50] sm:$0xff]  ;;  %v5520_v23 = vld [vmem:[#allocation32 + $0xe8] sm:$0xff] }
0x1280   : > { %v5448_v4 = vmax.f32 %v5436_v18, %v5439_v22  ;;  %v5471_v28 = vadd.f32 %v5439_v22, %v5436_v18  ;;  %v5421_v38 = vpop.permute.xlu0 %5420  ;;  %v5502_v18 = vld [vmem:[#allocation32 + $0x58] sm:$0xff]  ;;  %v5519_v22 = vld [vmem:[#allocation32 + $0xe0] sm:$0xff] }
0x1281   : > { %v5429_v12 = vsel %vm5426_vm1, %v5421_v38, %v5423_v54  ;;  %v5518_v54 = vld [vmem:[#allocation32 + $0xd8] sm:$0xff]  ;;  %v6737_v38 = vpack.c.bf16 %v5520_v23, %v5519_v22 }
0x1282   : > { %v5449_v41 = vrot.slane %v5448_v4, 4  ;;  %v5472_v40 = vrot.slane %v5471_v28, 4  ;;  %v5438_v20 = vmax.f32 %v10987_v1, %v5429_v12  ;;  %v5510_v1 = vld [vmem:[#allocation32 + $0x98] sm:$0xff]  ;;  %v6733_v13 = vpack.c.bf16 %v5518_v54, %v5517_v43  ;;  %v5503_v12 = vld [vmem:[#allocation32 + $0x60] sm:$0xff] }
0x1283   : > { %v6717_v19 = vpack.c.bf16 %v5510_v1, %v5509_v35  ;;  %v5095_v1 = vld [vmem:[#allocation30 + $0x10] sm:$0xff] }
0x1284   : > { %v5450_v11 = vmax.f32 %v5448_v4, %v5449_v41  ;;  %v5473_v62 = vadd.f32 %v5472_v40, %v5471_v28  ;;  %v5464_v59 = vadd.f32 %v5438_v20, %v5435_v8  ;;  %v5441_v37 = vmax.f32 %v5435_v8, %v5438_v20  ;;  %v5504_v41 = vld [vmem:[#allocation32 + $0x68] sm:$0xff]  ;;  %v5521_v40 = vld [vmem:[#allocation32 + $0xf0] sm:$0xff]  ;;  %v5522_v8 = vld [vmem:[#allocation32 + $0xf8] sm:$0xff] }
0x1285   : > { %v6735_v4 = vpack.c.bf16 %v5502_v18, %v5501_v53  ;;  %v6739_v20 = vpack.c.bf16 %v5504_v41, %v5503_v12 }
0x1286   : > { %v5465_v30 = vrot.slane %v5464_v59, 4  ;;  %v5474_v63 = vrot.slane %v5473_v62, 2  ;;  %v5451_v24 = vrot.slane %v5450_v11, 2  ;;  %v5442_v10 = vrot.slane %v5441_v37, 4 }
0x1288   : > { %v5466_v47 = vadd.f32 %v5465_v30, %v5464_v59  ;;  %v5475_v34 = vadd.f32 %v5474_v63, %v5473_v62  ;;  %v5452_v51 = vmax.f32 %v5450_v11, %v5451_v24  ;;  %v5443_v46 = vmax.f32 %v5441_v37, %v5442_v10  ;;  %v5505_v59 = vld [vmem:[#allocation32 + $0x70] sm:$0xff]  ;;  %v5506_v30 = vld [vmem:[#allocation32 + $0x78] sm:$0xff] }
0x1289   : > { %v6741_v62 = vpack.c.bf16 %v5522_v8, %v5521_v40  ;;  %v6743_v63 = vpack.c.bf16 %v5506_v30, %v5505_v59 }
0x128a   : > { %v5467_v60 = vrot.slane %v5466_v47, 2  ;;  %v5476_v52 = vrot.slane %v5475_v34, 1  ;;  %v5453_v3 = vrot.slane %v5452_v51, 1  ;;  %v5444_v28 = vrot.slane %v5443_v46, 2 }
0x128c   : > { %v5468_v61 = vadd.f32 %v5467_v60, %v5466_v47  ;;  %v5477_v55 = vadd.f32 %v5476_v52, %v5475_v34  ;;  %v5454_v26 = vmax.f32 %v5452_v51, %v5453_v3  ;;  %v5445_v11 = vmax.f32 %v5443_v46, %v5444_v28  ;;  %v5096_v3 = vld [vmem:[#allocation30 + $0x18] sm:$0xff] }
0x128e   : > { %v5469_v42 = vrot.slane %v5468_v61, 1  ;;  %v5489_v57 = vmul.f32 0.0625, %v5477_v55  ;;  %v5446_v24 = vrot.slane %v5445_v11, 1 }
0x1290   : > { %v5470_v58 = vadd.f32 %v5469_v42, %v5468_v61  ;;  %5630 = vmatprep.mubr.f32.mxu1 %v5489_v57  ;;  %v5447_v47 = vmax.f32 %v5445_v11, %v5446_v24 }
0x1292   : > { %v5488_v9 = vmul.f32 0.0625, %v5470_v58 }
0x1294   : > { %5631 = vmatmul.mubr.f32.vlgmr.msra.gmra.mrb[68].mxu1 %v5488_v9 }
0x1295   : > { %6716 = vmatpush3.bf16.msra.mxu1 %v6715_v17  ;;  %5773 = vmatprep.mubr.f32.mxu1 %v5454_v26  ;;  %v5098_v17 = vld [vmem:[#allocation30 + $0x28] sm:$0xff] }
0x1296   : > { %6718 = vmatprep.subr.bf16.mxu1 %v6717_v19  ;;  %v5097_v19 = vld [vmem:[#allocation30 + $0x20] sm:$0xff] }
0x1299   : > { %6720 = vmatpush3.bf16.msra.mxu1 %v6719_v6 }
0x129a   : > { %6722 = vmatprep.subr.bf16.mxu1 %v6721_v5 }
0x129d   : > { %6724 = vmatpush3.bf16.msra.mxu1 %v6723_v56 }
0x129e   : > { %6726 = vmatprep.subr.bf16.mxu1 %v6725_v45 }
0x12a1   : > { %6728 = vmatpush3.bf16.msra.mxu1 %v6727_v32 }
0x12a2   : > { %6730 = vmatprep.subr.bf16.mxu1 %v6729_v15 }
0x12a5   : > { %6732 = vmatpush3.bf16.msra.mxu1 %v6731_v2 }
0x12a6   : > { %6734 = vmatprep.subr.bf16.mxu1 %v6733_v13 }
0x12a9   : > { %6736 = vmatpush3.bf16.msra.mxu1 %v6735_v4 }
0x12aa   : > { %6738 = vmatprep.subr.bf16.mxu1 %v6737_v38 }
0x12ad   : > { %6740 = vmatpush3.bf16.msra.mxu1 %v6739_v20 }
0x12ae   : > { %6742 = vmatprep.subr.bf16.mxu1 %v6741_v62 }
0x12b1   : > { %6744 = vmatpush3.bf16.msra.mxu1 %v6743_v63 }
0x12b4   : > { %5774 = vmatmul.mubr.f32.vlgmr.msra.gmra.mrb[70].mxu1 %v5447_v47 }
0x12c6   : > { %v6611_v34 = vpop.f32.mrb[64].mxu0 }
0x12c7   : > { %v5191_v60 = vpop.f32.mrb[65].mxu0  ;;  %v5197_v35 = vadd.f32 %v6611_v34, %v5094_v50 }
0x12c8   : > { %v5192_v58 = vadd.f32 %v5191_v60, %v5093_v39 }
0x12c9   : > { %v5231_v26 = vsub.f32 0.0, %v5197_v35 }
0x12ca   : > { %v6614_v52 = vpop.f32.mrb[66].mxu0  ;;  %v5230_v6 = vsub.f32 0.0, %v5192_v58 }
0x12cb   : > { %v5201_v51 = vpop.f32.mrb[67].mxu0  ;;  %v5207_v9 = vadd.f32 %v6614_v52, %v5096_v3  ;;  %v5240_v56 = vmul.f32 1.442695, %v5231_v26 }
0x12cc   : > { %v5202_v27 = vadd.f32 %v5201_v51, %v5095_v1  ;;  %v5238_v36 = vmul.f32 1.442695, %v5230_v6 }
0x12cd   : > { %v5233_v25 = vsub.f32 0.0, %v5207_v9  ;;  %7134 = vpow2.f32 %v5240_v56 }
0x12ce   : > { %v6617_v61 = vpop.f32.mrb[68].mxu0  ;;  %v5232_v7 = vsub.f32 0.0, %v5202_v27  ;;  %7136 = vpow2.f32 %v5238_v36 }
0x12cf   : > { %v5211_v55 = vpop.f32.mrb[69].mxu0  ;;  %v5217_v44 = vadd.f32 %v6617_v61, %v5098_v17  ;;  %v5244_v21 = vmul.f32 1.442695, %v5233_v25 }
0x12d0   : > { %v5212_v5 = vadd.f32 %v5211_v55, %v5097_v19  ;;  %v5242_v10 = vmul.f32 1.442695, %v5232_v7 }
0x12d1   : > { %v5235_v37 = vsub.f32 0.0, %v5217_v44  ;;  %7138 = vpow2.f32 %v5244_v21 }
0x12d2   : > { %v6620_v42 = vpop.f32.mrb[70].mxu0  ;;  %v5234_v33 = vsub.f32 0.0, %v5212_v5  ;;  %7140 = vpow2.f32 %v5242_v10 }
0x12d3   : > { %v5221_v57 = vpop.f32.mrb[71].mxu0  ;;  %v5227_v14 = vadd.f32 %v6620_v42, %v5100_v16  ;;  %v5248_v49 = vmul.f32 1.442695, %v5235_v37 }
0x12d4   : > { %v5222_v48 = vadd.f32 %v5221_v57, %v5099_v29  ;;  %v5246_v31 = vmul.f32 1.442695, %v5234_v33 }
0x12d5   : > { %v5237_v32 = vsub.f32 0.0, %v5227_v14  ;;  %7142 = vpow2.f32 %v5248_v49 }
0x12d6   : > { %v5236_v15 = vsub.f32 0.0, %v5222_v48  ;;  %7144 = vpow2.f32 %v5246_v31 }
0x12d7   : > { %v5252_v43 = vmul.f32 1.442695, %v5237_v32  ;;  %v7135_v13 = vpop.eup %7134 }
0x12d8   : > { %v5250_v54 = vmul.f32 1.442695, %v5236_v15  ;;  %v7137_v53 = vpop.eup %7136  ;;  %v5255_v23 = vadd.f32 1.0, %v7135_v13 }
0x12d9   : > { %7146 = vpow2.f32 %v5252_v43  ;;  %v5254_v28 = vadd.f32 1.0, %v7137_v53 }
0x12da   : > { %7148 = vpow2.f32 %v5250_v54 }
0x12db   : > { %v7139_v18 = vpop.eup %7138  ;;  %7150 = vrcp.f32 %v5255_v23 }
0x12dc   : > { %v7141_v22 = vpop.eup %7140  ;;  %v5257_v12 = vadd.f32 1.0, %v7139_v18  ;;  %7152 = vrcp.f32 %v5254_v28 }
0x12dd   : > { %v5256_v40 = vadd.f32 1.0, %v7141_v22 }
0x12de   : > { %7154 = vrcp.f32 %v5257_v12 }
0x12df   : > { %v7143_v4 = vpop.eup %7142  ;;  %7156 = vrcp.f32 %v5256_v40 }
0x12e0   : > { %v7145_v38 = vpop.eup %7144  ;;  %v5259_v20 = vadd.f32 1.0, %v7143_v4 }
0x12e1   : > { %v5258_v11 = vadd.f32 1.0, %v7145_v38 }
0x12e2   : > { %7158 = vrcp.f32 %v5259_v20 }
0x12e3   : > { %v7147_v41 = vpop.eup %7146  ;;  %7160 = vrcp.f32 %v5258_v11 }
0x12e4   : > { %v7149_v8 = vpop.eup %7148  ;;  %v5261_v62 = vadd.f32 1.0, %v7147_v41 }
0x12e5   : > { %v5260_v59 = vadd.f32 1.0, %v7149_v8  ;;  %v7151_v30 = vpop.eup %7150 }
0x12e6   : > { %7162 = vrcp.f32 %v5261_v62  ;;  %v7153_v63 = vpop.eup %7152  ;;  %5271 = vst.msk [vmem:[%s981_s25 + $0x8] sm:$0xff] %vm1521_vm3, %v7151_v30 }
0x12e7   : > { %7164 = vrcp.f32 %v5260_v59  ;;  %5270 = vst.msk [vmem:[%s981_s25] sm:$0xff] %vm1521_vm3, %v7153_v63 }
0x12e8   : > { %v7155_v24 = vpop.eup %7154 }
0x12e9   : > { %v7157_v47 = vpop.eup %7156  ;;  %5273 = vst.msk [vmem:[%s981_s25 + $0x18] sm:$0xff] %vm1521_vm3, %v7155_v24 }
0x12ea   : > { %5272 = vst.msk [vmem:[%s981_s25 + $0x10] sm:$0xff] %vm1521_vm3, %v7157_v47 }
0x12ec   : > { %v7159_v34 = vpop.eup %7158 }
0x12ed   : > { %v7161_v60 = vpop.eup %7160  ;;  %5275 = vst.msk [vmem:[%s981_s25 + $0x28] sm:$0xff] %vm1521_vm3, %v7159_v34 }
0x12ee   : > { %5274 = vst.msk [vmem:[%s981_s25 + $0x20] sm:$0xff] %vm1521_vm3, %v7161_v60 }
0x12f0   : > { %v7163_v52 = vpop.eup %7162 }
0x12f1   : > { %v7165_v51 = vpop.eup %7164  ;;  %5277 = vst.msk [vmem:[%s981_s25 + $0x38] sm:$0xff] %vm1521_vm3, %v7163_v52 }
0x12f2   : > { %5276 = vst.msk [vmem:[%s981_s25 + $0x30] sm:$0xff] %vm1521_vm3, %v7165_v51 }
0x12f4   : > { %v11005_v45 = vpop.f32.mrb[72].mxu0 }
0x12f5   : > { %v6631_v0 = vpop.f32.mrb[73].mxu0 }
0x12fc   : > { %v11007_v2 = vpop.f32.mrb[74].mxu0 }
0x12fd   : > { %v6642_v46 = vpop.f32.mrb[75].mxu0 }
0x12fe   : > { %7747 = shalt.err (!%p7744_p8)
}
0x12ff   : > { %s7748_s25 = scalar_lea.hbm %s11022_s26, 1024  ;;  %s7752_s0 = scalar_lea.hbm %s11323_s21, 2048 }
0x1300   : > { %p7749_p6 = scmp.ne.s32.totalorder %s11022_s26, %s7748_s25  ;;  %p7753_p9 = scmp.lt.u32.totalorder %s11022_s26, %s11323_s21 }
0x1301   : > { %p7754_p10 = scmp.lt.u32.totalorder %s7752_s0, %s7748_s25  ;;  %p7756_p11 = scmp.lt.u32.totalorder %s7748_s25, %s11022_s26 }
0x1302   : > { %p7750_p0 = pnand %p7749_p6, %p11324_p13 }
0x1303   : > { %p7755_p12 = por %p7754_p10, %p7753_p9 }
0x1304   : > { %p7751_p2 = pneg %p7750_p0 }
0x1305   : > { %p7757_p5 = por %p7756_p11, %p7755_p12 }
0x1307   : > { %p7758_p7 = pnand %p7757_p5, %p7751_p2 }
0x1309   : > { %7761 = shalt.err (!%p7758_p7)
}
0x130a   : > { %s7918_s29 = smov 128   ;;  %s7919_s2 = smov 8   ;;  %v5853_v35 = vpop.permute.xlu1 %5852  ;;  %v11325_v58 = vld [vmem:[#allocation58_spill] sm:$0xff]  ;;  %vm5865_vm3 = vcmask 122880  }
0x130b   : > { %6892 = dma.vmem_to_hbm [thread:$0]  (%p11324_p13), %s11024_s8, 1024, %s11022_s26, %s5868_s3, %s7918_s29, %s7918_s29, %s7919_s2   ;;  %v5858_v17 = vrot.slane %v5853_v35, %v11325_v58 }
0x130c   : > { %s6307_s26 = sshll.u32 %s11245_s5, 4  ;;  %s987_s8 = scalar_lea.vmem [#allocation36], %s8594_s24 }
0x130d   : > { %s5901_s3 = sshll.u32 %s987_s8, 4  ;;  %s11326_s9 = sld [smem:[#allocation97_spill]]  ;;  %s11060_s3 = int_to_ptr.vmem [resolvable:$true] %s5901_s3 }
0x130e   : > { %s5873_s23 = scalar_lea.sflag [#allocation37], %s8594_s24  ;;  %s7762_s30 = scalar_lea.vmem %s11060_s3, 16 }
0x130f   : > { %p7763_p4 = scmp.ne.s32.totalorder %s11060_s3, %s7762_s30  ;;  %s7920_s5 = smov [#allocation36]  }
0x1310   : > { %s7766_s29 = sshll.u32 %s7920_s5, 4  ;;  %s7767_s29 = int_to_ptr.vmem [resolvable:$false] %s7766_s29 }
0x1311   : > { %p7764_p1 = pnand %p7763_p4, %p11324_p13  ;;  %s7768_s2 = scalar_lea.vmem %s7767_s29, 32 }
0x1312   : > { %p7769_p8 = scmp.lt.s32.totalorder %s11060_s3, %s7767_s29  ;;  %p7770_p6 = scmp.lt.s32.totalorder %s7768_s2, %s7762_s30 }
0x1313   : > { %s11058_s0 = scalar_lea.hbm %s11326_s9, %s6307_s26  ;;  %p7765_p3 = pneg %p7764_p1 }
0x1314   : > { %p7771_p0 = por %p7770_p6, %p7769_p8 }
0x1316   : > { %p7772_p2 = pnand %p7771_p0, %p7765_p3 }
0x1367   : > { %v6497_v61 = vpop.f32.mrb[68].mxu1 }
0x1368   : > { %v6498_v55 = vpop.f32.mrb[69].mxu1 }
0x1369   : > { %v6499_v42 = vadd.f32 %v6498_v55, %v6497_v61 }
0x136b   : > { %v5703_v57 = vadd.f32 %v6499_v42, %v11005_v45 }
0x1387   : > { %v6537_v50 = vpop.f32.mrb[70].mxu1 }
0x1388   : > { %v6538_v39 = vpop.f32.mrb[71].mxu1 }
0x1389   : > { %v6539_v3 = vadd.f32 %v6538_v39, %v6537_v50 }
0x138b   : > { %v5776_v1 = vadd.f32 %v6539_v3, %v5703_v57 }
0x138d   : > { %v5846_v9 = vadd.f32 %v11007_v2, %v5776_v1 }
0x138f   : > { %v5859_v19 = vadd.f32 %v5858_v17, %v5846_v9 }
0x1391   : > { %v5860_v27 = vsub.f32 0.0, %v5859_v19 }
0x1393   : > { %v5861_v16 = vmul.f32 1.442695, %v5860_v27 }
0x1395   : > { %7166 = vpow2.f32 %v5861_v16 }
0x139f   : > { %v7167_v26 = vpop.eup %7166 }
0x13a0   : > { %v5863_v44 = vadd.f32 1.0, %v7167_v26 }
0x13a2   : > { %7168 = vrcp.f32 %v5863_v44 }
0x13ac   : > { %v7169_v29 = vpop.eup %7168 }
0x13ad   : > { %5866 = vst.msk [vmem:[%s987_s8] sm:$0x1] %vm5865_vm3, %v7169_v29 }
0x13ae   : > { %7775 = shalt.err (!%p7772_p2)
}
0x13af   : > { %s7776_s24 = scalar_lea.hbm %s11058_s0, 16  ;;  %s7780_s25 = scalar_lea.hbm %s11326_s9, 32 }
0x13b0   : > { %p7777_p9 = scmp.ne.s32.totalorder %s11058_s0, %s7776_s24  ;;  %p7781_p11 = scmp.lt.u32.totalorder %s11058_s0, %s11326_s9 }
0x13b1   : > { %p7782_p5 = scmp.lt.u32.totalorder %s7780_s25, %s7776_s24  ;;  %p7784_p4 = scmp.lt.u32.totalorder %s7776_s24, %s11058_s0 }
0x13b2   : > { %p7778_p10 = pnand %p7777_p9, %p11324_p13 }
0x13b3   : > { %p7783_p7 = por %p7782_p5, %p7781_p11 }
0x13b4   : > { %p7779_p12 = pneg %p7778_p10 }
0x13b5   : > { %p7785_p1 = por %p7784_p4, %p7783_p7 }
0x13b7   : > { %p7786_p3 = pnand %p7785_p1, %p7779_p12 }
0x13b9   : > { %7789 = shalt.err (!%p7786_p3)
}
0x13ba   : > { %6893 = dma.vmem_to_hbm [thread:$0]  (%p11324_p13), %s11060_s3, 16, %s11058_s0, %s5873_s23  }
0x13bb PF: > { %s11327_s30 = sld [smem:[#allocation51_spill]]  ;;  %s11328_s29 = sld [smem:[#allocation54_spill]] }
0x13bc   : > { %p11329_p8 = scmp.ne.s32.totalorder %s11237_s7, 0 }
0x13c1   : > { %s5913_s2 = sand.u32 1, %s11327_s30   ;;  %p11330_p6 = scmp.ge.s32.totalorder %s11328_s29, 2 }
0x13c2   : > { %s5914_s26 = scalar_lea.sflag [#allocation5], %s5913_s2 }
0x13c3   : > { %p6959_p0 = pnand %p11330_p6, %p11329_p8 }
0x13c5   : > { %7851 = dma.done.wait (!%p6959_p0), %s5914_s26, 1024  }
0x13c6   : > { %7853 = vsyncadd (!%p6959_p0), %s5914_s26, 4294966272  ;;  %s5923_s24 = scalar_lea.sflag [#allocation37], %s5913_s2 }
0x13c7   : > { %7855 = dma.done.wait (!%p6959_p0), %s5923_s24, 16  }
0x13c8   : > { %7857 = vsyncadd (!%p6959_p0), %s5923_s24, 4294967280  ;;  %s11331_s29 = sld [smem:[#allocation52_spill]]  ;;  %s11332_s20 = sld [smem:[#allocation53_spill]] }
0x13c9   : > { %p51_p13 = scmp.ge.s32.totalorder %s8518_s4, 4   ;;  %s11333_s30 = smov %s8530_s28 }
0x13cb   :  { %53 = sbr.rel (!%p51_p13) target bundleno = 30 (0x1e), region = 246 }
0x13d2   :  { %5927 = vsyncpa [#allocation4], 1 }
0x13d3   :  { %5929 = vsyncpa [#allocation4 + $0x1], 1 }
0x13d4   :  { %5930 = vsyncpa [#allocation7], 1 }
0x13d5   :  { %5931 = vsyncpa [#allocation10], 1 }
0x13d6   :  { %5932 = vsyncpa [#allocation13], 1 }
0x13d7   :  { %5933 = vsyncpa [#allocation16], 1 }
0x13d8   :  { %5934 = vsyncpa [#allocation19], 1 }
0x13d9   :  { %5935 = vsyncpa [#allocation22], 1 }
0x13da   :  { %5936 = vsyncpa [#allocation25], 1 }
0x13db   :  { %5937 = vsyncpa [#allocation28], 1 }
0x13dc   :  { %5938 = vsyncpa [#allocation31], 1 }
0x13dd   :  { %5939 = vsyncpa [#allocation34], 1 }
0x13de   :  { %5940 = vsyncpa [#allocation5], 1 }
0x13df   :  { %5942 = vsyncpa [#allocation5 + $0x1], 1 }
0x13e0   :  { %5943 = vsyncpa [#allocation37], 1 }
0x13e1   :  { %5945 = vsyncpa [#allocation37 + $0x1], 1 }

</bundles_post_ra>
